<compile_context>
chip_gen: v6e
topology: v6e:2x2x1
jax: 0.10.0
libtpu: 0.0.40
codegen_flags: <defaults>
</compile_context>

<pallas_src>
import jax
import jax.numpy as jnp
from jax.experimental import pallas as pl
from jax.experimental.pallas import tpu as pltpu

BN_EPS = 1e-3


# ----------------------------- Pallas kernel --------------------------------

def _mixed4a_kernel(x_ref,
                    w00_ref, b00_ref, w01_ref, b01_ref,
                    w10_ref, b10_ref, w11_ref, b11_ref,
                    w12_ref, b12_ref, w13_ref, b13_ref,
                    o_ref,
                    a0_ref, padw_ref, padh_ref, b1c_ref):
    H, W, _ = a0_ref.shape
    Ho, Wo = H - 2, W - 2                      # final 3x3 "valid" convs
    PW = (padw_ref.shape[1] - W) // 2          # width pad of the 1x7 conv (=3)
    PH = (padh_ref.shape[0] - H) // 2          # height pad of the 7x1 conv (=3)
    c0 = w01_ref.shape[-1]                     # 96 (block0 output channels)
    c1 = w13_ref.shape[-1]                     # 96 (block1 output channels)
    f32 = jnp.float32

    def mm(a, w):                              # bf16 x bf16 -> f32 (MXU)
        return jnp.dot(a, w, preferred_element_type=f32)

    def epi(acc, b_ref):                       # +bias, ReLU (f32 on the VPU)
        return jnp.maximum(acc + b_ref[...], 0.0)

    def conv3x3_valid(src_ref, w_ref, b_ref):  # tap-wise valid 3x3 conv
        cout = w_ref.shape[-1]
        acc = jnp.zeros((Ho * Wo, cout), f32)
        for kh in range(3):
            for kw in range(3):
                win = src_ref[kh:kh + Ho, kw:kw + Wo, :].reshape(Ho * Wo, -1)
                acc = acc + mm(win, w_ref[kh * 3 + kw])
        return epi(acc, b_ref)

    # zero the padded scratch (borders must be zero; interiors overwritten).
    padw_ref[...] = jnp.zeros_like(padw_ref)
    padh_ref[...] = jnp.zeros_like(padh_ref)

    xs = x_ref[0]                              # (H*W, Cin) bf16, VMEM-resident

    # ---------------- block0: 1x1 -> 3x3(valid) ----------------
    y = epi(mm(xs, w00_ref[...]), b00_ref)                       # (H*W, 64)
    a0_ref[...] = y.astype(a0_ref.dtype).reshape(H, W, -1)
    o_ref[0, :, 0:c0] = conv3x3_valid(a0_ref, w01_ref, b01_ref).astype(o_ref.dtype)

    # ------ block1: 1x1 -> 1x7(pad 0,3) -> 7x1(pad 3,0) -> 3x3(valid) ------
    y = epi(mm(xs, w10_ref[...]), b10_ref)                       # (H*W, 64)
    padw_ref[:, PW:PW + W, :] = y.astype(padw_ref.dtype).reshape(H, W, -1)

    acc = jnp.zeros((H * W, w11_ref.shape[-1]), f32)
    for kw in range(w11_ref.shape[0]):          # 1x7: taps along W
        win = padw_ref[:, kw:kw + W, :].reshape(H * W, -1)
        acc = acc + mm(win, w11_ref[kw])
    padh_ref[PH:PH + H, :, :] = epi(acc, b11_ref).astype(padh_ref.dtype).reshape(H, W, -1)

    acc = jnp.zeros((H * W, w12_ref.shape[-1]), f32)
    for kh in range(w12_ref.shape[0]):          # 7x1: taps along H
        win = padh_ref[kh:kh + H, :, :].reshape(H * W, -1)
        acc = acc + mm(win, w12_ref[kh])
    b1c_ref[...] = epi(acc, b12_ref).astype(b1c_ref.dtype).reshape(H, W, -1)

    o_ref[0, :, c0:c0 + c1] = conv3x3_valid(b1c_ref, w13_ref, b13_ref).astype(o_ref.dtype)


# ----------------------------- wrapper ---------------------------------------

def mixed_4a_forward(x_nchw, params):
    N, Cin, H, W = x_nchw.shape
    Ho, Wo = H - 2, W - 2

    p00, p01 = params["b0_0"], params["b0_1"]
    p10, p11, p12, p13 = params["b1_0"], params["b1_1"], params["b1_2"], params["b1_3"]
    Cout = p01["w_taps"].shape[-1] + p13["w_taps"].shape[-1]     # 96 + 96

    # NCHW -> NHWC, bf16 (MXU operand dtype), flatten spatial for the 1x1 stems.
    x = jnp.transpose(x_nchw, (0, 2, 3, 1)).astype(jnp.bfloat16).reshape(N, H * W, Cin)

    args = (
        x,
        p00["w_taps"][0], p00["b"],
        p01["w_taps"],    p01["b"],
        p10["w_taps"][0], p10["b"],
        p11["w_taps"],    p11["b"],
        p12["w_taps"],    p12["b"],
        p13["w_taps"],    p13["b"],
    )

    def full_spec(a):
        nd = a.ndim
        return pl.BlockSpec(a.shape, lambda i, _nd=nd: (0,) * _nd)

    in_specs = [pl.BlockSpec((1, H * W, Cin), lambda i: (i, 0, 0))]
    in_specs += [full_spec(a) for a in args[1:]]

    kx7 = p11["w_taps"].shape[0]    # 7 taps of the 1x7 conv
    k7x = p12["w_taps"].shape[0]    # 7 taps of the 7x1 conv

    out = pl.pallas_call(
        _mixed4a_kernel,
        out_shape=jax.ShapeDtypeStruct((N, Ho * Wo, Cout), jnp.float32),
        grid_spec=pltpu.PrefetchScalarGridSpec(
            num_scalar_prefetch=0,
            grid=(N,),
            in_specs=in_specs,
            out_specs=pl.BlockSpec((1, Ho * Wo, Cout), lambda i: (i, 0, 0)),
            scratch_shapes=[
                pltpu.VMEM((H, W, p00["w_taps"].shape[-1]), jnp.bfloat16),           # block0 1x1 out
                pltpu.VMEM((H, W + kx7 - 1, p10["w_taps"].shape[-1]), jnp.bfloat16), # width-padded
                pltpu.VMEM((H + k7x - 1, W, p11["w_taps"].shape[-1]), jnp.bfloat16), # height-padded
                pltpu.VMEM((H, W, p12["w_taps"].shape[-1]), jnp.bfloat16),           # block1 7x1 out
            ],
        ),
        compiler_params=pltpu.CompilerParams(
            dimension_semantics=("parallel",)),
    )(*args)

    out = out.reshape(N, Ho, Wo, Cout)
    return jnp.transpose(out, (0, 3, 1, 2))      # NHWC -> NCHW


# ------------------------- deterministic params -----------------------------

def make_basic_conv_params(key, cin, cout, kh, kw):
    kw_, kg, kb, km, kv = jax.random.split(key, 5)
    fan_in = cin * kh * kw
    w = jax.random.normal(kw_, (cout, cin, kh, kw), jnp.float32) / jnp.sqrt(fan_in)
    gamma = jax.random.uniform(kg, (cout,), jnp.float32, 0.5, 1.5)
    beta = 0.1 * jax.random.normal(kb, (cout,), jnp.float32)
    mean = 0.1 * jax.random.normal(km, (cout,), jnp.float32)
    var = jax.random.uniform(kv, (cout,), jnp.float32, 0.5, 1.5)
    scale = gamma / jnp.sqrt(var + BN_EPS)
    bias = beta - mean * scale
    # Fold the BN scale into the conv weight; tap-major (KH*KW, Cin, Cout)
    # matmul layout in bf16 (halves weight bytes, MXU-native operand dtype).
    w_folded = w * scale[:, None, None, None]
    w_taps = jnp.transpose(w_folded, (2, 3, 1, 0)).reshape(kh * kw, cin, cout)
    return {
        "w": w, "scale": scale, "bias": bias,                # f32, for reference
        "w_taps": w_taps.astype(jnp.bfloat16),               # kernel matmul weight
        "b": bias.reshape(1, cout).astype(jnp.float32),      # kernel epilogue bias
    }


# ------------------------- pure-JAX reference --------------------------------

def ref_forward(x_nchw, params):
    def block(x, p, pad_hw):
        y = jax.lax.conv_general_dilated(
            x, p["w"], (1, 1), [(pad_hw[0], pad_hw[0]), (pad_hw[1], pad_hw[1])],
            dimension_numbers=("NCHW", "OIHW", "NCHW"))
        y = y * p["scale"][None, :, None, None] + p["bias"][None, :, None, None]
        return jnp.maximum(y, 0.0)

    x0 = block(x_nchw, params["b0_0"], (0, 0))
    x0 = block(x0, params["b0_1"], (0, 0))
    x1 = block(x_nchw, params["b1_0"], (0, 0))
    x1 = block(x1, params["b1_1"], (0, 3))
    x1 = block(x1, params["b1_2"], (3, 0))
    x1 = block(x1, params["b1_3"], (0, 0))
    return jnp.concatenate([x0, x1], axis=1)


# --------------------------------- main ---------------------------------------

if __name__ == "__main__":
    key = jax.random.PRNGKey(0)
    kx, k00, k01, k10, k11, k12, k13 = jax.random.split(key, 7)

    # Mixed_4a: 160 input channels fixed by the module; small batch / spatial.
    x = jax.random.normal(kx, (2, 160, 9, 9), jnp.float32)

    params = {
        "b0_0": make_basic_conv_params(k00, 160, 64, 1, 1),
        "b0_1": make_basic_conv_params(k01, 64, 96, 3, 3),
        "b1_0": make_basic_conv_params(k10, 160, 64, 1, 1),
        "b1_1": make_basic_conv_params(k11, 64, 64, 1, 7),
        "b1_2": make_basic_conv_params(k12, 64, 64, 7, 1),
        "b1_3": make_basic_conv_params(k13, 64, 96, 3, 3),
    }

    out = jax.block_until_ready(jax.jit(mixed_4a_forward)(x, params))
    assert out.shape == (2, 192, 7, 7), out.shape

    ref = jax.block_until_ready(ref_forward(x, params))
    # bf16 matmul operands vs full-f32 reference -> loosened tolerance.
    max_err = float(jnp.max(jnp.abs(out - ref)))
    assert jnp.allclose(out, ref, rtol=5e-2, atol=1e-1), max_err

    print("KERNEL_OK")
</pallas_src>

<mosaic_0001>
module attributes {stable_mosaic.version = 11 : i64} {
  func.func @_mixed4a_kernel(%arg0: i32, %arg1: memref<1x81x160xbf16, #tpu.memory_space<vmem>>, %arg2: memref<160x64xbf16, #tpu.memory_space<vmem>>, %arg3: memref<1x64xf32, #tpu.memory_space<vmem>>, %arg4: memref<9x64x96xbf16, #tpu.memory_space<vmem>>, %arg5: memref<1x96xf32, #tpu.memory_space<vmem>>, %arg6: memref<160x64xbf16, #tpu.memory_space<vmem>>, %arg7: memref<1x64xf32, #tpu.memory_space<vmem>>, %arg8: memref<7x64x64xbf16, #tpu.memory_space<vmem>>, %arg9: memref<1x64xf32, #tpu.memory_space<vmem>>, %arg10: memref<7x64x64xbf16, #tpu.memory_space<vmem>>, %arg11: memref<1x64xf32, #tpu.memory_space<vmem>>, %arg12: memref<9x64x96xbf16, #tpu.memory_space<vmem>>, %arg13: memref<1x96xf32, #tpu.memory_space<vmem>>, %arg14: memref<1x49x192xf32, #tpu.memory_space<vmem>>, %arg15: memref<9x9x64xbf16, #tpu.memory_space<vmem>>, %arg16: memref<9x15x64xbf16, #tpu.memory_space<vmem>>, %arg17: memref<15x9x64xbf16, #tpu.memory_space<vmem>>, %arg18: memref<9x9x64xbf16, #tpu.memory_space<vmem>>) attributes {dimension_semantics = [#tpu.dimension_semantics<parallel>], iteration_bounds = array<i64: 2>, scalar_prefetch = 0 : i64, scratch_operands = 4 : i64, tpu.core_type = #tpu.core_type<tc>, window_params = [{transform_indices = @transform_0, window_bounds = array<i64: 1, 81, 160>}, {pipeline_mode = #tpu.pipeline_mode<synchronous>, transform_indices = @transform_1, window_bounds = array<i64: 160, 64>}, {pipeline_mode = #tpu.pipeline_mode<synchronous>, transform_indices = @transform_2, window_bounds = array<i64: 1, 64>}, {pipeline_mode = #tpu.pipeline_mode<synchronous>, transform_indices = @transform_3, window_bounds = array<i64: 9, 64, 96>}, {pipeline_mode = #tpu.pipeline_mode<synchronous>, transform_indices = @transform_4, window_bounds = array<i64: 1, 96>}, {pipeline_mode = #tpu.pipeline_mode<synchronous>, transform_indices = @transform_5, window_bounds = array<i64: 160, 64>}, {pipeline_mode = #tpu.pipeline_mode<synchronous>, transform_indices = @transform_6, window_bounds = array<i64: 1, 64>}, {pipeline_mode = #tpu.pipeline_mode<synchronous>, transform_indices = @transform_7, window_bounds = array<i64: 7, 64, 64>}, {pipeline_mode = #tpu.pipeline_mode<synchronous>, transform_indices = @transform_8, window_bounds = array<i64: 1, 64>}, {pipeline_mode = #tpu.pipeline_mode<synchronous>, transform_indices = @transform_9, window_bounds = array<i64: 7, 64, 64>}, {pipeline_mode = #tpu.pipeline_mode<synchronous>, transform_indices = @transform_10, window_bounds = array<i64: 1, 64>}, {pipeline_mode = #tpu.pipeline_mode<synchronous>, transform_indices = @transform_11, window_bounds = array<i64: 9, 64, 96>}, {pipeline_mode = #tpu.pipeline_mode<synchronous>, transform_indices = @transform_12, window_bounds = array<i64: 1, 96>}, {transform_indices = @transform_13, window_bounds = array<i64: 1, 49, 192>}]} {
    %cst = arith.constant 0.000000e+00 : bf16
    %0 = vector.broadcast %cst : bf16 to vector<9x15x64xbf16>
    %c0 = arith.constant 0 : index
    %c0_0 = arith.constant 0 : index
    %c0_1 = arith.constant 0 : index
    %1 = vector.load %arg16[%c0, %c0_0, %c0_1] : memref<9x15x64xbf16, #tpu.memory_space<vmem>>, vector<9x15x64xbf16>
    tpu.vector_store %arg16[%c0, %c0_0, %c0_1], %0 {strides = array<i32>} : memref<9x15x64xbf16, #tpu.memory_space<vmem>>, vector<9x15x64xbf16>,
    %cst_2 = arith.constant 0.000000e+00 : bf16
    %2 = vector.broadcast %cst_2 : bf16 to vector<15x9x64xbf16>
    %c0_3 = arith.constant 0 : index
    %c0_4 = arith.constant 0 : index
    %c0_5 = arith.constant 0 : index
    %3 = vector.load %arg17[%c0_3, %c0_4, %c0_5] : memref<15x9x64xbf16, #tpu.memory_space<vmem>>, vector<15x9x64xbf16>
    tpu.vector_store %arg17[%c0_3, %c0_4, %c0_5], %2 {strides = array<i32>} : memref<15x9x64xbf16, #tpu.memory_space<vmem>>, vector<15x9x64xbf16>,
    %c0_6 = arith.constant 0 : index
    %c0_7 = arith.constant 0 : index
    %c0_8 = arith.constant 0 : index
    %4 = vector.load %arg1[%c0_6, %c0_7, %c0_8] : memref<1x81x160xbf16, #tpu.memory_space<vmem>>, vector<1x81x160xbf16>
    %5 = vector.shape_cast %4 : vector<1x81x160xbf16> to vector<81x160xbf16>
    %c0_9 = arith.constant 0 : index
    %c0_10 = arith.constant 0 : index
    %6 = vector.load %arg2[%c0_9, %c0_10] : memref<160x64xbf16, #tpu.memory_space<vmem>>, vector<160x64xbf16>
    %cst_11 = arith.constant dense<0.000000e+00> : vector<81x64xf32>
    %7 = tpu.matmul %5, %6, %cst_11 {dimension_numbers = #tpu.dot_dimension_numbers<[1], [0], [0], [1], [0, 0, 1, 1], [], []>} : vector<81x160xbf16>, vector<160x64xbf16>, vector<81x64xf32> -> vector<81x64xf32>
    %c0_12 = arith.constant 0 : index
    %c0_13 = arith.constant 0 : index
    %8 = vector.load %arg3[%c0_12, %c0_13] : memref<1x64xf32, #tpu.memory_space<vmem>>, vector<1x64xf32>
    %9 = vector.broadcast %8 : vector<1x64xf32> to vector<81x64xf32>
    %10 = arith.addf %7, %9 : vector<81x64xf32>
    %cst_14 = arith.constant 0.000000e+00 : f32
    %11 = vector.broadcast %cst_14 : f32 to vector<81x64xf32>
    %12 = arith.maximumf %10, %11 : vector<81x64xf32>
    %13 = arith.truncf %12 : vector<81x64xf32> to vector<81x64xbf16>
    %14 = vector.shape_cast %13 : vector<81x64xbf16> to vector<9x9x64xbf16>
    %c0_15 = arith.constant 0 : index
    %c0_16 = arith.constant 0 : index
    %c0_17 = arith.constant 0 : index
    %15 = vector.load %arg15[%c0_15, %c0_16, %c0_17] : memref<9x9x64xbf16, #tpu.memory_space<vmem>>, vector<9x9x64xbf16>
    tpu.vector_store %arg15[%c0_15, %c0_16, %c0_17], %14 {strides = array<i32>} : memref<9x9x64xbf16, #tpu.memory_space<vmem>>, vector<9x9x64xbf16>,
    %cst_18 = arith.constant 0.000000e+00 : f32
    %16 = vector.broadcast %cst_18 : f32 to vector<49x96xf32>
    %c0_19 = arith.constant 0 : index
    %c0_20 = arith.constant 0 : index
    %c0_21 = arith.constant 0 : index
    %17 = vector.load %arg15[%c0_19, %c0_20, %c0_21] : memref<9x9x64xbf16, #tpu.memory_space<vmem>>, vector<7x7x64xbf16>
    %18 = vector.shape_cast %17 : vector<7x7x64xbf16> to vector<49x64xbf16>
    %c0_22 = arith.constant 0 : index
    %c0_23 = arith.constant 0 : index
    %c0_24 = arith.constant 0 : index
    %19 = vector.load %arg4[%c0_22, %c0_23, %c0_24] : memref<9x64x96xbf16, #tpu.memory_space<vmem>>, vector<1x64x96xbf16>
    %20 = vector.shape_cast %19 : vector<1x64x96xbf16> to vector<64x96xbf16>
    %cst_25 = arith.constant dense<0.000000e+00> : vector<49x96xf32>
    %21 = tpu.matmul %18, %20, %cst_25 {dimension_numbers = #tpu.dot_dimension_numbers<[1], [0], [0], [1], [0, 0, 1, 1], [], []>} : vector<49x64xbf16>, vector<64x96xbf16>, vector<49x96xf32> -> vector<49x96xf32>
    %22 = arith.addf %16, %21 : vector<49x96xf32>
    %c0_26 = arith.constant 0 : index
    %c1 = arith.constant 1 : index
    %c0_27 = arith.constant 0 : index
    %23 = vector.load %arg15[%c0_26, %c1, %c0_27] : memref<9x9x64xbf16, #tpu.memory_space<vmem>>, vector<7x7x64xbf16>
    %24 = vector.shape_cast %23 : vector<7x7x64xbf16> to vector<49x64xbf16>
    %c1_28 = arith.constant 1 : index
    %c0_29 = arith.constant 0 : index
    %c0_30 = arith.constant 0 : index
    %25 = vector.load %arg4[%c1_28, %c0_29, %c0_30] : memref<9x64x96xbf16, #tpu.memory_space<vmem>>, vector<1x64x96xbf16>
    %26 = vector.shape_cast %25 : vector<1x64x96xbf16> to vector<64x96xbf16>
    %cst_31 = arith.constant dense<0.000000e+00> : vector<49x96xf32>
    %27 = tpu.matmul %24, %26, %cst_31 {dimension_numbers = #tpu.dot_dimension_numbers<[1], [0], [0], [1], [0, 0, 1, 1], [], []>} : vector<49x64xbf16>, vector<64x96xbf16>, vector<49x96xf32> -> vector<49x96xf32>
    %28 = arith.addf %22, %27 : vector<49x96xf32>
    %c0_32 = arith.constant 0 : index
    %c2 = arith.constant 2 : index
    %c0_33 = arith.constant 0 : index
    %29 = vector.load %arg15[%c0_32, %c2, %c0_33] : memref<9x9x64xbf16, #tpu.memory_space<vmem>>, vector<7x7x64xbf16>
    %30 = vector.shape_cast %29 : vector<7x7x64xbf16> to vector<49x64xbf16>
    %c2_34 = arith.constant 2 : index
    %c0_35 = arith.constant 0 : index
    %c0_36 = arith.constant 0 : index
    %31 = vector.load %arg4[%c2_34, %c0_35, %c0_36] : memref<9x64x96xbf16, #tpu.memory_space<vmem>>, vector<1x64x96xbf16>
    %32 = vector.shape_cast %31 : vector<1x64x96xbf16> to vector<64x96xbf16>
    %cst_37 = arith.constant dense<0.000000e+00> : vector<49x96xf32>
    %33 = tpu.matmul %30, %32, %cst_37 {dimension_numbers = #tpu.dot_dimension_numbers<[1], [0], [0], [1], [0, 0, 1, 1], [], []>} : vector<49x64xbf16>, vector<64x96xbf16>, vector<49x96xf32> -> vector<49x96xf32>
    %34 = arith.addf %28, %33 : vector<49x96xf32>
    %c1_38 = arith.constant 1 : index
    %c0_39 = arith.constant 0 : index
    %c0_40 = arith.constant 0 : index
    %35 = vector.load %arg15[%c1_38, %c0_39, %c0_40] : memref<9x9x64xbf16, #tpu.memory_space<vmem>>, vector<7x7x64xbf16>
    %36 = vector.shape_cast %35 : vector<7x7x64xbf16> to vector<49x64xbf16>
    %c3 = arith.constant 3 : index
    %c0_41 = arith.constant 0 : index
    %c0_42 = arith.constant 0 : index
    %37 = vector.load %arg4[%c3, %c0_41, %c0_42] : memref<9x64x96xbf16, #tpu.memory_space<vmem>>, vector<1x64x96xbf16>
    %38 = vector.shape_cast %37 : vector<1x64x96xbf16> to vector<64x96xbf16>
    %cst_43 = arith.constant dense<0.000000e+00> : vector<49x96xf32>
    %39 = tpu.matmul %36, %38, %cst_43 {dimension_numbers = #tpu.dot_dimension_numbers<[1], [0], [0], [1], [0, 0, 1, 1], [], []>} : vector<49x64xbf16>, vector<64x96xbf16>, vector<49x96xf32> -> vector<49x96xf32>
    %40 = arith.addf %34, %39 : vector<49x96xf32>
    %c1_44 = arith.constant 1 : index
    %c1_45 = arith.constant 1 : index
    %c0_46 = arith.constant 0 : index
    %41 = vector.load %arg15[%c1_44, %c1_45, %c0_46] : memref<9x9x64xbf16, #tpu.memory_space<vmem>>, vector<7x7x64xbf16>
    %42 = vector.shape_cast %41 : vector<7x7x64xbf16> to vector<49x64xbf16>
    %c4 = arith.constant 4 : index
    %c0_47 = arith.constant 0 : index
    %c0_48 = arith.constant 0 : index
    %43 = vector.load %arg4[%c4, %c0_47, %c0_48] : memref<9x64x96xbf16, #tpu.memory_space<vmem>>, vector<1x64x96xbf16>
    %44 = vector.shape_cast %43 : vector<1x64x96xbf16> to vector<64x96xbf16>
    %cst_49 = arith.constant dense<0.000000e+00> : vector<49x96xf32>
    %45 = tpu.matmul %42, %44, %cst_49 {dimension_numbers = #tpu.dot_dimension_numbers<[1], [0], [0], [1], [0, 0, 1, 1], [], []>} : vector<49x64xbf16>, vector<64x96xbf16>, vector<49x96xf32> -> vector<49x96xf32>
    %46 = arith.addf %40, %45 : vector<49x96xf32>
    %c1_50 = arith.constant 1 : index
    %c2_51 = arith.constant 2 : index
    %c0_52 = arith.constant 0 : index
    %47 = vector.load %arg15[%c1_50, %c2_51, %c0_52] : memref<9x9x64xbf16, #tpu.memory_space<vmem>>, vector<7x7x64xbf16>
    %48 = vector.shape_cast %47 : vector<7x7x64xbf16> to vector<49x64xbf16>
    %c5 = arith.constant 5 : index
    %c0_53 = arith.constant 0 : index
    %c0_54 = arith.constant 0 : index
    %49 = vector.load %arg4[%c5, %c0_53, %c0_54] : memref<9x64x96xbf16, #tpu.memory_space<vmem>>, vector<1x64x96xbf16>
    %50 = vector.shape_cast %49 : vector<1x64x96xbf16> to vector<64x96xbf16>
    %cst_55 = arith.constant dense<0.000000e+00> : vector<49x96xf32>
    %51 = tpu.matmul %48, %50, %cst_55 {dimension_numbers = #tpu.dot_dimension_numbers<[1], [0], [0], [1], [0, 0, 1, 1], [], []>} : vector<49x64xbf16>, vector<64x96xbf16>, vector<49x96xf32> -> vector<49x96xf32>
    %52 = arith.addf %46, %51 : vector<49x96xf32>
    %c2_56 = arith.constant 2 : index
    %c0_57 = arith.constant 0 : index
    %c0_58 = arith.constant 0 : index
    %53 = vector.load %arg15[%c2_56, %c0_57, %c0_58] : memref<9x9x64xbf16, #tpu.memory_space<vmem>>, vector<7x7x64xbf16>
    %54 = vector.shape_cast %53 : vector<7x7x64xbf16> to vector<49x64xbf16>
    %c6 = arith.constant 6 : index
    %c0_59 = arith.constant 0 : index
    %c0_60 = arith.constant 0 : index
    %55 = vector.load %arg4[%c6, %c0_59, %c0_60] : memref<9x64x96xbf16, #tpu.memory_space<vmem>>, vector<1x64x96xbf16>
    %56 = vector.shape_cast %55 : vector<1x64x96xbf16> to vector<64x96xbf16>
    %cst_61 = arith.constant dense<0.000000e+00> : vector<49x96xf32>
    %57 = tpu.matmul %54, %56, %cst_61 {dimension_numbers = #tpu.dot_dimension_numbers<[1], [0], [0], [1], [0, 0, 1, 1], [], []>} : vector<49x64xbf16>, vector<64x96xbf16>, vector<49x96xf32> -> vector<49x96xf32>
    %58 = arith.addf %52, %57 : vector<49x96xf32>
    %c2_62 = arith.constant 2 : index
    %c1_63 = arith.constant 1 : index
    %c0_64 = arith.constant 0 : index
    %59 = vector.load %arg15[%c2_62, %c1_63, %c0_64] : memref<9x9x64xbf16, #tpu.memory_space<vmem>>, vector<7x7x64xbf16>
    %60 = vector.shape_cast %59 : vector<7x7x64xbf16> to vector<49x64xbf16>
    %c7 = arith.constant 7 : index
    %c0_65 = arith.constant 0 : index
    %c0_66 = arith.constant 0 : index
    %61 = vector.load %arg4[%c7, %c0_65, %c0_66] : memref<9x64x96xbf16, #tpu.memory_space<vmem>>, vector<1x64x96xbf16>
    %62 = vector.shape_cast %61 : vector<1x64x96xbf16> to vector<64x96xbf16>
    %cst_67 = arith.constant dense<0.000000e+00> : vector<49x96xf32>
    %63 = tpu.matmul %60, %62, %cst_67 {dimension_numbers = #tpu.dot_dimension_numbers<[1], [0], [0], [1], [0, 0, 1, 1], [], []>} : vector<49x64xbf16>, vector<64x96xbf16>, vector<49x96xf32> -> vector<49x96xf32>
    %64 = arith.addf %58, %63 : vector<49x96xf32>
    %c2_68 = arith.constant 2 : index
    %c2_69 = arith.constant 2 : index
    %c0_70 = arith.constant 0 : index
    %65 = vector.load %arg15[%c2_68, %c2_69, %c0_70] : memref<9x9x64xbf16, #tpu.memory_space<vmem>>, vector<7x7x64xbf16>
    %66 = vector.shape_cast %65 : vector<7x7x64xbf16> to vector<49x64xbf16>
    %c8 = arith.constant 8 : index
    %c0_71 = arith.constant 0 : index
    %c0_72 = arith.constant 0 : index
    %67 = vector.load %arg4[%c8, %c0_71, %c0_72] : memref<9x64x96xbf16, #tpu.memory_space<vmem>>, vector<1x64x96xbf16>
    %68 = vector.shape_cast %67 : vector<1x64x96xbf16> to vector<64x96xbf16>
    %cst_73 = arith.constant dense<0.000000e+00> : vector<49x96xf32>
    %69 = tpu.matmul %66, %68, %cst_73 {dimension_numbers = #tpu.dot_dimension_numbers<[1], [0], [0], [1], [0, 0, 1, 1], [], []>} : vector<49x64xbf16>, vector<64x96xbf16>, vector<49x96xf32> -> vector<49x96xf32>
    %70 = arith.addf %64, %69 : vector<49x96xf32>
    %c0_74 = arith.constant 0 : index
    %c0_75 = arith.constant 0 : index
    %71 = vector.load %arg5[%c0_74, %c0_75] : memref<1x96xf32, #tpu.memory_space<vmem>>, vector<1x96xf32>
    %72 = vector.broadcast %71 : vector<1x96xf32> to vector<49x96xf32>
    %73 = arith.addf %70, %72 : vector<49x96xf32>
    %cst_76 = arith.constant 0.000000e+00 : f32
    %74 = vector.broadcast %cst_76 : f32 to vector<49x96xf32>
    %75 = arith.maximumf %73, %74 : vector<49x96xf32>
    %c0_77 = arith.constant 0 : index
    %c0_78 = arith.constant 0 : index
    %c0_79 = arith.constant 0 : index
    %76 = vector.load %arg14[%c0_77, %c0_78, %c0_79] : memref<1x49x192xf32, #tpu.memory_space<vmem>>, vector<1x49x96xf32>
    %77 = vector.shape_cast %76 : vector<1x49x96xf32> to vector<49x96xf32>
    %78 = vector.shape_cast %75 : vector<49x96xf32> to vector<1x49x96xf32>
    tpu.vector_store %arg14[%c0_77, %c0_78, %c0_79], %78 {strides = array<i32>} : memref<1x49x192xf32, #tpu.memory_space<vmem>>, vector<1x49x96xf32>,
    %c0_80 = arith.constant 0 : index
    %c0_81 = arith.constant 0 : index
    %79 = vector.load %arg6[%c0_80, %c0_81] : memref<160x64xbf16, #tpu.memory_space<vmem>>, vector<160x64xbf16>
    %cst_82 = arith.constant dense<0.000000e+00> : vector<81x64xf32>
    %80 = tpu.matmul %5, %79, %cst_82 {dimension_numbers = #tpu.dot_dimension_numbers<[1], [0], [0], [1], [0, 0, 1, 1], [], []>} : vector<81x160xbf16>, vector<160x64xbf16>, vector<81x64xf32> -> vector<81x64xf32>
    %c0_83 = arith.constant 0 : index
    %c0_84 = arith.constant 0 : index
    %81 = vector.load %arg7[%c0_83, %c0_84] : memref<1x64xf32, #tpu.memory_space<vmem>>, vector<1x64xf32>
    %82 = vector.broadcast %81 : vector<1x64xf32> to vector<81x64xf32>
    %83 = arith.addf %80, %82 : vector<81x64xf32>
    %cst_85 = arith.constant 0.000000e+00 : f32
    %84 = vector.broadcast %cst_85 : f32 to vector<81x64xf32>
    %85 = arith.maximumf %83, %84 : vector<81x64xf32>
    %86 = arith.truncf %85 : vector<81x64xf32> to vector<81x64xbf16>
    %87 = vector.shape_cast %86 : vector<81x64xbf16> to vector<9x9x64xbf16>
    %c0_86 = arith.constant 0 : index
    %c3_87 = arith.constant 3 : index
    %c0_88 = arith.constant 0 : index
    %88 = vector.load %arg16[%c0_86, %c3_87, %c0_88] : memref<9x15x64xbf16, #tpu.memory_space<vmem>>, vector<9x9x64xbf16>
    tpu.vector_store %arg16[%c0_86, %c3_87, %c0_88], %87 {strides = array<i32>} : memref<9x15x64xbf16, #tpu.memory_space<vmem>>, vector<9x9x64xbf16>,
    %cst_89 = arith.constant 0.000000e+00 : f32
    %89 = vector.broadcast %cst_89 : f32 to vector<81x64xf32>
    %c0_90 = arith.constant 0 : index
    %c0_91 = arith.constant 0 : index
    %c0_92 = arith.constant 0 : index
    %90 = vector.load %arg16[%c0_90, %c0_91, %c0_92] : memref<9x15x64xbf16, #tpu.memory_space<vmem>>, vector<9x9x64xbf16>
    %91 = vector.shape_cast %90 : vector<9x9x64xbf16> to vector<81x64xbf16>
    %c0_93 = arith.constant 0 : index
    %c0_94 = arith.constant 0 : index
    %c0_95 = arith.constant 0 : index
    %92 = vector.load %arg8[%c0_93, %c0_94, %c0_95] : memref<7x64x64xbf16, #tpu.memory_space<vmem>>, vector<1x64x64xbf16>
    %93 = vector.shape_cast %92 : vector<1x64x64xbf16> to vector<64x64xbf16>
    %cst_96 = arith.constant dense<0.000000e+00> : vector<81x64xf32>
    %94 = tpu.matmul %91, %93, %cst_96 {dimension_numbers = #tpu.dot_dimension_numbers<[1], [0], [0], [1], [0, 0, 1, 1], [], []>} : vector<81x64xbf16>, vector<64x64xbf16>, vector<81x64xf32> -> vector<81x64xf32>
    %95 = arith.addf %89, %94 : vector<81x64xf32>
    %c0_97 = arith.constant 0 : index
    %c1_98 = arith.constant 1 : index
    %c0_99 = arith.constant 0 : index
    %96 = vector.load %arg16[%c0_97, %c1_98, %c0_99] : memref<9x15x64xbf16, #tpu.memory_space<vmem>>, vector<9x9x64xbf16>
    %97 = vector.shape_cast %96 : vector<9x9x64xbf16> to vector<81x64xbf16>
    %c1_100 = arith.constant 1 : index
    %c0_101 = arith.constant 0 : index
    %c0_102 = arith.constant 0 : index
    %98 = vector.load %arg8[%c1_100, %c0_101, %c0_102] : memref<7x64x64xbf16, #tpu.memory_space<vmem>>, vector<1x64x64xbf16>
    %99 = vector.shape_cast %98 : vector<1x64x64xbf16> to vector<64x64xbf16>
    %cst_103 = arith.constant dense<0.000000e+00> : vector<81x64xf32>
    %100 = tpu.matmul %97, %99, %cst_103 {dimension_numbers = #tpu.dot_dimension_numbers<[1], [0], [0], [1], [0, 0, 1, 1], [], []>} : vector<81x64xbf16>, vector<64x64xbf16>, vector<81x64xf32> -> vector<81x64xf32>
    %101 = arith.addf %95, %100 : vector<81x64xf32>
    %c0_104 = arith.constant 0 : index
    %c2_105 = arith.constant 2 : index
    %c0_106 = arith.constant 0 : index
    %102 = vector.load %arg16[%c0_104, %c2_105, %c0_106] : memref<9x15x64xbf16, #tpu.memory_space<vmem>>, vector<9x9x64xbf16>
    %103 = vector.shape_cast %102 : vector<9x9x64xbf16> to vector<81x64xbf16>
    %c2_107 = arith.constant 2 : index
    %c0_108 = arith.constant 0 : index
    %c0_109 = arith.constant 0 : index
    %104 = vector.load %arg8[%c2_107, %c0_108, %c0_109] : memref<7x64x64xbf16, #tpu.memory_space<vmem>>, vector<1x64x64xbf16>
    %105 = vector.shape_cast %104 : vector<1x64x64xbf16> to vector<64x64xbf16>
    %cst_110 = arith.constant dense<0.000000e+00> : vector<81x64xf32>
    %106 = tpu.matmul %103, %105, %cst_110 {dimension_numbers = #tpu.dot_dimension_numbers<[1], [0], [0], [1], [0, 0, 1, 1], [], []>} : vector<81x64xbf16>, vector<64x64xbf16>, vector<81x64xf32> -> vector<81x64xf32>
    %107 = arith.addf %101, %106 : vector<81x64xf32>
    %c0_111 = arith.constant 0 : index
    %c3_112 = arith.constant 3 : index
    %c0_113 = arith.constant 0 : index
    %108 = vector.load %arg16[%c0_111, %c3_112, %c0_113] : memref<9x15x64xbf16, #tpu.memory_space<vmem>>, vector<9x9x64xbf16>
    %109 = vector.shape_cast %108 : vector<9x9x64xbf16> to vector<81x64xbf16>
    %c3_114 = arith.constant 3 : index
    %c0_115 = arith.constant 0 : index
    %c0_116 = arith.constant 0 : index
    %110 = vector.load %arg8[%c3_114, %c0_115, %c0_116] : memref<7x64x64xbf16, #tpu.memory_space<vmem>>, vector<1x64x64xbf16>
    %111 = vector.shape_cast %110 : vector<1x64x64xbf16> to vector<64x64xbf16>
    %cst_117 = arith.constant dense<0.000000e+00> : vector<81x64xf32>
    %112 = tpu.matmul %109, %111, %cst_117 {dimension_numbers = #tpu.dot_dimension_numbers<[1], [0], [0], [1], [0, 0, 1, 1], [], []>} : vector<81x64xbf16>, vector<64x64xbf16>, vector<81x64xf32> -> vector<81x64xf32>
    %113 = arith.addf %107, %112 : vector<81x64xf32>
    %c0_118 = arith.constant 0 : index
    %c4_119 = arith.constant 4 : index
    %c0_120 = arith.constant 0 : index
    %114 = vector.load %arg16[%c0_118, %c4_119, %c0_120] : memref<9x15x64xbf16, #tpu.memory_space<vmem>>, vector<9x9x64xbf16>
    %115 = vector.shape_cast %114 : vector<9x9x64xbf16> to vector<81x64xbf16>
    %c4_121 = arith.constant 4 : index
    %c0_122 = arith.constant 0 : index
    %c0_123 = arith.constant 0 : index
    %116 = vector.load %arg8[%c4_121, %c0_122, %c0_123] : memref<7x64x64xbf16, #tpu.memory_space<vmem>>, vector<1x64x64xbf16>
    %117 = vector.shape_cast %116 : vector<1x64x64xbf16> to vector<64x64xbf16>
    %cst_124 = arith.constant dense<0.000000e+00> : vector<81x64xf32>
    %118 = tpu.matmul %115, %117, %cst_124 {dimension_numbers = #tpu.dot_dimension_numbers<[1], [0], [0], [1], [0, 0, 1, 1], [], []>} : vector<81x64xbf16>, vector<64x64xbf16>, vector<81x64xf32> -> vector<81x64xf32>
    %119 = arith.addf %113, %118 : vector<81x64xf32>
    %c0_125 = arith.constant 0 : index
    %c5_126 = arith.constant 5 : index
    %c0_127 = arith.constant 0 : index
    %120 = vector.load %arg16[%c0_125, %c5_126, %c0_127] : memref<9x15x64xbf16, #tpu.memory_space<vmem>>, vector<9x9x64xbf16>
    %121 = vector.shape_cast %120 : vector<9x9x64xbf16> to vector<81x64xbf16>
    %c5_128 = arith.constant 5 : index
    %c0_129 = arith.constant 0 : index
    %c0_130 = arith.constant 0 : index
    %122 = vector.load %arg8[%c5_128, %c0_129, %c0_130] : memref<7x64x64xbf16, #tpu.memory_space<vmem>>, vector<1x64x64xbf16>
    %123 = vector.shape_cast %122 : vector<1x64x64xbf16> to vector<64x64xbf16>
    %cst_131 = arith.constant dense<0.000000e+00> : vector<81x64xf32>
    %124 = tpu.matmul %121, %123, %cst_131 {dimension_numbers = #tpu.dot_dimension_numbers<[1], [0], [0], [1], [0, 0, 1, 1], [], []>} : vector<81x64xbf16>, vector<64x64xbf16>, vector<81x64xf32> -> vector<81x64xf32>
    %125 = arith.addf %119, %124 : vector<81x64xf32>
    %c0_132 = arith.constant 0 : index
    %c6_133 = arith.constant 6 : index
    %c0_134 = arith.constant 0 : index
    %126 = vector.load %arg16[%c0_132, %c6_133, %c0_134] : memref<9x15x64xbf16, #tpu.memory_space<vmem>>, vector<9x9x64xbf16>
    %127 = vector.shape_cast %126 : vector<9x9x64xbf16> to vector<81x64xbf16>
    %c6_135 = arith.constant 6 : index
    %c0_136 = arith.constant 0 : index
    %c0_137 = arith.constant 0 : index
    %128 = vector.load %arg8[%c6_135, %c0_136, %c0_137] : memref<7x64x64xbf16, #tpu.memory_space<vmem>>, vector<1x64x64xbf16>
    %129 = vector.shape_cast %128 : vector<1x64x64xbf16> to vector<64x64xbf16>
    %cst_138 = arith.constant dense<0.000000e+00> : vector<81x64xf32>
    %130 = tpu.matmul %127, %129, %cst_138 {dimension_numbers = #tpu.dot_dimension_numbers<[1], [0], [0], [1], [0, 0, 1, 1], [], []>} : vector<81x64xbf16>, vector<64x64xbf16>, vector<81x64xf32> -> vector<81x64xf32>
    %131 = arith.addf %125, %130 : vector<81x64xf32>
    %c0_139 = arith.constant 0 : index
    %c0_140 = arith.constant 0 : index
    %132 = vector.load %arg9[%c0_139, %c0_140] : memref<1x64xf32, #tpu.memory_space<vmem>>, vector<1x64xf32>
    %133 = vector.broadcast %132 : vector<1x64xf32> to vector<81x64xf32>
    %134 = arith.addf %131, %133 : vector<81x64xf32>
    %cst_141 = arith.constant 0.000000e+00 : f32
    %135 = vector.broadcast %cst_141 : f32 to vector<81x64xf32>
    %136 = arith.maximumf %134, %135 : vector<81x64xf32>
    %137 = arith.truncf %136 : vector<81x64xf32> to vector<81x64xbf16>
    %138 = vector.shape_cast %137 : vector<81x64xbf16> to vector<9x9x64xbf16>
    %c3_142 = arith.constant 3 : index
    %c0_143 = arith.constant 0 : index
    %c0_144 = arith.constant 0 : index
    %139 = vector.load %arg17[%c3_142, %c0_143, %c0_144] : memref<15x9x64xbf16, #tpu.memory_space<vmem>>, vector<9x9x64xbf16>
    tpu.vector_store %arg17[%c3_142, %c0_143, %c0_144], %138 {strides = array<i32>} : memref<15x9x64xbf16, #tpu.memory_space<vmem>>, vector<9x9x64xbf16>,
    %cst_145 = arith.constant 0.000000e+00 : f32
    %140 = vector.broadcast %cst_145 : f32 to vector<81x64xf32>
    %c0_146 = arith.constant 0 : index
    %c0_147 = arith.constant 0 : index
    %c0_148 = arith.constant 0 : index
    %141 = vector.load %arg17[%c0_146, %c0_147, %c0_148] : memref<15x9x64xbf16, #tpu.memory_space<vmem>>, vector<9x9x64xbf16>
    %142 = vector.shape_cast %141 : vector<9x9x64xbf16> to vector<81x64xbf16>
    %c0_149 = arith.constant 0 : index
    %c0_150 = arith.constant 0 : index
    %c0_151 = arith.constant 0 : index
    %143 = vector.load %arg10[%c0_149, %c0_150, %c0_151] : memref<7x64x64xbf16, #tpu.memory_space<vmem>>, vector<1x64x64xbf16>
    %144 = vector.shape_cast %143 : vector<1x64x64xbf16> to vector<64x64xbf16>
    %cst_152 = arith.constant dense<0.000000e+00> : vector<81x64xf32>
    %145 = tpu.matmul %142, %144, %cst_152 {dimension_numbers = #tpu.dot_dimension_numbers<[1], [0], [0], [1], [0, 0, 1, 1], [], []>} : vector<81x64xbf16>, vector<64x64xbf16>, vector<81x64xf32> -> vector<81x64xf32>
    %146 = arith.addf %140, %145 : vector<81x64xf32>
    %c1_153 = arith.constant 1 : index
    %c0_154 = arith.constant 0 : index
    %c0_155 = arith.constant 0 : index
    %147 = vector.load %arg17[%c1_153, %c0_154, %c0_155] : memref<15x9x64xbf16, #tpu.memory_space<vmem>>, vector<9x9x64xbf16>
    %148 = vector.shape_cast %147 : vector<9x9x64xbf16> to vector<81x64xbf16>
    %c1_156 = arith.constant 1 : index
    %c0_157 = arith.constant 0 : index
    %c0_158 = arith.constant 0 : index
    %149 = vector.load %arg10[%c1_156, %c0_157, %c0_158] : memref<7x64x64xbf16, #tpu.memory_space<vmem>>, vector<1x64x64xbf16>
    %150 = vector.shape_cast %149 : vector<1x64x64xbf16> to vector<64x64xbf16>
    %cst_159 = arith.constant dense<0.000000e+00> : vector<81x64xf32>
    %151 = tpu.matmul %148, %150, %cst_159 {dimension_numbers = #tpu.dot_dimension_numbers<[1], [0], [0], [1], [0, 0, 1, 1], [], []>} : vector<81x64xbf16>, vector<64x64xbf16>, vector<81x64xf32> -> vector<81x64xf32>
    %152 = arith.addf %146, %151 : vector<81x64xf32>
    %c2_160 = arith.constant 2 : index
    %c0_161 = arith.constant 0 : index
    %c0_162 = arith.constant 0 : index
    %153 = vector.load %arg17[%c2_160, %c0_161, %c0_162] : memref<15x9x64xbf16, #tpu.memory_space<vmem>>, vector<9x9x64xbf16>
    %154 = vector.shape_cast %153 : vector<9x9x64xbf16> to vector<81x64xbf16>
    %c2_163 = arith.constant 2 : index
    %c0_164 = arith.constant 0 : index
    %c0_165 = arith.constant 0 : index
    %155 = vector.load %arg10[%c2_163, %c0_164, %c0_165] : memref<7x64x64xbf16, #tpu.memory_space<vmem>>, vector<1x64x64xbf16>
    %156 = vector.shape_cast %155 : vector<1x64x64xbf16> to vector<64x64xbf16>
    %cst_166 = arith.constant dense<0.000000e+00> : vector<81x64xf32>
    %157 = tpu.matmul %154, %156, %cst_166 {dimension_numbers = #tpu.dot_dimension_numbers<[1], [0], [0], [1], [0, 0, 1, 1], [], []>} : vector<81x64xbf16>, vector<64x64xbf16>, vector<81x64xf32> -> vector<81x64xf32>
    %158 = arith.addf %152, %157 : vector<81x64xf32>
    %c3_167 = arith.constant 3 : index
    %c0_168 = arith.constant 0 : index
    %c0_169 = arith.constant 0 : index
    %159 = vector.load %arg17[%c3_167, %c0_168, %c0_169] : memref<15x9x64xbf16, #tpu.memory_space<vmem>>, vector<9x9x64xbf16>
    %160 = vector.shape_cast %159 : vector<9x9x64xbf16> to vector<81x64xbf16>
    %c3_170 = arith.constant 3 : index
    %c0_171 = arith.constant 0 : index
    %c0_172 = arith.constant 0 : index
    %161 = vector.load %arg10[%c3_170, %c0_171, %c0_172] : memref<7x64x64xbf16, #tpu.memory_space<vmem>>, vector<1x64x64xbf16>
    %162 = vector.shape_cast %161 : vector<1x64x64xbf16> to vector<64x64xbf16>
    %cst_173 = arith.constant dense<0.000000e+00> : vector<81x64xf32>
    %163 = tpu.matmul %160, %162, %cst_173 {dimension_numbers = #tpu.dot_dimension_numbers<[1], [0], [0], [1], [0, 0, 1, 1], [], []>} : vector<81x64xbf16>, vector<64x64xbf16>, vector<81x64xf32> -> vector<81x64xf32>
    %164 = arith.addf %158, %163 : vector<81x64xf32>
    %c4_174 = arith.constant 4 : index
    %c0_175 = arith.constant 0 : index
    %c0_176 = arith.constant 0 : index
    %165 = vector.load %arg17[%c4_174, %c0_175, %c0_176] : memref<15x9x64xbf16, #tpu.memory_space<vmem>>, vector<9x9x64xbf16>
    %166 = vector.shape_cast %165 : vector<9x9x64xbf16> to vector<81x64xbf16>
    %c4_177 = arith.constant 4 : index
    %c0_178 = arith.constant 0 : index
    %c0_179 = arith.constant 0 : index
    %167 = vector.load %arg10[%c4_177, %c0_178, %c0_179] : memref<7x64x64xbf16, #tpu.memory_space<vmem>>, vector<1x64x64xbf16>
    %168 = vector.shape_cast %167 : vector<1x64x64xbf16> to vector<64x64xbf16>
    %cst_180 = arith.constant dense<0.000000e+00> : vector<81x64xf32>
    %169 = tpu.matmul %166, %168, %cst_180 {dimension_numbers = #tpu.dot_dimension_numbers<[1], [0], [0], [1], [0, 0, 1, 1], [], []>} : vector<81x64xbf16>, vector<64x64xbf16>, vector<81x64xf32> -> vector<81x64xf32>
    %170 = arith.addf %164, %169 : vector<81x64xf32>
    %c5_181 = arith.constant 5 : index
    %c0_182 = arith.constant 0 : index
    %c0_183 = arith.constant 0 : index
    %171 = vector.load %arg17[%c5_181, %c0_182, %c0_183] : memref<15x9x64xbf16, #tpu.memory_space<vmem>>, vector<9x9x64xbf16>
    %172 = vector.shape_cast %171 : vector<9x9x64xbf16> to vector<81x64xbf16>
    %c5_184 = arith.constant 5 : index
    %c0_185 = arith.constant 0 : index
    %c0_186 = arith.constant 0 : index
    %173 = vector.load %arg10[%c5_184, %c0_185, %c0_186] : memref<7x64x64xbf16, #tpu.memory_space<vmem>>, vector<1x64x64xbf16>
    %174 = vector.shape_cast %173 : vector<1x64x64xbf16> to vector<64x64xbf16>
    %cst_187 = arith.constant dense<0.000000e+00> : vector<81x64xf32>
    %175 = tpu.matmul %172, %174, %cst_187 {dimension_numbers = #tpu.dot_dimension_numbers<[1], [0], [0], [1], [0, 0, 1, 1], [], []>} : vector<81x64xbf16>, vector<64x64xbf16>, vector<81x64xf32> -> vector<81x64xf32>
    %176 = arith.addf %170, %175 : vector<81x64xf32>
    %c6_188 = arith.constant 6 : index
    %c0_189 = arith.constant 0 : index
    %c0_190 = arith.constant 0 : index
    %177 = vector.load %arg17[%c6_188, %c0_189, %c0_190] : memref<15x9x64xbf16, #tpu.memory_space<vmem>>, vector<9x9x64xbf16>
    %178 = vector.shape_cast %177 : vector<9x9x64xbf16> to vector<81x64xbf16>
    %c6_191 = arith.constant 6 : index
    %c0_192 = arith.constant 0 : index
    %c0_193 = arith.constant 0 : index
    %179 = vector.load %arg10[%c6_191, %c0_192, %c0_193] : memref<7x64x64xbf16, #tpu.memory_space<vmem>>, vector<1x64x64xbf16>
    %180 = vector.shape_cast %179 : vector<1x64x64xbf16> to vector<64x64xbf16>
    %cst_194 = arith.constant dense<0.000000e+00> : vector<81x64xf32>
    %181 = tpu.matmul %178, %180, %cst_194 {dimension_numbers = #tpu.dot_dimension_numbers<[1], [0], [0], [1], [0, 0, 1, 1], [], []>} : vector<81x64xbf16>, vector<64x64xbf16>, vector<81x64xf32> -> vector<81x64xf32>
    %182 = arith.addf %176, %181 : vector<81x64xf32>
    %c0_195 = arith.constant 0 : index
    %c0_196 = arith.constant 0 : index
    %183 = vector.load %arg11[%c0_195, %c0_196] : memref<1x64xf32, #tpu.memory_space<vmem>>, vector<1x64xf32>
    %184 = vector.broadcast %183 : vector<1x64xf32> to vector<81x64xf32>
    %185 = arith.addf %182, %184 : vector<81x64xf32>
    %cst_197 = arith.constant 0.000000e+00 : f32
    %186 = vector.broadcast %cst_197 : f32 to vector<81x64xf32>
    %187 = arith.maximumf %185, %186 : vector<81x64xf32>
    %188 = arith.truncf %187 : vector<81x64xf32> to vector<81x64xbf16>
    %189 = vector.shape_cast %188 : vector<81x64xbf16> to vector<9x9x64xbf16>
    %c0_198 = arith.constant 0 : index
    %c0_199 = arith.constant 0 : index
    %c0_200 = arith.constant 0 : index
    %190 = vector.load %arg18[%c0_198, %c0_199, %c0_200] : memref<9x9x64xbf16, #tpu.memory_space<vmem>>, vector<9x9x64xbf16>
    tpu.vector_store %arg18[%c0_198, %c0_199, %c0_200], %189 {strides = array<i32>} : memref<9x9x64xbf16, #tpu.memory_space<vmem>>, vector<9x9x64xbf16>,
    %cst_201 = arith.constant 0.000000e+00 : f32
    %191 = vector.broadcast %cst_201 : f32 to vector<49x96xf32>
    %c0_202 = arith.constant 0 : index
    %c0_203 = arith.constant 0 : index
    %c0_204 = arith.constant 0 : index
    %192 = vector.load %arg18[%c0_202, %c0_203, %c0_204] : memref<9x9x64xbf16, #tpu.memory_space<vmem>>, vector<7x7x64xbf16>
    %193 = vector.shape_cast %192 : vector<7x7x64xbf16> to vector<49x64xbf16>
    %c0_205 = arith.constant 0 : index
    %c0_206 = arith.constant 0 : index
    %c0_207 = arith.constant 0 : index
    %194 = vector.load %arg12[%c0_205, %c0_206, %c0_207] : memref<9x64x96xbf16, #tpu.memory_space<vmem>>, vector<1x64x96xbf16>
    %195 = vector.shape_cast %194 : vector<1x64x96xbf16> to vector<64x96xbf16>
    %cst_208 = arith.constant dense<0.000000e+00> : vector<49x96xf32>
    %196 = tpu.matmul %193, %195, %cst_208 {dimension_numbers = #tpu.dot_dimension_numbers<[1], [0], [0], [1], [0, 0, 1, 1], [], []>} : vector<49x64xbf16>, vector<64x96xbf16>, vector<49x96xf32> -> vector<49x96xf32>
    %197 = arith.addf %191, %196 : vector<49x96xf32>
    %c0_209 = arith.constant 0 : index
    %c1_210 = arith.constant 1 : index
    %c0_211 = arith.constant 0 : index
    %198 = vector.load %arg18[%c0_209, %c1_210, %c0_211] : memref<9x9x64xbf16, #tpu.memory_space<vmem>>, vector<7x7x64xbf16>
    %199 = vector.shape_cast %198 : vector<7x7x64xbf16> to vector<49x64xbf16>
    %c1_212 = arith.constant 1 : index
    %c0_213 = arith.constant 0 : index
    %c0_214 = arith.constant 0 : index
    %200 = vector.load %arg12[%c1_212, %c0_213, %c0_214] : memref<9x64x96xbf16, #tpu.memory_space<vmem>>, vector<1x64x96xbf16>
    %201 = vector.shape_cast %200 : vector<1x64x96xbf16> to vector<64x96xbf16>
    %cst_215 = arith.constant dense<0.000000e+00> : vector<49x96xf32>
    %202 = tpu.matmul %199, %201, %cst_215 {dimension_numbers = #tpu.dot_dimension_numbers<[1], [0], [0], [1], [0, 0, 1, 1], [], []>} : vector<49x64xbf16>, vector<64x96xbf16>, vector<49x96xf32> -> vector<49x96xf32>
    %203 = arith.addf %197, %202 : vector<49x96xf32>
    %c0_216 = arith.constant 0 : index
    %c2_217 = arith.constant 2 : index
    %c0_218 = arith.constant 0 : index
    %204 = vector.load %arg18[%c0_216, %c2_217, %c0_218] : memref<9x9x64xbf16, #tpu.memory_space<vmem>>, vector<7x7x64xbf16>
    %205 = vector.shape_cast %204 : vector<7x7x64xbf16> to vector<49x64xbf16>
    %c2_219 = arith.constant 2 : index
    %c0_220 = arith.constant 0 : index
    %c0_221 = arith.constant 0 : index
    %206 = vector.load %arg12[%c2_219, %c0_220, %c0_221] : memref<9x64x96xbf16, #tpu.memory_space<vmem>>, vector<1x64x96xbf16>
    %207 = vector.shape_cast %206 : vector<1x64x96xbf16> to vector<64x96xbf16>
    %cst_222 = arith.constant dense<0.000000e+00> : vector<49x96xf32>
    %208 = tpu.matmul %205, %207, %cst_222 {dimension_numbers = #tpu.dot_dimension_numbers<[1], [0], [0], [1], [0, 0, 1, 1], [], []>} : vector<49x64xbf16>, vector<64x96xbf16>, vector<49x96xf32> -> vector<49x96xf32>
    %209 = arith.addf %203, %208 : vector<49x96xf32>
    %c1_223 = arith.constant 1 : index
    %c0_224 = arith.constant 0 : index
    %c0_225 = arith.constant 0 : index
    %210 = vector.load %arg18[%c1_223, %c0_224, %c0_225] : memref<9x9x64xbf16, #tpu.memory_space<vmem>>, vector<7x7x64xbf16>
    %211 = vector.shape_cast %210 : vector<7x7x64xbf16> to vector<49x64xbf16>
    %c3_226 = arith.constant 3 : index
    %c0_227 = arith.constant 0 : index
    %c0_228 = arith.constant 0 : index
    %212 = vector.load %arg12[%c3_226, %c0_227, %c0_228] : memref<9x64x96xbf16, #tpu.memory_space<vmem>>, vector<1x64x96xbf16>
    %213 = vector.shape_cast %212 : vector<1x64x96xbf16> to vector<64x96xbf16>
    %cst_229 = arith.constant dense<0.000000e+00> : vector<49x96xf32>
    %214 = tpu.matmul %211, %213, %cst_229 {dimension_numbers = #tpu.dot_dimension_numbers<[1], [0], [0], [1], [0, 0, 1, 1], [], []>} : vector<49x64xbf16>, vector<64x96xbf16>, vector<49x96xf32> -> vector<49x96xf32>
    %215 = arith.addf %209, %214 : vector<49x96xf32>
    %c1_230 = arith.constant 1 : index
    %c1_231 = arith.constant 1 : index
    %c0_232 = arith.constant 0 : index
    %216 = vector.load %arg18[%c1_230, %c1_231, %c0_232] : memref<9x9x64xbf16, #tpu.memory_space<vmem>>, vector<7x7x64xbf16>
    %217 = vector.shape_cast %216 : vector<7x7x64xbf16> to vector<49x64xbf16>
    %c4_233 = arith.constant 4 : index
    %c0_234 = arith.constant 0 : index
    %c0_235 = arith.constant 0 : index
    %218 = vector.load %arg12[%c4_233, %c0_234, %c0_235] : memref<9x64x96xbf16, #tpu.memory_space<vmem>>, vector<1x64x96xbf16>
    %219 = vector.shape_cast %218 : vector<1x64x96xbf16> to vector<64x96xbf16>
    %cst_236 = arith.constant dense<0.000000e+00> : vector<49x96xf32>
    %220 = tpu.matmul %217, %219, %cst_236 {dimension_numbers = #tpu.dot_dimension_numbers<[1], [0], [0], [1], [0, 0, 1, 1], [], []>} : vector<49x64xbf16>, vector<64x96xbf16>, vector<49x96xf32> -> vector<49x96xf32>
    %221 = arith.addf %215, %220 : vector<49x96xf32>
    %c1_237 = arith.constant 1 : index
    %c2_238 = arith.constant 2 : index
    %c0_239 = arith.constant 0 : index
    %222 = vector.load %arg18[%c1_237, %c2_238, %c0_239] : memref<9x9x64xbf16, #tpu.memory_space<vmem>>, vector<7x7x64xbf16>
    %223 = vector.shape_cast %222 : vector<7x7x64xbf16> to vector<49x64xbf16>
    %c5_240 = arith.constant 5 : index
    %c0_241 = arith.constant 0 : index
    %c0_242 = arith.constant 0 : index
    %224 = vector.load %arg12[%c5_240, %c0_241, %c0_242] : memref<9x64x96xbf16, #tpu.memory_space<vmem>>, vector<1x64x96xbf16>
    %225 = vector.shape_cast %224 : vector<1x64x96xbf16> to vector<64x96xbf16>
    %cst_243 = arith.constant dense<0.000000e+00> : vector<49x96xf32>
    %226 = tpu.matmul %223, %225, %cst_243 {dimension_numbers = #tpu.dot_dimension_numbers<[1], [0], [0], [1], [0, 0, 1, 1], [], []>} : vector<49x64xbf16>, vector<64x96xbf16>, vector<49x96xf32> -> vector<49x96xf32>
    %227 = arith.addf %221, %226 : vector<49x96xf32>
    %c2_244 = arith.constant 2 : index
    %c0_245 = arith.constant 0 : index
    %c0_246 = arith.constant 0 : index
    %228 = vector.load %arg18[%c2_244, %c0_245, %c0_246] : memref<9x9x64xbf16, #tpu.memory_space<vmem>>, vector<7x7x64xbf16>
    %229 = vector.shape_cast %228 : vector<7x7x64xbf16> to vector<49x64xbf16>
    %c6_247 = arith.constant 6 : index
    %c0_248 = arith.constant 0 : index
    %c0_249 = arith.constant 0 : index
    %230 = vector.load %arg12[%c6_247, %c0_248, %c0_249] : memref<9x64x96xbf16, #tpu.memory_space<vmem>>, vector<1x64x96xbf16>
    %231 = vector.shape_cast %230 : vector<1x64x96xbf16> to vector<64x96xbf16>
    %cst_250 = arith.constant dense<0.000000e+00> : vector<49x96xf32>
    %232 = tpu.matmul %229, %231, %cst_250 {dimension_numbers = #tpu.dot_dimension_numbers<[1], [0], [0], [1], [0, 0, 1, 1], [], []>} : vector<49x64xbf16>, vector<64x96xbf16>, vector<49x96xf32> -> vector<49x96xf32>
    %233 = arith.addf %227, %232 : vector<49x96xf32>
    %c2_251 = arith.constant 2 : index
    %c1_252 = arith.constant 1 : index
    %c0_253 = arith.constant 0 : index
    %234 = vector.load %arg18[%c2_251, %c1_252, %c0_253] : memref<9x9x64xbf16, #tpu.memory_space<vmem>>, vector<7x7x64xbf16>
    %235 = vector.shape_cast %234 : vector<7x7x64xbf16> to vector<49x64xbf16>
    %c7_254 = arith.constant 7 : index
    %c0_255 = arith.constant 0 : index
    %c0_256 = arith.constant 0 : index
    %236 = vector.load %arg12[%c7_254, %c0_255, %c0_256] : memref<9x64x96xbf16, #tpu.memory_space<vmem>>, vector<1x64x96xbf16>
    %237 = vector.shape_cast %236 : vector<1x64x96xbf16> to vector<64x96xbf16>
    %cst_257 = arith.constant dense<0.000000e+00> : vector<49x96xf32>
    %238 = tpu.matmul %235, %237, %cst_257 {dimension_numbers = #tpu.dot_dimension_numbers<[1], [0], [0], [1], [0, 0, 1, 1], [], []>} : vector<49x64xbf16>, vector<64x96xbf16>, vector<49x96xf32> -> vector<49x96xf32>
    %239 = arith.addf %233, %238 : vector<49x96xf32>
    %c2_258 = arith.constant 2 : index
    %c2_259 = arith.constant 2 : index
    %c0_260 = arith.constant 0 : index
    %240 = vector.load %arg18[%c2_258, %c2_259, %c0_260] : memref<9x9x64xbf16, #tpu.memory_space<vmem>>, vector<7x7x64xbf16>
    %241 = vector.shape_cast %240 : vector<7x7x64xbf16> to vector<49x64xbf16>
    %c8_261 = arith.constant 8 : index
    %c0_262 = arith.constant 0 : index
    %c0_263 = arith.constant 0 : index
    %242 = vector.load %arg12[%c8_261, %c0_262, %c0_263] : memref<9x64x96xbf16, #tpu.memory_space<vmem>>, vector<1x64x96xbf16>
    %243 = vector.shape_cast %242 : vector<1x64x96xbf16> to vector<64x96xbf16>
    %cst_264 = arith.constant dense<0.000000e+00> : vector<49x96xf32>
    %244 = tpu.matmul %241, %243, %cst_264 {dimension_numbers = #tpu.dot_dimension_numbers<[1], [0], [0], [1], [0, 0, 1, 1], [], []>} : vector<49x64xbf16>, vector<64x96xbf16>, vector<49x96xf32> -> vector<49x96xf32>
    %245 = arith.addf %239, %244 : vector<49x96xf32>
    %c0_265 = arith.constant 0 : index
    %c0_266 = arith.constant 0 : index
    %246 = vector.load %arg13[%c0_265, %c0_266] : memref<1x96xf32, #tpu.memory_space<vmem>>, vector<1x96xf32>
    %247 = vector.broadcast %246 : vector<1x96xf32> to vector<49x96xf32>
    %248 = arith.addf %245, %247 : vector<49x96xf32>
    %cst_267 = arith.constant 0.000000e+00 : f32
    %249 = vector.broadcast %cst_267 : f32 to vector<49x96xf32>
    %250 = arith.maximumf %248, %249 : vector<49x96xf32>
    %c0_268 = arith.constant 0 : index
    %c0_269 = arith.constant 0 : index
    %c96 = arith.constant 96 : index
    %251 = vector.load %arg14[%c0_268, %c0_269, %c96] : memref<1x49x192xf32, #tpu.memory_space<vmem>>, vector<1x49x96xf32>
    %252 = vector.shape_cast %251 : vector<1x49x96xf32> to vector<49x96xf32>
    %253 = vector.shape_cast %250 : vector<49x96xf32> to vector<1x49x96xf32>
    tpu.vector_store %arg14[%c0_268, %c0_269, %c96], %253 {strides = array<i32>} : memref<1x49x192xf32, #tpu.memory_space<vmem>>, vector<1x49x96xf32>,
    return
  }
  func.func @transform_0(%arg0: i32) -> (i32, i32, i32) {
    %c0_i32 = arith.constant 0 : i32
    %c0_i32_0 = arith.constant 0 : i32
    %c0_i32_1 = arith.constant 0 : i32
    return %arg0, %c0_i32, %c0_i32_0 : i32, i32, i32
  }
  func.func @transform_1(%arg0: i32) -> (i32, i32) {
    %c0_i32 = arith.constant 0 : i32
    %c0_i32_0 = arith.constant 0 : i32
    %c0_i32_1 = arith.constant 0 : i32
    return %c0_i32, %c0_i32_0 : i32, i32
  }
  func.func @transform_2(%arg0: i32) -> (i32, i32) {
    %c0_i32 = arith.constant 0 : i32
    %c0_i32_0 = arith.constant 0 : i32
    %c0_i32_1 = arith.constant 0 : i32
    return %c0_i32, %c0_i32_0 : i32, i32
  }
  func.func @transform_3(%arg0: i32) -> (i32, i32, i32) {
    %c0_i32 = arith.constant 0 : i32
    %c0_i32_0 = arith.constant 0 : i32
    %c0_i32_1 = arith.constant 0 : i32
    %c0_i32_2 = arith.constant 0 : i32
    return %c0_i32, %c0_i32_0, %c0_i32_1 : i32, i32, i32
  }
  func.func @transform_4(%arg0: i32) -> (i32, i32) {
    %c0_i32 = arith.constant 0 : i32
    %c0_i32_0 = arith.constant 0 : i32
    %c0_i32_1 = arith.constant 0 : i32
    return %c0_i32, %c0_i32_0 : i32, i32
  }
  func.func @transform_5(%arg0: i32) -> (i32, i32) {
    %c0_i32 = arith.constant 0 : i32
    %c0_i32_0 = arith.constant 0 : i32
    %c0_i32_1 = arith.constant 0 : i32
    return %c0_i32, %c0_i32_0 : i32, i32
  }
  func.func @transform_6(%arg0: i32) -> (i32, i32) {
    %c0_i32 = arith.constant 0 : i32
    %c0_i32_0 = arith.constant 0 : i32
    %c0_i32_1 = arith.constant 0 : i32
    return %c0_i32, %c0_i32_0 : i32, i32
  }
  func.func @transform_7(%arg0: i32) -> (i32, i32, i32) {
    %c0_i32 = arith.constant 0 : i32
    %c0_i32_0 = arith.constant 0 : i32
    %c0_i32_1 = arith.constant 0 : i32
    %c0_i32_2 = arith.constant 0 : i32
    return %c0_i32, %c0_i32_0, %c0_i32_1 : i32, i32, i32
  }
  func.func @transform_8(%arg0: i32) -> (i32, i32) {
    %c0_i32 = arith.constant 0 : i32
    %c0_i32_0 = arith.constant 0 : i32
    %c0_i32_1 = arith.constant 0 : i32
    return %c0_i32, %c0_i32_0 : i32, i32
  }
  func.func @transform_9(%arg0: i32) -> (i32, i32, i32) {
    %c0_i32 = arith.constant 0 : i32
    %c0_i32_0 = arith.constant 0 : i32
    %c0_i32_1 = arith.constant 0 : i32
    %c0_i32_2 = arith.constant 0 : i32
    return %c0_i32, %c0_i32_0, %c0_i32_1 : i32, i32, i32
  }
  func.func @transform_10(%arg0: i32) -> (i32, i32) {
    %c0_i32 = arith.constant 0 : i32
    %c0_i32_0 = arith.constant 0 : i32
    %c0_i32_1 = arith.constant 0 : i32
    return %c0_i32, %c0_i32_0 : i32, i32
  }
  func.func @transform_11(%arg0: i32) -> (i32, i32, i32) {
    %c0_i32 = arith.constant 0 : i32
    %c0_i32_0 = arith.constant 0 : i32
    %c0_i32_1 = arith.constant 0 : i32
    %c0_i32_2 = arith.constant 0 : i32
    return %c0_i32, %c0_i32_0, %c0_i32_1 : i32, i32, i32
  }
  func.func @transform_12(%arg0: i32) -> (i32, i32) {
    %c0_i32 = arith.constant 0 : i32
    %c0_i32_0 = arith.constant 0 : i32
    %c0_i32_1 = arith.constant 0 : i32
    return %c0_i32, %c0_i32_0 : i32, i32
  }
  func.func @transform_13(%arg0: i32) -> (i32, i32, i32) {
    %c0_i32 = arith.constant 0 : i32
    %c0_i32_0 = arith.constant 0 : i32
    %c0_i32_1 = arith.constant 0 : i32
    return %arg0, %c0_i32, %c0_i32_0 : i32, i32, i32
  }
}

</mosaic_0001>

<bundles_post_ra>
// kernel: mixed_4a_forward.1
= control target key start
LH: loop header
LB: loop body
LE: loop exit
PB: predicated region body
PF: predicated region fallthrough
CT: control target
= control target key end

     0   :  { %s29402_s25 = smov 0   ;;  %s34680_s0 = inlined_call_operand.vmem [shape: bf16[2,81,160], index: 0, kind: input, shape index: {}]   ;;  %s34681_s1 = inlined_call_operand.vmem [shape: bf16[160,64], index: 1, kind: input, shape index: {}]   ;;  %s34682_s2 = inlined_call_operand.vmem [shape: f32[1,64], index: 2, kind: input, shape index: {}]   ;;  %s34683_s3 = inlined_call_operand.vmem [shape: bf16[9,64,96], index: 3, kind: input, shape index: {}]   ;;  %s34684_s4 = inlined_call_operand.vmem [shape: f32[1,96], index: 4, kind: input, shape index: {}]   ;;  %s34685_s5 = inlined_call_operand.vmem [shape: bf16[160,64], index: 5, kind: input, shape index: {}]   ;;  %s34686_s6 = inlined_call_operand.vmem [shape: f32[1,64], index: 6, kind: input, shape index: {}]   ;;  %s34687_s7 = inlined_call_operand.vmem [shape: bf16[7,64,64], index: 7, kind: input, shape index: {}]   ;;  %s34688_s8 = inlined_call_operand.vmem [shape: f32[1,64], index: 8, kind: input, shape index: {}]   ;;  %s34689_s9 = inlined_call_operand.vmem [shape: bf16[7,64,64], index: 9, kind: input, shape index: {}]   ;;  %s34690_s10 = inlined_call_operand.vmem [shape: f32[1,64], index: 10, kind: input, shape index: {}]   ;;  %s34691_s11 = inlined_call_operand.vmem [shape: bf16[9,64,96], index: 11, kind: input, shape index: {}]   ;;  %s34692_s12 = inlined_call_operand.vmem [shape: f32[1,96], index: 12, kind: input, shape index: {}]   ;;  %s34693_s13 = inlined_call_operand.vmem [shape: f32[2,49,192], index: 13, kind: output, shape index: {}]  }
   0x1 LB: > { %s26680_s26 = sadd.s32 4294967295, %s29326_s25   ;;  %p26684_p0 = scmp.ge.s32.totalorder %s29326_s25, 1  ;;  %s29326_s25 = sphi %s29402_s25, %s23_s25  }
   0x2   : > { %p387_p1 = scmp.lt.s32.totalorder %s29326_s25, 3 }
   0x4   : > { %p388_p2 = pnand %p26684_p0, %p387_p1 }
   0x6   : > { %391 = sbr.rel (%p388_p2) target bundleno = 2168 (0x878), region = 72 }
   0xb   : > { %v29143_v0 = vld [vmem:[%s34681_s1 + $0x38] sm:$0xff]   ;;  %v34694_v1 = vmov 0   ;;  %p431_p3 = scmp.lt.s32.totalorder %s26680_s26, 1  ;;  %v29144_v2 = vld [vmem:[%s34681_s1 + $0x30] sm:$0xff]   ;;  %v29145_v3 = vld [vmem:[%s34681_s1 + $0x28] sm:$0xff]   ;;  %vm694_vm0 = vcmask 261120   ;;  %v820_v36 = vlaneseq }
   0xc   : > { %713 = vmatprep.subr.bf16.mxu0 %v34694_v1  ;;  %v29146_v4 = vld [vmem:[%s34681_s1 + $0x20] sm:$0xff]   ;;  %v29147_v6 = vld [vmem:[%s34681_s1 + $0x18] sm:$0xff]   ;;  %v29148_v7 = vld [vmem:[%s34681_s1 + $0x10] sm:$0xff]   ;;  %vm442_vm1 = vcmask 519168   ;;  %v29329_v34 = vmov 1966171168  }
   0xd   : > { %714 = vmatpush1.bf16.msra.mxu0 %v29143_v0  ;;  %s34880_s26 = smov (!%p431_p3, %s26680_s26), 1  ;;  %v29149_v8 = vld [vmem:[%s34681_s1 + $0x8] sm:$0xff]   ;;  %v29150_v9 = vld [vmem:[%s34681_s1] sm:$0xff]   ;;  %443 = vst.msk [vmem:[#allocation3] sm:$0xf] %vm442_vm1, %v34694_v1  ;;  %v29170_v24 = vld [vmem:[%s34683_s3 + $0xb8] sm:$0xff]   ;;  %v818_v35 = vunpack.c.l.s4 %v29329_v34 }
   0xe   : > { %715 = vmatprep.subr.bf16.mxu0 %v34694_v1  ;;  %s29129_s14 = smul.u32 88, %s34880_s26  ;;  %v29151_v10 = vld [vmem:[%s34681_s1 + $0x48] sm:$0xff]   ;;  %v29152_v11 = vld [vmem:[%s34681_s1 + $0x40] sm:$0xff]   ;;  %450 = vst.msk [vmem:[#allocation3 + $0x8] sm:$0xf] %vm442_vm1, %v34694_v1  ;;  %v29173_v25 = vld [vmem:[%s34683_s3 + $0x38] sm:$0xff]  }
   0xf   : > { %454 = vst.msk [vmem:[#allocation3 + $0x10] sm:$0xf] %vm442_vm1, %v34694_v1  ;;  %458 = vst.msk [vmem:[#allocation3 + $0x18] sm:$0xf] %vm442_vm1, %v34694_v1  ;;  %28561 = vmatprep.subr.bf16.mxu1 %v29173_v25  ;;  %v29174_v26 = vld [vmem:[%s34683_s3 + $0x30] sm:$0xff]   ;;  %v29172_v28 = vld [vmem:[%s34683_s3 + $0xa8] sm:$0xff]   ;;  %v819_v41 = vunpack.c.0.s8 %v818_v35 }
  0x10   : > { %s29428_s19 = scalar_lea.vmem %s34680_s0, %s29129_s14  ;;  %462 = vst.msk [vmem:[#allocation3 + $0x20] sm:$0xf] %vm442_vm1, %v34694_v1  ;;  %466 = vst.msk [vmem:[#allocation3 + $0x28] sm:$0xf] %vm442_vm1, %v34694_v1  ;;  %28562 = vmatpush3.bf16.msra.mxu1 %v29173_v25  ;;  %v29171_v27 = vld [vmem:[%s34683_s3 + $0xb0] sm:$0xff]   ;;  %v29175_v29 = vld [vmem:[%s34683_s3 + $0x28] sm:$0xff]  }
  0x11   : > { %716 = vmatpush1.bf16.msra.mxu0 %v29144_v2  ;;  %v29155_v5 = vld [vmem:[%s29428_s19 + $0x4] ss:$8 sps:$4 sm:$0xff]   ;;  %v29153_v12 = vld [vmem:[%s29428_s19] ss:$8 sps:$4 sm:$0xff]   ;;  %v29156_v13 = vld [vmem:[%s29428_s19 + $0x14] ss:$8 sps:$4 sm:$0xff]   ;;  %28563 = vmatprep.subr.bf16.mxu1 %v29174_v26 }
  0x12   : > { %717 = vmatprep.subr.bf16.mxu0 %v34694_v1  ;;  %26710 = vmatprep.mubr.msk.bf16.mxu0 %vm694_vm0, %v29155_v5  ;;  %v29158_v14 = vld [vmem:[%s29428_s19 + $0x10] ss:$8 sps:$4 sm:$0xff]   ;;  %v29159_v15 = vld [vmem:[%s29428_s19 + $0x24] ss:$8 sps:$4 sm:$0xff]   ;;  %v29161_v16 = vld [vmem:[%s29428_s19 + $0x20] ss:$8 sps:$4 sm:$0xff]  }
  0x13   : > { %v29162_v17 = vld [vmem:[%s29428_s19 + $0x34] ss:$8 sps:$4 sm:$0xff]   ;;  %v29164_v18 = vld [vmem:[%s29428_s19 + $0x30] ss:$8 sps:$4 sm:$0xff]   ;;  %v29165_v19 = vld [vmem:[%s29428_s19 + $0x44] ss:$8 sps:$4 sm:$0xff]  }
  0x14   : > { %v555_v20 = vld [vmem:[%s29428_s19 + $0x50] sm:$0x11]  ;;  %v29167_v21 = vld [vmem:[%s29428_s19 + $0x40] ss:$8 sps:$4 sm:$0xff]   ;;  %470 = vst.msk [vmem:[#allocation3 + $0x30] sm:$0xf] %vm442_vm1, %v34694_v1  ;;  %28564 = vmatpush3.bf16.msra.mxu1 %v29174_v26 }
  0x15   : > { %718 = vmatpush1.bf16.msra.mxu0 %v29145_v3  ;;  %v29474_v22 = vcombine.high %v555_v20, %v555_v20  ;;  %v29478_v23 = vcombine.low %v555_v20, %v555_v20  ;;  %474 = vst.msk [vmem:[#allocation3 + $0x38] sm:$0xf] %vm442_vm1, %v34694_v1  ;;  %478 = vst.msk [vmem:[#allocation3 + $0x40] sm:$0xf] %vm442_vm1, %v34694_v1  ;;  %v29176_v30 = vld [vmem:[%s34683_s3 + $0xa0] sm:$0xff]   ;;  %28565 = vmatprep.subr.bf16.mxu1 %v29175_v29  ;;  %v29556_v32 = vld [vmem:[%s34683_s3 + $0x18] sm:$0xff]  }
  0x16   : > { %719 = vmatprep.subr.bf16.mxu0 %v34694_v1  ;;  %482 = vst.msk [vmem:[#allocation4] sm:$0xf] %vm442_vm1, %v34694_v1  ;;  %489 = vst.msk [vmem:[#allocation4 + $0x8] sm:$0xf] %vm442_vm1, %v34694_v1  ;;  %v29177_v31 = vld [vmem:[%s34683_s3 + $0x20] sm:$0xff]   ;;  %v29562_v33 = vld [vmem:[%s34683_s3 + $0xf8] sm:$0xff]  }
  0x17   : > { %34742 = vst [vmem:[#allocation6_spill] sm:$0xff] %v29474_v22  ;;  %34743 = vst [vmem:[#allocation7_spill] sm:$0xff] %v29478_v23  ;;  %v29568_v37 = vld [vmem:[%s34682_s2] ss:$0 sm:$0xff]  ;;  %v821_v42 = vshrl.u32 %v820_v36, 7  ;;  %vm483_vm2 = vcmask 516096  }
  0x18   : > { %493 = vst.msk [vmem:[#allocation4 + $0x10] sm:$0xf] %vm442_vm1, %v34694_v1  ;;  %497 = vst.msk [vmem:[#allocation4 + $0x18] sm:$0xf] %vm442_vm1, %v34694_v1  ;;  %28566 = vmatpush3.bf16.msra.mxu1 %v29175_v29  ;;  %v29330_v45 = vmov 1935823168  }
  0x19   : > { %720 = vmatpush1.bf16.msra.mxu0 %v29146_v4  ;;  %501 = vst.msk [vmem:[#allocation4 + $0x20] sm:$0xf] %vm442_vm1, %v34694_v1  ;;  %505 = vst.msk [vmem:[#allocation4 + $0x28] sm:$0xf] %vm442_vm1, %v34694_v1  ;;  %28567 = vmatprep.subr.bf16.mxu1 %v29177_v31  ;;  %v1204_v46 = vunpack.c.l.s4 %v29330_v45  ;;  %v29572_v50 = vsub.s32 %v819_v41, %v821_v42  ;;  %vm484_vm3 = vsmask.f32 256 }
  0x1a   : > { %721 = vmatprep.subr.bf16.mxu0 %v34694_v1  ;;  %509 = vst.msk [vmem:[#allocation4 + $0x30] sm:$0xf] %vm442_vm1, %v34694_v1  ;;  %513 = vst.msk [vmem:[#allocation4 + $0x38] sm:$0xf] %vm442_vm1, %v34694_v1  ;;  %vm2062_vm5 = vcmask 523264   ;;  %vm7531_vm8 = vcmask 519169  }
  0x1b   : > { %517 = vst.msk [vmem:[#allocation4 + $0x40] sm:$0xf] %vm442_vm1, %v34694_v1  ;;  %521 = vst.msk [vmem:[#allocation4 + $0x48] sm:$0xf] %vm442_vm1, %v34694_v1  ;;  %v1205_v54 = vunpack.c.0.s8 %v1204_v46  ;;  %vm445_vm6 = vsmask.f32 3328 }
  0x1c   : > { %525 = vst.msk [vmem:[#allocation4 + $0x50] sm:$0xf] %vm442_vm1, %v34694_v1  ;;  %529 = vst.msk [vmem:[#allocation4 + $0x58] sm:$0xf] %vm442_vm1, %v34694_v1  ;;  %28568 = vmatpush3.bf16.msra.mxu1 %v29177_v31  ;;  %vm7532_vm9 = vsmask.f32 7942 }
  0x1d   : > { %722 = vmatpush1.bf16.msra.mxu0 %v29147_v6  ;;  %533 = vst.msk [vmem:[#allocation4 + $0x60] sm:$0xf] %vm442_vm1, %v34694_v1  ;;  %537 = vst.msk [vmem:[#allocation4 + $0x68] sm:$0xf] %vm442_vm1, %v34694_v1  ;;  %28577 = vmatprep.subr.bf16.mxu1 %v29556_v32  ;;  %v29579_v0 = vsub.s32 %v1205_v54, %v821_v42  ;;  %vm7537_vm10 = vcmask 517120   ;;  %s29130_s18 = smul.u32 112, %s34880_s26 }
  0x1e   : > { %723 = vmatprep.subr.bf16.mxu0 %v34694_v1  ;;  %541 = vst.msk [vmem:[#allocation4 + $0x70] sm:$0xf] %vm442_vm1, %v34694_v1  ;;  %vm29587_vm4 = vmand %vm483_vm2, %vm484_vm3  ;;  %vm6515_vm12 = vcmask 785408   ;;  %vm6522_vm13 = vcmask 778240   ;;  %s29331_s21 = smov 96   ;;  %vm26608_vm14 = vcmask 1048320  }
  0x1f   : > { %34744 = vst [vmem:[#allocation8_spill] sm:$0xff] %v29579_v0  ;;  %vm30729_vm7 = vmand %vm442_vm1, %vm445_vm6  ;;  %s32061_s22 = scalar_lea.vmem %s34693_s13, %s29130_s18  ;;  %vm26621_vm15 = vcmask 1041152  }
  0x20   : > { %vm30870_vm11 = vmand %vm7531_vm8, %vm7532_vm9 }
  0x21   : > { %724 = vmatpush1.bf16.msra.mxu0 %v29148_v7 }
  0x22   : > { %725 = vmatprep.subr.bf16.mxu0 %v34694_v1 }
  0x25   : > { %726 = vmatpush1.bf16.msra.mxu0 %v29149_v8 }
  0x26   : > { %727 = vmatprep.subr.bf16.mxu0 %v34694_v1 }
  0x29   : > { %728 = vmatpush1.bf16.msra.mxu0 %v29150_v9 }
  0x2a   : > { %741 = vmatprep.subr.bf16.mxu0 %v34694_v1 }
  0x2d   : > { %742 = vmatpush2.bf16.msra.mxu0 %v29151_v10 }
  0x2e   : > { %743 = vmatprep.subr.bf16.mxu0 %v34694_v1 }
  0x31   : > { %744 = vmatpush2.bf16.msra.mxu0 %v29152_v11 }
  0x32   : > { %28641 = vmatprep.subr.bf16.mxu0 %v29170_v24 }
  0x34   : > { %746 = vmatmul.mubr.bf16.vlgmr.msra.gmra.mxu0 %v29153_v12 }
  0x35   : > { %26711 = vmatprep.mubr.msk.bf16.mxu0 %vm694_vm0, %v29156_v13  ;;  %28642 = vmatpush3.bf16.msra.mxu0 %v29170_v24 }
  0x36   : > { %28643 = vmatprep.subr.bf16.mxu0 %v29171_v27 }
  0x39   : > { %28644 = vmatpush3.bf16.msra.mxu0 %v29171_v27  ;;  %v1562_v27 = vld [vmem:[#allocation2 + $0x4] sm:$0x1] }
  0x3a   : > { %28645 = vmatprep.subr.bf16.mxu0 %v29172_v28 }
  0x3c   : > { %754 = vmatmul.mubr.bf16.gmra.mxu0 %v29158_v14 }
  0x3d   : > { %26712 = vmatprep.mubr.msk.bf16.mxu0 %vm694_vm0, %v29159_v15  ;;  %28646 = vmatpush3.bf16.msra.mxu0 %v29172_v28 }
  0x3e   : > { %28647 = vmatprep.subr.bf16.mxu0 %v29176_v30 }
  0x41   : > { %28648 = vmatpush3.bf16.msra.mxu0 %v29176_v30 }
  0x42   : > { %28673 = vmatprep.subr.bf16.mxu0 %v29562_v33 }
  0x44   : > { %762 = vmatmul.mubr.bf16.gmra.mxu0 %v29161_v16 }
  0x45   : > { %26713 = vmatprep.mubr.msk.bf16.mxu0 %vm694_vm0, %v29162_v17 }
  0x4c   : > { %770 = vmatmul.mubr.bf16.gmra.mxu0 %v29164_v18 }
  0x4d   : > { %26714 = vmatprep.mubr.msk.bf16.mxu0 %vm694_vm0, %v29165_v19 }
  0x54   : > { %778 = vmatmul.mubr.bf16.gmra.mxu0 %v29167_v21  ;;  %v34745_v21 = vmov 0 }
  0x55   : > { %26715 = vmatprep.mubr.msk.bf16.mxu0 %vm694_vm0, %v29474_v22  ;;  %v34746_v21 = vsel %vm29587_vm4, 4294967295, %v34745_v21 }
  0x56   : > { %34747 = vst [vmem:[#allocation9_spill] sm:$0xff] %v34746_v21 }
  0x5c   : > { %786 = vmatmul.mubr.bf16.gmra.mxu0 %v29478_v23 }
  0xf4   : > { %v747_v38 = vpop.f32.mrf.mxu0 }
  0xf5   : > { %v748_v40 = vadd.f32 %v29568_v37, %v747_v38 }
  0xf6   : > { %v749_v39 = vpop.f32.mrf.mxu0 }
  0xf7   : > { %v793_v48 = vmax.f32 %v748_v40, 0.0 }
  0xf8   : > { %v750_v43 = vpop.f32.mrf.mxu0 }
  0xf9   : > { %v751_v44 = vadd.f32 %v29568_v37, %v750_v43 }
  0xfa   : > { %v752_v47 = vpop.f32.mrf.mxu0 }
  0xfb   : > { %v794_v49 = vmax.f32 %v751_v44, 0.0 }
  0xfc   : > { %v755_v51 = vpop.f32.mrf.mxu0 }
  0xfd   : > { %v804_v52 = vpack.c.bf16 %v794_v49, %v793_v48  ;;  %v26716_v53 = vpack.c.bf16 %v794_v49, %v794_v49  ;;  %v756_v58 = vadd.f32 %v29568_v37, %v755_v51 }
  0xfe   : > { %v757_v55 = vpop.f32.mrf.mxu0 }
  0xff   : > { %v823_v56 = vrot.slane %v804_v52, %v29572_v50  ;;  %v830_v57 = vrot.slane %v26716_v53, %v29572_v50  ;;  %v795_v10 = vmax.f32 %v756_v58, 0.0 }
 0x100   : > { %v758_v59 = vpop.f32.mrf.mxu0 }
 0x101   : > { %v831_v60 = vcombine.high %v823_v56, %v823_v56  ;;  %v832_v61 = vcombine.high %v830_v57, %v830_v57  ;;  %v839_v62 = vrot.slane %v823_v56, %v29572_v50  ;;  %v846_v63 = vrot.slane %v830_v57, %v29572_v50 }
 0x102   : > { %v759_v2 = vadd.f32 %v29568_v37, %v758_v59  ;;  %v760_v3 = vpop.f32.mrf.mxu0 }
 0x103   : > { %v853_v4 = vrot.slane %v831_v60, %v29572_v50  ;;  %v860_v5 = vrot.slane %v832_v61, %v29572_v50  ;;  %v861_v6 = vcombine.high %v839_v62, %v839_v62  ;;  %v862_v7 = vcombine.high %v846_v63, %v846_v63 }
 0x104   : > { %v1083_v8 = vunpack.i.l.s16 %v846_v63  ;;  %v1084_v9 = vunpack.i.h.s16 %v846_v63  ;;  %v796_v11 = vmax.f32 %v759_v2, 0.0  ;;  %v763_v12 = vpop.f32.mrf.mxu0 }
 0x105   : > { %v863_v13 = vcombine.high %v853_v4, %v853_v4  ;;  %v864_v14 = vcombine.high %v860_v5, %v860_v5  ;;  %v1086_v15 = vunpack.i.h.s16 %v860_v5  ;;  %v1088_v16 = vunpack.i.h.s16 %v862_v7 }
 0x106   : > { %v1201_v17 = vcombine.low %v839_v62, %v861_v6  ;;  %v1231_v18 = vrot.slane %v1083_v8, %v29579_v0  ;;  %v805_v19 = vpack.c.bf16 %v796_v11, %v795_v10  ;;  %v765_v20 = vpop.f32.mrf.mxu0  ;;  %v26721_v24 = vpack.i.b16 %v860_v5, %v1084_v9 }
 0x107   : > { %v26723_v25 = vpack.i.b16 %v864_v14, %v1088_v16  ;;  %v1202_v26 = vcombine.low %v853_v4, %v863_v13  ;;  %v26717_v28 = vpack.c.bf16 %v796_v11, %v796_v11  ;;  %v26722_v29 = vpack.i.b16 %v862_v7, %v1086_v15  ;;  %v1566_v7 = vld [vmem:[#allocation2 + $0xc] sm:$0x1] }
 0x108   : > { %v1209_v30 = vrot.slane %v1201_v17, %v29579_v0  ;;  %v1238_v31 = vrot.slane %v1231_v18, %v29579_v0  ;;  %v872_v34 = vrot.slane %v805_v19, %v29572_v50  ;;  %v766_v35 = vpop.f32.mrf.mxu0  ;;  %v1090_v40 = vunpack.i.h.s16 %v864_v14 }
 0x109   : > { %v1216_v36 = vrot.slane %v1202_v26, %v29579_v0  ;;  %v1239_v38 = vcombine.low %v26721_v24, %v26723_v25  ;;  %v879_v39 = vrot.slane %v26717_v28, %v29572_v50  ;;  %v764_v44 = vadd.f32 %v29568_v37, %v763_v12  ;;  %v1570_v24 = vld [vmem:[#allocation2 + $0x14] sm:$0x1] }
 0x10a   : > { %v1563_v41 = vsel %vm29587_vm4, %v1238_v31, %v1562_v27  ;;  %v880_v42 = vcombine.high %v872_v34, %v872_v34  ;;  %v888_v43 = vrot.slane %v872_v34, %v29572_v50  ;;  %v768_v45 = vpop.f32.mrf.mxu0  ;;  %v767_v49 = vadd.f32 %v29568_v37, %v766_v35 }
 0x10b   : > { %v1217_v46 = vcombine.low %v1209_v30, %v1216_v36  ;;  %1564 = vst [vmem:[#allocation2 + $0x4] sm:$0x1] %v1563_v41  ;;  %v881_v47 = vcombine.high %v879_v39, %v879_v39  ;;  %v895_v48 = vrot.slane %v879_v39, %v29572_v50  ;;  %v1247_v57 = vrot.slane %v1239_v38, %v29579_v0 }
 0x10c   : > { %v902_v51 = vrot.slane %v880_v42, %v29572_v50  ;;  %v910_v52 = vcombine.high %v888_v43, %v888_v43  ;;  %v1092_v53 = vunpack.i.h.s16 %v888_v43  ;;  %v26724_v54 = vpack.i.b16 %v888_v43, %v1090_v40  ;;  %v771_v55 = vpop.f32.mrf.mxu0 }
 0x10d   : > { %v1224_v56 = vrot.slane %v1217_v46, %v29579_v0  ;;  %v909_v58 = vrot.slane %v881_v47, %v29572_v50  ;;  %v911_v59 = vcombine.high %v895_v48, %v895_v48  ;;  %v797_v11 = vmax.f32 %v764_v44, 0.0 }
 0x10e   : > { %v912_v60 = vcombine.high %v902_v51, %v902_v51  ;;  %v1240_v61 = vcombine.low %v26722_v29, %v26724_v54  ;;  %v1269_v62 = vrot.slane %v1092_v53, %v29579_v0  ;;  %v1278_v63 = vcombine.low %v910_v52, %v895_v48  ;;  %v773_v2 = vpop.f32.mrf.mxu0 }
 0x10f   : > { %1561 = vst.msk [vmem:[#allocation2] sm:$0xf] %vm442_vm1, %v1224_v56  ;;  %v913_v3 = vcombine.high %v909_v58, %v909_v58  ;;  %v1101_v4 = vunpack.i.l.s16 %v909_v58  ;;  %v1102_v5 = vunpack.i.h.s16 %v909_v58  ;;  %v1104_v6 = vunpack.i.h.s16 %v911_v59 }
 0x110   : > { %v1254_v8 = vrot.slane %v1240_v61, %v29579_v0  ;;  %v1276_v9 = vrot.slane %v1269_v62, %v29579_v0  ;;  %v1277_v10 = vcombine.low %v902_v51, %v912_v60  ;;  %v774_v12 = vpop.f32.mrf.mxu0  ;;  %v1292_v14 = vrot.slane %v1278_v63, %v29579_v0 }
 0x111   : > { %v29610_v13 = vpack.i.b16 %v911_v59, %v1102_v5  ;;  %v1307_v15 = vrot.slane %v1101_v4, %v29579_v0  ;;  %v798_v16 = vmax.f32 %v767_v49, 0.0  ;;  %v29614_v17 = vpack.i.b16 %v913_v3, %v1104_v6 }
 0x112   : > { %v1255_v18 = vcombine.low %v1247_v57, %v1254_v8  ;;  %v1285_v19 = vrot.slane %v1277_v10, %v29579_v0  ;;  %v1567_v20 = vsel %vm29587_vm4, %v1276_v9, %v1566_v7  ;;  %v776_v25 = vpop.f32.mrf.mxu0  ;;  %v29619_v26 = vld.sshfl [vmem:[#allocation2 + $0x4] sm:$0x1 pattern:$0x75316420]  ;;  %v772_v30 = vadd.f32 %v29568_v37, %v771_v55 }
 0x113   : > { %v1314_v27 = vrot.slane %v1307_v15, %v29579_v0  ;;  %1568 = vst [vmem:[#allocation2 + $0xc] sm:$0x1] %v1567_v20  ;;  %v806_v28 = vpack.c.bf16 %v798_v16, %v797_v11  ;;  %v26718_v29 = vpack.c.bf16 %v798_v16, %v798_v16  ;;  %v1106_v35 = vunpack.i.h.s16 %v913_v3 }
 0x114   : > { %v1262_v31 = vrot.slane %v1255_v18, %v29579_v0  ;;  %v1293_v34 = vcombine.low %v1285_v19, %v1292_v14  ;;  %v775_v36 = vadd.f32 %v29568_v37, %v774_v12  ;;  %v779_v38 = vpop.f32.mrf.mxu0  ;;  %v799_v44 = vmax.f32 %v772_v30, 0.0 }
 0x115   : > { %v1571_v39 = vsel %vm29587_vm4, %v1314_v27, %v1570_v24  ;;  %v921_v40 = vrot.slane %v806_v28, %v29572_v50  ;;  %v928_v41 = vrot.slane %v26718_v29, %v29572_v50  ;;  %v29634_v46 = vadd.f32 %v29568_v37, %v779_v38  ;;  %v1574_v28 = vld [vmem:[#allocation2 + $0x1c] sm:$0x1]  ;;  %v1578_v29 = vld [vmem:[#allocation2 + $0x24] sm:$0x1] }
 0x116   : > { %v1300_v43 = vrot.slane %v1293_v34, %v29579_v0  ;;  %1565 = vst.msk [vmem:[#allocation2 + $0x8] sm:$0xf] %vm442_vm1, %v1262_v31  ;;  %1572 = vst [vmem:[#allocation2 + $0x14] sm:$0x1] %v1571_v39  ;;  %v800_v45 = vmax.f32 %v775_v36, 0.0  ;;  %v781_v47 = vpop.f32.mrf.mxu0 }
 0x117   : > { %v29636_v48 = vld.sshfl [vmem:[#allocation2] sm:$0x33 pattern:$0x75316420]  ;;  %v929_v49 = vcombine.high %v921_v40, %v921_v40  ;;  %v930_v51 = vcombine.high %v928_v41, %v928_v41  ;;  %v937_v52 = vrot.slane %v921_v40, %v29572_v50  ;;  %v944_v53 = vrot.slane %v928_v41, %v29572_v50 }
 0x118   : > { %1569 = vst.msk [vmem:[#allocation2 + $0x10] sm:$0xf] %vm442_vm1, %v1300_v43  ;;  %v807_v54 = vpack.c.bf16 %v800_v45, %v799_v44  ;;  %v26719_v55 = vpack.c.bf16 %v800_v45, %v800_v45  ;;  %v801_v56 = vmax.f32 %v29634_v46, 0.0  ;;  %v29642_v57 = vpop.f32.mrf.mxu0  ;;  %v1618_v58 = vcombine.high %v29636_v48, %v29636_v48 }
 0x119   : > { %v951_v59 = vrot.slane %v929_v49, %v29572_v50  ;;  %v958_v60 = vrot.slane %v930_v51, %v29572_v50  ;;  %v959_v61 = vcombine.high %v937_v52, %v937_v52  ;;  %v960_v62 = vcombine.high %v944_v53, %v944_v53 }
 0x11a   : > { %v1108_v63 = vunpack.i.h.s16 %v937_v52  ;;  %v26727_v2 = vpack.i.b16 %v937_v52, %v1106_v35  ;;  %v970_v3 = vrot.slane %v807_v54, %v29572_v50  ;;  %v977_v4 = vrot.slane %v26719_v55, %v29572_v50  ;;  %v784_v5 = vpop.f32.mrf.mxu0 }
 0x11b   : > { %v961_v6 = vcombine.high %v951_v59, %v951_v59  ;;  %v962_v7 = vcombine.high %v958_v60, %v958_v60  ;;  %v1110_v8 = vunpack.i.h.s16 %v951_v59  ;;  %v1119_v9 = vunpack.i.l.s16 %v960_v62 }
 0x11c   : > { %v1120_v10 = vunpack.i.h.s16 %v960_v62  ;;  %v26728_v11 = vpack.i.b16 %v951_v59, %v1108_v63  ;;  %v1315_v12 = vcombine.low %v29610_v13, %v26727_v2  ;;  %v1353_v14 = vcombine.low %v959_v61, %v944_v53 }
 0x11d   : > { %v1122_v15 = vunpack.i.h.s16 %v962_v7  ;;  %v1345_v16 = vrot.slane %v1110_v8, %v29579_v0  ;;  %v1354_v18 = vcombine.low %v961_v6, %v958_v60  ;;  %v1383_v19 = vrot.slane %v1119_v9, %v29579_v0 }
 0x11e   : > { %v26729_v20 = vpack.i.b16 %v962_v7, %v1120_v10  ;;  %v1316_v24 = vcombine.low %v29614_v17, %v26728_v11  ;;  %v1323_v25 = vrot.slane %v1315_v12, %v29579_v0  ;;  %v1361_v27 = vrot.slane %v1353_v14, %v29579_v0  ;;  %v1582_v12 = vld [vmem:[#allocation2 + $0x2c] sm:$0x1] }
 0x11f   : > { %v1352_v30 = vrot.slane %v1345_v16, %v29579_v0  ;;  %v1368_v13 = vrot.slane %v1354_v18, %v29579_v0  ;;  %v1390_v31 = vrot.slane %v1383_v19, %v29579_v0  ;;  %v978_v34 = vcombine.high %v970_v3, %v970_v3 }
 0x120   : > { %v1330_v35 = vrot.slane %v1316_v24, %v29579_v0  ;;  %v979_v36 = vcombine.high %v977_v4, %v977_v4  ;;  %v986_v38 = vrot.slane %v970_v3, %v29572_v50  ;;  %v993_v17 = vrot.slane %v977_v4, %v29572_v50  ;;  %v26738_v24 = vld.sshfl [vmem:[#allocation2 + $0x8] sm:$0x33 pattern:$0x75316420] }
 0x121   : > { %v1369_v39 = vcombine.low %v1361_v27, %v1368_v13  ;;  %v1575_v40 = vsel %vm29587_vm4, %v1352_v30, %v1574_v28  ;;  %v1579_v41 = vsel %vm29587_vm4, %v1390_v31, %v1578_v29  ;;  %v1000_v43 = vrot.slane %v978_v34, %v29572_v50  ;;  %v26739_v13 = vld.sshfl [vmem:[#allocation2 + $0x10] sm:$0x33 pattern:$0x75316420] }
 0x122   : > { %v1331_v44 = vcombine.low %v1323_v25, %v1330_v35  ;;  %1576 = vst [vmem:[#allocation2 + $0x1c] sm:$0x1] %v1575_v40  ;;  %1580 = vst [vmem:[#allocation2 + $0x24] sm:$0x1] %v1579_v41  ;;  %v1007_v45 = vrot.slane %v979_v36, %v29572_v50  ;;  %v1008_v47 = vcombine.high %v986_v38, %v986_v38  ;;  %v1124_v53 = vunpack.i.h.s16 %v986_v38 }
 0x123   : > { %v1009_v49 = vcombine.high %v993_v17, %v993_v17  ;;  %v1376_v51 = vrot.slane %v1369_v39, %v29579_v0  ;;  %v1010_v52 = vcombine.high %v1000_v43, %v1000_v43  ;;  %v1126_v54 = vunpack.i.h.s16 %v1000_v43 }
 0x124   : > { %v1338_v55 = vrot.slane %v1331_v44, %v29579_v0  ;;  %v29670_v59 = vcombine.high %v1007_v45, %v1007_v45  ;;  %v1128_v60 = vunpack.i.h.s16 %v1008_v47  ;;  %v26730_v61 = vpack.i.b16 %v986_v38, %v1122_v15 }
 0x125   : > { %1577 = vst.msk [vmem:[#allocation2 + $0x20] sm:$0xf] %vm442_vm1, %v1376_v51  ;;  %v26731_v62 = vpack.i.b16 %v1000_v43, %v1124_v53  ;;  %v26732_v63 = vpack.i.b16 %v1008_v47, %v1126_v54  ;;  %v1429_v2 = vcombine.low %v1010_v52, %v1007_v45  ;;  %v1430_v3 = vcombine.low %v993_v17, %v1009_v49 }
 0x126   : > { %1573 = vst.msk [vmem:[#allocation2 + $0x18] sm:$0xf] %vm442_vm1, %v1338_v55  ;;  %v1137_v4 = vunpack.i.l.s16 %v29670_v59  ;;  %v1138_v5 = vunpack.i.h.s16 %v29670_v59  ;;  %v1421_v6 = vrot.slane %v1128_v60, %v29579_v0  ;;  %v783_v7 = vadd.f32 %v29568_v37, %v29642_v57 }
 0x127   : > { %v1391_v8 = vcombine.low %v26729_v20, %v26731_v62  ;;  %v1392_v9 = vcombine.low %v26730_v61, %v26732_v63  ;;  %v1437_v10 = vrot.slane %v1429_v2, %v29579_v0  ;;  %v1444_v11 = vrot.slane %v1430_v3, %v29579_v0  ;;  %v1586_v20 = vld [vmem:[#allocation2 + $0x34] sm:$0x1] }
 0x128   : > { %v1428_v14 = vrot.slane %v1421_v6, %v29579_v0  ;;  %v1459_v15 = vrot.slane %v1137_v4, %v29579_v0  ;;  %v802_v16 = vmax.f32 %v783_v7, 0.0  ;;  %v29685_v18 = vrot.slane %v29636_v48, %v29572_v50 }
 0x129   : > { %v1399_v19 = vrot.slane %v1391_v8, %v29579_v0  ;;  %v1406_v37 = vrot.slane %v1392_v9, %v29579_v0  ;;  %v1445_v57 = vcombine.low %v1437_v10, %v1444_v11  ;;  %v29693_v25 = vrot.slane %v1618_v58, %v29572_v50 }
 0x12a   : > { %v1466_v27 = vrot.slane %v1459_v15, %v29579_v0  ;;  %v1583_v28 = vsel %vm29587_vm4, %v1428_v14, %v1582_v12  ;;  %v808_v29 = vpack.c.bf16 %v802_v16, %v801_v56  ;;  %v26720_v30 = vpack.c.bf16 %v802_v16, %v802_v16 }
 0x12b   : > { %v1407_v31 = vcombine.low %v1399_v19, %v1406_v37  ;;  %v1452_v34 = vrot.slane %v1445_v57, %v29579_v0  ;;  %1584 = vst [vmem:[#allocation2 + $0x2c] sm:$0x1] %v1583_v28  ;;  %v29703_v35 = vcombine.high %v29685_v18, %v29685_v18  ;;  %v29707_v48 = vcombine.high %v29693_v25, %v29693_v25  ;;  %v1590_v28 = vld [vmem:[#allocation2 + $0x3c] sm:$0x1] }
 0x12c   : > { %v1587_v58 = vsel %vm29587_vm4, %v1466_v27, %v1586_v20  ;;  %v1019_v46 = vrot.slane %v808_v29, %v29572_v50  ;;  %v1026_v56 = vrot.slane %v26720_v30, %v29572_v50  ;;  %v1642_v36 = vcombine.high %v26738_v24, %v26738_v24 }
 0x12d   : > { %v1414_v38 = vrot.slane %v1407_v31, %v29579_v0  ;;  %1585 = vst.msk [vmem:[#allocation2 + $0x30] sm:$0xf] %vm442_vm1, %v1452_v34  ;;  %1588 = vst [vmem:[#allocation2 + $0x34] sm:$0x1] %v1587_v58  ;;  %v29716_v17 = vrot.slane %v26738_v24, %v29572_v50  ;;  %v1666_v39 = vcombine.high %v26739_v13, %v26739_v13  ;;  %v1780_v52 = vunpack.i.h.s16 %v29685_v18 }
 0x12e   : > { %v29719_v40 = vrot.slane %v26739_v13, %v29572_v50  ;;  %v1027_v41 = vcombine.high %v1019_v46, %v1019_v46  ;;  %v1028_v43 = vcombine.high %v1026_v56, %v1026_v56  ;;  %v1035_v44 = vrot.slane %v1019_v46, %v29572_v50 }
 0x12f   : > { %v1042_v45 = vrot.slane %v1026_v56, %v29572_v50  ;;  %1581 = vst.msk [vmem:[#allocation2 + $0x28] sm:$0xf] %vm442_vm1, %v1414_v38  ;;  %v29725_v47 = vrot.slane %v1642_v36, %v29572_v50  ;;  %v29729_v49 = vcombine.high %v29716_v17, %v29716_v17  ;;  %v29732_v51 = vrot.slane %v1666_v39, %v29572_v50  ;;  %v26909_v36 = vld.sshfl [vmem:[#allocation2 + $0xc] sm:$0x1 pattern:$0x75316420] }
 0x130   : > { %v1049_v53 = vrot.slane %v1027_v41, %v29572_v50  ;;  %v1056_v54 = vrot.slane %v1028_v43, %v29572_v50  ;;  %v1057_v55 = vcombine.high %v1035_v44, %v1035_v44  ;;  %v1140_v60 = vunpack.i.h.s16 %v1035_v44 }
 0x131   : > { %v1058_v59 = vcombine.high %v1042_v45, %v1042_v45  ;;  %v26733_v61 = vpack.i.b16 %v1035_v44, %v1138_v5  ;;  %v1658_v62 = vcombine.high %v29725_v47, %v29725_v47  ;;  %v1782_v63 = vunpack.i.h.s16 %v29693_v25  ;;  %v26908_v44 = vld.sshfl [vmem:[#allocation2 + $0x8] sm:$0x32 pattern:$0x75316420] }
 0x132   : > { %v1059_v2 = vcombine.high %v1049_v53, %v1049_v53  ;;  %v1060_v3 = vcombine.high %v1056_v54, %v1056_v54  ;;  %v1142_v4 = vunpack.i.h.s16 %v1049_v53  ;;  %v1144_v6 = vunpack.i.h.s16 %v1057_v55 }
 0x133   : > { %v26734_v7 = vpack.i.b16 %v1049_v53, %v1140_v60  ;;  %v1505_v8 = vcombine.low %v1042_v45, %v1058_v59  ;;  %v1784_v9 = vunpack.i.h.s16 %v29703_v35  ;;  %v1787_v10 = vunpack.i.h.s16 %v29716_v17 }
 0x134   : > { %v1146_v11 = vunpack.i.h.s16 %v1059_v2  ;;  %v26735_v12 = vpack.i.b16 %v1057_v55, %v1142_v4  ;;  %v26736_v14 = vpack.i.b16 %v1059_v2, %v1144_v6  ;;  %v1506_v15 = vcombine.low %v1056_v54, %v1060_v3  ;;  %v26910_v55 = vld.sshfl [vmem:[#allocation2 + $0x10] sm:$0x32 pattern:$0x75316420] }
 0x135   : > { %v1513_v5 = vrot.slane %v1505_v8, %v29579_v0  ;;  %v1791_v16 = vunpack.i.h.s16 %v29729_v49  ;;  %v1794_v19 = vunpack.i.h.s16 %v29719_v40  ;;  %v1836_v37 = vunpack.i.h.s16 %v29707_v48  ;;  %v26911_v2 = vld.sshfl [vmem:[#allocation2 + $0x14] sm:$0x1 pattern:$0x75316420] }
 0x136   : > { %v1467_v57 = vcombine.low %v26733_v61, %v26735_v12  ;;  %v1468_v20 = vcombine.low %v26734_v7, %v26736_v14  ;;  %v1497_v24 = vrot.slane %v1146_v11, %v29579_v0  ;;  %v1520_v27 = vrot.slane %v1506_v15, %v29579_v0  ;;  %v26912_v6 = vld.sshfl [vmem:[#allocation2 + $0x18] sm:$0x32 pattern:$0x75316420] }
 0x137   : > { %v26752_v29 = vpack.i.b16 %v29693_v25, %v1780_v52  ;;  %v26753_v30 = vpack.i.b16 %v29703_v35, %v1782_v63  ;;  %v26754_v13 = vpack.i.b16 %v29707_v48, %v1784_v9  ;;  %v1855_v31 = vpack.i.b16 %v1787_v10, %v1836_v37 }
 0x138   : > { %v1475_v34 = vrot.slane %v1467_v57, %v29579_v0  ;;  %v1482_v58 = vrot.slane %v1468_v20, %v29579_v0  ;;  %v1504_v46 = vrot.slane %v1497_v24, %v29579_v0  ;;  %v1521_v56 = vcombine.low %v1513_v5, %v1520_v27 }
 0x139   : > { %v29755_v38 = vpack.i.b16 %v29732_v51, %v1794_v19  ;;  %v1877_v39 = vcombine.low %v26752_v29, %v26753_v30  ;;  %v1878_v41 = vcombine.low %v26754_v13, %v1855_v31  ;;  %v1879_v43 = vcombine.low %v29725_v47, %v29729_v49 }
 0x13a   : > { %v1483_v45 = vcombine.low %v1475_v34, %v1482_v58  ;;  %v1528_v52 = vrot.slane %v1521_v56, %v29579_v0  ;;  %v1591_v53 = vsel %vm29587_vm4, %v1504_v46, %v1590_v28  ;;  %v29763_v54 = vpack.i.b16 %v29725_v47, %v1787_v10  ;;  %v26740_v34 = vld.sshfl [vmem:[#allocation2 + $0x18] sm:$0x33 pattern:$0x75316420] }
 0x13b   : > { %1592 = vst [vmem:[#allocation2 + $0x3c] sm:$0x1] %v1591_v53  ;;  %v1880_v59 = vcombine.low %v1658_v62, %v29755_v38  ;;  %v1887_v60 = vrot.slane %v1877_v39, %v29572_v50  ;;  %v1894_v61 = vrot.slane %v1878_v41, %v29572_v50  ;;  %v1901_v63 = vrot.slane %v1879_v43, %v29572_v50 }
 0x13c   : > { %v1490_v3 = vrot.slane %v1483_v45, %v29579_v0  ;;  %1593 = vst.msk [vmem:[#allocation2 + $0x40] sm:$0xf] %vm442_vm1, %v1528_v52  ;;  %v29771_v4 = vpack.i.b16 %v1658_v62, %v1791_v16  ;;  %v4172_v7 = vcombine.high %v26908_v44, %v26908_v44  ;;  %v4179_v8 = vrot.slane %v26908_v44, %v29572_v50 }
 0x13d   : > { %v1908_v9 = vrot.slane %v1880_v59, %v29572_v50  ;;  %v1909_v10 = vcombine.low %v1887_v60, %v1894_v61  ;;  %v29776_v11 = vrot.slane %v26909_v36, %v29572_v50  ;;  %v4210_v12 = vcombine.high %v26910_v55, %v26910_v55  ;;  %v26741_v36 = vld.sshfl [vmem:[#allocation2 + $0x20] sm:$0x33 pattern:$0x75316420] }
 0x13e   : > { %1589 = vst.msk [vmem:[#allocation2 + $0x38] sm:$0xf] %vm442_vm1, %v1490_v3  ;;  %v29780_v14 = vrot.slane %v4172_v7, %v29572_v50  ;;  %v29782_v15 = vcombine.high %v4179_v8, %v4179_v8  ;;  %v29785_v62 = vrot.slane %v26910_v55, %v29572_v50  ;;  %v29788_v5 = vrot.slane %v26911_v2, %v29572_v50 }
 0x13f   : > { %v1910_v16 = vcombine.low %v1901_v63, %v1908_v9  ;;  %v1917_v19 = vrot.slane %v1909_v10, %v29572_v50  ;;  %v29792_v37 = vrot.slane %v4210_v12, %v29572_v50  ;;  %v4248_v57 = vcombine.high %v26912_v6, %v26912_v6 }
 0x140   : > { %34748 = vst [vmem:[#allocation10_spill] sm:$0xff] %v29785_v62  ;;  %34749 = vst [vmem:[#allocation11_spill] sm:$0xff] %v29788_v5  ;;  %v29796_v20 = vcombine.high %v29780_v14, %v29780_v14  ;;  %v4225_v24 = vcombine.high %v29785_v62, %v29785_v62  ;;  %v29801_v27 = vrot.slane %v26912_v6, %v29572_v50  ;;  %v1796_v12 = vunpack.i.h.s16 %v29732_v51 }
 0x141   : > { %34750 = vst [vmem:[#allocation12_spill] sm:$0xff] %v29792_v37  ;;  %v4514_v28 = vcombine.low %v29780_v14, %v29782_v15  ;;  %v1924_v29 = vrot.slane %v1910_v16, %v29572_v50  ;;  %v4226_v30 = vcombine.high %v29792_v37, %v29792_v37  ;;  %v29809_v13 = vrot.slane %v4248_v57, %v29572_v50 }
 0x142   : > { %34751 = vst [vmem:[#allocation13_spill] sm:$0xff] %v29801_v27  ;;  %v4439_v31 = vunpack.i.h.s16 %v29792_v37  ;;  %v4441_v58 = vunpack.i.h.s16 %v4225_v24  ;;  %v26930_v46 = vpack.i.b16 %v29792_v37, %v29776_v11  ;;  %v29817_v39 = vcombine.high %v29719_v40, %v29719_v40 }
 0x143   : > { %34752 = vst [vmem:[#allocation14_spill] sm:$0xff] %v29809_v13  ;;  %v4524_v56 = vrot.slane %v4514_v28, %v29572_v50  ;;  %v1925_v41 = vcombine.low %v1917_v19, %v1924_v29  ;;  %v4443_v43 = vunpack.i.h.s16 %v4226_v30  ;;  %v26942_v45 = vcombine.high %v29801_v27, %v29809_v13  ;;  %v29851_v29 = vpop.f32.mrf.mxu0  ;;  %v26917_v27 = vld.sshfl [vmem:[#allocation2 + $0x2c] sm:$0x1 pattern:$0x75316420] }
 0x144   : > { %v26931_v44 = vpack.i.b16 %v4225_v24, %v4439_v31  ;;  %v26932_v52 = vpack.i.b16 %v4226_v30, %v4441_v58  ;;  %v4515_v53 = vcombine.low %v29796_v20, %v26930_v46  ;;  %v1682_v55 = vcombine.high %v29732_v51, %v29732_v51  ;;  %34753 = vst [vmem:[#allocation15_spill] sm:$0xff] %v29851_v29 }
 0x145   : > { %v1690_v59 = vcombine.high %v26740_v34, %v26740_v34  ;;  %28569 = vmatprep.mubr.msk.bf16.mxu1 %vm2062_vm5, %v1925_v41  ;;  %v26933_v60 = vpack.i.b16 %v29788_v5, %v4443_v43  ;;  %v29827_v61 = vrot.slane %v26942_v45, %v29572_v50  ;;  %v29830_v63 = vrot.slane %v26740_v34, %v29572_v50  ;;  %v26913_v43 = vld.sshfl [vmem:[#allocation2 + $0x1c] sm:$0x1 pattern:$0x75316420] }
 0x146   : > { %v1714_v2 = vcombine.high %v26741_v36, %v26741_v36  ;;  %v4516_v3 = vcombine.low %v26931_v44, %v26932_v52  ;;  %v4531_v6 = vrot.slane %v4515_v53, %v29572_v50  ;;  %v29837_v8 = vrot.slane %v26741_v36, %v29572_v50  ;;  %v789_v44 = vpop.f32.mrf.mxu0 }
 0x147   : > { %v29834_v7 = vrot.slane %v1690_v59, %v29572_v50  ;;  %v4517_v9 = vcombine.low %v26933_v60, %v29809_v13  ;;  %v1798_v16 = vunpack.i.h.s16 %v29817_v39  ;;  %v1801_v28 = vunpack.i.h.s16 %v29830_v63  ;;  %v26914_v60 = vld.sshfl [vmem:[#allocation2 + $0x20] sm:$0x32 pattern:$0x75316420] }
 0x148   : > { %v29841_v10 = vrot.slane %v1714_v2, %v29572_v50  ;;  %v4538_v19 = vrot.slane %v4516_v3, %v29572_v50  ;;  %v4546_v57 = vcombine.low %v4524_v56, %v4531_v6  ;;  %v29848_v24 = vcombine.high %v29837_v8, %v29837_v8  ;;  %v26742_v44 = vld.sshfl [vmem:[#allocation2 + $0x28] sm:$0x33 pattern:$0x75316420] }
 0x149   : > { %v4545_v30 = vrot.slane %v4517_v9, %v29572_v50  ;;  %v1808_v31 = vunpack.i.h.s16 %v29837_v8  ;;  %v1838_v58 = vunpack.i.h.s16 %v1682_v55  ;;  %v29858_v36 = vpack.i.b16 %v29817_v39, %v1796_v12  ;;  %v26915_v12 = vld.sshfl [vmem:[#allocation2 + $0x24] sm:$0x1 pattern:$0x75316420] }
 0x14a   : > { %v1810_v34 = vunpack.i.h.s16 %v29841_v10  ;;  %v4554_v46 = vrot.slane %v4546_v57, %v29572_v50  ;;  %v29860_v56 = vpack.i.b16 %v1682_v55, %v1798_v16  ;;  %v26764_v41 = vcombine.high %v29830_v63, %v29834_v7  ;;  %v790_v16 = vpop.f32.mrf.mxu0 }
 0x14b   : > { %v4547_v45 = vcombine.low %v4538_v19, %v4545_v30  ;;  %v29864_v52 = vpack.i.b16 %v1801_v28, %v1838_v58  ;;  %v29867_v53 = vpack.i.b16 %v29841_v10, %v1808_v31  ;;  %v26777_v6 = vpack.i.b16 %v29830_v63, %v1682_v55  ;;  %v26916_v31 = vld.sshfl [vmem:[#allocation2 + $0x28] sm:$0x32 pattern:$0x75316420] }
 0x14c   : > { %v29870_v59 = vpack.i.b16 %v29848_v24, %v1810_v34  ;;  %v1926_v2 = vcombine.low %v29858_v36, %v29860_v56  ;;  %v1950_v3 = vrot.slane %v26764_v41, %v29572_v50  ;;  %v26778_v9 = vpack.i.b16 %v29834_v7, %v1801_v28  ;;  %v791_v16 = vpop.f32.mrf.mxu0 }
 0x14d   : > { %v4561_v19 = vrot.slane %v4547_v45, %v29572_v50  ;;  %v1927_v57 = vcombine.low %v29864_v52, %v29834_v7  ;;  %v29883_v34 = vrot.slane %v26913_v43, %v29572_v50  ;;  %v4286_v55 = vcombine.high %v26914_v60, %v26914_v60 }
 0x14e   : > { %v1929_v30 = vcombine.low %v29867_v53, %v29870_v59  ;;  %v1936_v58 = vrot.slane %v1926_v2, %v29572_v50  ;;  %v29886_v41 = vcombine.low %v26777_v6, %v26778_v9  ;;  %v4293_v28 = vrot.slane %v26914_v60, %v29572_v50 }
 0x14f   : > { %34754 = vst [vmem:[#allocation16_spill] sm:$0xff] %v29883_v34  ;;  %v4562_v45 = vcombine.low %v4554_v46, %v4561_v19  ;;  %v1943_v42 = vrot.slane %v1927_v57, %v29572_v50  ;;  %v29892_v23 = vrot.slane %v26915_v12, %v29572_v50  ;;  %v29895_v43 = vrot.slane %v4286_v55, %v29572_v50  ;;  %v26743_v55 = vld.sshfl [vmem:[#allocation2 + $0x30] sm:$0x33 pattern:$0x75316420] }
 0x150   : > { %v1957_v1 = vrot.slane %v1929_v30, %v29572_v50  ;;  %v29897_v22 = vcombine.high %v4293_v28, %v4293_v28  ;;  %v4324_v2 = vcombine.high %v26916_v31, %v26916_v31  ;;  %v4331_v6 = vrot.slane %v26916_v31, %v29572_v50 }
 0x151   : > { %34755 = vst [vmem:[#allocation17_spill] sm:$0xff] %v29892_v23  ;;  %34756 = vst [vmem:[#allocation18_spill] sm:$0xff] %v29895_v43  ;;  %28649 = vmatprep.mubr.msk.bf16.mxu0 %vm2062_vm5, %v4562_v45  ;;  %v1958_v60 = vcombine.low %v1936_v58, %v1943_v42  ;;  %v29903_v46 = vcombine.high %v29841_v10, %v29841_v10  ;;  %v1738_v19 = vcombine.high %v26742_v44, %v26742_v44 }
 0x152   : > { %34757 = vst [vmem:[#allocation19_spill] sm:$0xff] %v29897_v22  ;;  %v1959_v9 = vcombine.low %v1950_v3, %v1957_v1  ;;  %v29907_v12 = vcombine.high %v29895_v43, %v29895_v43  ;;  %v29910_v57 = vrot.slane %v4324_v2, %v29572_v50  ;;  %v29912_v30 = vcombine.high %v4331_v6, %v4331_v6 }
 0x153   : > { %v4453_v31 = vunpack.i.h.s16 %v29895_v43  ;;  %v1966_v42 = vrot.slane %v1958_v60, %v29572_v50  ;;  %v4455_v3 = vunpack.i.h.s16 %v29897_v22  ;;  %v26934_v58 = vpack.i.b16 %v29895_v43, %v29883_v34  ;;  %v29179_v60 = vld [vmem:[%s34683_s3 + $0x10] sm:$0xff]  }
 0x154   : > { %34758 = vst [vmem:[#allocation20_spill] sm:$0xff] %v29907_v12  ;;  %34759 = vst [vmem:[#allocation21_spill] sm:$0xff] %v29912_v30  ;;  %v1973_v1 = vrot.slane %v1959_v9, %v29572_v50  ;;  %v4457_v28 = vunpack.i.h.s16 %v29907_v12  ;;  %v4566_v45 = vcombine.low %v29910_v57, %v29912_v30  ;;  %v29925_v2 = vrot.slane %v26742_v44, %v29572_v50 }
 0x155   : > { %v26935_v16 = vpack.i.b16 %v29897_v22, %v4453_v31  ;;  %v26936_v9 = vpack.i.b16 %v29907_v12, %v4455_v3  ;;  %v29932_v21 = vrot.slane %v1738_v19, %v29572_v50  ;;  %v1762_v0 = vcombine.high %v26743_v55, %v26743_v55 }
 0x156   : > { %v1974_v6 = vcombine.low %v1966_v42, %v1973_v1  ;;  %v26937_v29 = vpack.i.b16 %v29892_v23, %v4457_v28  ;;  %v4594_v34 = vrot.slane %v4566_v45, %v29572_v50  ;;  %v29938_v44 = vcombine.high %v29925_v2, %v29925_v2 }
 0x157   : > { %v4564_v31 = vcombine.low %v26934_v58, %v26935_v16  ;;  %v29943_v42 = vcombine.high %v29932_v21, %v29932_v21  ;;  %v29946_v1 = vrot.slane %v26743_v55, %v29572_v50  ;;  %v29949_v19 = vrot.slane %v1762_v0, %v29572_v50 }
 0x158   : > { %28570 = vmatmul.mubr.msk.bf16.vlgmr.msra.gmra.mxu1 %vm2062_vm5, %v1974_v6  ;;  %v1812_v3 = vunpack.i.h.s16 %v29848_v24  ;;  %v4565_v58 = vcombine.low %v26936_v9, %v26937_v29  ;;  %v1840_v45 = vunpack.i.h.s16 %v29903_v46  ;;  %v29181_v29 = vld [vmem:[%s34683_s3 + $0x8] sm:$0xff]   ;;  %v34760_v12 = vunpack.i.h.s16 %v29925_v2 }
 0x159   : > { %28578 = vmatpush3.bf16.msra.mxu1 %v29556_v32  ;;  %v4580_v28 = vrot.slane %v4564_v31, %v29572_v50  ;;  %v29958_v6 = vcombine.high %v29946_v1, %v29946_v1  ;;  %v29962_v0 = vcombine.high %v29949_v19, %v29949_v19  ;;  %v1822_v55 = vunpack.i.h.s16 %v29946_v1 }
 0x15a   : > { %28579 = vmatprep.subr.bf16.mxu1 %v29179_v60  ;;  %v1824_v32 = vunpack.i.h.s16 %v29949_v19  ;;  %v4587_v9 = vrot.slane %v4565_v58, %v29572_v50  ;;  %v29972_v16 = vpack.i.b16 %v29903_v46, %v1812_v3  ;;  %v29976_v23 = vpack.i.b16 %v34760_v12, %v1840_v45 }
 0x15b   : > { %v4595_v31 = vcombine.low %v29827_v61, %v4580_v28  ;;  %v1826_v30 = vunpack.i.h.s16 %v29958_v6  ;;  %v29980_v43 = vpack.i.b16 %v29949_v19, %v1822_v55  ;;  %v1976_v58 = vcombine.low %v29932_v21, %v29938_v44 }
 0x15c   : > { %v29983_v22 = vpack.i.b16 %v29958_v6, %v1824_v32  ;;  %v4596_v61 = vcombine.low %v4587_v9, %v4594_v34  ;;  %v1975_v28 = vcombine.low %v29972_v16, %v29976_v23  ;;  %v34714_v12 = vunpack.i.h.s16 %v29962_v0  ;;  %v29183_v34 = vld [vmem:[%s34683_s3] sm:$0xff]  }
 0x15d   : > { %28580 = vmatpush3.bf16.msra.mxu1 %v29179_v60  ;;  %v4603_v3 = vrot.slane %v4595_v31, %v29572_v50  ;;  %v29992_v45 = vpack.i.b16 %v29962_v0, %v1826_v30  ;;  %v1977_v55 = vcombine.low %v29943_v42, %v29980_v43  ;;  %v1992_v32 = vrot.slane %v1976_v58, %v29572_v50 }
 0x15e   : > { %28581 = vmatprep.subr.bf16.mxu1 %v29181_v29  ;;  %v1789_v5 = vunpack.i.h.s16 %v29725_v47  ;;  %v4610_v60 = vrot.slane %v4596_v61, %v29572_v50  ;;  %v1985_v9 = vrot.slane %v1975_v28, %v29572_v50  ;;  %v30006_v30 = vrot.slane %v34714_v12, %v29572_v50 }
 0x15f   : > { %v26773_v31 = vpack.i.b16 %v29716_v17, %v29707_v48  ;;  %v1978_v58 = vcombine.low %v29983_v22, %v29992_v45  ;;  %v1999_v47 = vrot.slane %v1977_v55, %v29572_v50  ;;  %v2164_v61 = vcombine.low %v29685_v18, %v29693_v25  ;;  %v29182_v48 = vld [vmem:[%s34683_s3 + $0xf0] sm:$0xff]  }
 0x160   : > { %v26775_v13 = vpack.i.b16 %v29729_v49, %v1789_v5  ;;  %v4611_v28 = vcombine.low %v4603_v3, %v4610_v60  ;;  %v2007_v62 = vcombine.low %v1985_v9, %v1992_v32  ;;  %v2037_v12 = vrot.slane %v30006_v30, %v29572_v50  ;;  %v26918_v17 = vld.sshfl [vmem:[#allocation2 + $0x30] sm:$0x32 pattern:$0x75316420] }
 0x161   : > { %28582 = vmatpush3.bf16.msra.mxu1 %v29181_v29  ;;  %v2165_v37 = vcombine.low %v29703_v35, %v26773_v31  ;;  %v2006_v55 = vrot.slane %v1978_v58, %v29572_v50  ;;  %v2167_v18 = vcombine.low %v29771_v4, %v29719_v40  ;;  %v2174_v25 = vrot.slane %v2164_v61, %v29572_v50  ;;  %v26919_v5 = vld.sshfl [vmem:[#allocation2 + $0x34] sm:$0x1 pattern:$0x75316420]  ;;  %v30030_v35 = vld [vmem:[%s34683_s3 + $0x58] sm:$0xff]  }
 0x162   : > { %v2166_v49 = vcombine.low %v29763_v54, %v26775_v13  ;;  %28583 = vmatprep.subr.bf16.mxu1 %v29183_v34  ;;  %28650 = vmatmul.mubr.msk.bf16.vlgmr.msra.gmra.mxu0 %vm2062_vm5, %v4611_v28  ;;  %v2015_v29 = vrot.slane %v2007_v62, %v29572_v50  ;;  %v26920_v32 = vld.sshfl [vmem:[#allocation2 + $0x38] sm:$0x32 pattern:$0x75316420]  ;;  %v30037_v54 = vcombine.high %v29910_v57, %v29910_v57 }
 0x163   : > { %v2181_v3 = vrot.slane %v2165_v37, %v29572_v50  ;;  %v30040_v40 = vrot.slane %v26917_v27, %v29572_v50  ;;  %28674 = vmatpush3.bf16.msra.mxu0 %v29562_v33  ;;  %v2008_v4 = vcombine.low %v1999_v47, %v2006_v55  ;;  %v2195_v60 = vrot.slane %v2167_v18, %v29572_v50  ;;  %v26921_v30 = vld.sshfl [vmem:[#allocation2 + $0x3c] sm:$0x1 pattern:$0x75316420]  ;;  %v29184_v33 = vld [vmem:[%s34683_s3 + $0xe8] sm:$0xff]  }
 0x164   : > { %v2188_v13 = vrot.slane %v2166_v49, %v29572_v50  ;;  %v4362_v9 = vcombine.high %v26918_v17, %v26918_v17  ;;  %28675 = vmatprep.subr.bf16.mxu0 %v29182_v48  ;;  %v30046_v37 = vrot.slane %v26918_v17, %v29572_v50  ;;  %v30049_v31 = vrot.slane %v26919_v5, %v29572_v50 }
 0x165   : > { %v2196_v62 = vcombine.low %v2174_v25, %v2181_v3  ;;  %28584 = vmatpush3.bf16.msra.mxu1 %v29183_v34  ;;  %v1803_v27 = vunpack.i.h.s16 %v29834_v7  ;;  %v2022_v58 = vrot.slane %v2008_v4, %v29572_v50  ;;  %v4400_v28 = vcombine.high %v26920_v32, %v26920_v32 }
 0x166   : > { %34761 = vst [vmem:[#allocation22_spill] sm:$0xff] %v30046_v37  ;;  %v2197_v47 = vcombine.low %v2188_v13, %v2195_v60  ;;  %v30057_v61 = vrot.slane %v4362_v9, %v29572_v50  ;;  %28593 = vmatprep.subr.bf16.mxu1 %v30030_v35  ;;  %v4377_v17 = vcombine.high %v30046_v37, %v30046_v37 }
 0x167   : > { %v2204_v34 = vrot.slane %v2196_v62, %v29572_v50  ;;  %v4407_v55 = vrot.slane %v26920_v32, %v29572_v50  ;;  %v4430_v49 = vrot.slane %v26921_v30, %v29572_v50  ;;  %v2023_v18 = vcombine.low %v2015_v29, %v2022_v58  ;;  %28676 = vmatpush3.bf16.msra.mxu0 %v29182_v48  ;;  %v29186_v29 = vld [vmem:[%s34683_s3 + $0xe0] sm:$0xff]  }
 0x168   : > { %v2211_v25 = vrot.slane %v2197_v47, %v29572_v50  ;;  %v4378_v5 = vcombine.high %v30057_v61, %v30057_v61  ;;  %v4414_v3 = vrot.slane %v4400_v28, %v29572_v50  ;;  %v4467_v4 = vunpack.i.h.s16 %v30057_v61  ;;  %28677 = vmatprep.subr.bf16.mxu0 %v29184_v33 }
 0x169   : > { %v4469_v13 = vunpack.i.h.s16 %v4377_v17  ;;  %v26938_v60 = vpack.i.b16 %v30057_v61, %v30040_v40  ;;  %v4479_v9 = vunpack.i.l.s16 %v4430_v49  ;;  %28573 = vmatprep.mubr.msk.bf16.mxu1 %vm2062_vm5, %v2023_v18  ;;  %v5376_v62 = vcombine.high %v29830_v63, %v29830_v63 }
 0x16a   : > { %v2212_v48 = vcombine.low %v2204_v34, %v2211_v25  ;;  %v4471_v32 = vunpack.i.h.s16 %v4378_v5  ;;  %v26943_v30 = vcombine.high %v4407_v55, %v4414_v3  ;;  %28574 = vmatmul.mubr.msk.bf16.gmra.mxu1 %vm2062_vm5, %v2037_v12  ;;  %v26939_v58 = vpack.i.b16 %v4377_v17, %v4467_v4 }
 0x16b   : > { %v26940_v47 = vpack.i.b16 %v4378_v5, %v4469_v13  ;;  %v4612_v28 = vcombine.low %v30037_v54, %v26938_v60  ;;  %v4667_v49 = vrot.slane %v4479_v9, %v29572_v50  ;;  %28678 = vmatpush3.bf16.msra.mxu0 %v29184_v33  ;;  %v5377_v34 = vcombine.high %v29834_v7, %v29834_v7 }
 0x16c   : > { %28585 = vmatprep.mubr.msk.bf16.mxu1 %vm2062_vm5, %v2212_v48  ;;  %v26941_v37 = vpack.i.b16 %v30049_v31, %v4471_v32  ;;  %v4643_v18 = vrot.slane %v26943_v30, %v29572_v50  ;;  %v1817_v63 = vunpack.i.h.s16 %v29932_v21  ;;  %v5581_v25 = vcombine.low %v29755_v38, %v29858_v36  ;;  %28679 = vmatprep.subr.bf16.mxu0 %v29186_v29 }
 0x16d   : > { %v4613_v55 = vcombine.low %v26939_v58, %v26940_v47  ;;  %v4622_v12 = vrot.slane %v4612_v28, %v29572_v50  ;;  %v4674_v17 = vrot.slane %v4667_v49, %v29572_v50  ;;  %v5582_v4 = vcombine.low %v29860_v56, %v29864_v52 }
 0x16e   : > { %v4614_v5 = vcombine.low %v26941_v37, %v4414_v3  ;;  %v5583_v33 = vcombine.low %v29834_v7, %v5376_v62  ;;  %v5584_v13 = vcombine.low %v5377_v34, %v29867_v53  ;;  %v5591_v9 = vrot.slane %v5581_v25, %v29572_v50 }
 0x16f   : > { %v4629_v60 = vrot.slane %v4613_v55, %v29572_v50  ;;  %v5598_v32 = vrot.slane %v5582_v4, %v29572_v50  ;;  %28680 = vmatpush3.bf16.msra.mxu0 %v29186_v29  ;;  %v1805_v37 = vunpack.i.h.s16 %v5376_v62  ;;  %v26779_v56 = vpack.i.b16 %v5376_v62, %v1803_v27 }
 0x170   : > { %v4636_v48 = vrot.slane %v4614_v5, %v29572_v50  ;;  %v5605_v30 = vrot.slane %v5583_v33, %v29572_v50  ;;  %v5612_v38 = vrot.slane %v5584_v13, %v29572_v50  ;;  %v2213_v7 = vcombine.low %v29732_v51, %v29817_v39 }
 0x171   : > { %v4644_v36 = vcombine.low %v4622_v12, %v4629_v60  ;;  %v34762_v52 = vmov 0   ;;  %v5613_v3 = vcombine.low %v5591_v9, %v5598_v32  ;;  %v2216_v47 = vcombine.low %v29837_v8, %v29841_v10 }
 0x172   : > { %6611 = vmatprep.subr.bf16.mxu0 %v34762_v52  ;;  %v4645_v53 = vcombine.low %v4636_v48, %v4643_v18  ;;  %v5614_v58 = vcombine.low %v5605_v30, %v5612_v38  ;;  %v26780_v49 = vpack.i.b16 %v5377_v34, %v1805_v37  ;;  %v2223_v55 = vrot.slane %v2213_v7, %v29572_v50  ;;  %v26992_v38 = vld.sshfl [vmem:[#allocation2 + $0x38] sm:$0x33 pattern:$0x75316420] }
 0x173   : > { %v4652_v28 = vrot.slane %v4644_v36, %v29572_v50  ;;  %v2230_v29 = vrot.slane %v29886_v41, %v29572_v50  ;;  %v5621_v51 = vrot.slane %v5613_v3, %v29572_v50  ;;  %v2244_v62 = vrot.slane %v2216_v47, %v29572_v50 }
 0x174   : > { %v4659_v27 = vrot.slane %v4645_v53, %v29572_v50  ;;  %v5628_v39 = vrot.slane %v5614_v58, %v29572_v50  ;;  %v2215_v18 = vcombine.low %v26779_v56, %v26780_v49  ;;  %v1819_v8 = vunpack.i.h.s16 %v29938_v44 }
 0x175   : > { %v2245_v12 = vcombine.low %v2223_v55, %v2230_v29  ;;  %v26781_v10 = vpack.i.b16 %v29925_v2, %v29903_v46  ;;  %v34763_v5 = vunpack.i.h.s16 %v29925_v2  ;;  %v26783_v4 = vpack.i.b16 %v29938_v44, %v1817_v63 }
 0x176   : > { %v4660_v34 = vcombine.low %v4652_v28, %v4659_v27  ;;  %v5629_v25 = vcombine.low %v5621_v51, %v5628_v39  ;;  %v2237_v33 = vrot.slane %v2215_v18, %v29572_v50  ;;  %v26784_v60 = vpack.i.b16 %v29943_v42, %v1819_v8 }
 0x177   : > { %v26782_v41 = vpack.i.b16 %v29932_v21, %v34763_v5  ;;  %v2253_v13 = vrot.slane %v2245_v12, %v29572_v50  ;;  %v2262_v9 = vcombine.low %v29848_v24, %v26781_v10  ;;  %v2265_v46 = vcombine.low %v29949_v19, %v29958_v6  ;;  %v26993_v6 = vld.sshfl [vmem:[#allocation2 + $0x40] sm:$0x33 pattern:$0x75316420] }
 0x178   : > { %28653 = vmatprep.mubr.msk.bf16.mxu0 %vm2062_vm5, %v4660_v34  ;;  %v5630_v32 = vcombine.low %v29870_v59, %v29972_v16  ;;  %v5631_v44 = vcombine.low %v29976_v23, %v29932_v21  ;;  %v2246_v63 = vcombine.low %v2237_v33, %v2244_v62  ;;  %v2264_v30 = vcombine.low %v26784_v60, %v29946_v1  ;;  %v26793_v10 = vld.sshfl [vmem:[#allocation2] sm:$0x32 pattern:$0x75316420] }
 0x179   : > { %v2263_v48 = vcombine.low %v26782_v41, %v26783_v4  ;;  %28654 = vmatmul.mubr.msk.bf16.gmra.mxu0 %vm2062_vm5, %v4674_v17  ;;  %v2272_v42 = vrot.slane %v2262_v9, %v29572_v50  ;;  %v27014_v24 = vcombine.high %v29925_v2, %v29932_v21  ;;  %v2293_v59 = vrot.slane %v2265_v46, %v29572_v50  ;;  %v29189_v4 = vld [vmem:[%s34683_s3 + $0x48] sm:$0xff]  }
 0x17a   : > { %28681 = vmatprep.mubr.msk.bf16.mxu0 %vm2062_vm5, %v5629_v25  ;;  %v5633_v23 = vcombine.low %v29980_v43, %v29983_v22  ;;  %v5640_v16 = vrot.slane %v5630_v32, %v29572_v50  ;;  %v2260_v1 = vrot.slane %v2246_v63, %v29572_v50  ;;  %v2286_v17 = vrot.slane %v2264_v30, %v29572_v50  ;;  %v29187_v43 = vld [vmem:[%s34683_s3 + $0x50] sm:$0xff]   ;;  %v29188_v25 = vld [vmem:[%s34685_s5 + $0x38] sm:$0xff]  }
 0x17b   : > { %v2279_v19 = vrot.slane %v2263_v48, %v29572_v50  ;;  %v5647_v36 = vrot.slane %v5631_v44, %v29572_v50  ;;  %v5654_v21 = vrot.slane %v27014_v24, %v29572_v50  ;;  %v5457_v56 = vcombine.high %v26992_v38, %v26992_v38 }
 0x17c   : > { %v5661_v37 = vrot.slane %v5633_v23, %v29572_v50  ;;  %v30149_v7 = vrot.slane %v26992_v38, %v29572_v50  ;;  %v2261_v53 = vcombine.low %v2253_v13, %v2260_v1  ;;  %v2295_v22 = vcombine.low %v2286_v17, %v2293_v59  ;;  %v29190_v17 = vld [vmem:[%s34685_s5 + $0x30] sm:$0xff]  }
 0x17d   : > { %v2294_v2 = vcombine.low %v2272_v42, %v2279_v19  ;;  %v5662_v3 = vcombine.low %v5640_v16, %v5647_v36  ;;  %v5481_v58 = vcombine.high %v26993_v6, %v26993_v6  ;;  %v30156_v49 = vrot.slane %v5457_v56, %v29572_v50  ;;  %v29191_v36 = vld [vmem:[%s34683_s3 + $0x40] sm:$0xff]  }
 0x17e   : > { %v5663_v28 = vcombine.low %v5654_v21, %v5661_v37  ;;  %v30160_v55 = vcombine.high %v30149_v7, %v30149_v7  ;;  %28586 = vmatmul.mubr.msk.bf16.vlgmr.msra.gmra.mxu1 %vm2062_vm5, %v2261_v53  ;;  %v2309_v29 = vrot.slane %v2295_v22, %v29572_v50  ;;  %v5488_v51 = vrot.slane %v26993_v6, %v29572_v50 }
 0x17f   : > { %v2302_v47 = vrot.slane %v2294_v2, %v29572_v50  ;;  %v5670_v27 = vrot.slane %v5662_v3, %v29572_v50  ;;  %v5495_v39 = vrot.slane %v5481_v58, %v29572_v50  ;;  %28594 = vmatpush3.bf16.msra.mxu1 %v30030_v35  ;;  %v30171_v18 = vcombine.high %v30156_v49, %v30156_v49 }
 0x180   : > { %v5677_v62 = vrot.slane %v5663_v28, %v29572_v50  ;;  %v5533_v12 = vunpack.i.h.s16 %v30149_v7  ;;  %v5680_v8 = vcombine.low %v30156_v49, %v30160_v55  ;;  %28595 = vmatprep.subr.bf16.mxu1 %v29187_v43  ;;  %v5496_v5 = vcombine.high %v5488_v51, %v5488_v51 }
 0x181   : > { %v2310_v34 = vcombine.low %v2302_v47, %v2309_v29  ;;  %v5497_v35 = vcombine.high %v5495_v39, %v5495_v39  ;;  %v5540_v41 = vunpack.i.h.s16 %v5488_v51  ;;  %v5542_v13 = vunpack.i.h.s16 %v5495_v39  ;;  %v34767_v51 = vld [vmem:[#allocation10_spill] sm:$0xff] }
 0x182   : > { %v5678_v33 = vcombine.low %v5670_v27, %v5677_v62  ;;  %v34764_v60 = vunpack.i.h.s16 %v29962_v0  ;;  %v30187_v48 = vrot.slane %v5680_v8, %v29572_v50  ;;  %v5544_v46 = vunpack.i.h.s16 %v5496_v5  ;;  %v34766_v27 = vld [vmem:[#allocation12_spill] sm:$0xff] }
 0x183   : > { %28589 = vmatprep.mubr.msk.bf16.mxu1 %vm2062_vm5, %v2310_v34  ;;  %v27011_v32 = vpack.i.b16 %v5495_v39, %v5540_v41  ;;  %v1827_v44 = vunpack.i.l.s16 %v29962_v0  ;;  %v2460_v63 = vcombine.high %v26793_v10, %v26793_v10  ;;  %28596 = vmatpush3.bf16.msra.mxu1 %v29187_v43  ;;  %v27012_v30 = vpack.i.b16 %v5496_v5, %v5542_v13 }
 0x184   : > { %v5573_v9 = vpack.i.b16 %v5533_v12, %v34764_v60  ;;  %28682 = vmatmul.mubr.msk.bf16.vlgmr.msra.gmra.mxu0 %vm2062_vm5, %v5678_v33  ;;  %v2467_v24 = vrot.slane %v26793_v10, %v29572_v50  ;;  %v2727_v38 = vunpack.i.h.s16 %v29780_v14  ;;  %v27013_v19 = vpack.i.b16 %v5497_v35, %v5544_v46  ;;  %28597 = vmatprep.subr.bf16.mxu1 %v29189_v4 }
 0x185   : > { %6612 = vmatpush1.bf16.msra.mxu0 %v29188_v25  ;;  %v5681_v59 = vcombine.low %v30171_v18, %v27011_v32  ;;  %v2317_v23 = vrot.slane %v1827_v44, %v29572_v50  ;;  %v2729_v0 = vunpack.i.h.s16 %v29782_v15  ;;  %v2474_v6 = vrot.slane %v2460_v63, %v29572_v50 }
 0x186   : > { %v5679_v42 = vcombine.low %v29992_v45, %v5573_v9  ;;  %v2475_v1 = vcombine.high %v2467_v24, %v2467_v24  ;;  %v2731_v45 = vunpack.i.h.s16 %v29796_v20  ;;  %6613 = vmatprep.subr.bf16.mxu0 %v34762_v52  ;;  %v5682_v21 = vcombine.low %v27012_v30, %v27013_v19  ;;  %v34769_v9 = vld [vmem:[#allocation14_spill] sm:$0xff] }
 0x187   : > { %v5703_v2 = vrot.slane %v5681_v59, %v29572_v50  ;;  %v2324_v37 = vrot.slane %v2317_v23, %v29572_v50  ;;  %v34765_v56 = vrot.slane %v29619_v26, %v29572_v50  ;;  %28598 = vmatpush3.bf16.msra.mxu1 %v29189_v4  ;;  %v2476_v43 = vcombine.high %v2474_v6, %v2474_v6  ;;  %v34768_v4 = vld [vmem:[#allocation13_spill] sm:$0xff] }
 0x188   : > { %v5689_v16 = vrot.slane %v5679_v42, %v29572_v50  ;;  %v26816_v3 = vpack.i.b16 %v29782_v15, %v2727_v38  ;;  %v26817_v58 = vpack.i.b16 %v29796_v20, %v2729_v0  ;;  %v5710_v47 = vrot.slane %v5682_v21, %v29572_v50  ;;  %28599 = vmatprep.subr.bf16.mxu1 %v29191_v36  ;;  %v34770_v42 = vld [vmem:[#allocation11_spill] sm:$0xff]  ;;  %v29194_v0 = vld [vmem:[%s34685_s5 + $0x20] sm:$0xff]  }
 0x189   : > { %v26815_v53 = vpack.i.b16 %v29780_v14, %v34765_v56  ;;  %28590 = vmatmul.mubr.msk.bf16.gmra.mxu1 %vm2062_vm5, %v2324_v37  ;;  %v26818_v28 = vpack.i.b16 %v29776_v11, %v2731_v45  ;;  %v2802_v29 = vcombine.low %v2474_v6, %v2475_v1  ;;  %v26827_v26 = vcombine.high %v34767_v51, %v34766_v27  ;;  %v30225_v14 = vld [vmem:[%s34683_s3 + $0x78] sm:$0xff]   ;;  %v29192_v11 = vld [vmem:[%s34685_s5 + $0x28] sm:$0xff]   ;;  %v34772_v45 = vld [vmem:[#allocation18_spill] sm:$0xff] }
 0x18a   : > { %v5711_v22 = vcombine.low %v5689_v16, %v30187_v48  ;;  %v2804_v62 = vcombine.low %v26816_v3, %v26817_v58  ;;  %6614 = vmatpush1.bf16.msra.mxu0 %v29190_v17  ;;  %v5546_v20 = vunpack.i.h.s16 %v5497_v35  ;;  %v5712_v8 = vcombine.low %v5703_v2, %v5710_v47  ;;  %v34771_v1 = vld [vmem:[#allocation19_spill] sm:$0xff]  ;;  %v34773_v2 = vld [vmem:[#allocation16_spill] sm:$0xff]  ;;  %v34775_v58 = vld [vmem:[#allocation17_spill] sm:$0xff] }
 0x18b   : > { %v2803_v15 = vcombine.low %v2476_v43, %v26815_v53  ;;  %v2805_v10 = vcombine.low %v26818_v28, %v34766_v27  ;;  %v2812_v34 = vrot.slane %v2802_v29, %v29572_v50  ;;  %v2861_v25 = vrot.slane %v26827_v26, %v29572_v50  ;;  %6615 = vmatprep.subr.bf16.mxu0 %v34762_v52  ;;  %v34774_v53 = vld [vmem:[#allocation21_spill] sm:$0xff] }
 0x18c   : > { %v5719_v39 = vrot.slane %v5711_v22, %v29572_v50  ;;  %v2826_v41 = vrot.slane %v2804_v62, %v29572_v50  ;;  %28600 = vmatpush3.bf16.msra.mxu1 %v29191_v36  ;;  %v5734_v35 = vrot.slane %v5546_v20, %v29572_v50  ;;  %v2589_v33 = vcombine.high %v34768_v4, %v34768_v4  ;;  %v26837_v29 = vld.sshfl [vmem:[#allocation2 + $0x8] sm:$0x33 pattern:$0x75316420]  ;;  %v34776_v20 = vld [vmem:[#allocation20_spill] sm:$0xff] }
 0x18d   : > { %v2819_v5 = vrot.slane %v2803_v15, %v29572_v50  ;;  %v5726_v13 = vrot.slane %v5712_v8, %v29572_v50  ;;  %v2833_v60 = vrot.slane %v2805_v10, %v29572_v50  ;;  %v2590_v46 = vcombine.high %v34769_v9, %v34769_v9  ;;  %28609 = vmatprep.subr.bf16.mxu1 %v30225_v14  ;;  %v29196_v15 = vld [vmem:[%s34685_s5 + $0x18] sm:$0xff]  }
 0x18e   : > { %v2741_v32 = vunpack.i.h.s16 %v34769_v9  ;;  %v5741_v63 = vrot.slane %v5734_v35, %v29572_v50  ;;  %6616 = vmatpush1.bf16.msra.mxu0 %v29192_v11  ;;  %v2743_v30 = vunpack.i.h.s16 %v2589_v33  ;;  %v26819_v24 = vpack.i.b16 %v34769_v9, %v34770_v42  ;;  %v26838_v35 = vld.sshfl [vmem:[#allocation2 + $0x10] sm:$0x33 pattern:$0x75316420] }
 0x18f   : > { %v2834_v44 = vcombine.low %v2812_v34, %v2819_v5  ;;  %v5727_v38 = vcombine.low %v5719_v39, %v5726_v13  ;;  %v2835_v19 = vcombine.low %v2826_v41, %v2833_v60  ;;  %v2745_v59 = vunpack.i.h.s16 %v2590_v46  ;;  %6617 = vmatprep.subr.bf16.mxu0 %v34762_v52  ;;  %v29308_v34 = vld [vmem:[%s29428_s19 + $0x4] ss:$8 sps:$4 sm:$0xff]  }
 0x190   : > { %v26820_v23 = vpack.i.b16 %v2589_v33, %v2741_v32  ;;  %v26821_v6 = vpack.i.b16 %v2590_v46, %v2743_v30  ;;  %v2854_v17 = vcombine.low %v34772_v45, %v34771_v1  ;;  %v2755_v36 = vunpack.i.h.s16 %v29910_v57  ;;  %v26839_v32 = vld.sshfl [vmem:[#allocation2 + $0x18] sm:$0x33 pattern:$0x75316420] }
 0x191   : > { %v2842_v16 = vrot.slane %v2834_v44, %v29572_v50  ;;  %28685 = vmatprep.mubr.msk.bf16.mxu0 %vm2062_vm5, %v5727_v38  ;;  %v2849_v21 = vrot.slane %v2835_v19, %v29572_v50  ;;  %v26822_v37 = vpack.i.b16 %v34773_v2, %v2745_v59  ;;  %v2757_v22 = vunpack.i.h.s16 %v34774_v53  ;;  %v26840_v19 = vld.sshfl [vmem:[#allocation2 + $0x20] sm:$0x33 pattern:$0x75316420] }
 0x192   : > { %v2852_v56 = vcombine.low %v26819_v24, %v26820_v23  ;;  %28686 = vmatmul.mubr.msk.bf16.gmra.mxu0 %vm2062_vm5, %v5741_v63  ;;  %v2882_v43 = vrot.slane %v2854_v17, %v29572_v50  ;;  %v2759_v3 = vunpack.i.h.s16 %v30037_v54  ;;  %v26823_v47 = vpack.i.b16 %v29910_v57, %v34775_v58  ;;  %v34777_v57 = vld [vmem:[#allocation22_spill] sm:$0xff] }
 0x193   : > { %v26824_v28 = vpack.i.b16 %v34774_v53, %v2755_v36  ;;  %v2850_v27 = vcombine.low %v2842_v16, %v2849_v21  ;;  %v2853_v51 = vcombine.low %v26821_v6, %v26822_v37  ;;  %v26825_v39 = vpack.i.b16 %v30037_v54, %v2757_v22  ;;  %6618 = vmatpush1.bf16.msra.mxu0 %v29194_v0  ;;  %v29195_v36 = vld [vmem:[%s34683_s3 + $0x70] sm:$0xff]  }
 0x194   : > { %v2868_v26 = vrot.slane %v2852_v56, %v29572_v50  ;;  %v26826_v62 = vpack.i.b16 %v30040_v40, %v2759_v3  ;;  %v2900_v11 = vcombine.low %v34776_v20, %v26823_v47  ;;  %v26828_v8 = vcombine.high %v34777_v57, %v30057_v61  ;;  %6619 = vmatprep.subr.bf16.mxu0 %v34762_v52 }
 0x195   : > { %v2767_v10 = vunpack.i.l.s16 %v30049_v31  ;;  %27079 = vmatprep.mubr.msk.bf16.mxu0 %vm694_vm0, %v29308_v34  ;;  %28601 = vmatprep.mubr.msk.bf16.mxu1 %vm2062_vm5, %v2850_v27  ;;  %v2875_v54 = vrot.slane %v2853_v51, %v29572_v50  ;;  %v2901_v41 = vcombine.low %v26824_v28, %v26825_v39  ;;  %v3092_v40 = vcombine.high %v26837_v29, %v26837_v29  ;;  %v29197_v39 = vld [vmem:[%s34683_s3 + $0x68] sm:$0xff]  }
 0x196   : > { %v2883_v5 = vcombine.low %v2861_v25, %v2868_v26  ;;  %v2902_v4 = vcombine.low %v26826_v62, %v30057_v61  ;;  %v2910_v33 = vrot.slane %v2900_v11, %v29572_v50  ;;  %v2931_v13 = vrot.slane %v26828_v8, %v29572_v50  ;;  %v29198_v61 = vld [vmem:[%s34685_s5 + $0x10] sm:$0xff]   ;;  %v26841_v11 = vld.sshfl [vmem:[#allocation2 + $0x28] sm:$0x33 pattern:$0x75316420] }
 0x197   : > { %v30286_v60 = vrot.slane %v2767_v10, %v29572_v50  ;;  %v2884_v31 = vcombine.low %v2875_v54, %v2882_v43  ;;  %v2917_v46 = vrot.slane %v2901_v41, %v29572_v50  ;;  %6620 = vmatpush1.bf16.msra.mxu0 %v29196_v15  ;;  %v30291_v25 = vrot.slane %v26837_v29, %v29572_v50  ;;  %v29200_v43 = vld [vmem:[%s34685_s5 + $0x8] sm:$0xff]   ;;  %v29202_v54 = vld [vmem:[%s34685_s5] sm:$0xff]  }
 0x198   : > { %v2891_v9 = vrot.slane %v2883_v5, %v29572_v50  ;;  %v2924_v44 = vrot.slane %v2902_v4, %v29572_v50  ;;  %v30300_v30 = vrot.slane %v3092_v40, %v29572_v50  ;;  %v3116_v42 = vcombine.high %v26838_v35, %v26838_v35  ;;  %6621 = vmatprep.subr.bf16.mxu0 %v34762_v52 }
 0x199   : > { %v2962_v63 = vrot.slane %v30286_v60, %v29572_v50  ;;  %v2898_v24 = vrot.slane %v2884_v31, %v29572_v50  ;;  %v2932_v38 = vcombine.low %v2910_v33, %v2917_v46  ;;  %v30306_v59 = vcombine.high %v30291_v25, %v30291_v25  ;;  %v29199_v46 = vld [vmem:[%s34683_s3 + $0x60] sm:$0xff]  }
 0x19a   : > { %v30309_v23 = vrot.slane %v26838_v35, %v29572_v50  ;;  %v2933_v0 = vcombine.low %v2924_v44, %v2931_v13  ;;  %v30313_v16 = vcombine.high %v30300_v30, %v30300_v30  ;;  %v30316_v6 = vrot.slane %v3116_v42, %v29572_v50 }
 0x19b   : > { %v3140_v1 = vcombine.high %v26839_v32, %v26839_v32  ;;  %v2899_v45 = vcombine.low %v2891_v9, %v2898_v24  ;;  %v2940_v17 = vrot.slane %v2932_v38, %v29572_v50  ;;  %v30327_v2 = vrot.slane %v26839_v32, %v29572_v50  ;;  %6622 = vmatpush1.bf16.msra.mxu0 %v29198_v61 }
 0x19c   : > { %v30324_v21 = vcombine.high %v30309_v23, %v30309_v23  ;;  %v2947_v37 = vrot.slane %v2933_v0, %v29572_v50  ;;  %v30332_v56 = vcombine.high %v30316_v6, %v30316_v6  ;;  %v3164_v22 = vcombine.high %v26840_v19, %v26840_v19  ;;  %6623 = vmatprep.subr.bf16.mxu0 %v34762_v52  ;;  %v26842_v0 = vld.sshfl [vmem:[#allocation2 + $0x30] sm:$0x33 pattern:$0x75316420] }
 0x19d   : > { %v30335_v53 = vrot.slane %v3140_v1, %v29572_v50  ;;  %28602 = vmatmul.mubr.msk.bf16.vlgmr.msra.gmra.mxu1 %vm2062_vm5, %v2899_v45  ;;  %v30344_v3 = vcombine.high %v30327_v2, %v30327_v2  ;;  %v30347_v58 = vrot.slane %v26840_v19, %v29572_v50  ;;  %v3261_v47 = vunpack.i.h.s16 %v30309_v23 }
 0x19e   : > { %v3263_v28 = vunpack.i.h.s16 %v30316_v6  ;;  %v2948_v29 = vcombine.low %v2940_v17, %v2947_v37  ;;  %28610 = vmatpush3.bf16.msra.mxu1 %v30225_v14  ;;  %v3265_v51 = vunpack.i.h.s16 %v30324_v21  ;;  %v26852_v26 = vpack.i.b16 %v30309_v23, %v30313_v16  ;;  %v29204_v37 = vld [vmem:[%s34685_s5 + $0x48] sm:$0xff]  }
 0x19f   : > { %v30354_v27 = vcombine.high %v30335_v53, %v30335_v53  ;;  %28611 = vmatprep.subr.bf16.mxu1 %v29195_v36  ;;  %v26853_v15 = vpack.i.b16 %v30316_v6, %v3261_v47  ;;  %v3336_v62 = vcombine.low %v30291_v25, %v30300_v30  ;;  %v3385_v20 = vcombine.low %v30335_v53, %v30344_v3 }
 0x1a0   : > { %v26854_v14 = vpack.i.b16 %v30324_v21, %v3263_v28  ;;  %28605 = vmatprep.mubr.msk.bf16.mxu1 %vm2062_vm5, %v2948_v29  ;;  %v26855_v57 = vpack.i.b16 %v30332_v56, %v3265_v51  ;;  %v3337_v10 = vcombine.low %v30306_v59, %v26852_v26  ;;  %6624 = vmatpush1.bf16.msra.mxu0 %v29200_v43  ;;  %v3275_v34 = vunpack.i.h.s16 %v30347_v58  ;;  %v29201_v29 = vld [vmem:[%s34683_s3 + $0x98] sm:$0xff]  }
 0x1a1   : > { %v26856_v8 = vpack.i.b16 %v30347_v58, %v30354_v27  ;;  %v3346_v41 = vrot.slane %v3336_v62, %v29572_v50  ;;  %v30381_v35 = vrot.slane %v3164_v22, %v29572_v50  ;;  %v30385_v40 = vcombine.high %v30347_v58, %v30347_v58  ;;  %6625 = vmatprep.subr.bf16.mxu0 %v34762_v52 }
 0x1a2   : > { %v3338_v5 = vcombine.low %v26853_v15, %v26854_v14  ;;  %28612 = vmatpush3.bf16.msra.mxu1 %v29195_v36  ;;  %v3339_v4 = vcombine.low %v26855_v57, %v30327_v2  ;;  %v3353_v33 = vrot.slane %v3337_v10, %v29572_v50  ;;  %v3188_v13 = vcombine.high %v26841_v11, %v26841_v11 }
 0x1a3   : > { %v30391_v31 = vrot.slane %v26841_v11, %v29572_v50  ;;  %28613 = vmatprep.subr.bf16.mxu1 %v29197_v39  ;;  %v30399_v32 = vcombine.high %v30381_v35, %v30381_v35  ;;  %v3277_v61 = vunpack.i.h.s16 %v30381_v35  ;;  %v3279_v44 = vunpack.i.h.s16 %v30385_v40 }
 0x1a4   : > { %v3360_v9 = vrot.slane %v3338_v5, %v29572_v50  ;;  %v3367_v42 = vrot.slane %v3339_v4, %v29572_v50  ;;  %v3368_v24 = vcombine.low %v3346_v41, %v3353_v33  ;;  %v30405_v38 = vrot.slane %v3188_v13, %v29572_v50  ;;  %6626 = vmatpush1.bf16.msra.mxu0 %v29202_v54  ;;  %v29206_v54 = vld [vmem:[%s34685_s5 + $0x40] sm:$0xff]  }
 0x1a5   : > { %v26857_v19 = vpack.i.b16 %v30381_v35, %v3275_v34  ;;  %28606 = vmatmul.mubr.msk.bf16.gmra.mxu1 %vm2062_vm5, %v2962_v63  ;;  %v26858_v1 = vpack.i.b16 %v30385_v40, %v3277_v61  ;;  %v26859_v45 = vpack.i.b16 %v30399_v32, %v3279_v44  ;;  %v3395_v17 = vrot.slane %v3385_v20, %v29572_v50 }
 0x1a6   : > { %v30419_v36 = vcombine.high %v30391_v31, %v30391_v31  ;;  %28614 = vmatpush3.bf16.msra.mxu1 %v29197_v39  ;;  %v3369_v22 = vcombine.low %v3360_v9, %v3367_v42  ;;  %v3376_v60 = vrot.slane %v3368_v24, %v29572_v50  ;;  %v3388_v63 = vcombine.low %v30391_v31, %v30405_v38 }
 0x1a7   : > { %v3386_v43 = vcombine.low %v26856_v8, %v26857_v19  ;;  %28615 = vmatprep.subr.bf16.mxu1 %v29199_v46  ;;  %v3387_v28 = vcombine.low %v26858_v1, %v26859_v45  ;;  %v30432_v51 = vcombine.high %v30405_v38, %v30405_v38  ;;  %v3212_v26 = vcombine.high %v26842_v0, %v26842_v0 }
 0x1a8   : > { %v30435_v39 = vrot.slane %v26842_v0, %v29572_v50  ;;  %v3383_v15 = vrot.slane %v3369_v22, %v29572_v50  ;;  %v3416_v62 = vrot.slane %v3388_v63, %v29572_v50  ;;  %6639 = vmatprep.subr.bf16.mxu0 %v34762_v52  ;;  %v3301_v20 = vunpack.i.l.s16 %v30171_v18 }
 0x1a9   : > { %v3402_v14 = vrot.slane %v3386_v43, %v29572_v50  ;;  %v3409_v11 = vrot.slane %v3387_v28, %v29572_v50  ;;  %v30444_v57 = vrot.slane %v3212_v26, %v29572_v50  ;;  %6640 = vmatpush2.bf16.msra.mxu0 %v29204_v37  ;;  %v3788_v37 = vunpack.i.h.s16 %v30300_v30  ;;  %v29203_v26 = vld [vmem:[%s34683_s3 + $0x90] sm:$0xff]  }
 0x1aa   : > { %v30448_v8 = vcombine.high %v30435_v39, %v30435_v39  ;;  %v3289_v10 = vunpack.i.h.s16 %v30435_v39  ;;  %v3384_v5 = vcombine.low %v3376_v60, %v3383_v15  ;;  %28616 = vmatpush3.bf16.msra.mxu1 %v29199_v46  ;;  %v26860_v4 = vpack.i.b16 %v30435_v39, %v30432_v51  ;;  %6641 = vmatprep.subr.bf16.mxu0 %v34762_v52 }
 0x1ab   : > { %v3417_v41 = vcombine.low %v3395_v17, %v3402_v14  ;;  %v30457_v33 = vrot.slane %v3301_v20, %v29572_v50  ;;  %v3418_v13 = vcombine.low %v3409_v11, %v3416_v62  ;;  %28625 = vmatprep.subr.bf16.mxu1 %v29201_v29  ;;  %v30461_v9 = vcombine.high %v30444_v57, %v30444_v57  ;;  %v29309_v11 = vld [vmem:[%s29428_s19] ss:$8 sps:$4 sm:$0xff]  }
 0x1ac   : > { %v3291_v61 = vunpack.i.h.s16 %v30444_v57  ;;  %v3293_v44 = vunpack.i.h.s16 %v30448_v8  ;;  %28617 = vmatprep.mubr.msk.bf16.mxu1 %vm2062_vm5, %v3384_v5  ;;  %v26861_v42 = vpack.i.b16 %v30444_v57, %v3289_v10  ;;  %v3434_v24 = vcombine.low %v30419_v36, %v26860_v4 }
 0x1ad   : > { %v3425_v46 = vrot.slane %v3417_v41, %v29572_v50  ;;  %v3496_v19 = vrot.slane %v30457_v33, %v29572_v50  ;;  %v3432_v0 = vrot.slane %v3418_v13, %v29572_v50  ;;  %v3786_v52 = vunpack.i.h.s16 %v30291_v25  ;;  %6642 = vmatpush2.bf16.msra.mxu0 %v29206_v54 }
 0x1ae   : > { %v26862_v1 = vpack.i.b16 %v30448_v8, %v3291_v61  ;;  %v26863_v45 = vpack.i.b16 %v30461_v9, %v3293_v44  ;;  %v3444_v17 = vrot.slane %v3434_v24, %v29572_v50  ;;  %v3790_v22 = vunpack.i.h.s16 %v30306_v59 }
 0x1af   : > { %v3792_v60 = vunpack.i.h.s16 %v30313_v16  ;;  %v3433_v43 = vcombine.low %v3425_v46, %v3432_v0  ;;  %v3800_v15 = vunpack.i.h.s16 %v30327_v2  ;;  %v3802_v25 = vunpack.i.h.s16 %v30335_v53 }
 0x1b0   : > { %v3435_v63 = vcombine.low %v26861_v42, %v26862_v1  ;;  %v3436_v28 = vcombine.low %v26863_v45, %v30149_v7  ;;  %v3804_v14 = vunpack.i.h.s16 %v30344_v3  ;;  %v3806_v62 = vunpack.i.h.s16 %v30354_v27  ;;  %6644 = vmatmul.mubr.bf16.vlgmr.msra.gmra.mxu0 %v29309_v11  ;;  %v29313_v7 = vld [vmem:[%s34682_s2] ss:$0 sm:$0xff] }
 0x1b1   : > { %v26887_v20 = vpack.i.b16 %v30300_v30, %v3786_v52  ;;  %28618 = vmatmul.mubr.msk.bf16.vlgmr.msra.gmra.mxu1 %vm2062_vm5, %v3433_v43  ;;  %v26888_v41 = vpack.i.b16 %v30306_v59, %v3788_v37  ;;  %v26889_v4 = vpack.i.b16 %v30313_v16, %v3790_v22  ;;  %v3847_v13 = vpack.i.b16 %v3261_v47, %v3792_v60  ;;  %v29205_v59 = vld [vmem:[%s34683_s3 + $0x88] sm:$0xff]  }
 0x1b2   : > { %v3451_v54 = vrot.slane %v3435_v63, %v29572_v50  ;;  %v3458_v5 = vrot.slane %v3436_v28, %v29572_v50  ;;  %28626 = vmatpush3.bf16.msra.mxu1 %v29201_v29  ;;  %v30500_v61 = vpack.i.b16 %v30335_v53, %v3800_v15  ;;  %v30503_v30 = vpack.i.b16 %v30344_v3, %v3802_v25  ;;  %v29310_v29 = vld [vmem:[%s29428_s19 + $0x14] ss:$8 sps:$4 sm:$0xff]  }
 0x1b3   : > { %v3871_v44 = vcombine.low %v30316_v6, %v30324_v21  ;;  %28627 = vmatprep.subr.bf16.mxu1 %v29203_v26  ;;  %v3869_v16 = vcombine.low %v26887_v20, %v26888_v41  ;;  %v3814_v47 = vunpack.i.h.s16 %v30391_v31  ;;  %27080 = vmatprep.mubr.msk.bf16.mxu0 %vm694_vm0, %v29310_v29  ;;  %v3870_v53 = vcombine.low %v26889_v4, %v3847_v13 }
 0x1b4   : > { %v3466_v46 = vcombine.low %v3444_v17, %v3451_v54  ;;  %v3467_v42 = vcombine.low %v3458_v5, %v30187_v48  ;;  %v3872_v3 = vcombine.low %v30332_v56, %v30500_v61  ;;  %v3816_v0 = vunpack.i.h.s16 %v30405_v38  ;;  %v29312_v5 = vld [vmem:[%s29428_s19 + $0x24] ss:$8 sps:$4 sm:$0xff]  }
 0x1b5   : > { %v3893_v24 = vrot.slane %v3871_v44, %v29572_v50  ;;  %v3879_v45 = vrot.slane %v3869_v16, %v29572_v50  ;;  %v30522_v52 = vpack.i.b16 %v30354_v27, %v3804_v14  ;;  %v3886_v17 = vrot.slane %v3870_v53, %v29572_v50  ;;  %v29311_v14 = vld [vmem:[%s29428_s19 + $0x10] ss:$8 sps:$4 sm:$0xff]  }
 0x1b6   : > { %v3474_v48 = vrot.slane %v3466_v46, %v29572_v50  ;;  %v3481_v1 = vrot.slane %v3467_v42, %v29572_v50  ;;  %28628 = vmatpush3.bf16.msra.mxu1 %v29203_v26  ;;  %v3900_v37 = vrot.slane %v3872_v3, %v29572_v50  ;;  %v3854_v22 = vpack.i.b16 %v3275_v34, %v3806_v62  ;;  %v29207_v34 = vld [vmem:[%s34683_s3 + $0x80] sm:$0xff]  }
 0x1b7   : > { %v30529_v60 = vpack.i.b16 %v30405_v38, %v3814_v47  ;;  %28629 = vmatprep.subr.bf16.mxu1 %v29205_v59  ;;  %v30532_v63 = vpack.i.b16 %v30419_v36, %v3816_v0  ;;  %v3918_v27 = vcombine.low %v30503_v30, %v30522_v52  ;;  %v26899_v28 = vcombine.high %v30347_v58, %v30381_v35  ;;  %v29208_v47 = vld [vmem:[%s34683_s3 + $0xd8] sm:$0xff]  }
 0x1b8   : > { %v3482_v43 = vcombine.low %v3474_v48, %v3481_v1  ;;  %v3901_v26 = vcombine.low %v3879_v45, %v3886_v17  ;;  %v3902_v15 = vcombine.low %v3893_v24, %v3900_v37  ;;  %v3919_v38 = vcombine.low %v3854_v22, %v30381_v35  ;;  %6652 = vmatmul.mubr.bf16.gmra.mxu0 %v29311_v14 }
 0x1b9   : > { %v3818_v25 = vunpack.i.h.s16 %v30419_v36  ;;  %v3921_v62 = vcombine.low %v30529_v60, %v30532_v63  ;;  %v3928_v20 = vrot.slane %v3918_v27, %v29572_v50  ;;  %v3942_v11 = vrot.slane %v26899_v28, %v29572_v50  ;;  %27081 = vmatprep.mubr.msk.bf16.mxu0 %vm694_vm0, %v29312_v5  ;;  %v29314_v27 = vld [vmem:[%s29428_s19 + $0x20] ss:$8 sps:$4 sm:$0xff]  }
 0x1ba   : > { %28621 = vmatprep.mubr.msk.bf16.mxu1 %vm2062_vm5, %v3482_v43  ;;  %v3820_v54 = vunpack.i.h.s16 %v30432_v51  ;;  %v3909_v36 = vrot.slane %v3901_v26, %v29572_v50  ;;  %v3916_v41 = vrot.slane %v3902_v15, %v29572_v50  ;;  %v3935_v4 = vrot.slane %v3919_v38, %v29572_v50  ;;  %28630 = vmatpush3.bf16.msra.mxu1 %v29205_v59  ;;  %v29209_v15 = vld [vmem:[%s34683_s3 + $0xd0] sm:$0xff]  }
 0x1bb   : > { %28622 = vmatmul.mubr.msk.bf16.gmra.mxu1 %vm2062_vm5, %v3496_v19  ;;  %v3830_v13 = vunpack.i.h.s16 %v30156_v49  ;;  %v3949_v44 = vrot.slane %v3921_v62, %v29572_v50  ;;  %v3832_v46 = vunpack.i.h.s16 %v30160_v55  ;;  %v30563_v42 = vpack.i.b16 %v30432_v51, %v3818_v25  ;;  %28631 = vmatprep.subr.bf16.mxu1 %v29207_v34 }
 0x1bc   : > { %v3861_v33 = vpack.i.b16 %v3289_v10, %v3820_v54  ;;  %v3917_v19 = vcombine.low %v3909_v36, %v3916_v41  ;;  %v3950_v16 = vcombine.low %v3928_v20, %v3935_v4  ;;  %v26896_v59 = vpack.i.b16 %v30156_v49, %v5533_v12  ;;  %v34778_v49 = vld [vmem:[#allocation15_spill] sm:$0xff] }
 0x1bd   : > { %v26897_v29 = vpack.i.b16 %v30160_v55, %v3830_v13  ;;  %v3951_v53 = vcombine.low %v3942_v11, %v3949_v44  ;;  %v26898_v51 = vpack.i.b16 %v30171_v18, %v3832_v46  ;;  %v3968_v10 = vcombine.low %v30444_v57, %v30448_v8  ;;  %v29316_v46 = vld [vmem:[%s29428_s19 + $0x30] ss:$8 sps:$4 sm:$0xff]  }
 0x1be   : > { %v3967_v3 = vcombine.low %v30563_v42, %v3861_v33  ;;  %28633 = vmatprep.mubr.msk.bf16.mxu1 %vm2062_vm5, %v3917_v19  ;;  %v3958_v24 = vrot.slane %v3950_v16, %v29572_v50  ;;  %v3969_v0 = vcombine.low %v30461_v9, %v26896_v59  ;;  %v788_v55 = vadd.f32 %v29313_v7, %v34778_v49  ;;  %v29317_v59 = vld [vmem:[%s29428_s19 + $0x44] ss:$8 sps:$4 sm:$0xff]  }
 0x1bf   : > { %v3834_v12 = vunpack.i.h.s16 %v30171_v18  ;;  %28632 = vmatpush3.bf16.msra.mxu1 %v29207_v34  ;;  %v3965_v48 = vrot.slane %v3951_v53, %v29572_v50  ;;  %v3970_v1 = vcombine.low %v26897_v29, %v26898_v51  ;;  %v3984_v17 = vrot.slane %v3968_v10, %v29572_v50  ;;  %v29315_v34 = vld [vmem:[%s29428_s19 + $0x34] ss:$8 sps:$4 sm:$0xff]   ;;  %v1594_v29 = vld [vmem:[#allocation2 + $0x44] sm:$0x1] }
 0x1c0   : > { %v3977_v45 = vrot.slane %v3967_v3, %v29572_v50  ;;  %28657 = vmatprep.subr.bf16.mxu1 %v29208_v47  ;;  %v3991_v37 = vrot.slane %v3969_v0, %v29572_v50  ;;  %v803_v22 = vmax.f32 %v788_v55, 0.0  ;;  %6660 = vmatmul.mubr.bf16.gmra.mxu0 %v29314_v27  ;;  %v26967_v14 = vpack.i.b16 %v30327_v2, %v30332_v56  ;;  %v29210_v2 = vld [vmem:[%s34683_s3 + $0xc8] sm:$0xff]   ;;  %v29212_v0 = vld [vmem:[%s34683_s3 + $0x118] sm:$0xff]  }
 0x1c1   : > { %v4022_v43 = vrot.slane %v3834_v12, %v29572_v50  ;;  %v3966_v28 = vcombine.low %v3958_v24, %v3965_v48  ;;  %v3998_v18 = vrot.slane %v3970_v1, %v29572_v50  ;;  %27082 = vmatprep.mubr.msk.bf16.mxu0 %vm694_vm0, %v29315_v34  ;;  %v26971_v54 = vpack.i.b16 %v30391_v31, %v30399_v32  ;;  %v27023_v27 = vld.sshfl [vmem:[#allocation2 + $0x10] sm:$0x32 pattern:$0x75316420] }
 0x1c2   : > { %v3999_v26 = vcombine.low %v3977_v45, %v3984_v17  ;;  %v809_v38 = vpack.c.bf16 %v803_v22, %v803_v22  ;;  %v5048_v5 = vcombine.low %v30309_v23, %v30316_v6  ;;  %v5049_v56 = vcombine.low %v30324_v21, %v26967_v14 }
 0x1c3   : > { %v4029_v25 = vrot.slane %v4022_v43, %v29572_v50  ;;  %28634 = vmatmul.mubr.msk.bf16.vlgmr.msra.gmra.mxu1 %vm2062_vm5, %v3966_v28  ;;  %v4000_v62 = vcombine.low %v3991_v37, %v3998_v18  ;;  %v5050_v41 = vcombine.low %v30500_v61, %v30503_v30  ;;  %v5097_v4 = vcombine.low %v30381_v35, %v30385_v40  ;;  %v26957_v30 = vld.sshfl [vmem:[#allocation2 + $0x38] sm:$0x33 pattern:$0x75316420] }
 0x1c4   : > { %v4007_v20 = vrot.slane %v3999_v26, %v29572_v50  ;;  %28658 = vmatpush3.bf16.msra.mxu1 %v29208_v47  ;;  %v1067_v11 = vrot.slane %v809_v38, %v29572_v50  ;;  %v5051_v23 = vcombine.low %v30522_v52, %v30347_v58  ;;  %v5058_v6 = vrot.slane %v5048_v5, %v29572_v50  ;;  %v29211_v58 = vld [vmem:[%s34683_s3 + $0xc0] sm:$0xff]  }
 0x1c5   : > { %v4014_v36 = vrot.slane %v4000_v62, %v29572_v50  ;;  %28659 = vmatprep.subr.bf16.mxu1 %v29209_v15  ;;  %v5065_v13 = vrot.slane %v5049_v56, %v29572_v50  ;;  %v5072_v44 = vrot.slane %v5050_v41, %v29572_v50  ;;  %v5100_v40 = vcombine.low %v30435_v39, %v30444_v57  ;;  %v34779_v52 = vld [vmem:[#allocation8_spill] sm:$0xff] }
 0x1c6   : > { %v1074_v31 = vrot.slane %v1067_v11, %v29572_v50  ;;  %v5079_v61 = vrot.slane %v5051_v23, %v29572_v50  ;;  %v5098_v16 = vcombine.low %v26971_v54, %v30529_v60  ;;  %v26958_v47 = vld.sshfl [vmem:[#allocation2 + $0x40] sm:$0x33 pattern:$0x75316420]  ;;  %v5107_v51 = vrot.slane %v5097_v4, %v29572_v50 }
 0x1c7   : > { %v4015_v32 = vcombine.low %v4007_v20, %v4014_v36  ;;  %v5080_v35 = vcombine.low %v5058_v6, %v5065_v13  ;;  %v5128_v3 = vrot.slane %v5100_v40, %v29572_v50  ;;  %v4924_v10 = vcombine.high %v26957_v30, %v26957_v30  ;;  %v29318_v62 = vld [vmem:[%s29428_s19 + $0x40] ss:$8 sps:$4 sm:$0xff]   ;;  %v34781_v36 = vld [vmem:[#allocation6_spill] sm:$0xff] }
 0x1c8   : > { %28660 = vmatpush3.bf16.msra.mxu1 %v29209_v15  ;;  %v1155_v21 = vunpack.i.l.s16 %v1074_v31  ;;  %6668 = vmatmul.mubr.bf16.gmra.mxu0 %v29316_v46  ;;  %v5081_v19 = vcombine.low %v5072_v44, %v5079_v61  ;;  %v5099_v60 = vcombine.low %v30532_v63, %v30563_v42  ;;  %v5114_v24 = vrot.slane %v5098_v16, %v29572_v50  ;;  %v27025_v4 = vld.sshfl [vmem:[#allocation2 + $0x18] sm:$0x32 pattern:$0x75316420] }
 0x1c9   : > { %28637 = vmatprep.mubr.msk.bf16.mxu1 %vm2062_vm5, %v4015_v32  ;;  %28661 = vmatprep.subr.bf16.mxu1 %v29210_v2  ;;  %v5088_v53 = vrot.slane %v5080_v35, %v29572_v50  ;;  %v4931_v7 = vrot.slane %v26957_v30, %v29572_v50  ;;  %v4938_v49 = vrot.slane %v4924_v10, %v29572_v50  ;;  %v27024_v6 = vld.sshfl [vmem:[#allocation2 + $0x14] sm:$0x1 pattern:$0x75316420] }
 0x1ca   : > { %v1535_v33 = vrot.slane %v1155_v21, %v34779_v52  ;;  %27083 = vmatprep.mubr.msk.bf16.mxu0 %vm694_vm0, %v29317_v59  ;;  %v5095_v57 = vrot.slane %v5081_v19, %v29572_v50  ;;  %v4948_v55 = vcombine.high %v26958_v47, %v26958_v47  ;;  %v4955_v12 = vrot.slane %v26958_v47, %v29572_v50  ;;  %v27027_v30 = vld.sshfl [vmem:[#allocation2 + $0x20] sm:$0x32 pattern:$0x75316420] }
 0x1cb   : > { %28638 = vmatmul.mubr.msk.bf16.gmra.mxu1 %vm2062_vm5, %v4029_v25  ;;  %v5121_v63 = vrot.slane %v5099_v60, %v29572_v50  ;;  %v5129_v42 = vcombine.low %v5107_v51, %v5114_v24  ;;  %v4939_v17 = vcombine.high %v4931_v7, %v4931_v7  ;;  %v4940_v37 = vcombine.high %v4938_v49, %v4938_v49  ;;  %v27026_v35 = vld.sshfl [vmem:[#allocation2 + $0x1c] sm:$0x1 pattern:$0x75316420] }
 0x1cc   : > { %v1542_v39 = vrot.slane %v1535_v33, %v34779_v52  ;;  %28662 = vmatpush3.bf16.msra.mxu1 %v29210_v2  ;;  %v5096_v45 = vcombine.low %v5088_v53, %v5095_v57  ;;  %v4962_v22 = vrot.slane %v4948_v55, %v29572_v50  ;;  %v4963_v43 = vcombine.high %v4955_v12, %v4955_v12  ;;  %v29214_v53 = vld [vmem:[%s34683_s3 + $0x108] sm:$0xff]   ;;  %v27028_v10 = vld.sshfl [vmem:[#allocation2 + $0x24] sm:$0x1 pattern:$0x75316420] }
 0x1cd   : > { %28663 = vmatprep.subr.bf16.mxu1 %v29211_v58  ;;  %v5130_v28 = vcombine.low %v5121_v63, %v5128_v3  ;;  %v5137_v18 = vrot.slane %v5129_v42, %v29572_v50  ;;  %v5001_v26 = vunpack.i.h.s16 %v4931_v7  ;;  %v5003_v15 = vunpack.i.h.s16 %v4938_v49 }
 0x1ce   : > { %v1595_v1 = vsel %vm29587_vm4, %v1542_v39, %v1594_v29  ;;  %28665 = vmatprep.mubr.msk.bf16.mxu1 %vm2062_vm5, %v5096_v45  ;;  %v5005_v34 = vunpack.i.h.s16 %v4939_v17  ;;  %v26975_v38 = vpack.i.b16 %v4931_v7, %v30461_v9  ;;  %v5149_v25 = vcombine.low %v4962_v22, %v4963_v43  ;;  %v29213_v9 = vld [vmem:[%s34683_s3 + $0x110] sm:$0xff]   ;;  %v34782_v7 = vld [vmem:[#allocation7_spill] sm:$0xff]  ;;  %v29215_v43 = vld [vmem:[%s34683_s3 + $0x100] sm:$0xff]  }
 0x1cf   : > { %1596 = vst [vmem:[#allocation2 + $0x44] sm:$0x1] %v1595_v1  ;;  %v4964_v14 = vcombine.high %v4962_v22, %v4962_v22  ;;  %v5144_v20 = vrot.slane %v5130_v28, %v29572_v50  ;;  %v26976_v11 = vpack.i.b16 %v4938_v49, %v5001_v26  ;;  %v26977_v54 = vpack.i.b16 %v4939_v17, %v5003_v15 }
 0x1d0   : > { %28664 = vmatpush3.bf16.msra.mxu1 %v29211_v58  ;;  %6676 = vmatmul.mubr.bf16.gmra.mxu0 %v29318_v62  ;;  %v5884_v5 = vcombine.high %v27023_v27, %v27023_v27  ;;  %v26978_v2 = vpack.i.b16 %v4940_v37, %v5005_v34  ;;  %v5146_v56 = vcombine.low %v30448_v8, %v26975_v38  ;;  %v27031_v34 = vld.sshfl [vmem:[#allocation2 + $0x30] sm:$0x32 pattern:$0x75316420] }
 0x1d1   : > { %28689 = vmatprep.subr.bf16.mxu1 %v29212_v0  ;;  %27084 = vmatprep.mubr.msk.bf16.mxu0 %vm694_vm0, %v34781_v36  ;;  %v5013_v41 = vunpack.i.l.s16 %v4964_v14  ;;  %v5145_v31 = vcombine.low %v5137_v18, %v5144_v20  ;;  %v5147_v23 = vcombine.low %v26976_v11, %v26977_v54  ;;  %v5891_v32 = vrot.slane %v27023_v27, %v29572_v50  ;;  %v27030_v20 = vld.sshfl [vmem:[#allocation2 + $0x2c] sm:$0x1 pattern:$0x75316420] }
 0x1d2   : > { %v5898_v13 = vrot.slane %v5884_v5, %v29572_v50  ;;  %v5148_v44 = vcombine.low %v26978_v2, %v4955_v12  ;;  %v5177_v21 = vrot.slane %v5149_v25, %v29572_v50  ;;  %v5156_v8 = vrot.slane %v5146_v56, %v29572_v50 }
 0x1d3   : > { %v5201_v61 = vrot.slane %v5013_v41, %v29572_v50  ;;  %28666 = vmatmul.mubr.msk.bf16.vlgmr.msra.gmra.mxu1 %vm2062_vm5, %v5145_v31  ;;  %v5163_v46 = vrot.slane %v5147_v23, %v29572_v50  ;;  %v5899_v58 = vcombine.high %v5891_v32, %v5891_v32  ;;  %v5922_v40 = vcombine.high %v27025_v4, %v27025_v4 }
 0x1d4   : > { %v5170_v33 = vrot.slane %v5148_v44, %v29572_v50  ;;  %28690 = vmatpush3.bf16.msra.mxu1 %v29212_v0  ;;  %v5900_v19 = vcombine.high %v5898_v13, %v5898_v13  ;;  %v5914_v16 = vrot.slane %v27024_v6, %v29572_v50  ;;  %v5929_v47 = vrot.slane %v27025_v4, %v29572_v50  ;;  %v27029_v0 = vld.sshfl [vmem:[#allocation2 + $0x28] sm:$0x32 pattern:$0x75316420] }
 0x1d5   : > { %v5178_v59 = vcombine.low %v5156_v8, %v5163_v46  ;;  %28691 = vmatprep.subr.bf16.mxu1 %v29213_v9  ;;  %v5208_v29 = vrot.slane %v5201_v61, %v29572_v50  ;;  %v5936_v51 = vrot.slane %v5922_v40, %v29572_v50  ;;  %v5960_v3 = vcombine.high %v27027_v30, %v27027_v30  ;;  %v27033_v61 = vld.sshfl [vmem:[#allocation2 + $0x38] sm:$0x32 pattern:$0x75316420] }
 0x1d6   : > { %v5179_v39 = vcombine.low %v5170_v33, %v5177_v21  ;;  %v5937_v57 = vcombine.high %v5929_v47, %v5929_v47  ;;  %v5952_v60 = vrot.slane %v27026_v35, %v29572_v50  ;;  %v6226_v24 = vcombine.low %v5898_v13, %v5899_v58  ;;  %v27035_v58 = vld.sshfl [vmem:[#allocation2 + $0x40] sm:$0x32 pattern:$0x75316420] }
 0x1d7   : > { %v5186_v49 = vrot.slane %v5178_v59, %v29572_v50  ;;  %v5938_v55 = vcombine.high %v5936_v51, %v5936_v51  ;;  %v5974_v12 = vrot.slane %v5960_v3, %v29572_v50  ;;  %v6151_v1 = vunpack.i.h.s16 %v5936_v51  ;;  %v27032_v47 = vld.sshfl [vmem:[#allocation2 + $0x34] sm:$0x1 pattern:$0x75316420] }
 0x1d8   : > { %6684 = vmatmul.mubr.bf16.gmra.mxu0 %v34782_v7  ;;  %v5193_v45 = vrot.slane %v5179_v39, %v29572_v50  ;;  %28692 = vmatpush3.bf16.msra.mxu1 %v29213_v9  ;;  %v5967_v63 = vrot.slane %v27027_v30, %v29572_v50  ;;  %v6153_v42 = vunpack.i.h.s16 %v5937_v57  ;;  %v27045_v17 = vpack.i.b16 %v5936_v51, %v5914_v16  ;;  %v27034_v39 = vld.sshfl [vmem:[#allocation2 + $0x3c] sm:$0x1 pattern:$0x75316420] }
 0x1d9   : > { %28693 = vmatprep.subr.bf16.mxu1 %v29214_v53  ;;  %v6155_v37 = vunpack.i.h.s16 %v5938_v55  ;;  %v27046_v22 = vpack.i.b16 %v5937_v57, %v6151_v1  ;;  %v5990_v27 = vrot.slane %v27028_v10, %v29572_v50  ;;  %v5998_v28 = vcombine.high %v27029_v0, %v27029_v0 }
 0x1da   : > { %v5194_v18 = vcombine.low %v5186_v49, %v5193_v45  ;;  %v27047_v26 = vpack.i.b16 %v5938_v55, %v6153_v42  ;;  %v6227_v15 = vcombine.low %v5900_v19, %v27045_v17  ;;  %v6005_v38 = vrot.slane %v27029_v0, %v29572_v50  ;;  %v27036_v55 = vld.sshfl [vmem:[#allocation2 + $0x44] sm:$0x1 pattern:$0x75316420] }
 0x1db   : > { %v27048_v25 = vpack.i.b16 %v5952_v60, %v6155_v37  ;;  %v6236_v14 = vrot.slane %v6226_v24, %v29572_v50  ;;  %v27057_v62 = vcombine.high %v5967_v63, %v5974_v12  ;;  %v6012_v11 = vrot.slane %v5998_v28, %v29572_v50 }
 0x1dc   : > { %28669 = vmatprep.mubr.msk.bf16.mxu1 %vm2062_vm5, %v5194_v18  ;;  %28694 = vmatpush3.bf16.msra.mxu1 %v29214_v53  ;;  %v6228_v54 = vcombine.low %v27046_v22, %v27047_v26  ;;  %v6243_v5 = vrot.slane %v6227_v15, %v29572_v50  ;;  %v6013_v36 = vcombine.high %v6005_v38, %v6005_v38 }
 0x1dd   : > { %28670 = vmatmul.mubr.msk.bf16.gmra.mxu1 %vm2062_vm5, %v5208_v29  ;;  %v6229_v2 = vcombine.low %v27048_v25, %v5974_v12  ;;  %28695 = vmatprep.subr.bf16.mxu1 %v29215_v43  ;;  %v6014_v56 = vcombine.high %v6012_v11, %v6012_v11  ;;  %v6036_v41 = vcombine.high %v27031_v34, %v27031_v34  ;;  %v6165_v4 = vunpack.i.h.s16 %v6012_v11 }
 0x1de   : > { %v6258_v31 = vcombine.low %v6236_v14, %v6243_v5  ;;  %v6028_v23 = vrot.slane %v27030_v20, %v29572_v50  ;;  %v6043_v9 = vrot.slane %v27031_v34, %v29572_v50  ;;  %v6167_v6 = vunpack.i.h.s16 %v6013_v36 }
 0x1df   : > { %v6250_v32 = vrot.slane %v6228_v54, %v29572_v50  ;;  %v6257_v13 = vrot.slane %v6229_v2, %v29572_v50  ;;  %v6050_v44 = vrot.slane %v6036_v41, %v29572_v50  ;;  %v6169_v21 = vunpack.i.h.s16 %v6014_v56 }
 0x1e0   : > { %v6285_v30 = vrot.slane %v27057_v62, %v29572_v50  ;;  %28696 = vmatpush3.bf16.msra.mxu1 %v29215_v43  ;;  %v6051_v8 = vcombine.high %v6043_v9, %v6043_v9  ;;  %v27049_v46 = vpack.i.b16 %v6012_v11, %v5990_v27  ;;  %v27050_v35 = vpack.i.b16 %v6013_v36, %v6165_v4 }
 0x1e1   : > { %v6259_v40 = vcombine.low %v6250_v32, %v6257_v13  ;;  %v6266_v33 = vrot.slane %v6258_v31, %v29572_v50  ;;  %v27051_v19 = vpack.i.b16 %v6014_v56, %v6167_v6  ;;  %v27052_v16 = vpack.i.b16 %v6028_v23, %v6169_v21 }
 0x1e2   : > { %v6276_v59 = vcombine.low %v27049_v46, %v27050_v35  ;;  %v6278_v29 = vcombine.low %v6050_v44, %v6051_v8  ;;  %v6074_v53 = vcombine.high %v27033_v61, %v27033_v61  ;;  %v6081_v51 = vrot.slane %v27033_v61, %v29572_v50  ;;  %v447_v61 = vld [vmem:[#allocation3 + $0x4] sm:$0xf]  ;;  %v451_v46 = vld [vmem:[#allocation3 + $0xc] sm:$0xf] }
 0x1e3   : > { %v6273_v3 = vrot.slane %v6259_v40, %v29572_v50  ;;  %v6277_v10 = vcombine.low %v27051_v19, %v27052_v16  ;;  %v6052_v57 = vcombine.high %v6050_v44, %v6050_v44  ;;  %v6112_v60 = vcombine.high %v27035_v58, %v27035_v58  ;;  %v463_v19 = vld [vmem:[#allocation3 + $0x24] sm:$0xf] }
 0x1e4   : > { %v6292_v24 = vrot.slane %v6276_v59, %v29572_v50  ;;  %v6066_v0 = vrot.slane %v27032_v47, %v29572_v50  ;;  %v6088_v7 = vrot.slane %v6074_v53, %v29572_v50  ;;  %v6089_v49 = vcombine.high %v6081_v51, %v6081_v51 }
 0x1e5   : > { %v6274_v12 = vcombine.low %v6266_v33, %v6273_v3  ;;  %v6299_v1 = vrot.slane %v6277_v10, %v29572_v50  ;;  %v6306_v45 = vrot.slane %v6278_v29, %v29572_v50  ;;  %v6126_v63 = vrot.slane %v6112_v60, %v29572_v50  ;;  %v459_v33 = vld [vmem:[#allocation3 + $0x1c] sm:$0xf] }
 0x1e6   : > { %v6307_v42 = vcombine.low %v6285_v30, %v6292_v24  ;;  %v6090_v17 = vcombine.high %v6088_v7, %v6088_v7  ;;  %v6179_v37 = vunpack.i.h.s16 %v6088_v7  ;;  %v6181_v22 = vunpack.i.h.s16 %v6089_v49  ;;  %v467_v24 = vld [vmem:[#allocation3 + $0x2c] sm:$0xf] }
 0x1e7   : > { %28697 = vmatprep.mubr.msk.bf16.mxu1 %vm2062_vm5, %v6274_v12  ;;  %v6308_v43 = vcombine.low %v6299_v1, %v6306_v45  ;;  %v6104_v27 = vrot.slane %v27034_v39, %v29572_v50  ;;  %v27053_v28 = vpack.i.b16 %v6088_v7, %v6066_v0  ;;  %v6142_v18 = vrot.slane %v27036_v55, %v29572_v50  ;;  %v471_v0 = vld [vmem:[#allocation3 + $0x34] sm:$0xf]  ;;  %v475_v1 = vld [vmem:[#allocation3 + $0x3c] sm:$0xf] }
 0x1e8   : > { %v6119_v26 = vrot.slane %v27035_v58, %v29572_v50  ;;  %v6183_v15 = vunpack.i.h.s16 %v6090_v17  ;;  %v27054_v34 = vpack.i.b16 %v6089_v49, %v6179_v37  ;;  %v27055_v38 = vpack.i.b16 %v6090_v17, %v6181_v22  ;;  %v455_v58 = vld [vmem:[#allocation3 + $0x14] sm:$0xf] }
 0x1e9   : > { %v6315_v25 = vrot.slane %v6307_v42, %v29572_v50  ;;  %v6322_v14 = vrot.slane %v6308_v43, %v29572_v50  ;;  %v6324_v62 = vcombine.low %v6052_v57, %v27053_v28  ;;  %v6191_v36 = vunpack.i.l.s16 %v6142_v18 }
 0x1ea   : > { %v27056_v20 = vpack.i.b16 %v6104_v27, %v6183_v15  ;;  %v6325_v11 = vcombine.low %v27054_v34, %v27055_v38  ;;  %v27058_v54 = vcombine.high %v6119_v26, %v6126_v63  ;;  %v448_v8 = vsel %vm30729_vm7, 0, %v447_v61 }
 0x1eb   : > { %v6323_v5 = vcombine.low %v6315_v25, %v6322_v14  ;;  %v6334_v56 = vrot.slane %v6324_v62, %v29572_v50  ;;  %v6379_v9 = vrot.slane %v6191_v36, %v29572_v50  ;;  %449 = vst [vmem:[#allocation3 + $0x4] sm:$0xf] %v448_v8  ;;  %v452_v35 = vsel %vm30729_vm7, 0, %v451_v46  ;;  %v479_v25 = vld [vmem:[#allocation3 + $0x44] sm:$0xf] }
 0x1ec   : > { %v6326_v2 = vcombine.low %v27056_v20, %v6126_v63  ;;  %v6341_v41 = vrot.slane %v6325_v11, %v29572_v50  ;;  %v6355_v31 = vrot.slane %v27058_v54, %v29572_v50  ;;  %453 = vst [vmem:[#allocation3 + $0xc] sm:$0xf] %v452_v35  ;;  %v456_v40 = vsel %vm30729_vm7, 0, %v455_v58  ;;  %v29222_v58 = vld [vmem:[%s34687_s7 + $0x20] sm:$0xff]  }
 0x1ed   : > { %28698 = vmatmul.mubr.msk.bf16.vlgmr.msra.gmra.mxu1 %vm2062_vm5, %v6323_v5  ;;  %v6386_v44 = vrot.slane %v6379_v9, %v29572_v50  ;;  %457 = vst [vmem:[#allocation3 + $0x14] sm:$0xf] %v456_v40  ;;  %v460_v47 = vsel %vm30729_vm7, 0, %v459_v33  ;;  %v464_v59 = vsel %vm30729_vm7, 0, %v463_v19  ;;  %v468_v7 = vsel %vm30729_vm7, 0, %v467_v24  ;;  %v29220_v9 = vld [vmem:[%s34687_s7 + $0x28] sm:$0xff]  }
 0x1ee   : > { %v6348_v4 = vrot.slane %v6326_v2, %v29572_v50  ;;  %v6356_v23 = vcombine.low %v6334_v56, %v6341_v41  ;;  %461 = vst [vmem:[#allocation3 + $0x1c] sm:$0xf] %v460_v47  ;;  %465 = vst [vmem:[#allocation3 + $0x24] sm:$0xf] %v464_v59  ;;  %v472_v49 = vsel %vm30729_vm7, 0, %v471_v0  ;;  %v476_v45 = vsel %vm30729_vm7, 0, %v475_v1 }
 0x1ef   : > { %469 = vst [vmem:[#allocation3 + $0x2c] sm:$0xf] %v468_v7  ;;  %473 = vst [vmem:[#allocation3 + $0x34] sm:$0xf] %v472_v49  ;;  %v480_v62 = vsel %vm30729_vm7, 0, %v479_v25  ;;  %v29216_v56 = vld [vmem:[%s34687_s7 + $0x38] sm:$0xff]  }
 0x1f0   : > { %v6357_v6 = vcombine.low %v6348_v4, %v6355_v31  ;;  %v6364_v32 = vrot.slane %v6356_v23, %v29572_v50  ;;  %477 = vst [vmem:[#allocation3 + $0x3c] sm:$0xf] %v476_v45  ;;  %481 = vst [vmem:[#allocation3 + $0x44] sm:$0xf] %v480_v62  ;;  %v29217_v41 = vld [vmem:[%s34687_s7 + $0x78] sm:$0xff]   ;;  %v29218_v4 = vld [vmem:[%s34687_s7 + $0x30] sm:$0xff]   ;;  %28705 = vmatprep.subr.bf16.mxu1 %v29216_v56 }
 0x1f1   : > { %v29219_v23 = vld [vmem:[%s34687_s7 + $0x70] sm:$0xff]   ;;  %28765 = vmatprep.subr.bf16.mxu0 %v29217_v41  ;;  %28706 = vmatpush3.bf16.msra.mxu1 %v29216_v56  ;;  %v29223_v40 = vld [vmem:[%s34687_s7 + $0x60] sm:$0xff]   ;;  %v29224_v1 = vld [vmem:[%s34687_s7 + $0x18] sm:$0xff]  }
 0x1f2   : > { %v6371_v13 = vrot.slane %v6357_v6, %v29572_v50  ;;  %28766 = vmatpush3.bf16.msra.mxu0 %v29217_v41  ;;  %28707 = vmatprep.subr.bf16.mxu1 %v29218_v4 }
 0x1f3   : > { %28767 = vmatprep.subr.bf16.mxu0 %v29219_v23 }
 0x1f4   : > { %v6372_v21 = vcombine.low %v6364_v32, %v6371_v13 }
 0x1f5   : > { %28708 = vmatpush3.bf16.msra.mxu1 %v29218_v4 }
 0x1f6   : > { %28701 = vmatprep.mubr.msk.bf16.mxu1 %vm2062_vm5, %v6372_v21  ;;  %28768 = vmatpush3.bf16.msra.mxu0 %v29219_v23 }
 0x1f7   : > { %28702 = vmatmul.mubr.msk.bf16.gmra.mxu1 %vm2062_vm5, %v6386_v44  ;;  %28709 = vmatprep.subr.bf16.mxu1 %v29220_v9  ;;  %v29221_v44 = vld [vmem:[%s34687_s7 + $0x68] sm:$0xff]  }
 0x1f8   : > { %28769 = vmatprep.subr.bf16.mxu0 %v29221_v44 }
 0x1f9   : > { %28710 = vmatpush3.bf16.msra.mxu1 %v29220_v9 }
 0x1fa   : > { %28770 = vmatpush3.bf16.msra.mxu0 %v29221_v44  ;;  %28711 = vmatprep.subr.bf16.mxu1 %v29222_v58 }
 0x1fb   : > { %28771 = vmatprep.subr.bf16.mxu0 %v29223_v40 }
 0x1fd   : > { %28712 = vmatpush3.bf16.msra.mxu1 %v29222_v58 }
 0x1fe   : > { %28772 = vmatpush3.bf16.msra.mxu0 %v29223_v40  ;;  %28725 = vmatprep.subr.bf16.mxu1 %v29224_v1 }
 0x218   : > { %v28571_v16 = vpop.f32.mrf.mxu1 }
 0x21a   : > { %v2109_v29 = vpop.f32.mrf.mxu1 }
 0x21c   : > { %v28572_v53 = vpop.f32.mrf.mxu1 }
 0x21e   : > { %v30743_v51 = vpop.f32.mrf.mxu1 }
 0x21f   : > { %34785 = vst [vmem:[#allocation12_spill] sm:$0xff] %v30743_v51 }
 0x222   : > { %v30745_v3 = vpop.f32.mrf.mxu0 }
 0x224   : > { %v30747_v39 = vpop.f32.mrf.mxu0 }
 0x226   : > { %v30753_v55 = vpop.f32.mrf.mxu0 }
 0x228   : > { %v30755_v12 = vpop.f32.mrf.mxu0 }
 0x229   : > { %34786 = vst [vmem:[#allocation10_spill] sm:$0xff] %v30755_v12 }
 0x22a   : > { %v28575_v10 = vpop.f32.mrf.mxu1 }
 0x22c   : > { %v2125_v57 = vpop.f32.mrf.mxu1 }
 0x22e   : > { %v28576_v60 = vpop.f32.mrf.mxu1 }
 0x22f   : > { %v30818_v60 = vld [vmem:[%s34686_s6] ss:$0 sm:$0xff] }
 0x230   : > { %v30761_v42 = vpop.f32.mrf.mxu1 }
 0x231   : > { %34787 = vst [vmem:[#allocation13_spill] sm:$0xff] %v30761_v42 }
 0x239   : > { %v30759_v63 = vpop.f32.mrf.mxu0 }
 0x23b   : > { %v30763_v17 = vpop.f32.mrf.mxu0 }
 0x23d   : > { %v28656_v37 = vpop.f32.mrf.mxu0 }
 0x23e   : > { %v28587_v22 = vpop.f32.mrf.mxu1 }
 0x23f   : > { %v2404_v43 = vadd.f32 %v28587_v22, %v28571_v16  ;;  %v30765_v27 = vpop.f32.mrf.mxu0 }
 0x240   : > { %34788 = vst [vmem:[#allocation14_spill] sm:$0xff] %v30765_v27  ;;  %v2395_v28 = vpop.f32.mrf.mxu1 }
 0x241   : > { %v2396_v18 = vadd.f32 %v2395_v28, %v2109_v29 }
 0x242   : > { %v28588_v26 = vpop.f32.mrf.mxu1 }
 0x243   : > { %v2407_v15 = vadd.f32 %v28588_v26, %v28572_v53 }
 0x244   : > { %v30767_v34 = vpop.f32.mrf.mxu0  ;;  %v30769_v38 = vpop.f32.mrf.mxu1 }
 0x245   : > { %34789 = vst [vmem:[#allocation11_spill] sm:$0xff] %v30769_v38 }
 0x246   : > { %v30771_v14 = vpop.f32.mrf.mxu0 }
 0x248   : > { %v30775_v54 = vpop.f32.mrf.mxu0 }
 0x249   : > { %v28591_v20 = vpop.f32.mrf.mxu1 }
 0x24a   : > { %v2420_v11 = vadd.f32 %v28591_v20, %v28575_v10  ;;  %v30786_v31 = vpop.f32.mrf.mxu0 }
 0x24b   : > { %v2411_v5 = vpop.f32.mrf.mxu1  ;;  %34790 = vst [vmem:[#allocation19_spill] sm:$0xff] %v30786_v31 }
 0x24c   : > { %v2412_v36 = vadd.f32 %v2411_v5, %v2125_v57 }
 0x24d   : > { %v28592_v2 = vpop.f32.mrf.mxu1 }
 0x24f   : > { %v30801_v21 = vpop.f32.mrf.mxu1 }
 0x250   : > { %34791 = vst [vmem:[#allocation18_spill] sm:$0xff] %v30801_v21 }
 0x252   : > { %v30794_v6 = vpop.f32.mrf.mxu0 }
 0x254   : > { %v30796_v32 = vpop.f32.mrf.mxu0 }
 0x256   : > { %v28688_v13 = vpop.f32.mrf.mxu0 }
 0x258   : > { %v30813_v57 = vpop.f32.mrf.mxu0 }
 0x259   : > { %34794 = vst [vmem:[#allocation17_spill] sm:$0xff] %v30813_v57 }
 0x25d   : > { %v28603_v61 = vpop.f32.mrf.mxu1 }
 0x25e   : > { %v3065_v30 = vadd.f32 %v28603_v61, %v2404_v43 }
 0x25f   : > { %v3033_v8 = vpop.f32.mrf.mxu1 }
 0x260   : > { %v3063_v46 = vadd.f32 %v3033_v8, %v2396_v18 }
 0x261   : > { %v28604_v35 = vpop.f32.mrf.mxu1 }
 0x262   : > { %v3066_v33 = vadd.f32 %v28604_v35, %v2407_v15 }
 0x263   : > { %v30809_v19 = vpop.f32.mrf.mxu1 }
 0x264   : > { %34792 = vst [vmem:[#allocation16_spill] sm:$0xff] %v30809_v19 }
 0x265   : > { %v28607_v16 = vpop.f32.mrf.mxu1 }
 0x266   : > { %v3069_v47 = vadd.f32 %v28607_v16, %v2420_v11 }
 0x267   : > { %v3049_v59 = vpop.f32.mrf.mxu1 }
 0x268   : > { %v3067_v29 = vadd.f32 %v3049_v59, %v2412_v36 }
 0x269   : > { %v28608_v53 = vpop.f32.mrf.mxu1 }
 0x26b   : > { %v30811_v10 = vpop.f32.mrf.mxu1 }
 0x26c   : > { %34793 = vst [vmem:[#allocation21_spill] sm:$0xff] %v30811_v10 }
 0x270   : > { %v6645_v24 = vpop.f32.mrf.mxu0 }
 0x271   : > { %v28619_v0 = vpop.f32.mrf.mxu1  ;;  %v6646_v37 = vadd.f32 %v30818_v60, %v6645_v24 }
 0x272   : > { %v3599_v7 = vadd.f32 %v28619_v0, %v3065_v30  ;;  %v6647_v49 = vpop.f32.mrf.mxu0 }
 0x273   : > { %v3567_v45 = vpop.f32.mrf.mxu1  ;;  %v6691_v62 = vmax.f32 %v6646_v37, 0.0 }
 0x274   : > { %v30824_v22 = vadd.f32 %v3567_v45, %v3063_v46  ;;  %v6648_v43 = vpop.f32.mrf.mxu0 }
 0x275   : > { %v28620_v28 = vpop.f32.mrf.mxu1  ;;  %v6649_v18 = vadd.f32 %v30818_v60, %v6648_v43 }
 0x276   : > { %v30827_v26 = vadd.f32 %v28620_v28, %v3066_v33  ;;  %v6650_v15 = vpop.f32.mrf.mxu0 }
 0x277   : > { %v30829_v25 = vpop.f32.mrf.mxu1  ;;  %v6692_v20 = vmax.f32 %v6649_v18, 0.0 }
 0x278   : > { %34795 = vst [vmem:[#allocation20_spill] sm:$0xff] %v30829_v25  ;;  %v6653_v11 = vpop.f32.mrf.mxu0 }
 0x279   : > { %v6702_v5 = vpack.c.bf16 %v6692_v20, %v6691_v62  ;;  %v27085_v36 = vpack.c.bf16 %v6692_v20, %v6692_v20  ;;  %v6654_v13 = vadd.f32 %v30818_v60, %v6653_v11 }
 0x27a   : > { %v6655_v56 = vpop.f32.mrf.mxu0 }
 0x27b   : > { %v28623_v2 = vpop.f32.mrf.mxu1  ;;  %v6721_v4 = vrot.slane %v6702_v5, %v29572_v50  ;;  %v6728_v23 = vrot.slane %v27085_v36, %v29572_v50  ;;  %v6693_v49 = vmax.f32 %v6654_v13, 0.0 }
 0x27c   : > { %v30831_v41 = vadd.f32 %v28623_v2, %v3069_v47  ;;  %v6656_v44 = vpop.f32.mrf.mxu0 }
 0x27d   : > { %v3583_v9 = vpop.f32.mrf.mxu1  ;;  %v6729_v30 = vcombine.high %v6721_v4, %v6721_v4  ;;  %v6730_v8 = vcombine.high %v6728_v23, %v6728_v23  ;;  %v6737_v46 = vrot.slane %v6721_v4, %v29572_v50  ;;  %v6744_v58 = vrot.slane %v6728_v23, %v29572_v50 }
 0x27e   : > { %v30836_v61 = vadd.f32 %v3583_v9, %v3067_v29  ;;  %v6657_v40 = vadd.f32 %v30818_v60, %v6656_v44  ;;  %v6658_v33 = vpop.f32.mrf.mxu0 }
 0x27f   : > { %v28624_v35 = vpop.f32.mrf.mxu1  ;;  %v6751_v16 = vrot.slane %v6729_v30, %v29572_v50  ;;  %v6758_v47 = vrot.slane %v6730_v8, %v29572_v50  ;;  %v6759_v59 = vcombine.high %v6737_v46, %v6737_v46  ;;  %v6974_v53 = vunpack.i.h.s16 %v6737_v46 }
 0x280   : > { %v6760_v24 = vcombine.high %v6744_v58, %v6744_v58  ;;  %v6982_v0 = vunpack.i.h.s16 %v6744_v58  ;;  %v6694_v1 = vmax.f32 %v6657_v40, 0.0  ;;  %v30845_v45 = vpop.f32.mrf.mxu0  ;;  %v27090_v18 = vpack.i.b16 %v6737_v46, %v6737_v46 }
 0x281   : > { %v30843_v29 = vpop.f32.mrf.mxu1  ;;  %v6761_v37 = vcombine.high %v6751_v16, %v6751_v16  ;;  %v6762_v43 = vcombine.high %v6758_v47, %v6758_v47  ;;  %v6976_v28 = vunpack.i.h.s16 %v6751_v16  ;;  %v6978_v15 = vunpack.i.h.s16 %v6759_v59 }
 0x282   : > { %34796 = vst [vmem:[#allocation22_spill] sm:$0xff] %v30843_v29  ;;  %v27091_v62 = vpack.i.b16 %v6751_v16, %v6974_v53  ;;  %v7059_v20 = vpack.i.b16 %v6982_v0, %v6982_v0  ;;  %v7145_v11 = vcombine.low %v6758_v47, %v6758_v47  ;;  %v6663_v5 = vpop.f32.mrf.mxu0  ;;  %v6703_v4 = vpack.c.bf16 %v6694_v1, %v6693_v49 }
 0x283   : > { %v28635_v36 = vpop.f32.mrf.mxu1  ;;  %v6980_v2 = vunpack.i.h.s16 %v6761_v37  ;;  %v27092_v56 = vpack.i.b16 %v6759_v59, %v6976_v28  ;;  %v27086_v23 = vpack.c.bf16 %v6694_v1, %v6694_v1  ;;  %v27093_v13 = vpack.i.b16 %v6761_v37, %v6978_v15  ;;  %v7539_v5 = vld [vmem:[#allocation3 + $0x8] sm:$0xe] }
 0x284   : > { %v30847_v9 = vadd.f32 %v28635_v36, %v3599_v7  ;;  %v7099_v44 = vcombine.low %v27091_v62, %v27091_v62  ;;  %v7146_v30 = vcombine.low %v7059_v20, %v6760_v24  ;;  %v30849_v8 = vpop.f32.mrf.mxu0  ;;  %v7153_v46 = vrot.slane %v7145_v11, %v34779_v52 }
 0x285   : > { %v27094_v35 = vpack.i.b16 %v6744_v58, %v6980_v2  ;;  %v7100_v40 = vcombine.low %v27090_v18, %v27092_v56  ;;  %v4100_v33 = vpop.f32.mrf.mxu1  ;;  %v6770_v16 = vrot.slane %v6703_v4, %v29572_v50  ;;  %v7129_v59 = vrot.slane %v27093_v13, %v34779_v52  ;;  %v7534_v4 = vld [vmem:[#allocation3] sm:$0xe] }
 0x286   : > { %v7107_v47 = vrot.slane %v7099_v44, %v34779_v52  ;;  %v7160_v53 = vrot.slane %v7146_v30, %v34779_v52  ;;  %v30857_v7 = vadd.f32 %v4100_v33, %v30824_v22  ;;  %v6666_v0 = vpop.f32.mrf.mxu0  ;;  %v6777_v1 = vrot.slane %v27086_v23, %v29572_v50 }
 0x287   : > { %v7114_v24 = vrot.slane %v7100_v40, %v34779_v52  ;;  %v7136_v58 = vrot.slane %v27094_v35, %v34779_v52  ;;  %v28636_v49 = vpop.f32.mrf.mxu1  ;;  %v6778_v37 = vcombine.high %v6770_v16, %v6770_v16  ;;  %v6786_v15 = vrot.slane %v6770_v16, %v29572_v50 }
 0x288   : > { %v7161_v28 = vcombine.low %v7153_v46, %v7160_v53  ;;  %v30863_v18 = vadd.f32 %v28636_v49, %v30827_v26  ;;  %v30866_v62 = vpop.f32.mrf.mxu0  ;;  %v6779_v2 = vcombine.high %v6777_v1, %v6777_v1  ;;  %v6793_v56 = vrot.slane %v6777_v1, %v29572_v50 }
 0x289   : > { %v7115_v22 = vcombine.low %v7107_v47, %v7114_v24  ;;  %v7137_v20 = vcombine.low %v7129_v59, %v7136_v58  ;;  %v30874_v36 = vpop.f32.mrf.mxu1  ;;  %v6800_v23 = vrot.slane %v6778_v37, %v29572_v50  ;;  %v6808_v13 = vcombine.high %v6786_v15, %v6786_v15 }
 0x28a   : > { %34799 = vst [vmem:[#allocation15_spill] sm:$0xff] %v30874_v36  ;;  %v7168_v26 = vrot.slane %v7161_v28, %v34779_v52  ;;  %v7175_v44 = vrot.slane %v6762_v43, %v34779_v52  ;;  %v6671_v30 = vpop.f32.mrf.mxu0  ;;  %v6807_v33 = vrot.slane %v6779_v2, %v29572_v50  ;;  %v6998_v16 = vunpack.i.h.s16 %v6793_v56 }
 0x28b   : > { %v7122_v35 = vrot.slane %v7115_v22, %v34779_v52  ;;  %v7144_v40 = vrot.slane %v7137_v20, %v34779_v52  ;;  %v28639_v46 = vpop.f32.mrf.mxu1  ;;  %v6810_v53 = vcombine.high %v6800_v23, %v6800_v23  ;;  %v6992_v0 = vunpack.i.h.s16 %v6800_v23 }
 0x28c   : > { %v7540_v47 = vsel %vm30870_vm11, %v7168_v26, %v7539_v5  ;;  %v30886_v59 = vadd.f32 %v28639_v46, %v30831_v41  ;;  %v6672_v24 = vpop.f32.mrf.mxu0  ;;  %v6811_v58 = vcombine.high %v6807_v33, %v6807_v33  ;;  %v6994_v49 = vunpack.i.h.s16 %v6808_v13 }
 0x28d   : > { %v7535_v43 = vsel %vm30870_vm11, %v7122_v35, %v7534_v4  ;;  %7538 = vst.msk [vmem:[#allocation3 + $0x4] sm:$0x3] %vm7537_vm10, %v7144_v40  ;;  %7541 = vst [vmem:[#allocation3 + $0x8] sm:$0xe] %v7540_v47  ;;  %v7000_v1 = vunpack.i.h.s16 %v6807_v33  ;;  %v4116_v37 = vpop.f32.mrf.mxu1  ;;  %v6996_v28 = vunpack.i.h.s16 %v6810_v53  ;;  %v27095_v22 = vpack.i.b16 %v6800_v23, %v6800_v23 }
 0x28e   : > { %7536 = vst [vmem:[#allocation3] sm:$0xe] %v7535_v43  ;;  %v27096_v20 = vpack.i.b16 %v6808_v13, %v6992_v0  ;;  %v27099_v5 = vpack.i.b16 %v6807_v33, %v6998_v16  ;;  %v6674_v41 = vpop.f32.mrf.mxu0  ;;  %v27097_v2 = vpack.i.b16 %v6810_v53, %v6994_v49  ;;  %v7182_v30 = vrot.slane %v6786_v15, %v34779_v52 }
 0x28f   : > { %v7069_v26 = vpack.i.b16 %v7000_v1, %v7000_v1  ;;  %v27115_v46 = vcombine.high %v6793_v56, %v6793_v56  ;;  %v28640_v48 = vpop.f32.mrf.mxu1  ;;  %v27098_v4 = vpack.i.b16 %v6793_v56, %v6996_v28  ;;  %v4134_v40 = vadd.f32 %v4116_v37, %v30836_v61  ;;  %v7547_v28 = vld [vmem:[#allocation3 + $0x18] sm:$0xe] }
 0x290   : > { %v7191_v35 = vcombine.low %v27096_v20, %v27096_v20  ;;  %v7183_v47 = vcombine.low %v7175_v44, %v7182_v30  ;;  %v7192_v57 = vcombine.low %v27095_v22, %v27097_v2  ;;  %v6677_v27 = vpop.f32.mrf.mxu0  ;;  %v7228_v13 = vrot.slane %v27099_v5, %v34779_v52 }
 0x291   : > { %v7238_v31 = vcombine.low %v7069_v26, %v6811_v58  ;;  %v7221_v23 = vrot.slane %v27098_v4, %v34779_v52  ;;  %v6662_v33 = vadd.f32 %v30818_v60, %v30845_v45  ;;  %v30898_v15 = vpop.f32.mrf.mxu1  ;;  %v7245_v61 = vrot.slane %v27115_v46, %v34779_v52  ;;  %v7543_v45 = vld [vmem:[#allocation3 + $0x10] sm:$0xe] }
 0x292   : > { %v7199_v43 = vrot.slane %v7191_v35, %v34779_v52  ;;  %34800 = vst [vmem:[#allocation6_spill] sm:$0xff] %v30898_v15  ;;  %v7190_v48 = vrot.slane %v7183_v47, %v34779_v52  ;;  %v7206_v56 = vrot.slane %v7192_v57, %v34779_v52  ;;  %v6679_v16 = vpop.f32.mrf.mxu0  ;;  %v6665_v0 = vadd.f32 %v30818_v60, %v30849_v8  ;;  %v30915_v8 = vld [vmem:[%s34687_s7 + $0xb8] sm:$0xff]  }
 0x293   : > { %v7252_v44 = vrot.slane %v7238_v31, %v34779_v52  ;;  %v7229_v53 = vcombine.low %v7221_v23, %v7228_v13  ;;  %v4777_v1 = vadd.f32 %v30745_v3, %v30847_v9  ;;  %v6695_v22 = vmax.f32 %v6662_v33, 0.0  ;;  %v28667_v20 = vpop.f32.mrf.mxu1  ;;  %28805 = vmatprep.subr.bf16.mxu0 %v30915_v8 }
 0x294   : > { %v7207_v58 = vcombine.low %v7199_v43, %v7206_v56  ;;  %7542 = vst.msk [vmem:[#allocation3 + $0xc] sm:$0x3] %vm7537_vm10, %v7190_v48  ;;  %v6680_v37 = vpop.f32.mrf.mxu0  ;;  %v6696_v31 = vmax.f32 %v6665_v0, 0.0  ;;  %v4775_v5 = vadd.f32 %v30747_v39, %v30857_v7  ;;  %v6670_v9 = vadd.f32 %v30818_v60, %v30866_v62 }
 0x295   : > { %v7253_v49 = vcombine.low %v7245_v61, %v7252_v44  ;;  %v7236_v57 = vrot.slane %v7229_v53, %v34779_v52  ;;  %v30919_v3 = vadd.f32 %v28667_v20, %v4777_v1  ;;  %v5279_v39 = vpop.f32.mrf.mxu1  ;;  %v4778_v7 = vadd.f32 %v30753_v55, %v30863_v18 }
 0x296   : > { %v7214_v41 = vrot.slane %v7207_v58, %v34779_v52  ;;  %v6682_v26 = vpop.f32.mrf.mxu0  ;;  %v6704_v30 = vpack.c.bf16 %v6696_v31, %v6695_v22  ;;  %v27087_v46 = vpack.c.bf16 %v6696_v31, %v6696_v31  ;;  %v6673_v4 = vadd.f32 %v30818_v60, %v6672_v24 }
 0x297   : > { %v7260_v2 = vrot.slane %v7253_v49, %v34779_v52  ;;  %7546 = vst.msk [vmem:[#allocation3 + $0x14] sm:$0x3] %vm7537_vm10, %v7236_v57  ;;  %v30932_v62 = vadd.f32 %v5279_v39, %v4775_v5  ;;  %v30935_v43 = vadd.f32 %v30818_v60, %v6677_v27  ;;  %v28668_v24 = vpop.f32.mrf.mxu1  ;;  %v4781_v13 = vadd.f32 %v30759_v63, %v30886_v59 }
 0x298   : > { %v7544_v35 = vsel %vm30870_vm11, %v7214_v41, %v7543_v45  ;;  %v30937_v23 = vpop.f32.mrf.mxu0  ;;  %v6819_v55 = vrot.slane %v6704_v30, %v29572_v50  ;;  %v6826_v18 = vrot.slane %v27087_v46, %v29572_v50  ;;  %v6698_v33 = vmax.f32 %v6673_v4, 0.0 }
 0x299   : > { %v7548_v47 = vsel %vm30870_vm11, %v7260_v2, %v7547_v28  ;;  %7545 = vst [vmem:[#allocation3 + $0x10] sm:$0xe] %v7544_v35  ;;  %v30943_v48 = vadd.f32 %v28668_v24, %v4778_v7  ;;  %v6697_v56 = vmax.f32 %v6670_v9, 0.0  ;;  %v30946_v61 = vadd.f32 %v30763_v17, %v4134_v40  ;;  %v30951_v49 = vpop.f32.mrf.mxu1 }
 0x29a   : > { %7549 = vst [vmem:[#allocation3 + $0x18] sm:$0xe] %v7548_v47  ;;  %v6681_v27 = vadd.f32 %v30818_v60, %v6680_v37  ;;  %v6687_v44 = vpop.f32.mrf.mxu0  ;;  %v6827_v16 = vcombine.high %v6819_v55, %v6819_v55  ;;  %v6828_v53 = vcombine.high %v6826_v18, %v6826_v18  ;;  %v6835_v0 = vrot.slane %v6819_v55, %v29572_v50 }
 0x29b   : > { %v6842_v58 = vrot.slane %v6826_v18, %v29572_v50  ;;  %34801 = vst [vmem:[#allocation7_spill] sm:$0xff] %v30951_v49  ;;  %v6705_v45 = vpack.c.bf16 %v6698_v33, %v6697_v56  ;;  %v27088_v63 = vpack.c.bf16 %v6698_v33, %v6698_v33  ;;  %v6699_v59 = vmax.f32 %v30935_v43, 0.0 }
 0x29c   : > { %v30954_v1 = vmax.f32 %v6681_v27, 0.0  ;;  %v6688_v57 = vpop.f32.mrf.mxu0  ;;  %v6849_v17 = vrot.slane %v6827_v16, %v29572_v50  ;;  %v6856_v40 = vrot.slane %v6828_v53, %v29572_v50  ;;  %v6857_v37 = vcombine.high %v6835_v0, %v6835_v0 }
 0x29d   : > { %v6858_v28 = vcombine.high %v6842_v58, %v6842_v58  ;;  %v7014_v22 = vunpack.i.h.s16 %v6842_v58  ;;  %v7267_v20 = vrot.slane %v6835_v0, %v34779_v52  ;;  %v6868_v31 = vrot.slane %v6705_v45, %v29572_v50  ;;  %v28671_v46 = vpop.f32.mrf.mxu1 }
 0x29e   : > { %v6875_v5 = vrot.slane %v27088_v63, %v29572_v50  ;;  %v6689_v41 = vpop.f32.mrf.mxu0  ;;  %v6859_v2 = vcombine.high %v6849_v17, %v6849_v17  ;;  %v7010_v9 = vunpack.i.h.s16 %v6857_v37  ;;  %v7016_v26 = vunpack.i.h.s16 %v6856_v40 }
 0x29f   : > { %v27100_v30 = vpack.i.b16 %v6857_v37, %v6857_v37  ;;  %v27103_v39 = vpack.i.b16 %v6856_v40, %v7014_v22  ;;  %v7274_v7 = vrot.slane %v6849_v17, %v34779_v52  ;;  %v27116_v4 = vcombine.high %v6856_v40, %v6856_v40  ;;  %v5295_v33 = vpop.f32.mrf.mxu1 }
 0x2a0   : > { %v30962_v35 = vadd.f32 %v28671_v46, %v4781_v13  ;;  %v7012_v47 = vunpack.i.h.s16 %v6859_v2  ;;  %v27101_v55 = vpack.i.b16 %v6859_v2, %v7010_v9  ;;  %v27104_v18 = vpack.i.b16 %v6858_v28, %v7016_v26 }
 0x2a1   : > { %v6876_v24 = vcombine.high %v6868_v31, %v6868_v31  ;;  %v7275_v56 = vcombine.low %v7267_v20, %v7274_v7  ;;  %v7313_v27 = vrot.slane %v27103_v39, %v34779_v52  ;;  %v6877_v44 = vcombine.high %v6875_v5, %v6875_v5  ;;  %v28672_v57 = vpop.f32.mrf.mxu1 }
 0x2a2   : > { %v6884_v16 = vrot.slane %v6868_v31, %v29572_v50  ;;  %v27102_v53 = vpack.i.b16 %v6842_v58, %v7012_v47  ;;  %v7283_v0 = vcombine.low %v27101_v55, %v27101_v55  ;;  %v7320_v45 = vrot.slane %v27104_v18, %v34779_v52 }
 0x2a3   : > { %v6891_v63 = vrot.slane %v6875_v5, %v29572_v50  ;;  %v7282_v13 = vrot.slane %v7275_v56, %v34779_v52  ;;  %v6898_v17 = vrot.slane %v6876_v24, %v29572_v50  ;;  %v6905_v40 = vrot.slane %v6877_v44, %v29572_v50 }
 0x2a4   : > { %v6906_v37 = vcombine.high %v6884_v16, %v6884_v16  ;;  %v7284_v22 = vcombine.low %v27100_v30, %v27102_v53  ;;  %v7291_v20 = vrot.slane %v7283_v0, %v34779_v52  ;;  %v7321_v41 = vcombine.low %v7313_v27, %v7320_v45 }
 0x2a5   : > { %v6907_v2 = vcombine.high %v6891_v63, %v6891_v63  ;;  %7550 = vst.msk [vmem:[#allocation3 + $0x1c] sm:$0x3] %vm7537_vm10, %v7282_v13  ;;  %v6908_v58 = vcombine.high %v6898_v17, %v6898_v17  ;;  %v30973_v31 = vcombine.high %v6905_v40, %v6905_v40  ;;  %v7018_v9 = vunpack.i.h.s16 %v6858_v28  ;;  %v7551_v28 = vld [vmem:[#allocation3 + $0x20] sm:$0xe] }
 0x2a6   : > { %v7030_v5 = vunpack.i.h.s16 %v6891_v63  ;;  %v7298_v26 = vrot.slane %v7284_v22, %v34779_v52  ;;  %v7328_v46 = vrot.slane %v7321_v41, %v34779_v52  ;;  %v7032_v39 = vunpack.i.h.s16 %v6905_v40  ;;  %v30985_v41 = vpop.f32.mrf.mxu1 }
 0x2a7   : > { %v7034_v7 = vunpack.i.h.s16 %v6907_v2  ;;  %v7028_v47 = vunpack.i.h.s16 %v6908_v58  ;;  %v7079_v55 = vpack.i.b16 %v7018_v9, %v7018_v9  ;;  %v27105_v30 = vpack.i.b16 %v6908_v58, %v6908_v58  ;;  %34802 = vst [vmem:[#allocation23_spill] sm:$0xff] %v30985_v41 }
 0x2a8   : > { %v27107_v18 = vpack.i.b16 %v6905_v40, %v7030_v5  ;;  %v7299_v24 = vcombine.low %v7291_v20, %v7298_v26  ;;  %7554 = vst.msk [vmem:[#allocation3 + $0x24] sm:$0x3] %vm7537_vm10, %v7328_v46  ;;  %v27108_v56 = vpack.i.b16 %v6907_v2, %v7032_v39  ;;  %v7337_v44 = vrot.slane %v27116_v4, %v34779_v52  ;;  %v7555_v39 = vld [vmem:[#allocation3 + $0x28] sm:$0xe] }
 0x2a9   : > { %v27109_v27 = vpack.i.b16 %v30973_v31, %v7034_v7  ;;  %v27106_v53 = vpack.i.b16 %v6891_v63, %v7028_v47  ;;  %v7330_v0 = vcombine.low %v7079_v55, %v6884_v16  ;;  %v7359_v45 = vrot.slane %v6898_v17, %v34779_v52 }
 0x2aa   : > { %v7366_v57 = vrot.slane %v6906_v37, %v34779_v52  ;;  %v7306_v13 = vrot.slane %v7299_v24, %v34779_v52  ;;  %v7376_v22 = vcombine.low %v27105_v30, %v27107_v18  ;;  %v7405_v40 = vrot.slane %v27108_v56, %v34779_v52  ;;  %v7559_v18 = vld [vmem:[#allocation3 + $0x30] sm:$0xe] }
 0x2ab   : > { %v7412_v20 = vrot.slane %v27109_v27, %v34779_v52  ;;  %v7344_v2 = vrot.slane %v7330_v0, %v34779_v52  ;;  %v7375_v4 = vcombine.low %v27106_v53, %v27106_v53  ;;  %v30989_v63 = vadd.f32 %v5295_v33, %v30946_v61 }
 0x2ac   : > { %v7367_v58 = vcombine.low %v7359_v45, %v7366_v57  ;;  %v7552_v16 = vsel %vm30870_vm11, %v7306_v13, %v7551_v28  ;;  %v7390_v17 = vrot.slane %v7376_v22, %v34779_v52  ;;  %v5844_v9 = vadd.f32 %v30767_v34, %v30919_v3 }
 0x2ad   : > { %v7413_v37 = vcombine.low %v7405_v40, %v7412_v20  ;;  %7553 = vst [vmem:[#allocation3 + $0x20] sm:$0xe] %v7552_v16  ;;  %v7345_v5 = vcombine.low %v7337_v44, %v7344_v2  ;;  %v7383_v46 = vrot.slane %v7375_v4, %v34779_v52  ;;  %v6706_v61 = vpack.c.bf16 %v30954_v1, %v6699_v59  ;;  %v28699_v7 = vpop.f32.mrf.mxu1 }
 0x2ae   : > { %v7374_v26 = vrot.slane %v7367_v58, %v34779_v52  ;;  %v27089_v47 = vpack.c.bf16 %v30954_v1, %v30954_v1  ;;  %v7036_v55 = vunpack.i.h.s16 %v30973_v31  ;;  %v31007_v30 = vadd.f32 %v28699_v7, %v5844_v9 }
 0x2af   : > { %v7420_v33 = vrot.slane %v7413_v37, %v34779_v52  ;;  %v7352_v34 = vrot.slane %v7345_v5, %v34779_v52  ;;  %v7391_v3 = vcombine.low %v7383_v46, %v7390_v17  ;;  %v6917_v43 = vrot.slane %v6706_v61, %v29572_v50  ;;  %v6457_v1 = vpop.f32.mrf.mxu1 }
 0x2b0   : > { %7558 = vst.msk [vmem:[#allocation3 + $0x2c] sm:$0x3] %vm7537_vm10, %v7374_v26  ;;  %34803 = vst [vmem:[#allocation24_spill] sm:$0xff] %v31007_v30  ;;  %v6924_v59 = vrot.slane %v27089_v47, %v29572_v50  ;;  %v5842_v24 = vadd.f32 %v30771_v14, %v30932_v62  ;;  %v5845_v44 = vadd.f32 %v30775_v54, %v30943_v48 }
 0x2b1   : > { %7562 = vst.msk [vmem:[#allocation3 + $0x34] sm:$0x3] %vm7537_vm10, %v7420_v33  ;;  %v7398_v31 = vrot.slane %v7391_v3, %v34779_v52  ;;  %v7556_v56 = vsel %vm30870_vm11, %v7352_v34, %v7555_v39  ;;  %v6925_v27 = vcombine.high %v6917_v43, %v6917_v43  ;;  %v6933_v53 = vrot.slane %v6917_v43, %v29572_v50  ;;  %v28700_v57 = vpop.f32.mrf.mxu1 }
 0x2b2   : > { %7557 = vst [vmem:[#allocation3 + $0x28] sm:$0xe] %v7556_v56  ;;  %v6926_v28 = vcombine.high %v6924_v59, %v6924_v59  ;;  %v6940_v0 = vrot.slane %v6924_v59, %v29572_v50  ;;  %v31021_v45 = vadd.f32 %v6457_v1, %v5842_v24  ;;  %v7089_v13 = vpack.i.b16 %v7036_v55, %v7036_v55 }
 0x2b3   : > { %v7560_v14 = vsel %vm30870_vm11, %v7398_v31, %v7559_v18  ;;  %v6947_v62 = vrot.slane %v6925_v27, %v29572_v50  ;;  %v31026_v22 = vadd.f32 %v28700_v57, %v5845_v44  ;;  %v6955_v48 = vcombine.high %v6933_v53, %v6933_v53  ;;  %v31029_v20 = vpop.f32.mrf.mxu1  ;;  %v7563_v18 = vld [vmem:[#allocation3 + $0x38] sm:$0xe] }
 0x2b4   : > { %34804 = vst [vmem:[#allocation25_spill] sm:$0xff] %v31021_v45  ;;  %7561 = vst [vmem:[#allocation3 + $0x30] sm:$0xe] %v7560_v14  ;;  %v6954_v54 = vrot.slane %v6926_v28, %v29572_v50  ;;  %v7046_v40 = vunpack.i.h.s16 %v6940_v0  ;;  %v7421_v58 = vcombine.low %v6933_v53, %v6933_v53  ;;  %v6956_v16 = vcombine.high %v6940_v0, %v6940_v0 }
 0x2b5   : > { %34805 = vst [vmem:[#allocation26_spill] sm:$0xff] %v31026_v22  ;;  %34806 = vst [vmem:[#allocation27_spill] sm:$0xff] %v31029_v20  ;;  %v6957_v2 = vcombine.high %v6947_v62, %v6947_v62  ;;  %v7422_v4 = vcombine.low %v7089_v13, %v6947_v62  ;;  %v7451_v26 = vrot.slane %v6955_v48, %v34779_v52  ;;  %v27117_v53 = vld.sshfl [vmem:[#allocation3] sm:$0x33 pattern:$0x75316420] }
 0x2b6   : > { %v7048_v17 = vunpack.i.h.s16 %v6954_v54  ;;  %v27111_v37 = vpack.i.b16 %v6954_v54, %v7046_v40  ;;  %v7429_v9 = vrot.slane %v7421_v58, %v34779_v52  ;;  %v27110_v61 = vpack.i.b16 %v6940_v0, %v6940_v0  ;;  %v27118_v48 = vld.sshfl [vmem:[#allocation3 + $0x4] sm:$0x1 pattern:$0x75316420] }
 0x2b7   : > { %v7436_v5 = vrot.slane %v7422_v4, %v34779_v52  ;;  %v7458_v46 = vrot.slane %v6957_v2, %v34779_v52  ;;  %v28703_v7 = vpop.f32.mrf.mxu1  ;;  %v6686_v34 = vadd.f32 %v30818_v60, %v30937_v23  ;;  %v7050_v3 = vunpack.i.h.s16 %v6956_v16  ;;  %v27119_v58 = vld.sshfl [vmem:[#allocation3 + $0x8] sm:$0x33 pattern:$0x75316420] }
 0x2b8   : > { %v27112_v33 = vpack.i.b16 %v6956_v16, %v7048_v17  ;;  %v7467_v39 = vcombine.low %v27111_v37, %v27111_v37  ;;  %v6958_v56 = vcombine.high %v6954_v54, %v6954_v54  ;;  %v5848_v28 = vadd.f32 %v30794_v6, %v30962_v35  ;;  %v7567_v54 = vld [vmem:[#allocation3 + $0x40] sm:$0xe] }
 0x2b9   : > { %v7437_v47 = vcombine.low %v7429_v9, %v7436_v5  ;;  %v7459_v55 = vcombine.low %v7451_v26, %v7458_v46  ;;  %v6473_v59 = vpop.f32.mrf.mxu1  ;;  %v6701_v31 = vmax.f32 %v6686_v34, 0.0  ;;  %v5846_v60 = vadd.f32 %v30796_v32, %v30989_v63 }
 0x2ba   : > { %v7468_v43 = vcombine.low %v27110_v61, %v27112_v33  ;;  %v7475_v27 = vrot.slane %v7467_v39, %v34779_v52  ;;  %v31048_v62 = vadd.f32 %v28703_v7, %v5848_v28  ;;  %v7052_v35 = vunpack.i.h.s16 %v6958_v56 }
 0x2bb   : > { %v7444_v24 = vrot.slane %v7437_v47, %v34779_v52  ;;  %v7466_v1 = vrot.slane %v7459_v55, %v34779_v52  ;;  %v28704_v23 = vpop.f32.mrf.mxu1  ;;  %v6707_v57 = vpack.c.bf16 %v6701_v31, %v6701_v31  ;;  %v31050_v13 = vadd.f32 %v6473_v59, %v5846_v60  ;;  %v27266_v47 = vld.sshfl [vmem:[#allocation3] sm:$0x32 pattern:$0x75316420] }
 0x2bc   : > { %v7482_v44 = vrot.slane %v7468_v43, %v34779_v52  ;;  %34807 = vst [vmem:[#allocation28_spill] sm:$0xff] %v31048_v62  ;;  %v7614_v32 = vcombine.high %v27117_v53, %v27117_v53  ;;  %v31054_v63 = vrot.slane %v27117_v53, %v29572_v50  ;;  %v27113_v2 = vpack.i.b16 %v6958_v56, %v7050_v3  ;;  %v27268_v53 = vld.sshfl [vmem:[#allocation3 + $0x8] sm:$0x32 pattern:$0x75316420] }
 0x2bd   : > { %v7564_v0 = vsel %vm30870_vm11, %v7444_v24, %v7563_v18  ;;  %7566 = vst.msk [vmem:[#allocation3 + $0x3c] sm:$0x3] %vm7537_vm10, %v7466_v1  ;;  %34808 = vst [vmem:[#allocation29_spill] sm:$0xff] %v31050_v13  ;;  %v6965_v6 = vrot.slane %v6707_v57, %v29572_v50  ;;  %v31066_v9 = vrot.slane %v27118_v48, %v29572_v50 }
 0x2be   : > { %v7483_v14 = vcombine.low %v7475_v27, %v7482_v44  ;;  %7565 = vst [vmem:[#allocation3 + $0x38] sm:$0xe] %v7564_v0  ;;  %v31059_v16 = vrot.slane %v7614_v32, %v29572_v50  ;;  %v7629_v17 = vcombine.high %v31054_v63, %v31054_v63  ;;  %v7652_v46 = vcombine.high %v27119_v58, %v27119_v58  ;;  %v27267_v18 = vld.sshfl [vmem:[#allocation3 + $0x4] sm:$0x11 pattern:$0x75316420] }
 0x2bf   : > { %v6972_v4 = vrot.slane %v6965_v6, %v29572_v50  ;;  %v31071_v61 = vrot.slane %v27119_v58, %v29572_v50  ;;  %v7497_v33 = vrot.slane %v27113_v2, %v34779_v52  ;;  %v7950_v39 = vunpack.i.h.s16 %v31054_v63  ;;  %v27270_v2 = vld.sshfl [vmem:[#allocation3 + $0x10] sm:$0x32 pattern:$0x75316420] }
 0x2c0   : > { %v7490_v40 = vrot.slane %v7483_v14, %v34779_v52  ;;  %v7630_v26 = vcombine.high %v31059_v16, %v31059_v16  ;;  %v7952_v7 = vunpack.i.h.s16 %v31059_v16  ;;  %v7954_v11 = vunpack.i.h.s16 %v7629_v17 }
 0x2c1   : > { %v27114_v5 = vpack.i.b16 %v6972_v4, %v7052_v35  ;;  %v31078_v34 = vrot.slane %v7652_v46, %v29572_v50  ;;  %v34719_v43 = vunpack.i.h.s16 %v31071_v61  ;;  %v8038_v59 = vunpack.i.h.s16 %v31066_v9  ;;  %v27269_v35 = vld.sshfl [vmem:[#allocation3 + $0xc] sm:$0x11 pattern:$0x75316420] }
 0x2c2   : > { %v7568_v37 = vsel %vm30870_vm11, %v7490_v40, %v7567_v54  ;;  %v7956_v3 = vunpack.i.h.s16 %v7630_v26  ;;  %v27143_v24 = vpack.i.b16 %v31059_v16, %v7950_v39  ;;  %v27144_v1 = vpack.i.b16 %v7629_v17, %v7952_v7 }
 0x2c3   : > { %7569 = vst [vmem:[#allocation3 + $0x40] sm:$0xe] %v7568_v37  ;;  %v7504_v55 = vrot.slane %v27114_v5, %v34779_v52  ;;  %v27145_v31 = vpack.i.b16 %v7630_v26, %v7954_v11  ;;  %v27163_v44 = vcombine.high %v31071_v61, %v31078_v34  ;;  %v9916_v28 = vcombine.high %v27266_v47, %v27266_v47 }
 0x2c4   : > { %v27146_v27 = vpack.i.b16 %v31066_v9, %v7956_v3  ;;  %v8060_v60 = vpack.i.b16 %v34719_v43, %v8038_v59  ;;  %v8097_v23 = vcombine.low %v27143_v24, %v27144_v1  ;;  %v9923_v0 = vrot.slane %v27266_v47, %v29572_v50  ;;  %v27127_v43 = vld.sshfl [vmem:[#allocation3 + $0x28] sm:$0x33 pattern:$0x75316420] }
 0x2c5   : > { %v7505_v56 = vcombine.low %v7497_v33, %v7504_v55  ;;  %v9940_v57 = vcombine.high %v27267_v18, %v27267_v18  ;;  %v8128_v6 = vrot.slane %v27163_v44, %v29572_v50  ;;  %v9930_v48 = vrot.slane %v9916_v28, %v29572_v50  ;;  %v31266_v41 = vld.sshfl [vmem:[#allocation3 + $0x38] sm:$0x33 pattern:$0x75316420] }
 0x2c6   : > { %v8098_v54 = vcombine.low %v27145_v31, %v27146_v27  ;;  %v8099_v32 = vcombine.low %v8060_v60, %v31078_v34  ;;  %v8107_v40 = vrot.slane %v8097_v23, %v29572_v50  ;;  %v9931_v58 = vcombine.high %v9923_v0, %v9923_v0  ;;  %v27120_v0 = vld.sshfl [vmem:[#allocation3 + $0xc] sm:$0x1 pattern:$0x75316420] }
 0x2c7   : > { %v7512_v14 = vrot.slane %v7505_v56, %v34779_v52  ;;  %v9947_v4 = vrot.slane %v27267_v18, %v29572_v50  ;;  %v9932_v37 = vcombine.high %v9930_v48, %v9930_v48  ;;  %v9954_v5 = vrot.slane %v9940_v57, %v29572_v50 }
 0x2c8   : > { %v8114_v17 = vrot.slane %v8098_v54, %v29572_v50  ;;  %v9962_v26 = vcombine.high %v27268_v53, %v27268_v53  ;;  %v8121_v46 = vrot.slane %v8099_v32, %v29572_v50  ;;  %v9969_v33 = vrot.slane %v27268_v53, %v29572_v50 }
 0x2c9   : > { %7570 = vst.msk [vmem:[#allocation3 + $0x44] sm:$0x3] %vm7537_vm10, %v7512_v14  ;;  %v9986_v39 = vcombine.high %v27269_v35, %v27269_v35  ;;  %v9993_v7 = vrot.slane %v27269_v35, %v29572_v50  ;;  %v10008_v55 = vcombine.high %v27270_v2, %v27270_v2  ;;  %v10015_v3 = vrot.slane %v27270_v2, %v29572_v50  ;;  %v27121_v35 = vld.sshfl [vmem:[#allocation3 + $0x10] sm:$0x33 pattern:$0x75316420] }
 0x2ca   : > { %v8129_v11 = vcombine.low %v8107_v40, %v8114_v17  ;;  %v9976_v47 = vrot.slane %v9962_v26, %v29572_v50  ;;  %v8130_v18 = vcombine.low %v8121_v46, %v8128_v6  ;;  %v9977_v59 = vcombine.high %v9969_v33, %v9969_v33  ;;  %v27122_v17 = vld.sshfl [vmem:[#allocation3 + $0x14] sm:$0x1 pattern:$0x75316420] }
 0x2cb   : > { %v31104_v24 = vrot.slane %v9986_v39, %v29572_v50  ;;  %v10323_v1 = vunpack.i.h.s16 %v9930_v48  ;;  %v10022_v27 = vrot.slane %v10008_v55, %v29572_v50  ;;  %v31108_v44 = vcombine.high %v10015_v3, %v10015_v3  ;;  %v27123_v55 = vld.sshfl [vmem:[#allocation3 + $0x18] sm:$0x33 pattern:$0x75316420] }
 0x2cc   : > { %v8137_v31 = vrot.slane %v8129_v11, %v29572_v50  ;;  %v9978_v56 = vcombine.high %v9976_v47, %v9976_v47  ;;  %v8144_v28 = vrot.slane %v8130_v18, %v29572_v50  ;;  %v10325_v60 = vunpack.i.h.s16 %v9931_v58  ;;  %v27133_v19 = vld.sshfl [vmem:[#allocation3 + $0x40] sm:$0x33 pattern:$0x75316420] }
 0x2cd   : > { %v10327_v23 = vunpack.i.h.s16 %v9932_v37  ;;  %v10329_v53 = vunpack.i.h.s16 %v9947_v4  ;;  %v10331_v57 = vunpack.i.h.s16 %v9954_v5  ;;  %v10332_v14 = vunpack.i.h.s16 %v9976_v47 }
 0x2ce   : > { %v10341_v54 = vunpack.i.h.s16 %v10022_v27  ;;  %v27292_v6 = vpack.i.b16 %v9931_v58, %v10323_v1  ;;  %v8145_v32 = vcombine.low %v8137_v31, %v8144_v28  ;;  %v27293_v48 = vpack.i.b16 %v9932_v37, %v10325_v60 }
 0x2cf   : > { %v27294_v40 = vpack.i.b16 %v9947_v4, %v10327_v23  ;;  %v27295_v2 = vpack.i.b16 %v9954_v5, %v10329_v53  ;;  %v10417_v26 = vpack.i.b16 %v10332_v14, %v10331_v57  ;;  %v10457_v33 = vcombine.low %v9978_v56, %v9993_v7 }
 0x2d0   : > { %v31112_v46 = vpack.i.b16 %v31108_v44, %v10341_v54  ;;  %v31115_v39 = vrot.slane %v27120_v0, %v29572_v50  ;;  %28713 = vmatprep.mubr.msk.bf16.mxu1 %vm2062_vm5, %v8145_v32  ;;  %v10454_v11 = vcombine.low %v27292_v6, %v27293_v48  ;;  %v7690_v58 = vcombine.high %v27121_v35, %v27121_v35 }
 0x2d1   : > { %v10455_v47 = vcombine.low %v27294_v40, %v27295_v2  ;;  %v31119_v3 = vrot.slane %v27121_v35, %v29572_v50  ;;  %v10456_v4 = vcombine.low %v10417_v26, %v9977_v59  ;;  %v10485_v37 = vrot.slane %v10457_v33, %v29572_v50 }
 0x2d2   : > { %v10503_v5 = vcombine.low %v31104_v24, %v31112_v46  ;;  %v31125_v7 = vrot.slane %v27122_v17, %v29572_v50  ;;  %v10464_v18 = vrot.slane %v10454_v11, %v29572_v50  ;;  %v31130_v31 = vrot.slane %v7690_v58, %v29572_v50  ;;  %v27271_v17 = vld.sshfl [vmem:[#allocation3 + $0x14] sm:$0x11 pattern:$0x75316420] }
 0x2d3   : > { %v10471_v1 = vrot.slane %v10455_v47, %v29572_v50  ;;  %v31134_v56 = vcombine.high %v31119_v3, %v31119_v3  ;;  %v10478_v59 = vrot.slane %v10456_v4, %v29572_v50  ;;  %v7728_v28 = vcombine.high %v27123_v55, %v27123_v55  ;;  %v27272_v47 = vld.sshfl [vmem:[#allocation3 + $0x18] sm:$0x32 pattern:$0x75316420] }
 0x2d4   : > { %v31138_v60 = vrot.slane %v27123_v55, %v29572_v50  ;;  %v7968_v24 = vunpack.i.h.s16 %v31119_v3  ;;  %v31143_v53 = vcombine.high %v31130_v31, %v31130_v31  ;;  %v7970_v0 = vunpack.i.h.s16 %v31130_v31 }
 0x2d5   : > { %v10486_v23 = vcombine.low %v10464_v18, %v10471_v1  ;;  %v7972_v57 = vunpack.i.h.s16 %v31134_v56  ;;  %v10487_v14 = vcombine.low %v10478_v59, %v10485_v37  ;;  %v31148_v54 = vrot.slane %v7728_v28, %v29572_v50 }
 0x2d6   : > { %v31152_v6 = vcombine.high %v31138_v60, %v31138_v60  ;;  %v34718_v35 = vunpack.i.h.s16 %v31138_v60  ;;  %v7974_v48 = vunpack.i.h.s16 %v31143_v53  ;;  %v8040_v40 = vunpack.i.h.s16 %v31125_v7 }
 0x2d7   : > { %v10494_v32 = vrot.slane %v10486_v23, %v29572_v50  ;;  %v27147_v2 = vpack.i.b16 %v31130_v31, %v7968_v24  ;;  %v10501_v26 = vrot.slane %v10487_v14, %v29572_v50  ;;  %v27148_v46 = vpack.i.b16 %v31134_v56, %v7970_v0 }
 0x2d8   : > { %v27149_v33 = vpack.i.b16 %v31143_v53, %v7972_v57  ;;  %v8149_v11 = vcombine.low %v31148_v54, %v31152_v6  ;;  %v27150_v55 = vpack.i.b16 %v31125_v7, %v7974_v48  ;;  %v8069_v58 = vpack.i.b16 %v34718_v35, %v8040_v40 }
 0x2d9   : > { %v8146_v4 = vcombine.low %v31115_v39, %v27147_v2  ;;  %v10024_v37 = vcombine.high %v10022_v27, %v10022_v27  ;;  %v10502_v18 = vcombine.low %v10494_v32, %v10501_v26  ;;  %v10032_v28 = vcombine.high %v27271_v17, %v27271_v17  ;;  %v27124_v32 = vld.sshfl [vmem:[#allocation3 + $0x1c] sm:$0x1 pattern:$0x75316420] }
 0x2da   : > { %v8147_v1 = vcombine.low %v27148_v46, %v27149_v33  ;;  %v8177_v59 = vrot.slane %v8149_v11, %v29572_v50  ;;  %v8148_v24 = vcombine.low %v27150_v55, %v8069_v58  ;;  %v10039_v0 = vrot.slane %v27271_v17, %v29572_v50  ;;  %v27126_v11 = vld.sshfl [vmem:[#allocation3 + $0x24] sm:$0x1 pattern:$0x75316420] }
 0x2db   : > { %v8156_v23 = vrot.slane %v8146_v4, %v29572_v50  ;;  %v10054_v57 = vcombine.high %v27272_v47, %v27272_v47  ;;  %28773 = vmatprep.mubr.msk.bf16.mxu0 %vm2062_vm5, %v10502_v18  ;;  %v10046_v48 = vrot.slane %v10032_v28, %v29572_v50  ;;  %v10061_v40 = vrot.slane %v27272_v47, %v29572_v50  ;;  %v27125_v18 = vld.sshfl [vmem:[#allocation3 + $0x20] sm:$0x33 pattern:$0x75316420] }
 0x2dc   : > { %v8163_v14 = vrot.slane %v8147_v1, %v29572_v50  ;;  %v10343_v27 = vunpack.i.h.s16 %v31108_v44  ;;  %v8170_v2 = vrot.slane %v8148_v24, %v29572_v50  ;;  %v10345_v46 = vunpack.i.h.s16 %v10024_v37 }
 0x2dd   : > { %v10068_v26 = vrot.slane %v10054_v57, %v29572_v50  ;;  %v10347_v33 = vunpack.i.h.s16 %v10039_v0  ;;  %v10349_v55 = vunpack.i.h.s16 %v10046_v48  ;;  %v10513_v4 = vrot.slane %v10503_v5, %v29572_v50 }
 0x2de   : > { %v8178_v17 = vcombine.low %v8156_v23, %v8163_v14  ;;  %v27297_v58 = vpack.i.b16 %v10024_v37, %v10343_v27  ;;  %v8179_v1 = vcombine.low %v8170_v2, %v8177_v59  ;;  %v27298_v35 = vpack.i.b16 %v10039_v0, %v10345_v46 }
 0x2df   : > { %v10350_v28 = vunpack.i.h.s16 %v10068_v26  ;;  %v27299_v47 = vpack.i.b16 %v10046_v48, %v10347_v33  ;;  %v27312_v52 = vcombine.high %v10061_v40, %v10068_v26  ;;  %v31182_v24 = vcombine.high %v31148_v54, %v31148_v54 }
 0x2e0   : > { %v8186_v44 = vrot.slane %v8178_v17, %v29572_v50  ;;  %v31185_v57 = vrot.slane %v27124_v32, %v29572_v50  ;;  %v8193_v37 = vrot.slane %v8179_v1, %v29572_v50  ;;  %v10504_v5 = vcombine.low %v27297_v58, %v27298_v35  ;;  %v29225_v35 = vld [vmem:[%s34687_s7 + $0x10] sm:$0xff]   ;;  %v31216_v1 = vld.sshfl [vmem:[#allocation3 + $0x1c] sm:$0x11 pattern:$0x75316420] }
 0x2e1   : > { %v10426_v23 = vpack.i.b16 %v10350_v28, %v10349_v55  ;;  %v7766_v14 = vcombine.high %v27125_v18, %v27125_v18  ;;  %v10534_v59 = vrot.slane %v27312_v52, %v29572_v50  ;;  %v31190_v0 = vrot.slane %v27125_v18, %v29572_v50 }
 0x2e2   : > { %v31193_v48 = vrot.slane %v27126_v11, %v29572_v50  ;;  %v7804_v40 = vcombine.high %v27127_v43, %v27127_v43  ;;  %v8194_v27 = vcombine.low %v8186_v44, %v8193_v37  ;;  %v10520_v26 = vrot.slane %v10504_v5, %v29572_v50  ;;  %v29319_v37 = vld [vmem:[%s34687_s7 + $0x18] sm:$0xff]  }
 0x2e3   : > { %v10505_v2 = vcombine.low %v27299_v47, %v10426_v23  ;;  %v31197_v32 = vrot.slane %v7766_v14, %v29572_v50  ;;  %v7781_v52 = vcombine.high %v31190_v0, %v31190_v0  ;;  %v31205_v46 = vrot.slane %v27127_v43, %v29572_v50 }
 0x2e4   : > { %v31208_v33 = vrot.slane %v7804_v40, %v29572_v50  ;;  %v7986_v11 = vunpack.i.h.s16 %v31190_v0  ;;  %28714 = vmatmul.mubr.msk.bf16.vlgmr.msra.gmra.mxu1 %vm2062_vm5, %v8194_v27  ;;  %v10535_v55 = vcombine.low %v10513_v4, %v10520_v26  ;;  %v8042_v47 = vunpack.i.h.s16 %v31193_v48  ;;  %v27274_v40 = vld.sshfl [vmem:[#allocation3 + $0x20] sm:$0x32 pattern:$0x75316420] }
 0x2e5   : > { %v10527_v17 = vrot.slane %v10505_v2, %v29572_v50  ;;  %v7782_v58 = vcombine.high %v31197_v32, %v31197_v32  ;;  %v7988_v18 = vunpack.i.h.s16 %v31197_v32  ;;  %v7990_v28 = vunpack.i.h.s16 %v7781_v52  ;;  %28726 = vmatpush3.bf16.msra.mxu1 %v29319_v37  ;;  %v29227_v27 = vld [vmem:[%s34687_s7 + $0x8] sm:$0xff]  }
 0x2e6   : > { %v34721_v43 = vunpack.i.h.s16 %v31205_v46  ;;  %v27151_v44 = vpack.i.b16 %v31197_v32, %v7986_v11  ;;  %v10543_v23 = vrot.slane %v10535_v55, %v29572_v50  ;;  %28727 = vmatprep.subr.bf16.mxu1 %v29225_v35  ;;  %v8195_v11 = vcombine.low %v31182_v24, %v31185_v57 }
 0x2e7   : > { %v10536_v4 = vcombine.low %v10527_v17, %v10534_v59  ;;  %v7992_v5 = vunpack.i.h.s16 %v7782_v58  ;;  %v27152_v14 = vpack.i.b16 %v7781_v52, %v7988_v18  ;;  %v27153_v2 = vpack.i.b16 %v7782_v58, %v7990_v28  ;;  %v27275_v18 = vld.sshfl [vmem:[#allocation3 + $0x24] sm:$0x11 pattern:$0x75316420] }
 0x2e8   : > { %v8078_v26 = vpack.i.b16 %v34721_v43, %v8042_v47  ;;  %v10078_v59 = vcombine.high %v31216_v1, %v31216_v1  ;;  %v10085_v37 = vrot.slane %v31216_v1, %v29572_v50  ;;  %v8205_v28 = vrot.slane %v8195_v11, %v29572_v50  ;;  %v27276_v47 = vld.sshfl [vmem:[#allocation3 + $0x28] sm:$0x32 pattern:$0x75316420] }
 0x2e9   : > { %v10550_v17 = vrot.slane %v10536_v4, %v29572_v50  ;;  %v27154_v52 = vpack.i.b16 %v31193_v48, %v7992_v5  ;;  %v8196_v55 = vcombine.low %v27151_v44, %v27152_v14  ;;  %v10100_v62 = vcombine.high %v27274_v40, %v27274_v40  ;;  %28728 = vmatpush3.bf16.msra.mxu1 %v29225_v35  ;;  %v29228_v1 = vld [vmem:[%s34687_s7 + $0xb0] sm:$0xff]   ;;  %v29230_v44 = vld [vmem:[%s34687_s7] sm:$0xff]  }
 0x2ea   : > { %v8198_v58 = vcombine.low %v8078_v26, %v31208_v33  ;;  %v10092_v43 = vrot.slane %v10078_v59, %v29572_v50  ;;  %v10107_v5 = vrot.slane %v27274_v40, %v29572_v50  ;;  %28729 = vmatprep.subr.bf16.mxu1 %v29227_v27  ;;  %v10124_v35 = vcombine.high %v27275_v18, %v27275_v18 }
 0x2eb   : > { %v10551_v13 = vcombine.low %v10543_v23, %v10550_v17  ;;  %v8197_v22 = vcombine.low %v27153_v2, %v27154_v52  ;;  %v8212_v4 = vrot.slane %v8196_v55, %v29572_v50  ;;  %v10114_v26 = vrot.slane %v10100_v62, %v29572_v50 }
 0x2ec   : > { %v8226_v14 = vrot.slane %v8198_v58, %v29572_v50  ;;  %v10131_v23 = vrot.slane %v27275_v18, %v29572_v50  ;;  %v10115_v11 = vcombine.high %v10107_v5, %v10107_v5  ;;  %v10146_v59 = vcombine.high %v27276_v47, %v27276_v47 }
 0x2ed   : > { %28774 = vmatmul.mubr.msk.bf16.vlgmr.msra.gmra.mxu0 %vm2062_vm5, %v10551_v13  ;;  %v8219_v40 = vrot.slane %v8197_v22, %v29572_v50  ;;  %v8227_v2 = vcombine.low %v8205_v28, %v8212_v4  ;;  %v10116_v17 = vcombine.high %v10114_v26, %v10114_v26  ;;  %v10138_v52 = vrot.slane %v10124_v35, %v29572_v50  ;;  %v27128_v22 = vld.sshfl [vmem:[#allocation3 + $0x2c] sm:$0x1 pattern:$0x75316420]  ;;  %v29229_v28 = vld [vmem:[%s34687_s7 + $0xa8] sm:$0xff]  }
 0x2ee   : > { %v10153_v55 = vrot.slane %v27276_v47, %v29572_v50  ;;  %v10359_v45 = vunpack.i.h.s16 %v10114_v26  ;;  %28806 = vmatpush3.bf16.msra.mxu0 %v30915_v8  ;;  %28730 = vmatpush3.bf16.msra.mxu1 %v29227_v27  ;;  %v31259_v18 = vrot.slane %v10146_v59, %v29572_v50  ;;  %v10361_v13 = vunpack.i.h.s16 %v10115_v11  ;;  %v27129_v8 = vld.sshfl [vmem:[#allocation3 + $0x30] sm:$0x33 pattern:$0x75316420] }
 0x2ef   : > { %v8228_v62 = vcombine.low %v8219_v40, %v8226_v14  ;;  %v8235_v58 = vrot.slane %v8227_v2, %v29572_v50  ;;  %28807 = vmatprep.subr.bf16.mxu0 %v29228_v1  ;;  %28731 = vmatprep.subr.bf16.mxu1 %v29230_v44  ;;  %v10363_v47 = vunpack.i.h.s16 %v10116_v17  ;;  %v10365_v5 = vunpack.i.h.s16 %v10131_v23  ;;  %v27130_v2 = vld.sshfl [vmem:[#allocation3 + $0x34] sm:$0x1 pattern:$0x75316420] }
 0x2f0   : > { %v10161_v4 = vcombine.high %v10153_v55, %v10153_v55  ;;  %v10367_v26 = vunpack.i.h.s16 %v10138_v52  ;;  %v10368_v14 = vunpack.i.h.s16 %v31259_v18  ;;  %v27300_v35 = vpack.i.b16 %v10115_v11, %v10359_v45  ;;  %v31274_v55 = vld [vmem:[%s34687_s7 + $0x58] sm:$0xff]  }
 0x2f1   : > { %v8242_v27 = vrot.slane %v8228_v62, %v29572_v50  ;;  %v27301_v40 = vpack.i.b16 %v10116_v17, %v10361_v13  ;;  %v27302_v59 = vpack.i.b16 %v10131_v23, %v10363_v47  ;;  %v27303_v30 = vpack.i.b16 %v10138_v52, %v10365_v5 }
 0x2f2   : > { %v10552_v20 = vcombine.low %v10085_v37, %v10092_v43  ;;  %v31269_v49 = vrot.slane %v27128_v22, %v29572_v50  ;;  %28808 = vmatpush3.bf16.msra.mxu0 %v29228_v1  ;;  %v10435_v12 = vpack.i.b16 %v10368_v14, %v10367_v26  ;;  %v7842_v45 = vcombine.high %v27129_v8, %v27129_v8  ;;  %v29231_v43 = vld [vmem:[%s34687_s7 + $0xa0] sm:$0xff]  }
 0x2f3   : > { %v8243_v62 = vcombine.low %v8235_v58, %v8242_v27  ;;  %v10553_v15 = vcombine.low %v27300_v35, %v27301_v40  ;;  %28809 = vmatprep.subr.bf16.mxu0 %v29229_v28  ;;  %v10554_v37 = vcombine.low %v27302_v59, %v27303_v30  ;;  %v31281_v11 = vrot.slane %v27129_v8, %v29572_v50  ;;  %v27277_v27 = vld.sshfl [vmem:[#allocation3 + $0x2c] sm:$0x11 pattern:$0x75316420] }
 0x2f4   : > { %v10562_v23 = vrot.slane %v10552_v20, %v29572_v50  ;;  %v31284_v1 = vrot.slane %v27130_v2, %v29572_v50  ;;  %28732 = vmatpush3.bf16.msra.mxu1 %v29230_v44  ;;  %v10555_v17 = vcombine.low %v10435_v12, %v10161_v4  ;;  %v31289_v58 = vrot.slane %v7842_v45, %v29572_v50  ;;  %v27278_v59 = vld.sshfl [vmem:[#allocation3 + $0x30] sm:$0x32 pattern:$0x75316420] }
 0x2f5   : > { %28717 = vmatprep.mubr.msk.bf16.mxu1 %vm2062_vm5, %v8243_v62  ;;  %v10569_v52 = vrot.slane %v10553_v15, %v29572_v50  ;;  %v31293_v30 = vrot.slane %v31266_v41, %v29572_v50  ;;  %v10576_v20 = vrot.slane %v10554_v37, %v29572_v50  ;;  %v31298_v13 = vcombine.high %v31281_v11, %v31281_v11 }
 0x2f6   : > { %v8004_v44 = vunpack.i.h.s16 %v31281_v11  ;;  %v8044_v22 = vunpack.i.h.s16 %v31284_v1  ;;  %28810 = vmatpush3.bf16.msra.mxu0 %v29229_v28  ;;  %28745 = vmatprep.subr.bf16.mxu1 %v31274_v55  ;;  %v10583_v12 = vrot.slane %v10555_v17, %v29572_v50  ;;  %v31306_v4 = vcombine.high %v31289_v58, %v31289_v58 }
 0x2f7   : > { %v10584_v15 = vcombine.low %v10562_v23, %v10569_v52  ;;  %v8006_v47 = vunpack.i.h.s16 %v31289_v58  ;;  %28811 = vmatprep.subr.bf16.mxu0 %v29231_v43  ;;  %v8008_v5 = vunpack.i.h.s16 %v31298_v13  ;;  %v34722_v26 = vunpack.i.h.s16 %v31293_v30 }
 0x2f8   : > { %v27155_v8 = vpack.i.b16 %v31289_v58, %v8004_v44  ;;  %v27164_v28 = vcombine.high %v31205_v46, %v31208_v33  ;;  %v10585_v14 = vcombine.low %v10576_v20, %v10583_v12  ;;  %v8010_v40 = vunpack.i.h.s16 %v31306_v4  ;;  %v27279_v20 = vld.sshfl [vmem:[#allocation3 + $0x34] sm:$0x11 pattern:$0x75316420] }
 0x2f9   : > { %v10592_v35 = vrot.slane %v10584_v15, %v29572_v50  ;;  %v27156_v2 = vpack.i.b16 %v31298_v13, %v8006_v47  ;;  %v27157_v62 = vpack.i.b16 %v31306_v4, %v8008_v5  ;;  %v8087_v45 = vpack.i.b16 %v34722_v26, %v8044_v22  ;;  %v31327_v5 = vld.sshfl [vmem:[#allocation3 + $0x38] sm:$0x32 pattern:$0x75316420] }
 0x2fa   : > { %v8245_v37 = vcombine.low %v31269_v49, %v27155_v8  ;;  %v8254_v23 = vrot.slane %v27164_v28, %v29572_v50  ;;  %28812 = vmatpush3.bf16.msra.mxu0 %v29231_v43  ;;  %v10599_v17 = vrot.slane %v10585_v14, %v29572_v50  ;;  %v27158_v52 = vpack.i.b16 %v31284_v1, %v8010_v40 }
 0x2fb   : > { %v10162_v44 = vcombine.high %v31259_v18, %v31259_v18  ;;  %v10170_v12 = vcombine.high %v27277_v27, %v27277_v27  ;;  %v8246_v15 = vcombine.low %v27156_v2, %v27157_v62  ;;  %v10177_v22 = vrot.slane %v27277_v27, %v29572_v50 }
 0x2fc   : > { %v8261_v47 = vrot.slane %v8245_v37, %v29572_v50  ;;  %v10192_v8 = vcombine.high %v27278_v59, %v27278_v59  ;;  %v10600_v26 = vcombine.low %v10592_v35, %v10599_v17  ;;  %v8247_v28 = vcombine.low %v27158_v52, %v8087_v45 }
 0x2fd   : > { %v10184_v43 = vrot.slane %v10170_v12, %v29572_v50  ;;  %v10199_v14 = vrot.slane %v27278_v59, %v29572_v50  ;;  %v8268_v40 = vrot.slane %v8246_v15, %v29572_v50  ;;  %v10216_v29 = vcombine.high %v27279_v20, %v27279_v20 }
 0x2fe   : > { %v8276_v36 = vcombine.low %v8254_v23, %v8261_v47  ;;  %v10206_v18 = vrot.slane %v10192_v8, %v29572_v50  ;;  %28777 = vmatprep.mubr.msk.bf16.mxu0 %vm2062_vm5, %v10600_v26  ;;  %v8275_v2 = vrot.slane %v8247_v28, %v29572_v50  ;;  %v10223_v27 = vrot.slane %v27279_v20, %v29572_v50  ;;  %v27132_v20 = vld.sshfl [vmem:[#allocation3 + $0x3c] sm:$0x1 pattern:$0x75316420] }
 0x2ff   : > { %v10207_v62 = vcombine.high %v10199_v14, %v10199_v14  ;;  %v10238_v35 = vcombine.high %v31327_v5, %v31327_v5  ;;  %v10230_v59 = vrot.slane %v10216_v29, %v29572_v50  ;;  %v10601_v28 = vcombine.low %v10162_v44, %v10177_v22 }
 0x300   : > { %v8284_v45 = vrot.slane %v8276_v36, %v29572_v50  ;;  %v10208_v37 = vcombine.high %v10206_v18, %v10206_v18  ;;  %v10377_v17 = vunpack.i.h.s16 %v10206_v18  ;;  %v8277_v23 = vcombine.low %v8268_v40, %v8275_v2  ;;  %v27134_v2 = vld.sshfl [vmem:[#allocation3 + $0x44] sm:$0x1 pattern:$0x75316420] }
 0x301   : > { %v31342_v52 = vrot.slane %v10238_v35, %v29572_v50  ;;  %v10379_v12 = vunpack.i.h.s16 %v10207_v62  ;;  %v10383_v26 = vunpack.i.h.s16 %v10223_v27  ;;  %v10385_v47 = vunpack.i.h.s16 %v10230_v59 }
 0x302   : > { %v10381_v15 = vunpack.i.h.s16 %v10208_v37  ;;  %v27304_v8 = vpack.i.b16 %v10207_v62, %v10377_v17  ;;  %v8291_v14 = vrot.slane %v8277_v23, %v29572_v50  ;;  %v10611_v40 = vrot.slane %v10601_v28, %v29572_v50 }
 0x303   : > { %v10386_v25 = vunpack.i.h.s16 %v31342_v52  ;;  %v27305_v36 = vpack.i.b16 %v10208_v37, %v10379_v12  ;;  %v27307_v10 = vpack.i.b16 %v10230_v59, %v10383_v26  ;;  %v7880_v35 = vcombine.high %v31266_v41, %v31266_v41 }
 0x304   : > { %v27306_v29 = vpack.i.b16 %v10223_v27, %v10381_v15  ;;  %v10602_v18 = vcombine.low %v10184_v43, %v27304_v8  ;;  %v8292_v21 = vcombine.low %v8284_v45, %v8291_v14  ;;  %v31351_v44 = vcombine.high %v31293_v30, %v31293_v30 }
 0x305   : > { %v10444_v42 = vpack.i.b16 %v10386_v25, %v10385_v47  ;;  %v31354_v22 = vrot.slane %v27132_v20, %v29572_v50  ;;  %v31358_v43 = vrot.slane %v7880_v35, %v29572_v50  ;;  %v7918_v27 = vcombine.high %v27133_v19, %v27133_v19  ;;  %v27282_v20 = vld.sshfl [vmem:[#allocation3 + $0x40] sm:$0x32 pattern:$0x75316420] }
 0x306   : > { %v10603_v62 = vcombine.low %v27305_v36, %v27306_v29  ;;  %v10618_v37 = vrot.slane %v10602_v18, %v29572_v50  ;;  %28718 = vmatmul.mubr.msk.bf16.gmra.mxu1 %vm2062_vm5, %v8292_v21  ;;  %v31362_v41 = vrot.slane %v27133_v19, %v29572_v50  ;;  %v31365_v25 = vrot.slane %v27134_v2, %v29572_v50 }
 0x307   : > { %v10604_v59 = vcombine.low %v27307_v10, %v10444_v42  ;;  %v10245_v45 = vrot.slane %v31327_v5, %v29572_v50  ;;  %v31372_v12 = vcombine.high %v31358_v43, %v31358_v43  ;;  %v31375_v26 = vrot.slane %v7918_v27, %v29572_v50  ;;  %v27281_v5 = vld.sshfl [vmem:[#allocation3 + $0x3c] sm:$0x11 pattern:$0x75316420] }
 0x308   : > { %34809 = vst [vmem:[#allocation30_spill] sm:$0xff] %v31362_v41  ;;  %v10625_v17 = vrot.slane %v10603_v62, %v29572_v50  ;;  %v10633_v23 = vcombine.low %v10611_v40, %v10618_v37  ;;  %v7933_v21 = vcombine.high %v31362_v41, %v31362_v41  ;;  %v8022_v19 = vunpack.i.h.s16 %v31362_v41  ;;  %v27283_v62 = vld.sshfl [vmem:[#allocation3 + $0x44] sm:$0x11 pattern:$0x75316420] }
 0x309   : > { %34810 = vst [vmem:[#allocation31_spill] sm:$0xff] %v31375_v26  ;;  %v10632_v42 = vrot.slane %v10604_v59, %v29572_v50  ;;  %v8293_v10 = vcombine.low %v31358_v43, %v31351_v44  ;;  %v7934_v47 = vcombine.high %v31375_v26, %v31375_v26  ;;  %v8024_v8 = vunpack.i.h.s16 %v31375_v26 }
 0x30a   : > { %v10641_v15 = vrot.slane %v10633_v23, %v29572_v50  ;;  %v8294_v28 = vcombine.low %v31372_v12, %v31354_v22  ;;  %v8026_v36 = vunpack.i.h.s16 %v7933_v21  ;;  %v27159_v29 = vpack.i.b16 %v31375_v26, %v8022_v19 }
 0x30b   : > { %v10634_v14 = vcombine.low %v10625_v17, %v10632_v42  ;;  %v8303_v18 = vrot.slane %v8293_v10, %v29572_v50  ;;  %v8028_v40 = vunpack.i.h.s16 %v7934_v47  ;;  %v27160_v2 = vpack.i.b16 %v7933_v21, %v8024_v8 }
 0x30c   : > { %v8310_v35 = vrot.slane %v8294_v28, %v29572_v50  ;;  %v10262_v37 = vcombine.high %v27281_v5, %v27281_v5  ;;  %v27161_v59 = vpack.i.b16 %v7934_v47, %v8026_v36  ;;  %v10269_v23 = vrot.slane %v27281_v5, %v29572_v50 }
 0x30d   : > { %v10648_v27 = vrot.slane %v10634_v14, %v29572_v50  ;;  %v10284_v38 = vcombine.high %v27282_v20, %v27282_v20  ;;  %v27162_v51 = vpack.i.b16 %v31365_v25, %v8028_v40  ;;  %v8295_v17 = vcombine.low %v27159_v29, %v27160_v2 }
 0x30e   : > { %v8325_v42 = vcombine.low %v8303_v18, %v8310_v35  ;;  %v10276_v19 = vrot.slane %v10262_v37, %v29572_v50  ;;  %v10291_v10 = vrot.slane %v27282_v20, %v29572_v50  ;;  %v10308_v8 = vcombine.high %v27283_v62, %v27283_v62 }
 0x30f   : > { %v10649_v41 = vcombine.low %v10641_v15, %v10648_v27  ;;  %v10298_v21 = vrot.slane %v10284_v38, %v29572_v50  ;;  %v8296_v28 = vcombine.low %v27161_v59, %v27162_v51  ;;  %v8317_v26 = vrot.slane %v8295_v17, %v29572_v50 }
 0x310   : > { %v8333_v47 = vrot.slane %v8325_v42, %v29572_v50  ;;  %v10315_v5 = vrot.slane %v27283_v62, %v29572_v50  ;;  %v10299_v14 = vcombine.high %v10291_v10, %v10291_v10  ;;  %v10322_v29 = vrot.slane %v10308_v8, %v29572_v50 }
 0x311   : > { %28778 = vmatmul.mubr.msk.bf16.gmra.mxu0 %vm2062_vm5, %v10649_v41  ;;  %v10300_v36 = vcombine.high %v10298_v21, %v10298_v21  ;;  %v10395_v18 = vunpack.i.h.s16 %v10298_v21  ;;  %v8324_v15 = vrot.slane %v8296_v28, %v29572_v50  ;;  %v27313_v38 = vcombine.high %v10245_v45, %v31342_v52 }
 0x312   : > { %v10401_v20 = vunpack.i.h.s16 %v10315_v5  ;;  %v10651_v40 = vcombine.low %v10269_v23, %v10276_v19  ;;  %v10397_v51 = vunpack.i.h.s16 %v10299_v14  ;;  %v8046_v37 = vunpack.i.h.s16 %v31365_v25 }
 0x313   : > { %v10399_v2 = vunpack.i.h.s16 %v10300_v36  ;;  %v27308_v35 = vpack.i.b16 %v10299_v14, %v10395_v18  ;;  %v8326_v27 = vcombine.low %v8317_v26, %v8324_v15  ;;  %v10660_v41 = vrot.slane %v27313_v38, %v29572_v50 }
 0x314   : > { %v27311_v62 = vpack.i.b16 %v10322_v29, %v10401_v20  ;;  %v10667_v59 = vrot.slane %v10651_v40, %v29572_v50  ;;  %v27309_v17 = vpack.i.b16 %v10300_v36, %v10397_v51  ;;  %v8348_v10 = vrot.slane %v8046_v37, %v29572_v50  ;;  %v27383_v51 = vld.sshfl [vmem:[#allocation3] sm:$0x22 pattern:$0x75316420] }
 0x315   : > { %v27310_v42 = vpack.i.b16 %v10315_v5, %v10399_v2  ;;  %v10403_v21 = vunpack.i.h.s16 %v10322_v29  ;;  %v8340_v8 = vrot.slane %v8326_v27, %v29572_v50  ;;  %v7667_v45 = vcombine.high %v31071_v61, %v31071_v61 }
 0x316   : > { %v10682_v52 = vcombine.low %v10660_v41, %v10667_v59  ;;  %v7668_v23 = vcombine.high %v31078_v34, %v31078_v34  ;;  %v10652_v26 = vcombine.low %v27308_v35, %v27309_v17  ;;  %v8355_v28 = vrot.slane %v8348_v10, %v29572_v50 }
 0x317   : > { %v10653_v19 = vcombine.low %v27310_v42, %v27311_v62  ;;  %v10705_v14 = vrot.slane %v10403_v21, %v29572_v50  ;;  %v8341_v36 = vcombine.low %v8333_v47, %v8340_v8  ;;  %v7961_v29 = vunpack.i.h.s16 %v31078_v34  ;;  %v27384_v62 = vld.sshfl [vmem:[#allocation3 + $0x4] sm:$0x13 pattern:$0x75316420] }
 0x318   : > { %v10690_v5 = vrot.slane %v10682_v52, %v29572_v50  ;;  %v7963_v18 = vunpack.i.h.s16 %v7667_v45  ;;  %v10674_v15 = vrot.slane %v10652_v26, %v29572_v50  ;;  %v7965_v40 = vunpack.i.h.s16 %v7668_v23 }
 0x319   : > { %v10681_v20 = vrot.slane %v10653_v19, %v29572_v50  ;;  %v10712_v38 = vrot.slane %v10705_v14, %v29572_v50  ;;  %28721 = vmatprep.mubr.msk.bf16.mxu1 %vm2062_vm5, %v8341_v36  ;;  %v27175_v2 = vpack.i.b16 %v31071_v61, %v31066_v9  ;;  %v34811_v47 = vunpack.i.h.s16 %v31071_v61  ;;  %v27386_v19 = vld.sshfl [vmem:[#allocation3 + $0xc] sm:$0x13 pattern:$0x75316420] }
 0x31a   : > { %v27177_v37 = vpack.i.b16 %v7667_v45, %v7961_v29  ;;  %v27178_v27 = vpack.i.b16 %v7668_v23, %v7963_v18  ;;  %28722 = vmatmul.mubr.msk.bf16.gmra.mxu1 %vm2062_vm5, %v8355_v28  ;;  %v31429_v59 = vpack.i.b16 %v31115_v39, %v7965_v40  ;;  %v8519_v17 = vcombine.low %v31054_v63, %v31059_v16  ;;  %v27385_v45 = vld.sshfl [vmem:[#allocation3 + $0x8] sm:$0x22 pattern:$0x75316420] }
 0x31b   : > { %v27176_v35 = vpack.i.b16 %v31078_v34, %v34811_v47  ;;  %v10683_v41 = vcombine.low %v10674_v15, %v10681_v20  ;;  %v27195_v42 = vcombine.high %v31054_v63, %v31059_v16  ;;  %v11871_v61 = vcombine.high %v27383_v51, %v27383_v51  ;;  %v27387_v36 = vld.sshfl [vmem:[#allocation3 + $0x10] sm:$0x22 pattern:$0x75316420] }
 0x31c   : > { %v8522_v10 = vcombine.low %v27177_v37, %v27178_v27  ;;  %v11878_v34 = vrot.slane %v27383_v51, %v29572_v50  ;;  %v8529_v8 = vrot.slane %v8519_v17, %v29572_v50  ;;  %v11895_v39 = vcombine.high %v27384_v62, %v27384_v62 }
 0x31d   : > { %v8521_v9 = vcombine.low %v27175_v2, %v27176_v35  ;;  %v10697_v21 = vrot.slane %v10683_v41, %v29572_v50  ;;  %v8536_v52 = vrot.slane %v27195_v42, %v29572_v50  ;;  %v11885_v63 = vrot.slane %v11871_v61, %v29572_v50 }
 0x31e   : > { %v8550_v26 = vrot.slane %v8522_v10, %v29572_v50  ;;  %v11886_v16 = vcombine.high %v11878_v34, %v11878_v34  ;;  %v11902_v29 = vrot.slane %v27384_v62, %v29572_v50  ;;  %v11909_v18 = vrot.slane %v11895_v39, %v29572_v50 }
 0x31f   : > { %v8543_v23 = vrot.slane %v8521_v9, %v29572_v50  ;;  %v10698_v28 = vcombine.low %v10690_v5, %v10697_v21  ;;  %v8551_v14 = vcombine.low %v8529_v8, %v8536_v52  ;;  %v11887_v20 = vcombine.high %v11885_v63, %v11885_v63 }
 0x320   : > { %v11918_v40 = vcombine.high %v27385_v45, %v27385_v45  ;;  %v11925_v51 = vrot.slane %v27385_v45, %v29572_v50  ;;  %v11910_v47 = vcombine.high %v11902_v29, %v11902_v29  ;;  %v11942_v35 = vcombine.high %v27386_v19, %v27386_v19 }
 0x321   : > { %v8552_v15 = vcombine.low %v8543_v23, %v8550_v26  ;;  %28781 = vmatprep.mubr.msk.bf16.mxu0 %vm2062_vm5, %v10698_v28  ;;  %v8559_v2 = vrot.slane %v8551_v14, %v29572_v50  ;;  %v11949_v37 = vrot.slane %v27386_v19, %v29572_v50  ;;  %v11965_v41 = vcombine.high %v27387_v36, %v27387_v36 }
 0x322   : > { %28782 = vmatmul.mubr.msk.bf16.gmra.mxu0 %vm2062_vm5, %v10712_v38  ;;  %v11932_v27 = vrot.slane %v11918_v40, %v29572_v50  ;;  %v11933_v62 = vcombine.high %v11925_v51, %v11925_v51  ;;  %v11956_v17 = vrot.slane %v11942_v35, %v29572_v50  ;;  %v11972_v9 = vrot.slane %v27387_v36, %v29572_v50 }
 0x323   : > { %v8566_v5 = vrot.slane %v8552_v15, %v29572_v50  ;;  %v11957_v42 = vcombine.high %v11949_v37, %v11949_v37  ;;  %v12287_v10 = vunpack.i.h.s16 %v11886_v16  ;;  %v11979_v21 = vrot.slane %v11965_v41, %v29572_v50 }
 0x324   : > { %v11934_v34 = vcombine.high %v11932_v27, %v11932_v27  ;;  %v12289_v8 = vunpack.i.h.s16 %v11887_v20  ;;  %v11980_v52 = vcombine.high %v11972_v9, %v11972_v9  ;;  %v12291_v45 = vunpack.i.h.s16 %v11902_v29  ;;  %v27388_v9 = vld.sshfl [vmem:[#allocation3 + $0x14] sm:$0x13 pattern:$0x75316420] }
 0x325   : > { %v8567_v61 = vcombine.low %v8559_v2, %v8566_v5  ;;  %v12293_v38 = vunpack.i.h.s16 %v11909_v18  ;;  %v12295_v39 = vunpack.i.h.s16 %v11910_v47  ;;  %v11981_v23 = vcombine.high %v11979_v21, %v11979_v21 }
 0x326   : > { %v12296_v26 = vunpack.i.h.s16 %v11933_v62  ;;  %v27409_v19 = vpack.i.b16 %v11887_v20, %v12287_v10  ;;  %v27410_v63 = vpack.i.b16 %v11902_v29, %v12289_v8  ;;  %v12305_v28 = vunpack.i.h.s16 %v11980_v52 }
 0x327   : > { %28733 = vmatprep.mubr.msk.bf16.mxu1 %vm2062_vm5, %v8567_v61  ;;  %v27411_v14 = vpack.i.b16 %v11909_v18, %v12291_v45  ;;  %v27412_v15 = vpack.i.b16 %v11910_v47, %v12293_v38  ;;  %v12421_v36 = vcombine.low %v11949_v37, %v11956_v17  ;;  %v12307_v16 = vunpack.i.h.s16 %v11981_v23 }
 0x328   : > { %v12381_v40 = vpack.i.b16 %v12296_v26, %v12295_v39  ;;  %v12418_v51 = vcombine.low %v27409_v19, %v27410_v63  ;;  %v7979_v2 = vunpack.i.h.s16 %v31148_v54  ;;  %v27413_v35 = vpack.i.b16 %v11981_v23, %v12305_v28 }
 0x329   : > { %v12419_v5 = vcombine.low %v27411_v14, %v27412_v15  ;;  %v12449_v27 = vrot.slane %v12421_v36, %v29572_v50  ;;  %v27180_v41 = vpack.i.b16 %v31138_v60, %v31125_v7  ;;  %v34812_v18 = vunpack.i.h.s16 %v31138_v60  ;;  %v27389_v60 = vld.sshfl [vmem:[#allocation3 + $0x18] sm:$0x22 pattern:$0x75316420] }
 0x32a   : > { %v12420_v62 = vcombine.low %v12381_v40, %v11934_v34  ;;  %v12428_v29 = vrot.slane %v12418_v51, %v29572_v50  ;;  %v27182_v47 = vpack.i.b16 %v31152_v6, %v7979_v2  ;;  %v31465_v17 = vcombine.low %v11957_v42, %v27413_v35  ;;  %v27390_v42 = vld.sshfl [vmem:[#allocation3 + $0x1c] sm:$0x13 pattern:$0x75316420] }
 0x32b   : > { %v27181_v20 = vpack.i.b16 %v31148_v54, %v34812_v18  ;;  %v12435_v37 = vrot.slane %v12419_v5, %v29572_v50  ;;  %v8568_v10 = vcombine.low %v31429_v59, %v31119_v3  ;;  %v8569_v7 = vcombine.low %v31130_v31, %v31134_v56 }
 0x32c   : > { %v12442_v61 = vrot.slane %v12420_v62, %v29572_v50  ;;  %v8570_v34 = vcombine.low %v31143_v53, %v27180_v41  ;;  %v11989_v8 = vcombine.high %v27388_v9, %v27388_v9  ;;  %v11996_v38 = vrot.slane %v27388_v9, %v29572_v50 }
 0x32d   : > { %v8571_v21 = vcombine.low %v27181_v20, %v27182_v47  ;;  %v12450_v54 = vcombine.low %v12428_v29, %v12435_v37  ;;  %v8578_v52 = vrot.slane %v8568_v10, %v29572_v50  ;;  %v8585_v45 = vrot.slane %v8569_v7, %v29572_v50  ;;  %v29233_v10 = vld [vmem:[%s34687_s7 + $0x50] sm:$0xff]  }
 0x32e   : > { %v12451_v39 = vcombine.low %v12442_v61, %v12449_v27  ;;  %v8592_v3 = vrot.slane %v8570_v34, %v29572_v50  ;;  %v12003_v56 = vrot.slane %v11989_v8, %v29572_v50  ;;  %v12004_v23 = vcombine.high %v11996_v38, %v11996_v38 }
 0x32f   : > { %v8599_v31 = vrot.slane %v8571_v21, %v29572_v50  ;;  %v12458_v53 = vrot.slane %v12450_v54, %v29572_v50  ;;  %v8600_v59 = vcombine.low %v8578_v52, %v8585_v45  ;;  %v12012_v26 = vcombine.high %v27389_v60, %v27389_v60 }
 0x330   : > { %v12465_v19 = vrot.slane %v12451_v39, %v29572_v50  ;;  %v12019_v28 = vrot.slane %v27389_v60, %v29572_v50  ;;  %v31483_v14 = vrot.slane %v27390_v42, %v29572_v50  ;;  %v12309_v40 = vunpack.i.h.s16 %v11996_v38 }
 0x331   : > { %v8601_v63 = vcombine.low %v8592_v3, %v8599_v31  ;;  %v8608_v15 = vrot.slane %v8600_v59, %v29572_v50  ;;  %v12026_v36 = vrot.slane %v12012_v26, %v29572_v50  ;;  %v12311_v51 = vunpack.i.h.s16 %v12003_v56  ;;  %v27392_v31 = vld.sshfl [vmem:[#allocation3 + $0x24] sm:$0x13 pattern:$0x75316420] }
 0x332   : > { %v12466_v2 = vcombine.low %v12458_v53, %v12465_v19  ;;  %v12027_v5 = vcombine.high %v12019_v28, %v12019_v28  ;;  %v12313_v27 = vunpack.i.h.s16 %v12004_v23  ;;  %v27414_v9 = vpack.i.b16 %v11996_v38, %v12307_v16  ;;  %v27391_v38 = vld.sshfl [vmem:[#allocation3 + $0x20] sm:$0x22 pattern:$0x75316420] }
 0x333   : > { %v8615_v35 = vrot.slane %v8601_v63, %v29572_v50  ;;  %v12028_v41 = vcombine.high %v12026_v36, %v12026_v36  ;;  %v27415_v62 = vpack.i.b16 %v12003_v56, %v12309_v40  ;;  %v27416_v29 = vpack.i.b16 %v12004_v23, %v12311_v51  ;;  %v27393_v26 = vld.sshfl [vmem:[#allocation3 + $0x28] sm:$0x22 pattern:$0x75316420] }
 0x334   : > { %28813 = vmatprep.mubr.msk.bf16.mxu0 %vm2062_vm5, %v12466_v2  ;;  %v12314_v20 = vunpack.i.h.s16 %v12027_v5  ;;  %v12477_v47 = vrot.slane %v31465_v17, %v29572_v50  ;;  %v7981_v37 = vunpack.i.h.s16 %v31152_v6  ;;  %v7983_v16 = vunpack.i.h.s16 %v31182_v24 }
 0x335   : > { %v8616_v18 = vcombine.low %v8608_v15, %v8615_v35  ;;  %v12468_v7 = vcombine.low %v27414_v9, %v27415_v62  ;;  %v12470_v61 = vcombine.low %v12028_v41, %v31483_v14  ;;  %v27185_v34 = vpack.i.b16 %v31205_v46, %v31193_v48  ;;  %v29235_v35 = vld [vmem:[%s34687_s7 + $0x40] sm:$0xff]  }
 0x336   : > { %v12390_v21 = vpack.i.b16 %v12314_v20, %v12313_v27  ;;  %v27183_v60 = vpack.i.b16 %v31182_v24, %v7981_v37  ;;  %v34813_v17 = vunpack.i.h.s16 %v31205_v46  ;;  %v8618_v8 = vcombine.low %v31190_v0, %v31197_v32 }
 0x337   : > { %28734 = vmatmul.mubr.msk.bf16.vlgmr.msra.gmra.mxu1 %vm2062_vm5, %v8616_v18  ;;  %v12484_v54 = vrot.slane %v12468_v7, %v29572_v50  ;;  %v12498_v52 = vrot.slane %v12470_v61, %v29572_v50  ;;  %v27184_v48 = vpack.i.b16 %v31185_v57, %v7983_v16  ;;  %v27196_v45 = vcombine.high %v31190_v0, %v31197_v32 }
 0x338   : > { %v27186_v6 = vpack.i.b16 %v31208_v33, %v34813_v17  ;;  %28746 = vmatpush3.bf16.msra.mxu1 %v31274_v55  ;;  %v12469_v24 = vcombine.low %v27416_v29, %v12390_v21  ;;  %v8634_v3 = vrot.slane %v8618_v8, %v29572_v50  ;;  %v12036_v56 = vcombine.high %v27390_v42, %v27390_v42  ;;  %v29234_v55 = vld [vmem:[%s34687_s7 + $0x48] sm:$0xff]  }
 0x339   : > { %28747 = vmatprep.subr.bf16.mxu1 %v29233_v10  ;;  %v12499_v53 = vcombine.low %v12477_v47, %v12484_v54  ;;  %v8617_v59 = vcombine.low %v27183_v60, %v27184_v48  ;;  %v8641_v23 = vrot.slane %v27196_v45, %v29572_v50  ;;  %v12051_v57 = vcombine.high %v31483_v14, %v31483_v14  ;;  %v31557_v60 = vld [vmem:[%s34687_s7 + $0x98] sm:$0xff]  }
 0x33a   : > { %v8620_v39 = vcombine.low %v27185_v34, %v27186_v6  ;;  %v12491_v0 = vrot.slane %v12469_v24, %v29572_v50  ;;  %v12050_v19 = vrot.slane %v12036_v56, %v29572_v50  ;;  %v12059_v42 = vcombine.high %v27391_v38, %v27391_v38 }
 0x33b   : > { %v12507_v63 = vrot.slane %v12499_v53, %v29572_v50  ;;  %v8627_v28 = vrot.slane %v8617_v59, %v29572_v50  ;;  %v31525_v15 = vrot.slane %v27391_v38, %v29572_v50  ;;  %v12083_v36 = vcombine.high %v27392_v31, %v27392_v31 }
 0x33c   : > { %v8648_v32 = vrot.slane %v8620_v39, %v29572_v50  ;;  %28748 = vmatpush3.bf16.msra.mxu1 %v29233_v10  ;;  %v12500_v40 = vcombine.low %v12491_v0, %v12498_v52  ;;  %v31528_v14 = vrot.slane %v12059_v42, %v29572_v50  ;;  %v31531_v2 = vrot.slane %v27392_v31, %v29572_v50 }
 0x33d   : > { %28749 = vmatprep.subr.bf16.mxu1 %v29234_v55  ;;  %v8649_v5 = vcombine.low %v8627_v28, %v8634_v3  ;;  %v12074_v27 = vcombine.high %v31525_v15, %v31525_v15  ;;  %v31539_v41 = vrot.slane %v12083_v36, %v29572_v50  ;;  %v12106_v9 = vcombine.high %v27393_v26, %v27393_v26 }
 0x33e   : > { %v8650_v51 = vcombine.low %v8641_v23, %v8648_v32  ;;  %v12514_v62 = vrot.slane %v12500_v40, %v29572_v50  ;;  %v12075_v18 = vcombine.high %v31528_v14, %v31528_v14  ;;  %v31547_v20 = vcombine.high %v31531_v2, %v31531_v2  ;;  %v27394_v32 = vld.sshfl [vmem:[#allocation3 + $0x2c] sm:$0x13 pattern:$0x75316420] }
 0x33f   : > { %v8657_v47 = vrot.slane %v8649_v5, %v29572_v50  ;;  %v12113_v37 = vrot.slane %v27393_v26, %v29572_v50  ;;  %v12120_v10 = vrot.slane %v12106_v9, %v29572_v50  ;;  %v12323_v7 = vunpack.i.h.s16 %v12074_v27  ;;  %v27395_v40 = vld.sshfl [vmem:[#allocation3 + $0x30] sm:$0x22 pattern:$0x75316420] }
 0x340   : > { %v8664_v29 = vrot.slane %v8650_v51, %v29572_v50  ;;  %28750 = vmatpush3.bf16.msra.mxu1 %v29234_v55  ;;  %v12515_v61 = vcombine.low %v12507_v63, %v12514_v62  ;;  %v12325_v16 = vunpack.i.h.s16 %v12075_v18  ;;  %v12327_v34 = vunpack.i.h.s16 %v31531_v2 }
 0x341   : > { %v12329_v21 = vunpack.i.h.s16 %v31539_v41  ;;  %28751 = vmatprep.subr.bf16.mxu1 %v29235_v35  ;;  %v31559_v6 = vcombine.high %v12113_v37, %v12113_v37  ;;  %v31561_v8 = vcombine.high %v12120_v10, %v12120_v10  ;;  %v12331_v54 = vunpack.i.h.s16 %v31547_v20 }
 0x342   : > { %v8665_v17 = vcombine.low %v8657_v47, %v8664_v29  ;;  %28814 = vmatmul.mubr.msk.bf16.vlgmr.msra.gmra.mxu0 %vm2062_vm5, %v12515_v61  ;;  %v27417_v52 = vpack.i.b16 %v12075_v18, %v12323_v7  ;;  %v27418_v48 = vpack.i.b16 %v31531_v2, %v12325_v16  ;;  %v27419_v45 = vpack.i.b16 %v31539_v41, %v12327_v34  ;;  %v27396_v29 = vld.sshfl [vmem:[#allocation3 + $0x34] sm:$0x13 pattern:$0x75316420] }
 0x343   : > { %v27420_v38 = vpack.i.b16 %v31547_v20, %v12329_v21  ;;  %v12332_v24 = vunpack.i.h.s16 %v31559_v6  ;;  %v12516_v39 = vcombine.low %v12050_v19, %v12051_v57  ;;  %v7819_v3 = vcombine.high %v31205_v46, %v31205_v46  ;;  %v31596_v18 = vld.sshfl [vmem:[#allocation3 + $0x38] sm:$0x22 pattern:$0x75316420] }
 0x344   : > { %28737 = vmatprep.mubr.msk.bf16.mxu1 %vm2062_vm5, %v8665_v17  ;;  %v7820_v31 = vcombine.high %v31208_v33, %v31208_v33  ;;  %28752 = vmatpush3.bf16.msra.mxu1 %v29235_v35  ;;  %v12517_v56 = vcombine.low %v27417_v52, %v27418_v48  ;;  %v7997_v53 = vunpack.i.h.s16 %v31208_v33  ;;  %v27190_v59 = vpack.i.b16 %v31293_v30, %v31284_v1 }
 0x345   : > { %v12518_v55 = vcombine.low %v27419_v45, %v27420_v38  ;;  %28785 = vmatprep.subr.bf16.mxu1 %v31557_v60  ;;  %v12399_v23 = vpack.i.b16 %v12332_v24, %v12331_v54  ;;  %v12526_v57 = vrot.slane %v12516_v39, %v29572_v50  ;;  %v7999_v0 = vunpack.i.h.s16 %v7819_v3 }
 0x346   : > { %v8001_v46 = vunpack.i.h.s16 %v7820_v31  ;;  %v12533_v26 = vrot.slane %v12517_v56, %v29572_v50  ;;  %v27187_v42 = vpack.i.b16 %v7819_v3, %v7997_v53  ;;  %v8668_v33 = vcombine.low %v31289_v58, %v31298_v13 }
 0x347   : > { %v12540_v19 = vrot.slane %v12518_v55, %v29572_v50  ;;  %v12519_v1 = vcombine.low %v12399_v23, %v31561_v8  ;;  %v27188_v63 = vpack.i.b16 %v7820_v31, %v7999_v0  ;;  %v8669_v36 = vcombine.low %v31306_v4, %v27190_v59 }
 0x348   : > { %v27189_v28 = vpack.i.b16 %v31269_v49, %v8001_v46  ;;  %v12548_v51 = vcombine.low %v12526_v57, %v12533_v26  ;;  %v8690_v35 = vrot.slane %v8668_v33, %v29572_v50  ;;  %v12130_v5 = vcombine.high %v27394_v32, %v27394_v32 }
 0x349   : > { %v31590_v27 = vrot.slane %v27394_v32, %v29572_v50  ;;  %v12547_v9 = vrot.slane %v12519_v1, %v29572_v50  ;;  %v8666_v62 = vcombine.low %v27187_v42, %v27188_v63  ;;  %v8697_v13 = vrot.slane %v8669_v36, %v29572_v50 }
 0x34a   : > { %v8667_v58 = vcombine.low %v27189_v28, %v31281_v11  ;;  %v12556_v49 = vrot.slane %v12548_v51, %v29572_v50  ;;  %v31599_v4 = vrot.slane %v12130_v5, %v29572_v50  ;;  %v12153_v37 = vcombine.high %v27395_v40, %v27395_v40 }
 0x34b   : > { %v31603_v47 = vcombine.high %v31590_v27, %v31590_v27  ;;  %v12549_v10 = vcombine.low %v12540_v19, %v12547_v9  ;;  %v8676_v7 = vrot.slane %v8666_v62, %v29572_v50  ;;  %v8699_v61 = vcombine.low %v8690_v35, %v8697_v13 }
 0x34c   : > { %v8683_v11 = vrot.slane %v8667_v58, %v29572_v50  ;;  %v12160_v16 = vrot.slane %v27395_v40, %v29572_v50  ;;  %v12167_v34 = vrot.slane %v12153_v37, %v29572_v50  ;;  %v12177_v21 = vcombine.high %v27396_v29, %v27396_v29 }
 0x34d   : > { %v31610_v17 = vrot.slane %v27396_v29, %v29572_v50  ;;  %v12563_v54 = vrot.slane %v12549_v10, %v29572_v50  ;;  %v8713_v48 = vrot.slane %v8699_v61, %v29572_v50  ;;  %v12207_v45 = vrot.slane %v31596_v18, %v29572_v50  ;;  %v34815_v10 = vld [vmem:[#allocation31_spill] sm:$0xff]  ;;  %v27398_v61 = vld.sshfl [vmem:[#allocation3 + $0x3c] sm:$0x13 pattern:$0x75316420] }
 0x34e   : > { %v8698_v52 = vcombine.low %v8676_v7, %v8683_v11  ;;  %v31616_v38 = vcombine.high %v12160_v16, %v12160_v16  ;;  %v31618_v39 = vcombine.high %v12167_v34, %v12167_v34  ;;  %v31621_v3 = vrot.slane %v12177_v21, %v29572_v50  ;;  %v34816_v7 = vld [vmem:[#allocation30_spill] sm:$0xff] }
 0x34f   : > { %v31625_v31 = vcombine.high %v31610_v17, %v31610_v17  ;;  %v12564_v56 = vcombine.low %v12556_v49, %v12563_v54  ;;  %v31628_v53 = vcombine.high %v12207_v45, %v12207_v45  ;;  %v12345_v59 = vunpack.i.h.s16 %v31610_v17 }
 0x350   : > { %v8706_v55 = vrot.slane %v8698_v52, %v29572_v50  ;;  %v12341_v23 = vunpack.i.h.s16 %v31616_v38  ;;  %v12343_v57 = vunpack.i.h.s16 %v31618_v39  ;;  %v12347_v0 = vunpack.i.h.s16 %v31621_v3 }
 0x351   : > { %v12349_v46 = vunpack.i.h.s16 %v31625_v31  ;;  %28817 = vmatprep.mubr.msk.bf16.mxu0 %vm2062_vm5, %v12564_v56  ;;  %v12350_v26 = vunpack.i.h.s16 %v31628_v53  ;;  %v27423_v19 = vpack.i.b16 %v31621_v3, %v12345_v59  ;;  %v12565_v42 = vcombine.low %v31590_v27, %v31599_v4 }
 0x352   : > { %v8714_v32 = vcombine.low %v8706_v55, %v8713_v48  ;;  %v27421_v33 = vpack.i.b16 %v31618_v39, %v12341_v23  ;;  %v27422_v1 = vpack.i.b16 %v31610_v17, %v12343_v57  ;;  %v27424_v63 = vpack.i.b16 %v31625_v31, %v12347_v0  ;;  %v27400_v23 = vld.sshfl [vmem:[#allocation3 + $0x44] sm:$0x13 pattern:$0x75316420] }
 0x353   : > { %v8015_v28 = vunpack.i.h.s16 %v31358_v43  ;;  %v12408_v36 = vpack.i.b16 %v12350_v26, %v12349_v46  ;;  %v12575_v40 = vrot.slane %v12565_v42, %v29572_v50  ;;  %v8017_v51 = vunpack.i.h.s16 %v31351_v44 }
 0x354   : > { %28738 = vmatmul.mubr.msk.bf16.gmra.mxu1 %vm2062_vm5, %v8714_v32  ;;  %v8019_v35 = vunpack.i.h.s16 %v31372_v12  ;;  %v12566_v5 = vcombine.low %v31603_v47, %v27421_v33  ;;  %v12567_v9 = vcombine.low %v27422_v1, %v27423_v19  ;;  %v34814_v62 = vunpack.i.h.s16 %v31293_v30 }
 0x355   : > { %v27192_v13 = vpack.i.b16 %v31351_v44, %v8015_v28  ;;  %v12568_v29 = vcombine.low %v27424_v63, %v12408_v36  ;;  %v27193_v49 = vpack.i.b16 %v31372_v12, %v8017_v51  ;;  %v8717_v11 = vcombine.low %v34816_v7, %v34815_v10  ;;  %v27399_v12 = vld.sshfl [vmem:[#allocation3 + $0x40] sm:$0x22 pattern:$0x75316420] }
 0x356   : > { %v27191_v58 = vpack.i.b16 %v31358_v43, %v34814_v62  ;;  %v27194_v37 = vpack.i.b16 %v31354_v22, %v8019_v35  ;;  %v12582_v16 = vrot.slane %v12566_v5, %v29572_v50  ;;  %v12589_v34 = vrot.slane %v12567_v9, %v29572_v50 }
 0x357   : > { %v27197_v30 = vcombine.high %v34816_v7, %v34815_v10  ;;  %v12596_v43 = vrot.slane %v12568_v29, %v29572_v50  ;;  %v8739_v54 = vrot.slane %v8717_v11, %v29572_v50  ;;  %v12200_v22 = vcombine.high %v31596_v18, %v31596_v18 }
 0x358   : > { %v8715_v21 = vcombine.low %v27191_v58, %v27192_v13  ;;  %v8716_v44 = vcombine.low %v27193_v49, %v27194_v37  ;;  %v12597_v52 = vcombine.low %v12575_v40, %v12582_v16  ;;  %v12224_v56 = vcombine.high %v27398_v61, %v27398_v61  ;;  %v27208_v37 = vld.sshfl [vmem:[#allocation3] sm:$0x32 pattern:$0x75316420] }
 0x359   : > { %v8746_v45 = vrot.slane %v27197_v30, %v29572_v50  ;;  %v12598_v55 = vcombine.low %v12589_v34, %v12596_v43  ;;  %v12214_v57 = vrot.slane %v12200_v22, %v29572_v50  ;;  %v31672_v0 = vrot.slane %v27398_v61, %v29572_v50 }
 0x35a   : > { %v8725_v48 = vrot.slane %v8715_v21, %v29572_v50  ;;  %v8732_v59 = vrot.slane %v8716_v44, %v29572_v50  ;;  %v12605_v46 = vrot.slane %v12597_v52, %v29572_v50  ;;  %v31676_v18 = vrot.slane %v12224_v56, %v29572_v50 }
 0x35b   : > { %v8748_v32 = vcombine.low %v8739_v54, %v8746_v45  ;;  %v12247_v19 = vcombine.high %v27399_v12, %v27399_v12  ;;  %v12612_v42 = vrot.slane %v12598_v55, %v29572_v50  ;;  %v31679_v1 = vcombine.high %v12214_v57, %v12214_v57 }
 0x35c   : > { %v8747_v33 = vcombine.low %v8725_v48, %v8732_v59  ;;  %v31683_v63 = vcombine.high %v31672_v0, %v31672_v0  ;;  %v31687_v36 = vrot.slane %v27399_v12, %v29572_v50  ;;  %v12271_v51 = vcombine.high %v27400_v23, %v27400_v23  ;;  %v27209_v12 = vld.sshfl [vmem:[#allocation3 + $0x4] sm:$0x11 pattern:$0x75316420] }
 0x35d   : > { %v8762_v28 = vrot.slane %v8748_v32, %v29572_v50  ;;  %v31690_v40 = vrot.slane %v12247_v19, %v29572_v50  ;;  %v12613_v35 = vcombine.low %v12605_v46, %v12612_v42  ;;  %v31694_v9 = vrot.slane %v27400_v23, %v29572_v50  ;;  %v27210_v23 = vld.sshfl [vmem:[#allocation3 + $0x8] sm:$0x32 pattern:$0x75316420] }
 0x35e   : > { %v8755_v5 = vrot.slane %v8747_v33, %v29572_v50  ;;  %v12614_v62 = vcombine.low %v31679_v1, %v31672_v0  ;;  %v12262_v58 = vcombine.high %v31687_v36, %v31687_v36  ;;  %v31703_v29 = vrot.slane %v12271_v51, %v29572_v50  ;;  %v27211_v42 = vld.sshfl [vmem:[#allocation3 + $0xc] sm:$0x11 pattern:$0x75316420] }
 0x35f   : > { %v12263_v13 = vcombine.high %v31690_v40, %v31690_v40  ;;  %v12615_v49 = vcombine.low %v31676_v18, %v31683_v63  ;;  %28818 = vmatmul.mubr.msk.bf16.gmra.mxu0 %vm2062_vm5, %v12613_v35  ;;  %v31710_v7 = vcombine.high %v31694_v9, %v31694_v9  ;;  %v12363_v11 = vunpack.i.h.s16 %v31694_v9 }
 0x360   : > { %v8763_v10 = vcombine.low %v8755_v5, %v8762_v28  ;;  %v12624_v61 = vrot.slane %v12614_v62, %v29572_v50  ;;  %v12359_v16 = vunpack.i.h.s16 %v12262_v58  ;;  %v12365_v21 = vunpack.i.h.s16 %v31703_v29  ;;  %v27212_v62 = vld.sshfl [vmem:[#allocation3 + $0x10] sm:$0x32 pattern:$0x75316420] }
 0x361   : > { %v12361_v34 = vunpack.i.h.s16 %v12263_v13  ;;  %v12631_v30 = vrot.slane %v12615_v49, %v29572_v50  ;;  %v27427_v43 = vpack.i.b16 %v31703_v29, %v12363_v11  ;;  %v8029_v44 = vunpack.i.l.s16 %v31365_v25 }
 0x362   : > { %28741 = vmatprep.mubr.msk.bf16.mxu1 %vm2062_vm5, %v8763_v10  ;;  %v12367_v54 = vunpack.i.h.s16 %v31710_v7  ;;  %v8943_v22 = vcombine.high %v27208_v37, %v27208_v37  ;;  %v27425_v52 = vpack.i.b16 %v12263_v13, %v12359_v16  ;;  %v27428_v45 = vpack.i.b16 %v31710_v7, %v12365_v21 }
 0x363   : > { %v27426_v48 = vpack.i.b16 %v31694_v9, %v12361_v34  ;;  %v12646_v56 = vcombine.low %v12624_v61, %v12631_v30  ;;  %v8770_v55 = vrot.slane %v8029_v44, %v29572_v50  ;;  %v8950_v57 = vrot.slane %v27208_v37, %v29572_v50 }
 0x364   : > { %v12669_v59 = vrot.slane %v12367_v54, %v29572_v50  ;;  %v8957_v46 = vrot.slane %v8943_v22, %v29572_v50  ;;  %v12617_v32 = vcombine.low %v27427_v43, %v27428_v45  ;;  %v8967_v33 = vcombine.high %v27209_v12, %v27209_v12 }
 0x365   : > { %v12616_v25 = vcombine.low %v27425_v52, %v27426_v48  ;;  %v12654_v19 = vrot.slane %v12646_v56, %v29572_v50  ;;  %v8777_v28 = vrot.slane %v8770_v55, %v29572_v50  ;;  %v8958_v35 = vcombine.high %v8950_v57, %v8950_v57  ;;  %v27213_v56 = vld.sshfl [vmem:[#allocation3 + $0x14] sm:$0x11 pattern:$0x75316420] }
 0x366   : > { %v12676_v51 = vrot.slane %v12669_v59, %v29572_v50  ;;  %v8959_v5 = vcombine.high %v8957_v46, %v8957_v46  ;;  %v12645_v13 = vrot.slane %v12617_v32, %v29572_v50  ;;  %v8974_v49 = vrot.slane %v27209_v12, %v29572_v50 }
 0x367   : > { %v12638_v58 = vrot.slane %v12616_v25, %v29572_v50  ;;  %v8981_v37 = vrot.slane %v8967_v33, %v29572_v50  ;;  %28742 = vmatmul.mubr.msk.bf16.gmra.mxu1 %vm2062_vm5, %v8777_v28  ;;  %v8989_v10 = vcombine.high %v27210_v23, %v27210_v23  ;;  %v8996_v11 = vrot.slane %v27210_v23, %v29572_v50  ;;  %v27214_v25 = vld.sshfl [vmem:[#allocation3 + $0x18] sm:$0x32 pattern:$0x75316420] }
 0x368   : > { %v9013_v61 = vcombine.high %v27211_v42, %v27211_v42  ;;  %v9020_v16 = vrot.slane %v27211_v42, %v29572_v50  ;;  %v9481_v21 = vcombine.low %v8957_v46, %v8958_v35  ;;  %v9482_v30 = vcombine.low %v8959_v5, %v8974_v49  ;;  %v27215_v49 = vld.sshfl [vmem:[#allocation3 + $0x1c] sm:$0x11 pattern:$0x75316420] }
 0x369   : > { %v12647_v34 = vcombine.low %v12638_v58, %v12645_v13  ;;  %v9035_v43 = vcombine.high %v27212_v62, %v27212_v62  ;;  %v9003_v44 = vrot.slane %v8989_v10, %v29572_v50  ;;  %v9004_v54 = vcombine.high %v8996_v11, %v8996_v11 }
 0x36a   : > { %v9027_v22 = vrot.slane %v9013_v61, %v29572_v50  ;;  %v9366_v12 = vunpack.i.h.s16 %v9020_v16  ;;  %v9491_v48 = vrot.slane %v9481_v21, %v29572_v50  ;;  %v9498_v45 = vrot.slane %v9482_v30, %v29572_v50 }
 0x36b   : > { %v12661_v52 = vrot.slane %v12647_v34, %v29572_v50  ;;  %v9042_v55 = vrot.slane %v27212_v62, %v29572_v50  ;;  %v9005_v59 = vcombine.high %v9003_v44, %v9003_v44  ;;  %v9360_v23 = vunpack.i.h.s16 %v9003_v44 }
 0x36c   : > { %v9362_v57 = vunpack.i.h.s16 %v9004_v54  ;;  %v27234_v46 = vpack.i.b16 %v9003_v44, %v8981_v37  ;;  %v27238_v42 = vpack.i.b16 %v9027_v22, %v9366_v12  ;;  %v9513_v33 = vcombine.low %v9491_v48, %v9498_v45 }
 0x36d   : > { %v12662_v32 = vcombine.low %v12654_v19, %v12661_v52  ;;  %v9049_v28 = vrot.slane %v9035_v43, %v29572_v50  ;;  %v9364_v35 = vunpack.i.h.s16 %v9005_v59  ;;  %v27235_v5 = vpack.i.b16 %v9004_v54, %v9360_v23  ;;  %v27216_v54 = vld.sshfl [vmem:[#allocation3 + $0x20] sm:$0x32 pattern:$0x75316420] }
 0x36e   : > { %v27236_v58 = vpack.i.b16 %v9005_v59, %v9362_v57  ;;  %v9059_v13 = vcombine.high %v27213_v56, %v27213_v56  ;;  %v9521_v10 = vrot.slane %v9513_v33, %v29572_v50  ;;  %v9066_v62 = vrot.slane %v27213_v56, %v29572_v50  ;;  %v27217_v23 = vld.sshfl [vmem:[#allocation3 + $0x24] sm:$0x11 pattern:$0x75316420] }
 0x36f   : > { %28821 = vmatprep.mubr.msk.bf16.mxu0 %vm2062_vm5, %v12662_v32  ;;  %v9081_v11 = vcombine.high %v27214_v25, %v27214_v25  ;;  %v9088_v37 = vrot.slane %v27214_v25, %v29572_v50  ;;  %v27237_v19 = vpack.i.b16 %v9020_v16, %v9364_v35  ;;  %v9483_v61 = vcombine.low %v27234_v46, %v27235_v5 }
 0x370   : > { %28822 = vmatmul.mubr.msk.bf16.gmra.mxu0 %vm2062_vm5, %v12676_v51  ;;  %v9073_v34 = vrot.slane %v9059_v13, %v29572_v50  ;;  %v9530_v21 = vcombine.low %v27238_v42, %v9049_v28  ;;  %v27254_v44 = vcombine.high %v9042_v55, %v9049_v28  ;;  %v9105_v22 = vcombine.high %v27215_v49, %v27215_v49 }
 0x371   : > { %v9095_v30 = vrot.slane %v9081_v11, %v29572_v50  ;;  %v9096_v43 = vcombine.high %v9088_v37, %v9088_v37  ;;  %v9484_v12 = vcombine.low %v27236_v58, %v27237_v19  ;;  %v9505_v52 = vrot.slane %v9483_v61, %v29572_v50  ;;  %v27218_v58 = vld.sshfl [vmem:[#allocation3 + $0x28] sm:$0x32 pattern:$0x75316420] }
 0x372   : > { %v9540_v48 = vrot.slane %v9530_v21, %v29572_v50  ;;  %v9112_v45 = vrot.slane %v27215_v49, %v29572_v50  ;;  %v9547_v46 = vrot.slane %v27254_v44, %v29572_v50  ;;  %v9119_v55 = vrot.slane %v9105_v22, %v29572_v50 }
 0x373   : > { %v9097_v56 = vcombine.high %v9095_v30, %v9095_v30  ;;  %v9378_v51 = vunpack.i.h.s16 %v9095_v30  ;;  %v9380_v16 = vunpack.i.h.s16 %v9096_v43  ;;  %v27239_v59 = vpack.i.b16 %v9095_v30, %v9073_v34 }
 0x374   : > { %v9512_v57 = vrot.slane %v9484_v12, %v29572_v50  ;;  %v9127_v25 = vcombine.high %v27216_v54, %v27216_v54  ;;  %v9134_v28 = vrot.slane %v27216_v54, %v29572_v50  ;;  %v9562_v5 = vcombine.low %v9540_v48, %v9547_v46  ;;  %v27219_v12 = vld.sshfl [vmem:[#allocation3 + $0x2c] sm:$0x11 pattern:$0x75316420] }
 0x375   : > { %v27240_v32 = vpack.i.b16 %v9096_v43, %v9378_v51  ;;  %v27241_v42 = vpack.i.b16 %v9097_v56, %v9380_v16  ;;  %v9532_v33 = vcombine.low %v9066_v62, %v27239_v59  ;;  %v9151_v49 = vcombine.high %v27217_v23, %v27217_v23 }
 0x376   : > { %v9514_v35 = vcombine.low %v9505_v52, %v9512_v57  ;;  %v9141_v13 = vrot.slane %v9127_v25, %v29572_v50  ;;  %v9142_v19 = vcombine.high %v9134_v28, %v9134_v28  ;;  %v9158_v61 = vrot.slane %v27217_v23, %v29572_v50  ;;  %v27220_v25 = vld.sshfl [vmem:[#allocation3 + $0x30] sm:$0x32 pattern:$0x75316420] }
 0x377   : > { %v9533_v11 = vcombine.low %v27240_v32, %v27241_v42  ;;  %v9554_v37 = vrot.slane %v9532_v33, %v29572_v50  ;;  %v9570_v21 = vrot.slane %v9562_v5, %v29572_v50  ;;  %v9165_v62 = vrot.slane %v9151_v49, %v29572_v50  ;;  %v27221_v28 = vld.sshfl [vmem:[#allocation3 + $0x34] sm:$0x11 pattern:$0x75316420] }
 0x378   : > { %v9528_v34 = vrot.slane %v9514_v35, %v29572_v50  ;;  %v9143_v30 = vcombine.high %v9141_v13, %v9141_v13  ;;  %v9173_v44 = vcombine.high %v27218_v58, %v27218_v58  ;;  %v9180_v54 = vrot.slane %v27218_v58, %v29572_v50  ;;  %v27222_v58 = vld.sshfl [vmem:[#allocation3 + $0x38] sm:$0x32 pattern:$0x75316420] }
 0x379   : > { %v9561_v43 = vrot.slane %v9533_v11, %v29572_v50  ;;  %v9382_v22 = vunpack.i.h.s16 %v9097_v56  ;;  %v9384_v48 = vunpack.i.h.s16 %v9112_v45  ;;  %v9580_v51 = vcombine.low %v9141_v13, %v9142_v19 }
 0x37a   : > { %v9529_v52 = vcombine.low %v9521_v10, %v9528_v34  ;;  %v9581_v16 = vcombine.low %v9143_v30, %v9158_v61  ;;  %v9187_v23 = vrot.slane %v9173_v44, %v29572_v50  ;;  %v9188_v57 = vcombine.high %v9180_v54, %v9180_v54  ;;  %v29237_v61 = vld [vmem:[%s34687_s7 + $0x90] sm:$0xff]  }
 0x37b   : > { %v9563_v59 = vcombine.low %v9554_v37, %v9561_v43  ;;  %v27242_v46 = vpack.i.b16 %v9112_v45, %v9382_v22  ;;  %v27243_v32 = vpack.i.b16 %v9119_v55, %v9384_v48  ;;  %v9596_v42 = vrot.slane %v9580_v51, %v29572_v50 }
 0x37c   : > { %28753 = vmatprep.mubr.msk.bf16.mxu1 %vm2062_vm5, %v9529_v52  ;;  %v9603_v33 = vrot.slane %v9581_v16, %v29572_v50  ;;  %v9197_v56 = vcombine.high %v27219_v12, %v27219_v12  ;;  %v9396_v35 = vunpack.i.h.s16 %v9187_v23  ;;  %v27244_v5 = vpack.i.b16 %v9187_v23, %v9165_v62 }
 0x37d   : > { %v9577_v10 = vrot.slane %v9563_v59, %v29572_v50  ;;  %v9189_v13 = vcombine.high %v9187_v23, %v9187_v23  ;;  %v9579_v49 = vcombine.low %v27242_v46, %v27243_v32  ;;  %v9204_v11 = vrot.slane %v27219_v12, %v29572_v50  ;;  %v27223_v32 = vld.sshfl [vmem:[#allocation3 + $0x3c] sm:$0x11 pattern:$0x75316420] }
 0x37e   : > { %v9211_v45 = vrot.slane %v9197_v56, %v29572_v50  ;;  %v9219_v37 = vcombine.high %v27220_v25, %v27220_v25  ;;  %v27245_v55 = vpack.i.b16 %v9188_v57, %v9396_v35  ;;  %v9226_v34 = vrot.slane %v27220_v25, %v29572_v50  ;;  %v27224_v35 = vld.sshfl [vmem:[#allocation3 + $0x40] sm:$0x32 pattern:$0x75316420] }
 0x37f   : > { %v9578_v19 = vcombine.low %v9570_v21, %v9577_v10  ;;  %v9243_v30 = vcombine.high %v27221_v28, %v27221_v28  ;;  %v9589_v43 = vrot.slane %v9579_v49, %v29572_v50  ;;  %v9250_v44 = vrot.slane %v27221_v28, %v29572_v50 }
 0x380   : > { %v9233_v62 = vrot.slane %v9219_v37, %v29572_v50  ;;  %v9265_v54 = vcombine.high %v27222_v58, %v27222_v58  ;;  %v9582_v22 = vcombine.low %v27244_v5, %v27245_v55  ;;  %v9398_v12 = vunpack.i.h.s16 %v9188_v57  ;;  %v29238_v57 = vld [vmem:[%s34687_s7 + $0x88] sm:$0xff]  }
 0x381   : > { %28754 = vmatmul.mubr.msk.bf16.vlgmr.msra.gmra.mxu1 %vm2062_vm5, %v9578_v19  ;;  %v9257_v21 = vrot.slane %v9243_v30, %v29572_v50  ;;  %v9400_v52 = vunpack.i.h.s16 %v9189_v13  ;;  %v9611_v48 = vcombine.low %v9589_v43, %v9596_v42  ;;  %v9402_v16 = vunpack.i.h.s16 %v9204_v11  ;;  %v27225_v37 = vld.sshfl [vmem:[#allocation3 + $0x44] sm:$0x11 pattern:$0x75316420] }
 0x382   : > { %28786 = vmatpush3.bf16.msra.mxu1 %v31557_v60  ;;  %v9279_v51 = vrot.slane %v9265_v54, %v29572_v50  ;;  %v27255_v59 = vcombine.high %v9226_v34, %v9233_v62  ;;  %v9610_v23 = vrot.slane %v9582_v22, %v29572_v50  ;;  %v27246_v46 = vpack.i.b16 %v9189_v13, %v9398_v12 }
 0x383   : > { %28787 = vmatprep.subr.bf16.mxu1 %v29237_v61  ;;  %v27247_v25 = vpack.i.b16 %v9204_v11, %v9400_v52  ;;  %v9272_v28 = vrot.slane %v27222_v58, %v29572_v50  ;;  %v9619_v56 = vrot.slane %v9611_v48, %v29572_v50  ;;  %v27248_v60 = vpack.i.b16 %v9211_v45, %v9402_v16 }
 0x384   : > { %v27249_v42 = vpack.i.b16 %v9279_v51, %v9257_v21  ;;  %v9652_v10 = vrot.slane %v27255_v59, %v29572_v50  ;;  %v9612_v5 = vcombine.low %v9603_v33, %v9610_v23  ;;  %v9281_v13 = vcombine.high %v9279_v51, %v9279_v51  ;;  %v29239_v33 = vld [vmem:[%s34687_s7 + $0x80] sm:$0xff]  }
 0x385   : > { %v9628_v49 = vcombine.low %v27246_v46, %v27247_v25  ;;  %v9280_v19 = vcombine.high %v9272_v28, %v9272_v28  ;;  %v9629_v11 = vcombine.low %v27248_v60, %v9233_v62  ;;  %v9289_v58 = vcombine.high %v27223_v32, %v27223_v32 }
 0x386   : > { %28788 = vmatpush3.bf16.msra.mxu1 %v29237_v61  ;;  %v9631_v55 = vcombine.low %v9250_v44, %v27249_v42  ;;  %v9296_v34 = vrot.slane %v27223_v32, %v29572_v50  ;;  %v9626_v30 = vrot.slane %v9612_v5, %v29572_v50  ;;  %v9311_v45 = vcombine.high %v27224_v35, %v27224_v35  ;;  %v27324_v42 = vld.sshfl [vmem:[#allocation3] sm:$0x22 pattern:$0x75316420] }
 0x387   : > { %v9638_v43 = vrot.slane %v9628_v49, %v29572_v50  ;;  %v9318_v54 = vrot.slane %v27224_v35, %v29572_v50  ;;  %28789 = vmatprep.subr.bf16.mxu1 %v29238_v57  ;;  %v9645_v22 = vrot.slane %v9629_v11, %v29572_v50  ;;  %v9303_v62 = vrot.slane %v9289_v58, %v29572_v50  ;;  %v27326_v58 = vld.sshfl [vmem:[#allocation3 + $0x8] sm:$0x22 pattern:$0x75316420] }
 0x388   : > { %v9659_v61 = vrot.slane %v9631_v55, %v29572_v50  ;;  %v9342_v44 = vrot.slane %v27225_v37, %v29572_v50  ;;  %v9627_v21 = vcombine.low %v9619_v56, %v9626_v30  ;;  %v9325_v12 = vrot.slane %v9311_v45, %v29572_v50  ;;  %v31806_v56 = vld [vmem:[%s34687_s7 + $0xd8] sm:$0xff]  }
 0x389   : > { %v9326_v52 = vcombine.high %v9318_v54, %v9318_v54  ;;  %v9414_v48 = vunpack.i.h.s16 %v9279_v51  ;;  %v9660_v16 = vcombine.low %v9638_v43, %v9645_v22  ;;  %v9416_v23 = vunpack.i.h.s16 %v9280_v19 }
 0x38a   : > { %v9661_v59 = vcombine.low %v9652_v10, %v9659_v61  ;;  %v9418_v46 = vunpack.i.h.s16 %v9281_v13  ;;  %28790 = vmatpush3.bf16.msra.mxu1 %v29238_v57  ;;  %28757 = vmatprep.mubr.msk.bf16.mxu1 %vm2062_vm5, %v9627_v21  ;;  %v9327_v25 = vcombine.high %v9325_v12, %v9325_v12  ;;  %v9420_v32 = vunpack.i.h.s16 %v9296_v34  ;;  %v27325_v57 = vld.sshfl [vmem:[#allocation3 + $0x4] sm:$0x13 pattern:$0x75316420] }
 0x38b   : > { %v27250_v28 = vpack.i.b16 %v9280_v19, %v9414_v48  ;;  %v9679_v60 = vcombine.low %v9325_v12, %v9326_v52  ;;  %28791 = vmatprep.subr.bf16.mxu1 %v29239_v33  ;;  %v9668_v51 = vrot.slane %v9660_v16, %v29572_v50  ;;  %v27251_v35 = vpack.i.b16 %v9281_v13, %v9416_v23  ;;  %v27327_v13 = vld.sshfl [vmem:[#allocation3 + $0xc] sm:$0x13 pattern:$0x75316420] }
 0x38c   : > { %v9675_v10 = vrot.slane %v9661_v59, %v29572_v50  ;;  %v27252_v5 = vpack.i.b16 %v9296_v34, %v9418_v46  ;;  %v27253_v49 = vpack.i.b16 %v9303_v62, %v9420_v32  ;;  %v9680_v11 = vcombine.low %v9327_v25, %v9342_v44 }
 0x38d   : > { %v9701_v55 = vrot.slane %v9679_v60, %v29572_v50  ;;  %v9335_v19 = vcombine.high %v27225_v37, %v27225_v37  ;;  %v9677_v43 = vcombine.low %v27250_v28, %v27251_v35  ;;  %v10889_v45 = vcombine.high %v27324_v42, %v27324_v42 }
 0x38e   : > { %v9676_v30 = vcombine.low %v9668_v51, %v9675_v10  ;;  %v10896_v54 = vrot.slane %v27324_v42, %v29572_v50  ;;  %28792 = vmatpush3.bf16.msra.mxu1 %v29239_v33  ;;  %v9678_v22 = vcombine.low %v27252_v5, %v27253_v49  ;;  %v9708_v61 = vrot.slane %v9680_v11, %v29572_v50 }
 0x38f   : > { %v9349_v21 = vrot.slane %v9335_v19, %v29572_v50  ;;  %v10913_v34 = vcombine.high %v27325_v57, %v27325_v57  ;;  %28825 = vmatprep.subr.bf16.mxu1 %v31806_v56  ;;  %v9687_v37 = vrot.slane %v9677_v43, %v29572_v50  ;;  %v10903_v62 = vrot.slane %v10889_v45, %v29572_v50  ;;  %v27328_v19 = vld.sshfl [vmem:[#allocation3 + $0x10] sm:$0x22 pattern:$0x75316420] }
 0x390   : > { %28758 = vmatmul.mubr.msk.bf16.gmra.mxu1 %vm2062_vm5, %v9676_v30  ;;  %v10920_v44 = vrot.slane %v27325_v57, %v29572_v50  ;;  %v10936_v12 = vcombine.high %v27326_v58, %v27326_v58  ;;  %v9694_v33 = vrot.slane %v9678_v22, %v29572_v50  ;;  %v9710_v52 = vcombine.low %v9701_v55, %v9708_v61  ;;  %v27329_v22 = vld.sshfl [vmem:[#allocation3 + $0x14] sm:$0x13 pattern:$0x75316420] }
 0x391   : > { %v9430_v48 = vunpack.i.l.s16 %v9349_v21  ;;  %v10927_v16 = vrot.slane %v10913_v34, %v29572_v50  ;;  %v10943_v23 = vrot.slane %v27326_v58, %v29572_v50  ;;  %v10960_v25 = vcombine.high %v27327_v13, %v27327_v13 }
 0x392   : > { %v10928_v59 = vcombine.high %v10920_v44, %v10920_v44  ;;  %v10950_v46 = vrot.slane %v10936_v12, %v29572_v50  ;;  %v9709_v32 = vcombine.low %v9687_v37, %v9694_v33  ;;  %v9724_v28 = vrot.slane %v9710_v52, %v29572_v50  ;;  %v27330_v37 = vld.sshfl [vmem:[#allocation3 + $0x18] sm:$0x22 pattern:$0x75316420] }
 0x393   : > { %v9732_v60 = vrot.slane %v9430_v48, %v29572_v50  ;;  %v10967_v42 = vrot.slane %v27327_v13, %v29572_v50  ;;  %v10951_v51 = vcombine.high %v10943_v23, %v10943_v23  ;;  %v10974_v35 = vrot.slane %v10960_v25, %v29572_v50 }
 0x394   : > { %v10952_v10 = vcombine.high %v10950_v46, %v10950_v46  ;;  %v27370_v5 = vcombine.high %v10896_v54, %v10903_v62  ;;  %v9717_v57 = vrot.slane %v9709_v32, %v29572_v50  ;;  %v11437_v13 = vcombine.low %v10920_v44, %v10927_v16  ;;  %v27331_v16 = vld.sshfl [vmem:[#allocation3 + $0x1c] sm:$0x13 pattern:$0x75316420] }
 0x395   : > { %v9739_v49 = vrot.slane %v9732_v60, %v29572_v50  ;;  %v10975_v11 = vcombine.high %v10967_v42, %v10967_v42  ;;  %v11319_v55 = vunpack.i.h.s16 %v10967_v42  ;;  %v11315_v58 = vunpack.i.h.s16 %v10951_v51 }
 0x396   : > { %v11317_v30 = vunpack.i.h.s16 %v10952_v10  ;;  %v11321_v43 = vunpack.i.h.s16 %v10974_v35  ;;  %v27350_v45 = vpack.i.b16 %v10951_v51, %v10928_v59  ;;  %v9725_v61 = vcombine.low %v9717_v57, %v9724_v28 }
 0x397   : > { %v27353_v21 = vpack.i.b16 %v10974_v35, %v11319_v55  ;;  %v11446_v34 = vrot.slane %v27370_v5, %v29572_v50  ;;  %v27351_v12 = vpack.i.b16 %v10952_v10, %v11315_v58  ;;  %v10983_v33 = vcombine.high %v27328_v19, %v27328_v19 }
 0x398   : > { %v27352_v54 = vpack.i.b16 %v10967_v42, %v11317_v30  ;;  %v27354_v62 = vpack.i.b16 %v10975_v11, %v11321_v43  ;;  %28761 = vmatprep.mubr.msk.bf16.mxu1 %vm2062_vm5, %v9725_v61  ;;  %v11453_v52 = vrot.slane %v11437_v13, %v29572_v50  ;;  %v10990_v48 = vrot.slane %v27328_v19, %v29572_v50 }
 0x399   : > { %v11007_v23 = vcombine.high %v27329_v22, %v27329_v22  ;;  %v11014_v59 = vrot.slane %v27329_v22, %v29572_v50  ;;  %28762 = vmatmul.mubr.msk.bf16.gmra.mxu1 %vm2062_vm5, %v9739_v49  ;;  %v11438_v46 = vcombine.low %v27350_v45, %v27351_v12  ;;  %v10997_v25 = vrot.slane %v10983_v33, %v29572_v50 }
 0x39a   : > { %v11439_v44 = vcombine.low %v27352_v54, %v27353_v21  ;;  %v11030_v32 = vcombine.high %v27330_v37, %v27330_v37  ;;  %v11468_v28 = vcombine.low %v11446_v34, %v11453_v52  ;;  %v10998_v60 = vcombine.high %v10990_v48, %v10990_v48 }
 0x39b   : > { %v11021_v42 = vrot.slane %v11007_v23, %v29572_v50  ;;  %v11022_v51 = vcombine.high %v11014_v59, %v11014_v59  ;;  %v11460_v10 = vrot.slane %v11438_v46, %v29572_v50  ;;  %v10999_v5 = vcombine.high %v10997_v25, %v10997_v25 }
 0x39c   : > { %v11467_v35 = vrot.slane %v11439_v44, %v29572_v50  ;;  %v11037_v57 = vrot.slane %v27330_v37, %v29572_v50  ;;  %v11476_v49 = vrot.slane %v11468_v28, %v29572_v50  ;;  %v11044_v11 = vrot.slane %v11030_v32, %v29572_v50 }
 0x39d   : > { %v11061_v55 = vrot.slane %v27331_v16, %v29572_v50  ;;  %v11485_v19 = vcombine.low %v27354_v62, %v10998_v60  ;;  %v11486_v43 = vcombine.low %v10999_v5, %v11014_v59  ;;  %v11054_v45 = vcombine.high %v27331_v16, %v27331_v16 }
 0x39e   : > { %v11469_v58 = vcombine.low %v11460_v10, %v11467_v35  ;;  %v11045_v30 = vcombine.high %v11037_v57, %v11037_v57  ;;  %v11046_v22 = vcombine.high %v11044_v11, %v11044_v11  ;;  %v27360_v62 = vpack.i.b16 %v31559_v6, %v31547_v20 }
 0x39f   : > { %v11495_v61 = vrot.slane %v11485_v19, %v29572_v50  ;;  %v11069_v21 = vcombine.high %v11061_v55, %v11061_v55  ;;  %v11337_v13 = vunpack.i.h.s16 %v11061_v55  ;;  %v11502_v54 = vrot.slane %v11486_v43, %v29572_v50 }
 0x3a0   : > { %v11483_v34 = vrot.slane %v11469_v58, %v29572_v50  ;;  %v11333_v12 = vunpack.i.h.s16 %v11045_v30  ;;  %v27355_v37 = vpack.i.b16 %v11045_v30, %v11022_v51  ;;  %v11335_v33 = vunpack.i.h.s16 %v11046_v22 }
 0x3a1   : > { %v11068_v52 = vrot.slane %v11054_v45, %v29572_v50  ;;  %v27361_v48 = vpack.i.b16 %v31561_v8, %v12332_v24  ;;  %v11517_v44 = vcombine.low %v11495_v61, %v11502_v54  ;;  %v27371_v28 = vcombine.high %v31525_v15, %v31528_v14  ;;  %v29241_v54 = vld [vmem:[%s34687_s7 + $0xd0] sm:$0xff]  }
 0x3a2   : > { %v11484_v23 = vcombine.low %v11476_v49, %v11483_v34  ;;  %v27356_v59 = vpack.i.b16 %v11046_v22, %v11333_v12  ;;  %v11487_v46 = vcombine.low %v11021_v42, %v27355_v37  ;;  %v27357_v16 = vpack.i.b16 %v11061_v55, %v11335_v33 }
 0x3a3   : > { %v11339_v25 = vunpack.i.h.s16 %v11068_v52  ;;  %v27358_v32 = vpack.i.b16 %v11068_v52, %v11337_v13  ;;  %v11525_v20 = vrot.slane %v11517_v44, %v29572_v50  ;;  %v11536_v6 = vcombine.low %v31531_v2, %v31539_v41 }
 0x3a4   : > { %28793 = vmatprep.mubr.msk.bf16.mxu1 %vm2062_vm5, %v11484_v23  ;;  %v11509_v60 = vrot.slane %v11487_v46, %v29572_v50  ;;  %v11537_v24 = vcombine.low %v27360_v62, %v27361_v48  ;;  %v11488_v51 = vcombine.low %v27356_v59, %v27357_v16  ;;  %v11551_v42 = vrot.slane %v27371_v28, %v29572_v50  ;;  %v27439_v59 = vld.sshfl [vmem:[#allocation3] sm:$0x20 pattern:$0x75316420] }
 0x3a5   : > { %v27359_v10 = vpack.i.b16 %v11069_v21, %v11339_v25  ;;  %v11353_v35 = vunpack.i.h.s16 %v31561_v8  ;;  %v11558_v5 = vrot.slane %v11536_v6, %v29572_v50  ;;  %v11355_v14 = vunpack.i.h.s16 %v31590_v27  ;;  %v27440_v16 = vld.sshfl [vmem:[#allocation3 + $0x4] sm:$0x33 pattern:$0x75316420] }
 0x3a6   : > { %v11565_v15 = vrot.slane %v11537_v24, %v29572_v50  ;;  %v11357_v57 = vunpack.i.h.s16 %v31599_v4  ;;  %v11516_v49 = vrot.slane %v11488_v51, %v29572_v50  ;;  %v27365_v41 = vpack.i.b16 %v31628_v53, %v31625_v31 }
 0x3a7   : > { %v11534_v11 = vcombine.low %v27358_v32, %v27359_v10  ;;  %v27362_v2 = vpack.i.b16 %v31590_v27, %v11353_v35  ;;  %v27363_v19 = vpack.i.b16 %v31599_v4, %v11355_v14  ;;  %v11585_v58 = vcombine.low %v31618_v39, %v31610_v17  ;;  %v27443_v14 = vld.sshfl [vmem:[#allocation3 + $0x10] sm:$0x20 pattern:$0x75316420] }
 0x3a8   : > { %v11567_v55 = vcombine.low %v11558_v5, %v11565_v15  ;;  %v27364_v8 = vpack.i.b16 %v31603_v47, %v11357_v57  ;;  %v11518_v30 = vcombine.low %v11509_v60, %v11516_v49  ;;  %v11586_v45 = vcombine.low %v31621_v3, %v27365_v41  ;;  %v29243_v49 = vld [vmem:[%s34687_s7 + $0xc0] sm:$0xff]  }
 0x3a9   : > { %v11544_v43 = vrot.slane %v11534_v11, %v29572_v50  ;;  %v11371_v22 = vunpack.i.h.s16 %v31679_v1  ;;  %v11583_v61 = vcombine.low %v27362_v2, %v27363_v19  ;;  %v11607_v21 = vrot.slane %v11585_v58, %v29572_v50 }
 0x3aa   : > { %v11581_v27 = vrot.slane %v11567_v55, %v29572_v50  ;;  %v11584_v31 = vcombine.low %v27364_v8, %v31616_v38  ;;  %v11532_v4 = vrot.slane %v11518_v30, %v29572_v50  ;;  %v11614_v13 = vrot.slane %v11586_v45, %v29572_v50 }
 0x3ab   : > { %v11566_v47 = vcombine.low %v11544_v43, %v11551_v42  ;;  %v11373_v17 = vunpack.i.h.s16 %v31672_v0  ;;  %v11593_v39 = vrot.slane %v11583_v61, %v29572_v50  ;;  %v11375_v34 = vunpack.i.h.s16 %v31676_v18 }
 0x3ac   : > { %v11600_v3 = vrot.slane %v11584_v31, %v29572_v50  ;;  %v27366_v12 = vpack.i.b16 %v31679_v1, %v12350_v26  ;;  %v11533_v38 = vcombine.low %v11525_v20, %v11532_v4  ;;  %v11616_v33 = vcombine.low %v11607_v21, %v11614_v13  ;;  %v27444_v4 = vld.sshfl [vmem:[#allocation3 + $0x14] sm:$0x33 pattern:$0x75316420] }
 0x3ad   : > { %v11574_v37 = vrot.slane %v11566_v47, %v29572_v50  ;;  %v27367_v52 = vpack.i.b16 %v31672_v0, %v11371_v22  ;;  %v27368_v48 = vpack.i.b16 %v31676_v18, %v11373_v17  ;;  %v27369_v23 = vpack.i.b16 %v31683_v63, %v11375_v34 }
 0x3ae   : > { %v11615_v62 = vcombine.low %v11593_v39, %v11600_v3  ;;  %v27372_v53 = vcombine.high %v31687_v36, %v31690_v40  ;;  %28794 = vmatmul.mubr.msk.bf16.vlgmr.msra.gmra.mxu1 %vm2062_vm5, %v11533_v38  ;;  %v11630_v1 = vrot.slane %v11616_v33, %v29572_v50  ;;  %v11635_v44 = vcombine.low %v31694_v9, %v31703_v29  ;;  %v27441_v40 = vld.sshfl [vmem:[#allocation3 + $0x8] sm:$0x20 pattern:$0x75316420]  ;;  %v29242_v9 = vld [vmem:[%s34687_s7 + $0xc8] sm:$0xff]  }
 0x3af   : > { %v11582_v26 = vcombine.low %v11574_v37, %v11581_v27  ;;  %v11632_v46 = vcombine.low %v27366_v12, %v27367_v52  ;;  %28826 = vmatpush3.bf16.msra.mxu1 %v31806_v56  ;;  %v11633_v18 = vcombine.low %v27368_v48, %v27369_v23  ;;  %v11385_v36 = vunpack.i.l.s16 %v31710_v7  ;;  %v27442_v29 = vld.sshfl [vmem:[#allocation3 + $0xc] sm:$0x33 pattern:$0x75316420]  ;;  %v31934_v23 = vpop.f32.mrf.mxu1 }
 0x3b0   : > { %v11623_v0 = vrot.slane %v11615_v62, %v29572_v50  ;;  %v11656_v63 = vrot.slane %v27372_v53, %v29572_v50  ;;  %28827 = vmatprep.subr.bf16.mxu1 %v29241_v54  ;;  %v11663_v32 = vrot.slane %v11635_v44, %v29572_v50  ;;  %v12853_v56 = vcombine.high %v27439_v59, %v27439_v59  ;;  %v27445_v3 = vld.sshfl [vmem:[#allocation3 + $0x18] sm:$0x20 pattern:$0x75316420] }
 0x3b1   : > { %28797 = vmatprep.mubr.msk.bf16.mxu1 %vm2062_vm5, %v11582_v26  ;;  %v11642_v25 = vrot.slane %v11632_v46, %v29572_v50  ;;  %v11649_v60 = vrot.slane %v11633_v18, %v29572_v50  ;;  %v31913_v20 = vrot.slane %v11385_v36, %v29572_v50  ;;  %v12869_v7 = vcombine.high %v27440_v16, %v27440_v16  ;;  %v27446_v52 = vld.sshfl [vmem:[#allocation3 + $0x1c] sm:$0x33 pattern:$0x75316420] }
 0x3b2   : > { %v11631_v28 = vcombine.low %v11623_v0, %v11630_v1  ;;  %v11665_v6 = vcombine.low %v11656_v63, %v11663_v32  ;;  %v12860_v24 = vrot.slane %v12853_v56, %v29572_v50  ;;  %v12876_v51 = vrot.slane %v27440_v16, %v29572_v50  ;;  %v31940_v32 = vpop.f32.mrf.mxu1 }
 0x3b3   : > { %v12893_v10 = vcombine.high %v27441_v40, %v27441_v40  ;;  %28828 = vmatpush3.bf16.msra.mxu1 %v29241_v54  ;;  %v11664_v42 = vcombine.low %v11642_v25, %v11649_v60  ;;  %v11694_v35 = vrot.slane %v31913_v20, %v29572_v50  ;;  %v12883_v5 = vrot.slane %v12869_v7, %v29572_v50  ;;  %v27447_v25 = vld.sshfl [vmem:[#allocation3 + $0x20] sm:$0x20 pattern:$0x75316420] }
 0x3b4   : > { %v12909_v15 = vcombine.high %v27442_v29, %v27442_v29  ;;  %v11679_v57 = vrot.slane %v11665_v6, %v29572_v50  ;;  %28829 = vmatprep.subr.bf16.mxu1 %v29242_v9  ;;  %v12861_v11 = vcombine.high %v12860_v24, %v12860_v24  ;;  %v12884_v2 = vcombine.high %v12876_v51, %v12876_v51  ;;  %v27448_v24 = vld.sshfl [vmem:[#allocation3 + $0x24] sm:$0x33 pattern:$0x75316420] }
 0x3b5   : > { %v12900_v41 = vrot.slane %v12893_v10, %v29572_v50  ;;  %v11672_v55 = vrot.slane %v11664_v42, %v29572_v50  ;;  %v12885_v19 = vcombine.high %v12883_v5, %v12883_v5  ;;  %v12916_v8 = vrot.slane %v27442_v29, %v29572_v50 }
 0x3b6   : > { %v12923_v58 = vrot.slane %v12909_v15, %v29572_v50  ;;  %28798 = vmatmul.mubr.msk.bf16.gmra.mxu1 %vm2062_vm5, %v11631_v28  ;;  %v13337_v43 = vcombine.low %v12861_v11, %v12876_v51  ;;  %v13338_v45 = vcombine.low %v12883_v5, %v12884_v2  ;;  %v12933_v22 = vcombine.high %v27443_v14, %v27443_v14  ;;  %v31948_v11 = vpop.f32.mrf.mxu1 }
 0x3b7   : > { %v12901_v30 = vcombine.high %v12900_v41, %v12900_v41  ;;  %v11680_v27 = vcombine.low %v11672_v55, %v11679_v57  ;;  %28830 = vmatpush3.bf16.msra.mxu1 %v29242_v9  ;;  %v12924_v61 = vcombine.high %v12916_v8, %v12916_v8  ;;  %v13218_v21 = vunpack.i.h.s16 %v12916_v8 }
 0x3b8   : > { %v12925_v31 = vcombine.high %v12923_v58, %v12923_v58  ;;  %28831 = vmatprep.subr.bf16.mxu1 %v29243_v49  ;;  %v13220_v13 = vunpack.i.h.s16 %v12923_v58  ;;  %v13347_v39 = vrot.slane %v13337_v43, %v29572_v50  ;;  %v13354_v38 = vrot.slane %v13338_v45, %v29572_v50  ;;  %v27450_v43 = vld.sshfl [vmem:[#allocation3 + $0x2c] sm:$0x33 pattern:$0x75316420] }
 0x3b9   : > { %v13216_v47 = vunpack.i.h.s16 %v12901_v30  ;;  %v27465_v17 = vpack.i.b16 %v12901_v30, %v12885_v19  ;;  %28801 = vmatprep.mubr.msk.bf16.mxu1 %vm2062_vm5, %v11680_v27  ;;  %v13222_v34 = vunpack.i.h.s16 %v12924_v61  ;;  %v27467_v12 = vpack.i.b16 %v12923_v58, %v13218_v21  ;;  %v31954_v21 = vpop.f32.mrf.mxu0 }
 0x3ba   : > { %v12940_v37 = vrot.slane %v12933_v22, %v29572_v50  ;;  %v27468_v33 = vpack.i.b16 %v12924_v61, %v13220_v13  ;;  %v12949_v62 = vcombine.high %v27444_v4, %v27444_v4  ;;  %v12956_v48 = vrot.slane %v27444_v4, %v29572_v50 }
 0x3bb   : > { %v27466_v54 = vpack.i.b16 %v12916_v8, %v13216_v47  ;;  %v27469_v53 = vpack.i.b16 %v12925_v31, %v13222_v34  ;;  %v13369_v59 = vcombine.low %v13347_v39, %v13354_v38  ;;  %28832 = vmatpush3.bf16.msra.mxu1 %v29243_v49  ;;  %v12973_v1 = vcombine.high %v27445_v3, %v27445_v3  ;;  %v27449_v49 = vld.sshfl [vmem:[#allocation3 + $0x28] sm:$0x20 pattern:$0x75316420]  ;;  %v31958_v39 = vpop.f32.mrf.mxu1 }
 0x3bc   : > { %v12941_v26 = vcombine.high %v12940_v37, %v12940_v37  ;;  %v13340_v44 = vcombine.low %v27467_v12, %v27468_v33  ;;  %v12963_v16 = vrot.slane %v12949_v62, %v29572_v50  ;;  %v12964_v0 = vcombine.high %v12956_v48, %v12956_v48  ;;  %v27451_v62 = vld.sshfl [vmem:[#allocation3 + $0x30] sm:$0x20 pattern:$0x75316420] }
 0x3bd   : > { %v13339_v46 = vcombine.low %v27465_v17, %v27466_v54  ;;  %v13377_v18 = vrot.slane %v13369_v59, %v29572_v50  ;;  %v12980_v63 = vrot.slane %v12973_v1, %v29572_v50  ;;  %v12989_v36 = vcombine.high %v27446_v52, %v27446_v52  ;;  %v27452_v59 = vld.sshfl [vmem:[#allocation3 + $0x34] sm:$0x33 pattern:$0x75316420] }
 0x3be   : > { %v12996_v40 = vrot.slane %v27446_v52, %v29572_v50  ;;  %28802 = vmatmul.mubr.msk.bf16.gmra.mxu1 %vm2062_vm5, %v11694_v35  ;;  %v13368_v29 = vrot.slane %v13340_v44, %v29572_v50  ;;  %v12965_v56 = vcombine.high %v12963_v16, %v12963_v16  ;;  %v13386_v28 = vcombine.low %v27469_v53, %v12941_v26 }
 0x3bf   : > { %v13361_v9 = vrot.slane %v13339_v46, %v29572_v50  ;;  %v12981_v60 = vcombine.high %v12980_v63, %v12980_v63  ;;  %v13003_v20 = vrot.slane %v12989_v36, %v29572_v50  ;;  %v13387_v6 = vcombine.low %v12956_v48, %v12963_v16  ;;  %v31964_v46 = vpop.f32.mrf.mxu0  ;;  %v27453_v63 = vld.sshfl [vmem:[#allocation3 + $0x38] sm:$0x20 pattern:$0x75316420]  ;;  %v31968_v36 = vpop.f32.mrf.mxu1 }
 0x3c0   : > { %v13236_v7 = vunpack.i.h.s16 %v12996_v40  ;;  %v13396_v10 = vrot.slane %v13386_v28, %v29572_v50  ;;  %v13004_v42 = vcombine.high %v12996_v40, %v12996_v40  ;;  %v13013_v5 = vcombine.high %v27447_v25, %v27447_v25 }
 0x3c1   : > { %v13370_v51 = vcombine.low %v13361_v9, %v13368_v29  ;;  %v13234_v15 = vunpack.i.h.s16 %v12981_v60  ;;  %v27470_v14 = vpack.i.b16 %v12981_v60, %v12965_v56  ;;  %v13403_v57 = vrot.slane %v13387_v6, %v29572_v50 }
 0x3c2   : > { %v27472_v35 = vpack.i.b16 %v13003_v20, %v13236_v7  ;;  %v13005_v41 = vcombine.high %v13003_v20, %v13003_v20  ;;  %v13020_v55 = vrot.slane %v13013_v5, %v29572_v50  ;;  %v13029_v19 = vcombine.high %v27448_v24, %v27448_v24 }
 0x3c3   : > { %v13384_v2 = vrot.slane %v13370_v51, %v29572_v50  ;;  %v27471_v8 = vpack.i.b16 %v12996_v40, %v13234_v15  ;;  %v13388_v58 = vcombine.low %v12964_v0, %v27470_v14  ;;  %v13418_v30 = vcombine.low %v13396_v10, %v13403_v57 }
 0x3c4   : > { %v13036_v45 = vrot.slane %v27448_v24, %v29572_v50  ;;  %v13021_v27 = vcombine.high %v13020_v55, %v13020_v55  ;;  %v13043_v61 = vrot.slane %v13029_v19, %v29572_v50  ;;  %v13053_v31 = vcombine.high %v27449_v49, %v27449_v49  ;;  %v27454_v55 = vld.sshfl [vmem:[#allocation3 + $0x3c] sm:$0x33 pattern:$0x75316420] }
 0x3c5   : > { %v13385_v22 = vcombine.low %v13377_v18, %v13384_v2  ;;  %v13389_v4 = vcombine.low %v27471_v8, %v27472_v35  ;;  %v13410_v47 = vrot.slane %v13388_v58, %v29572_v50  ;;  %v13426_v13 = vrot.slane %v13418_v30, %v29572_v50 }
 0x3c6   : > { %v13044_v17 = vcombine.high %v13036_v45, %v13036_v45  ;;  %v13045_v3 = vcombine.high %v13043_v61, %v13043_v61  ;;  %v13060_v34 = vrot.slane %v13053_v31, %v29572_v50  ;;  %v13076_v12 = vrot.slane %v27450_v43, %v29572_v50  ;;  %v31973_v7 = vpop.f32.mrf.mxu1  ;;  %v27455_v31 = vld.sshfl [vmem:[#allocation3 + $0x40] sm:$0x20 pattern:$0x75316420] }
 0x3c7   : > { %28833 = vmatprep.mubr.msk.bf16.mxu1 %vm2062_vm5, %v13385_v22  ;;  %v13238_v38 = vunpack.i.h.s16 %v13003_v20  ;;  %v13417_v37 = vrot.slane %v13389_v4, %v29572_v50  ;;  %v13240_v54 = vunpack.i.h.s16 %v13004_v42  ;;  %v13436_v33 = vcombine.low %v13021_v27, %v13036_v45 }
 0x3c8   : > { %v13437_v52 = vcombine.low %v13043_v61, %v13044_v17  ;;  %v13061_v48 = vcombine.high %v13060_v34, %v13060_v34  ;;  %v13069_v26 = vcombine.high %v27450_v43, %v27450_v43  ;;  %v13084_v1 = vcombine.high %v13076_v12, %v13076_v12  ;;  %v31982_v43 = vpop.f32.mrf.mxu1 }
 0x3c9   : > { %v27473_v53 = vpack.i.b16 %v13004_v42, %v13238_v38  ;;  %v13419_v44 = vcombine.low %v13410_v47, %v13417_v37  ;;  %v27474_v16 = vpack.i.b16 %v13005_v41, %v13240_v54  ;;  %v13452_v0 = vrot.slane %v13436_v33, %v29572_v50  ;;  %v31976_v42 = vpop.f32.mrf.mxu0 }
 0x3ca   : > { %v13459_v18 = vrot.slane %v13437_v52, %v29572_v50  ;;  %v13252_v40 = vunpack.i.h.s16 %v13061_v48  ;;  %v27475_v25 = vpack.i.b16 %v13061_v48, %v13045_v3  ;;  %v13083_v9 = vrot.slane %v13069_v26, %v29572_v50  ;;  %v27456_v3 = vld.sshfl [vmem:[#allocation3 + $0x44] sm:$0x33 pattern:$0x75316420] }
 0x3cb   : > { %v13093_v29 = vcombine.high %v27451_v62, %v27451_v62  ;;  %v13433_v56 = vrot.slane %v13419_v44, %v29572_v50  ;;  %v13435_v28 = vcombine.low %v27473_v53, %v27474_v16  ;;  %v13109_v60 = vcombine.high %v27452_v59, %v27452_v59  ;;  %v31985_v4 = vpop.f32.mrf.mxu0 }
 0x3cc   : > { %v13116_v20 = vrot.slane %v27452_v59, %v29572_v50  ;;  %v27476_v6 = vpack.i.b16 %v13076_v12, %v13252_v40  ;;  %v13085_v24 = vcombine.high %v13083_v9, %v13083_v9  ;;  %v13133_v10 = vcombine.high %v27453_v63, %v27453_v63  ;;  %v31993_v59 = vpop.f32.mrf.mxu1 }
 0x3cd   : > { %v13100_v51 = vrot.slane %v13093_v29, %v29572_v50  ;;  %v13434_v5 = vcombine.low %v13426_v13, %v13433_v56  ;;  %v13445_v15 = vrot.slane %v13435_v28, %v29572_v50  ;;  %v13123_v14 = vrot.slane %v13109_v60, %v29572_v50 }
 0x3ce   : > { %v13124_v35 = vcombine.high %v13116_v20, %v13116_v20  ;;  %v13438_v57 = vcombine.low %v27475_v25, %v27476_v6  ;;  %v13140_v2 = vrot.slane %v13133_v10, %v29572_v50  ;;  %v13254_v41 = vunpack.i.h.s16 %v13076_v12 }
 0x3cf   : > { %v13101_v49 = vcombine.high %v13100_v51, %v13100_v51  ;;  %28834 = vmatmul.mubr.msk.bf16.vlgmr.msra.gmra.mxu1 %vm2062_vm5, %v13434_v5  ;;  %v13467_v19 = vcombine.low %v13445_v15, %v13452_v0  ;;  %v13125_v8 = vcombine.high %v13123_v14, %v13123_v14  ;;  %v13256_v58 = vunpack.i.h.s16 %v13083_v9  ;;  %v32004_v51 = vpop.f32.mrf.mxu1 }
 0x3d0   : > { %v13258_v30 = vunpack.i.h.s16 %v13084_v1  ;;  %v13466_v45 = vrot.slane %v13438_v57, %v29572_v50  ;;  %v13141_v22 = vcombine.high %v13140_v2, %v13140_v2  ;;  %v27477_v27 = vpack.i.b16 %v13083_v9, %v13254_v41 }
 0x3d1   : > { %v13486_v61 = vcombine.low %v13116_v20, %v13123_v14  ;;  %v13475_v47 = vrot.slane %v13467_v19, %v29572_v50  ;;  %v27478_v13 = vpack.i.b16 %v13084_v1, %v13256_v58  ;;  %v13149_v34 = vcombine.high %v27454_v55, %v27454_v55  ;;  %v31990_v33 = vpop.f32.mrf.mxu0 }
 0x3d2   : > { %v27479_v17 = vpack.i.b16 %v13085_v24, %v13258_v30  ;;  %v13468_v12 = vcombine.low %v13459_v18, %v13466_v45  ;;  %v27480_v38 = vpack.i.b16 %v13141_v22, %v13125_v8  ;;  %v13156_v54 = vrot.slane %v27454_v55, %v29572_v50 }
 0x3d3   : > { %v13508_v37 = vrot.slane %v13486_v61, %v29572_v50  ;;  %v13484_v52 = vcombine.low %v27477_v27, %v27478_v13  ;;  %v13163_v48 = vrot.slane %v13149_v34, %v29572_v50  ;;  %v13173_v53 = vcombine.high %v27455_v31, %v27455_v31  ;;  %v32002_v28 = vpop.f32.mrf.mxu0 }
 0x3d4   : > { %v13485_v62 = vcombine.low %v27479_v17, %v13101_v49  ;;  %v13482_v26 = vrot.slane %v13468_v12, %v29572_v50  ;;  %v13487_v1 = vcombine.low %v13124_v35, %v27480_v38  ;;  %v13164_v44 = vcombine.high %v13156_v54, %v13156_v54 }
 0x3d5   : > { %v13189_v16 = vcombine.high %v27456_v3, %v27456_v3  ;;  %v13494_v0 = vrot.slane %v13484_v52, %v29572_v50  ;;  %v13165_v63 = vcombine.high %v13163_v48, %v13163_v48  ;;  %v13180_v40 = vrot.slane %v13173_v53, %v29572_v50  ;;  %v32009_v58 = vpop.f32.mrf.mxu0 }
 0x3d6   : > { %v13501_v18 = vrot.slane %v13485_v62, %v29572_v50  ;;  %v13483_v25 = vcombine.low %v13475_v47, %v13482_v26  ;;  %v13515_v9 = vrot.slane %v13487_v1, %v29572_v50  ;;  %v13196_v29 = vrot.slane %v27456_v3, %v29572_v50  ;;  %v34817_v26 = vld [vmem:[#allocation12_spill] sm:$0xff]  ;;  %v34818_v1 = vld [vmem:[#allocation11_spill] sm:$0xff] }
 0x3d7   : > { %v13203_v56 = vrot.slane %v13189_v16, %v29572_v50  ;;  %v13181_v20 = vcombine.high %v13180_v40, %v13180_v40  ;;  %v13270_v6 = vunpack.i.h.s16 %v13141_v22  ;;  %v13272_v24 = vunpack.i.h.s16 %v13156_v54  ;;  %v32020_v38 = vpop.f32.mrf.mxu0  ;;  %v34819_v16 = vld [vmem:[#allocation13_spill] sm:$0xff] }
 0x3d8   : > { %v13516_v60 = vcombine.low %v13494_v0, %v13501_v18  ;;  %28837 = vmatprep.mubr.msk.bf16.mxu1 %vm2062_vm5, %v13483_v25  ;;  %v13517_v10 = vcombine.low %v13508_v37, %v13515_v9  ;;  %v13204_v5 = vcombine.high %v13196_v29, %v13196_v29  ;;  %v13274_v15 = vunpack.i.h.s16 %v13163_v48  ;;  %v34820_v0 = vld [vmem:[#allocation18_spill] sm:$0xff]  ;;  %v34821_v25 = vld [vmem:[#allocation16_spill] sm:$0xff] }
 0x3d9   : > { %v13276_v14 = vunpack.i.h.s16 %v13164_v44  ;;  %v27481_v57 = vpack.i.b16 %v13156_v54, %v13270_v6  ;;  %v27482_v49 = vpack.i.b16 %v13163_v48, %v13272_v24  ;;  %v13535_v2 = vcombine.low %v13181_v20, %v13196_v29  ;;  %v34822_v29 = vld [vmem:[#allocation21_spill] sm:$0xff]  ;;  %v34823_v6 = vld [vmem:[#allocation20_spill] sm:$0xff] }
 0x3da   : > { %v13524_v35 = vrot.slane %v13516_v60, %v29572_v50  ;;  %v13531_v41 = vrot.slane %v13517_v10, %v29572_v50  ;;  %v27483_v55 = vpack.i.b16 %v13164_v44, %v13274_v15  ;;  %v13536_v8 = vcombine.low %v13203_v56, %v13204_v5  ;;  %v32012_v27 = vpop.f32.mrf.mxu1  ;;  %v34824_v10 = vld [vmem:[#allocation22_spill] sm:$0xff]  ;;  %v34825_v15 = vld [vmem:[#allocation15_spill] sm:$0xff] }
 0x3db   : > { %v27484_v19 = vpack.i.b16 %v13165_v63, %v13276_v14  ;;  %v13533_v30 = vcombine.low %v27481_v57, %v27482_v49  ;;  %v13557_v45 = vrot.slane %v13535_v2, %v29572_v50  ;;  %v13205_v22 = vcombine.high %v13203_v56, %v13203_v56  ;;  %v34827_v49 = vld [vmem:[#allocation10_spill] sm:$0xff] }
 0x3dc   : > { %v13532_v61 = vcombine.low %v13524_v35, %v13531_v41  ;;  %v13564_v47 = vrot.slane %v13536_v8, %v29572_v50  ;;  %v32016_v3 = vpop.f32.mrf.mxu1  ;;  %v2399_v44 = vadd.f32 %v34818_v1, %v34817_v26  ;;  %v2415_v18 = vadd.f32 %v34820_v0, %v34819_v16  ;;  %v34826_v35 = vld [vmem:[#allocation6_spill] sm:$0xff] }
 0x3dd   : > { %v13534_v31 = vcombine.low %v27483_v55, %v27484_v19  ;;  %v13543_v13 = vrot.slane %v13533_v30, %v29572_v50  ;;  %v13286_v17 = vunpack.i.l.s16 %v13205_v22  ;;  %v34828_v41 = vld [vmem:[#allocation14_spill] sm:$0xff]  ;;  %v34829_v19 = vld [vmem:[#allocation7_spill] sm:$0xff] }
 0x3de   : > { %28838 = vmatmul.mubr.msk.bf16.gmra.mxu1 %vm2062_vm5, %v13532_v61  ;;  %v13566_v12 = vcombine.low %v13557_v45, %v13564_v47  ;;  %v28724_v37 = vpop.f32.mrf.mxu1  ;;  %v3064_v9 = vadd.f32 %v34821_v25, %v2399_v44  ;;  %v3068_v56 = vadd.f32 %v34822_v29, %v2415_v18  ;;  %v34830_v30 = vld [vmem:[#allocation23_spill] sm:$0xff]  ;;  %v34837_v44 = vld [vmem:[#allocation29_spill] sm:$0xff] }
 0x3df   : > { %v13550_v34 = vrot.slane %v13534_v31, %v29572_v50  ;;  %v13588_v62 = vrot.slane %v13286_v17, %v29572_v50  ;;  %v34831_v22 = vld [vmem:[#allocation19_spill] sm:$0xff]  ;;  %v34832_v31 = vld [vmem:[#allocation17_spill] sm:$0xff]  ;;  %v34834_v37 = vld [vmem:[#allocation24_spill] sm:$0xff] }
 0x3e0   : > { %v13580_v52 = vrot.slane %v13566_v12, %v29572_v50  ;;  %v3598_v24 = vadd.f32 %v34823_v6, %v3064_v9  ;;  %v3602_v5 = vadd.f32 %v34824_v10, %v3068_v56  ;;  %v34833_v17 = vld [vmem:[#allocation27_spill] sm:$0xff] }
 0x3e1   : > { %v13565_v54 = vcombine.low %v13543_v13, %v13550_v34  ;;  %v13595_v60 = vrot.slane %v13588_v62, %v29572_v50  ;;  %v27067_v13 = vld [vmem:[%s34684_s4] ss:$0 sm:$0xff] }
 0x3e2   : > { %v32025_v53 = vpop.f32.mrf.mxu0  ;;  %v4131_v14 = vadd.f32 %v34825_v15, %v3598_v24  ;;  %v4135_v57 = vadd.f32 %v34826_v35, %v3602_v5  ;;  %v6505_v16 = vadd.f32 %v27067_v13, %v34837_v44  ;;  %v518_v44 = vld [vmem:[#allocation4 + $0x44] sm:$0x1] }
 0x3e3   : > { %v13573_v48 = vrot.slane %v13565_v54, %v29572_v50  ;;  %v6503_v54 = vadd.f32 %v27067_v13, %v34834_v37 }
 0x3e4   : > { %v32031_v40 = vpop.f32.mrf.mxu0  ;;  %v4776_v2 = vadd.f32 %v34827_v49, %v4131_v14  ;;  %v4780_v55 = vadd.f32 %v34828_v41, %v4135_v57  ;;  %v6512_v29 = vmax.f32 %v6505_v16, 0.0  ;;  %v502_v49 = vld [vmem:[#allocation4 + $0x24] sm:$0x1]  ;;  %v522_v16 = vld [vmem:[#allocation4 + $0x4c] sm:$0x1] }
 0x3e5   : > { %v13581_v63 = vcombine.low %v13573_v48, %v13580_v52  ;;  %v34835_v52 = vld [vmem:[#allocation25_spill] sm:$0xff]  ;;  %v34836_v48 = vld [vmem:[#allocation26_spill] sm:$0xff]  ;;  %v6510_v18 = vmax.f32 %v6503_v54, 0.0 }
 0x3e6   : > { %v28784_v20 = vpop.f32.mrf.mxu0  ;;  %v5310_v8 = vadd.f32 %v34829_v19, %v4776_v2  ;;  %v5314_v45 = vadd.f32 %v34830_v30, %v4780_v55  ;;  %v6501_v62 = vadd.f32 %v27067_v13, %v34835_v52  ;;  %v6504_v26 = vadd.f32 %v27067_v13, %v34836_v48  ;;  %6520 = vst.msk [vmem:[%s32061_s22 + $0x40] sm:$0xff] %vm6515_vm12, %v6512_v29  ;;  %v506_v2 = vld [vmem:[#allocation4 + $0x2c] sm:$0x1]  ;;  %v498_v52 = vld [vmem:[#allocation4 + $0x1c] sm:$0x1] }
 0x3e7   : > { %28841 = vmatprep.mubr.msk.bf16.mxu1 %vm2062_vm5, %v13581_v63  ;;  %6518 = vst.msk [vmem:[%s32061_s22 + $0x20] sm:$0xff] %vm6515_vm12, %v6510_v18  ;;  %v32070_v20 = vpop.f32.mrf.mxu1  ;;  %v507_v30 = vsel %vm29587_vm4, 0, %v506_v2  ;;  %v523_v18 = vsel %vm29587_vm4, 0, %v522_v16 }
 0x3e8   : > { %28842 = vmatmul.mubr.msk.bf16.gmra.mxu1 %vm2062_vm5, %v13595_v60  ;;  %v5843_v61 = vadd.f32 %v34831_v22, %v5310_v8  ;;  %v5847_v47 = vadd.f32 %v34832_v31, %v5314_v45  ;;  %v6508_v63 = vmax.f32 %v6501_v62, 0.0  ;;  %v6511_v25 = vmax.f32 %v6504_v26, 0.0  ;;  %v32073_v10 = vpop.f32.mrf.mxu0  ;;  %508 = vst [vmem:[#allocation4 + $0x2c] sm:$0x1] %v507_v30  ;;  %524 = vst [vmem:[#allocation4 + $0x4c] sm:$0x1] %v523_v18 }
 0x3e9   : > { %v503_v8 = vsel %vm29587_vm4, 0, %v502_v49  ;;  %v499_v62 = vsel %vm29587_vm4, 0, %v498_v52  ;;  %v514_v49 = vld [vmem:[#allocation4 + $0x3c] sm:$0x1] }
 0x3ea   : > { %v6488_v34 = vadd.f32 %v34833_v17, %v5843_v61  ;;  %v6492_v12 = vadd.f32 %v31934_v23, %v5847_v47  ;;  %v34838_v23 = vld [vmem:[#allocation28_spill] sm:$0xff]  ;;  %6516 = vst.msk [vmem:[%s32061_s22] sm:$0xff] %vm6515_vm12, %v6508_v63  ;;  %6519 = vst.msk [vmem:[%s32061_s22 + $0x30] sm:$0xff] %vm6515_vm12, %v6511_v25 }
 0x3eb   : > { %v6507_v60 = vadd.f32 %v27067_v13, %v34838_v23  ;;  %504 = vst [vmem:[#allocation4 + $0x24] sm:$0x1] %v503_v8  ;;  %500 = vst [vmem:[#allocation4 + $0x1c] sm:$0x1] %v499_v62  ;;  %v515_v8 = vsel %vm29587_vm4, 0, %v514_v49 }
 0x3ec   : > { %v6502_v1 = vadd.f32 %v27067_v13, %v6488_v34  ;;  %v6506_v0 = vadd.f32 %v27067_v13, %v6492_v12  ;;  %516 = vst [vmem:[#allocation4 + $0x3c] sm:$0x1] %v515_v8  ;;  %v490_v8 = vld [vmem:[#allocation4 + $0xc] sm:$0x1] }
 0x3ed   : > { %v6514_v6 = vmax.f32 %v6507_v60, 0.0 }
 0x3ee   : > { %v6509_v9 = vmax.f32 %v6502_v1, 0.0  ;;  %v6513_v56 = vmax.f32 %v6506_v0, 0.0  ;;  %v519_v0 = vsel %vm29587_vm4, 0, %v518_v44 }
 0x3ef   : > { %6523 = vst.msk [vmem:[%s32061_s22 + $0x60] sm:$0x1] %vm6522_vm13, %v6514_v6  ;;  %520 = vst [vmem:[#allocation4 + $0x44] sm:$0x1] %v519_v0  ;;  %v510_v6 = vld [vmem:[#allocation4 + $0x34] sm:$0x1] }
 0x3f0   : > { %6517 = vst.msk [vmem:[%s32061_s22 + $0x10] sm:$0xff] %vm6515_vm12, %v6509_v9  ;;  %6521 = vst.msk [vmem:[%s32061_s22 + $0x50] sm:$0xff] %vm6515_vm12, %v6513_v56  ;;  %v511_v2 = vsel %vm29587_vm4, 0, %v510_v6  ;;  %v526_v0 = vld [vmem:[#allocation4 + $0x54] sm:$0x1]  ;;  %v29245_v6 = vld [vmem:[%s34689_s9 + $0x18] sm:$0xff]  }
 0x3f1   : > { %512 = vst [vmem:[#allocation4 + $0x34] sm:$0x1] %v511_v2  ;;  %28865 = vmatprep.subr.bf16.mxu1 %v29245_v6  ;;  %v486_v2 = vld [vmem:[#allocation4 + $0x4] sm:$0x1] }
 0x3f2   : > { %28866 = vmatpush3.bf16.msra.mxu1 %v29245_v6  ;;  %v29251_v6 = vld [vmem:[%s34689_s9 + $0x20] sm:$0xff]  }
 0x3f7   : > { %v28735_v24 = vpop.f32.mrf.mxu1 }
 0x3f8   : > { %v8863_v25 = vadd.f32 %v28735_v24, %v31940_v32 }
 0x3f9   : > { %v8854_v5 = vpop.f32.mrf.mxu1 }
 0x3fa   : > { %v8855_v29 = vadd.f32 %v8854_v5, %v31948_v11  ;;  %v530_v11 = vld [vmem:[#allocation4 + $0x5c] sm:$0x1] }
 0x3fb   : > { %v32077_v14 = vpop.f32.mrf.mxu1  ;;  %v531_v24 = vsel %vm29587_vm4, 0, %v530_v11  ;;  %v494_v11 = vld [vmem:[#allocation4 + $0x14] sm:$0x1] }
 0x3fc   : > { %532 = vst [vmem:[#allocation4 + $0x5c] sm:$0x1] %v531_v24  ;;  %v487_v24 = vsel %vm29587_vm4, 0, %v486_v2 }
 0x3fd   : > { %v32081_v57 = vpop.f32.mrf.mxu1  ;;  %488 = vst [vmem:[#allocation4 + $0x4] sm:$0x1] %v487_v24 }
 0x402   : > { %v32075_v15 = vpop.f32.mrf.mxu0 }
 0x404   : > { %v32079_v35 = vpop.f32.mrf.mxu0 }
 0x406   : > { %v32083_v41 = vpop.f32.mrf.mxu0 }
 0x408   : > { %v32089_v45 = vpop.f32.mrf.mxu0 }
 0x414   : > { %v28739_v55 = vpop.f32.mrf.mxu1 }
 0x415   : > { %v8879_v5 = vadd.f32 %v28739_v55, %v31973_v7 }
 0x416   : > { %v8870_v22 = vpop.f32.mrf.mxu1 }
 0x417   : > { %v8871_v52 = vadd.f32 %v8870_v22, %v31982_v43 }
 0x418   : > { %v28740_v31 = vpop.f32.mrf.mxu1 }
 0x419   : > { %v8882_v44 = vadd.f32 %v28740_v31, %v31993_v59 }
 0x41a   : > { %v32095_v13 = vpop.f32.mrf.mxu1 }
 0x41f   : > { %v32091_v61 = vpop.f32.mrf.mxu0 }
 0x420   : > { %34840 = vst [vmem:[#allocation31_spill] sm:$0xff] %v32091_v61 }
 0x421   : > { %v32093_v47 = vpop.f32.mrf.mxu0 }
 0x422   : > { %34841 = vst [vmem:[#allocation30_spill] sm:$0xff] %v32093_v47 }
 0x423   : > { %v32097_v17 = vpop.f32.mrf.mxu0 }
 0x424   : > { %34842 = vst [vmem:[#allocation12_spill] sm:$0xff] %v32097_v17 }
 0x425   : > { %v32099_v37 = vpop.f32.mrf.mxu0 }
 0x426   : > { %34843 = vst [vmem:[#allocation11_spill] sm:$0xff] %v32099_v37 }
 0x427   : > { %v28743_v34 = vpop.f32.mrf.mxu1 }
 0x428   : > { %v8895_v55 = vadd.f32 %v28743_v34, %v32012_v27  ;;  %v29246_v27 = vld [vmem:[%s34689_s9 + $0x30] sm:$0xff]   ;;  %v29248_v34 = vld [vmem:[%s34689_s9 + $0x28] sm:$0xff]  }
 0x429   : > { %v8886_v12 = vpop.f32.mrf.mxu1 }
 0x42a   : > { %v8887_v22 = vadd.f32 %v8886_v12, %v32016_v3  ;;  %v29247_v3 = vld [vmem:[%s34689_s9 + $0x10] sm:$0xff]   ;;  %v29249_v12 = vld [vmem:[%s34689_s9 + $0x8] sm:$0xff]  }
 0x42b   : > { %v28744_v54 = vpop.f32.mrf.mxu1  ;;  %28867 = vmatprep.subr.bf16.mxu1 %v29247_v3 }
 0x42c   : > { %28868 = vmatpush3.bf16.msra.mxu1 %v29247_v3 }
 0x42d   : > { %v32111_v63 = vpop.f32.mrf.mxu1  ;;  %28869 = vmatprep.subr.bf16.mxu1 %v29249_v12 }
 0x430   : > { %v32103_v48 = vpop.f32.mrf.mxu0  ;;  %28870 = vmatpush3.bf16.msra.mxu1 %v29249_v12 }
 0x431   : > { %34844 = vst [vmem:[#allocation13_spill] sm:$0xff] %v32103_v48 }
 0x432   : > { %v32105_v26 = vpop.f32.mrf.mxu0 }
 0x433   : > { %34845 = vst [vmem:[#allocation18_spill] sm:$0xff] %v32105_v26 }
 0x434   : > { %v28824_v1 = vpop.f32.mrf.mxu0 }
 0x441   : > { %v28755_v9 = vpop.f32.mrf.mxu1 }
 0x442   : > { %v32115_v56 = vadd.f32 %v28755_v9, %v8863_v25  ;;  %v527_v25 = vsel %vm29587_vm4, 0, %v526_v0  ;;  %v495_v0 = vsel %vm29587_vm4, 0, %v494_v11 }
 0x443   : > { %v9816_v23 = vpop.f32.mrf.mxu1  ;;  %528 = vst [vmem:[#allocation4 + $0x54] sm:$0x1] %v527_v25  ;;  %496 = vst [vmem:[#allocation4 + $0x14] sm:$0x1] %v495_v0 }
 0x444   : > { %v32117_v60 = vadd.f32 %v9816_v23, %v8855_v29  ;;  %v29244_v23 = vld [vmem:[%s34689_s9 + $0x38] sm:$0xff]  }
 0x445   : > { %v32123_v30 = vpop.f32.mrf.mxu1  ;;  %28845 = vmatprep.subr.bf16.mxu0 %v29244_v23 }
 0x446   : > { %28846 = vmatpush3.bf16.msra.mxu0 %v29244_v23  ;;  %v29250_v23 = vld [vmem:[%s34689_s9] sm:$0xff]  }
 0x447   : > { %v32125_v32 = vpop.f32.mrf.mxu1  ;;  %28847 = vmatprep.subr.bf16.mxu0 %v29246_v27  ;;  %28871 = vmatprep.subr.bf16.mxu1 %v29250_v23 }
 0x448   : > { %28872 = vmatpush3.bf16.msra.mxu1 %v29250_v23 }
 0x44a   : > { %28848 = vmatpush3.bf16.msra.mxu0 %v29246_v27 }
 0x44b   : > { %28849 = vmatprep.subr.bf16.mxu0 %v29248_v34 }
 0x44e   : > { %28850 = vmatpush3.bf16.msra.mxu0 %v29248_v34 }
 0x44f   : > { %28851 = vmatprep.subr.bf16.mxu0 %v29251_v6 }
 0x450   : > { %v28759_v54 = vpop.f32.mrf.mxu1 }
 0x451   : > { %v32131_v62 = vadd.f32 %v28759_v54, %v8879_v5  ;;  %v491_v5 = vsel %vm29587_vm4, 0, %v490_v8  ;;  %v27517_v54 = vld.sshfl [vmem:[#allocation4] sm:$0x33 pattern:$0x75316420] }
 0x452   : > { %v9832_v1 = vpop.f32.mrf.mxu1  ;;  %492 = vst [vmem:[#allocation4 + $0xc] sm:$0x1] %v491_v5  ;;  %28852 = vmatpush3.bf16.msra.mxu0 %v29251_v6 }
 0x453   : > { %v32134_v16 = vadd.f32 %v9832_v1, %v8871_v52  ;;  %v27519_v52 = vld.sshfl [vmem:[#allocation4 + $0x8] sm:$0x33 pattern:$0x75316420]  ;;  %v14595_v1 = vcombine.high %v27517_v54, %v27517_v54 }
 0x454   : > { %v28760_v18 = vpop.f32.mrf.mxu1  ;;  %v14633_v25 = vcombine.high %v27519_v52, %v27519_v52 }
 0x455   : > { %v32138_v9 = vadd.f32 %v28760_v18, %v8882_v44  ;;  %v14602_v44 = vrot.slane %v27517_v54, %v29572_v50  ;;  %v27521_v18 = vld.sshfl [vmem:[#allocation4 + $0x10] sm:$0x33 pattern:$0x75316420] }
 0x456   : > { %v32140_v7 = vpop.f32.mrf.mxu1 }
 0x459   : > { %v28763_v43 = vpop.f32.mrf.mxu1  ;;  %v27520_v34 = vld.sshfl [vmem:[#allocation4 + $0xc] sm:$0x1 pattern:$0x75316420] }
 0x45a   : > { %v32144_v29 = vadd.f32 %v28763_v43, %v8895_v55  ;;  %v32174_v55 = vrot.slane %v27519_v52, %v29572_v50  ;;  %v14609_v43 = vrot.slane %v14595_v1, %v29572_v50  ;;  %v14663_v17 = vrot.slane %v27520_v34, %v29572_v50 }
 0x45b   : > { %v9848_v59 = vpop.f32.mrf.mxu1 }
 0x45c   : > { %v32146_v31 = vadd.f32 %v9848_v59, %v8887_v22  ;;  %v14671_v22 = vcombine.high %v27521_v18, %v27521_v18  ;;  %v32178_v59 = vrot.slane %v27521_v18, %v29572_v50  ;;  %v14648_v27 = vcombine.high %v32174_v55, %v32174_v55 }
 0x45d   : > { %v28764_v49 = vpop.f32.mrf.mxu1  ;;  %v14940_v2 = vunpack.i.h.s16 %v32174_v55  ;;  %v15951_v8 = vcombine.low %v14602_v44, %v14609_v43  ;;  %v27614_v11 = vcombine.high %v14602_v44, %v14609_v43 }
 0x45e   : > { %v14647_v49 = vrot.slane %v14633_v25, %v29572_v50  ;;  %v14686_v3 = vcombine.high %v32178_v59, %v32178_v59  ;;  %v32193_v5 = vrot.slane %v14671_v22, %v29572_v50  ;;  %v14944_v52 = vunpack.i.h.s16 %v14648_v27  ;;  %v27518_v25 = vld.sshfl [vmem:[#allocation4 + $0x4] sm:$0x1 pattern:$0x75316420]  ;;  %v32202_v22 = vld [vmem:[%s34689_s9 + $0x58] sm:$0xff]  }
 0x45f   : > { %v15961_v1 = vrot.slane %v15951_v8, %v29572_v50  ;;  %v15968_v0 = vrot.slane %v27614_v11, %v29572_v50  ;;  %v15408_v18 = vunpack.i.h.s16 %v32178_v59  ;;  %34846 = vst [vmem:[#allocation16_spill] sm:$0xff] %v32202_v22  ;;  %v14625_v12 = vrot.slane %v27518_v25, %v29572_v50  ;;  %v32206_v37 = vpop.f32.mrf.mxu1  ;;  %28885 = vmatprep.subr.bf16.mxu0 %v32202_v22 }
 0x460   : > { %v14649_v24 = vcombine.high %v14647_v49, %v14647_v49  ;;  %v14942_v54 = vunpack.i.h.s16 %v14647_v49  ;;  %v16001_v43 = vcombine.low %v32193_v5, %v14686_v3  ;;  %v27595_v8 = vpack.i.b16 %v14647_v49, %v14940_v2 }
 0x461   : > { %v15410_v11 = vunpack.i.h.s16 %v32193_v5  ;;  %v15412_v48 = vunpack.i.h.s16 %v14686_v3  ;;  %v27561_v25 = vpack.i.b16 %v32178_v59, %v14663_v17  ;;  %v27562_v61 = vpack.i.b16 %v32193_v5, %v15408_v18 }
 0x462   : > { %v14946_v19 = vunpack.i.h.s16 %v14649_v24  ;;  %v27596_v26 = vpack.i.b16 %v14648_v27, %v14942_v54  ;;  %v27597_v44 = vpack.i.b16 %v14649_v24, %v14944_v52  ;;  %v32211_v24 = vcombine.high %v32193_v5, %v32193_v5 }
 0x463   : > { %v27594_v54 = vpack.i.b16 %v32174_v55, %v14625_v12  ;;  %v15983_v52 = vcombine.low %v15961_v1, %v15968_v0  ;;  %v32215_v2 = vrot.slane %v16001_v43, %v29572_v50  ;;  %v27563_v6 = vpack.i.b16 %v14686_v3, %v15410_v11 }
 0x464   : > { %v15954_v27 = vcombine.low %v27596_v26, %v27597_v44  ;;  %v27598_v47 = vpack.i.b16 %v14663_v17, %v14946_v19  ;;  %v27564_v44 = vpack.i.b16 %v32211_v24, %v15412_v48  ;;  %v15529_v19 = vcombine.low %v32174_v55, %v14647_v49 }
 0x465   : > { %v15953_v26 = vcombine.low %v27594_v54, %v27595_v8  ;;  %v27581_v1 = vcombine.high %v32174_v55, %v14647_v49  ;;  %v15531_v0 = vcombine.low %v27561_v25, %v27562_v61 }
 0x466   : > { %v15982_v23 = vrot.slane %v15954_v27, %v29572_v50  ;;  %v16000_v12 = vcombine.low %v27598_v47, %v32178_v59  ;;  %v15532_v43 = vcombine.low %v27563_v6, %v27564_v44  ;;  %v15539_v8 = vrot.slane %v15529_v19, %v29572_v50 }
 0x467   : > { %v15975_v17 = vrot.slane %v15953_v26, %v29572_v50  ;;  %v15546_v3 = vrot.slane %v27581_v1, %v29572_v50  ;;  %v15553_v48 = vrot.slane %v15531_v0, %v29572_v50  ;;  %v15991_v47 = vrot.slane %v15983_v52, %v29572_v50 }
 0x468   : > { %v32227_v22 = vrot.slane %v16000_v12, %v29572_v50  ;;  %v15560_v27 = vrot.slane %v15532_v43, %v29572_v50 }
 0x469   : > { %v15984_v11 = vcombine.low %v15975_v17, %v15982_v23  ;;  %v15561_v49 = vcombine.low %v15539_v8, %v15546_v3  ;;  %v32243_v23 = vld [vmem:[%s34689_s9 + $0x78] sm:$0xff]  }
 0x46a   : > { %v16032_v61 = vcombine.low %v32227_v22, %v32215_v2  ;;  %v15562_v25 = vcombine.low %v15553_v48, %v15560_v27  ;;  %28905 = vmatprep.subr.bf16.mxu1 %v32243_v23  ;;  %v8866_v48 = vadd.f32 %v32077_v14, %v31958_v39  ;;  %v10837_v27 = vadd.f32 %v31954_v21, %v32115_v56 }
 0x46b   : > { %v15998_v54 = vrot.slane %v15984_v11, %v29572_v50  ;;  %v15569_v6 = vrot.slane %v15561_v49, %v29572_v50  ;;  %v8858_v11 = vadd.f32 %v32081_v57, %v31968_v36  ;;  %v8874_v14 = vadd.f32 %v32095_v13, %v32004_v51 }
 0x46c   : > { %v15576_v12 = vrot.slane %v15562_v25, %v29572_v50  ;;  %v10835_v25 = vadd.f32 %v31964_v46, %v32117_v60  ;;  %v8890_v46 = vadd.f32 %v32111_v63, %v32070_v20  ;;  %v16842_v51 = vcombine.low %v32178_v59, %v32193_v5 }
 0x46d   : > { %v15999_v44 = vcombine.low %v15991_v47, %v15998_v54  ;;  %v9865_v47 = vadd.f32 %v32123_v30, %v8866_v48  ;;  %v9863_v49 = vadd.f32 %v32125_v32, %v8858_v11  ;;  %v9867_v60 = vadd.f32 %v32140_v7, %v8874_v14 }
 0x46e   : > { %v28795_v34 = vpop.f32.mrf.mxu1  ;;  %v15577_v52 = vcombine.low %v15569_v6, %v15576_v12  ;;  %v27673_v13 = vcombine.high %v32178_v59, %v32193_v5  ;;  %v10839_v20 = vadd.f32 %v32002_v28, %v32134_v16  ;;  %v9871_v7 = vadd.f32 %v32206_v37, %v8890_v46 }
 0x46f   : > { %28873 = vmatprep.mubr.msk.bf16.mxu1 %vm2062_vm5, %v15999_v44  ;;  %v11819_v54 = vadd.f32 %v28795_v34, %v10837_v27  ;;  %v10838_v12 = vadd.f32 %v31976_v42, %v9865_v47  ;;  %v10836_v39 = vadd.f32 %v31985_v4, %v9863_v49  ;;  %v32269_v42 = vld [vmem:[%s34688_s8] ss:$0 sm:$0xff]  ;;  %v10842_v28 = vadd.f32 %v32009_v58, %v32138_v9 }
 0x470   : > { %v11771_v18 = vpop.f32.mrf.mxu1  ;;  %28853 = vmatprep.mubr.msk.bf16.mxu0 %vm2062_vm5, %v15577_v52  ;;  %v10845_v37 = vadd.f32 %v32025_v53, %v32144_v29  ;;  %v10843_v48 = vadd.f32 %v32031_v40, %v32146_v31  ;;  %v10844_v58 = vadd.f32 %v32073_v10, %v9871_v7  ;;  %v34849_v10 = vld [vmem:[#allocation12_spill] sm:$0xff] }
 0x471   : > { %v11817_v44 = vadd.f32 %v11771_v18, %v10835_v25  ;;  %v12801_v36 = vadd.f32 %v32075_v15, %v11819_v54  ;;  %v27522_v15 = vld.sshfl [vmem:[#allocation4 + $0x14] sm:$0x1 pattern:$0x75316420]  ;;  %v15414_v18 = vunpack.i.h.s16 %v32211_v24 }
 0x472   : > { %v28796_v55 = vpop.f32.mrf.mxu1 }
 0x473   : > { %v11820_v52 = vadd.f32 %v28796_v55, %v10838_v12  ;;  %v12799_v30 = vadd.f32 %v32079_v35, %v11817_v44  ;;  %v10841_v35 = vadd.f32 %v31990_v33, %v32131_v62  ;;  %v16852_v55 = vrot.slane %v16842_v51, %v29572_v50 }
 0x474   : > { %v11774_v26 = vpop.f32.mrf.mxu1  ;;  %v32287_v62 = vrot.slane %v27522_v15, %v29572_v50  ;;  %v34852_v15 = vld [vmem:[#allocation18_spill] sm:$0xff] }
 0x475   : > { %v11818_v21 = vadd.f32 %v11774_v26, %v10836_v39  ;;  %v12802_v32 = vadd.f32 %v32083_v41, %v11820_v52  ;;  %v16859_v26 = vrot.slane %v27673_v13, %v29572_v50  ;;  %v10840_v41 = vadd.f32 %v32020_v38, %v9867_v60  ;;  %v34851_v60 = vld [vmem:[#allocation13_spill] sm:$0xff] }
 0x476   : > { %v28799_v19 = vpop.f32.mrf.mxu1  ;;  %v32301_v53 = vpack.i.b16 %v32287_v62, %v15414_v18 }
 0x477   : > { %v12800_v33 = vadd.f32 %v32089_v45, %v11818_v21  ;;  %v11823_v27 = vadd.f32 %v28799_v19, %v10841_v35  ;;  %v34847_v19 = vld [vmem:[#allocation31_spill] sm:$0xff] }
 0x478   : > { %v11787_v1 = vpop.f32.mrf.mxu1 }
 0x479   : > { %v11821_v49 = vadd.f32 %v11787_v1, %v10839_v20  ;;  %v12805_v1 = vadd.f32 %v34847_v19, %v11823_v27  ;;  %v34853_v27 = vld [vmem:[#allocation8_spill] sm:$0xff] }
 0x47a   : > { %v28800_v0 = vpop.f32.mrf.mxu1 }
 0x47b   : > { %v11824_v54 = vadd.f32 %v28800_v0, %v10842_v28  ;;  %v34848_v0 = vld [vmem:[#allocation30_spill] sm:$0xff] }
 0x47c   : > { %v11790_v17 = vpop.f32.mrf.mxu1  ;;  %v32305_v14 = vadd.f32 %v34848_v0, %v11821_v49 }
 0x47d   : > { %v11822_v29 = vadd.f32 %v11790_v17, %v10840_v41  ;;  %v32314_v17 = vrot.slane %v16032_v61, %v29572_v50 }
 0x47e   : > { %v28803_v43 = vpop.f32.mrf.mxu1 }
 0x47f   : > { %v11827_v44 = vadd.f32 %v28803_v43, %v10845_v37  ;;  %v12788_v43 = vpop.f32.mrf.mxu0 }
 0x480   : > { %v11803_v8 = vpop.f32.mrf.mxu1 }
 0x481   : > { %v11825_v40 = vadd.f32 %v11803_v8, %v10843_v48 }
 0x482   : > { %v28804_v3 = vpop.f32.mrf.mxu1 }
 0x483   : > { %v16874_v3 = vcombine.low %v16852_v55, %v16859_v26  ;;  %v32325_v51 = vadd.f32 %v34852_v15, %v11825_v40 }
 0x484   : > { %v11806_v6 = vpop.f32.mrf.mxu1 }
 0x485   : > { %v11826_v31 = vadd.f32 %v11806_v6, %v10844_v58 }
 0x487   : > { %v32327_v13 = vadd.f32 %v12788_v43, %v11826_v31 }
 0x48f   : > { %v28835_v57 = vpop.f32.mrf.mxu1 }
 0x490   : > { %v13720_v56 = vadd.f32 %v28835_v57, %v12801_v36  ;;  %v32308_v57 = vadd.f32 %v34849_v10, %v11824_v54 }
 0x491   : > { %v13672_v4 = vpop.f32.mrf.mxu1 }
 0x492   : > { %v13718_v63 = vadd.f32 %v13672_v4, %v12799_v30  ;;  %v13738_v59 = vadd.f32 %v32269_v42, %v13720_v56  ;;  %v34850_v30 = vld [vmem:[#allocation11_spill] sm:$0xff]  ;;  %v32322_v4 = vadd.f32 %v34851_v60, %v11827_v44 }
 0x493   : > { %v28836_v34 = vpop.f32.mrf.mxu1  ;;  %v32319_v46 = vadd.f32 %v34850_v30, %v11822_v29  ;;  %v14521_v29 = vld [vmem:[#allocation4 + $0x24] sm:$0x1] }
 0x494   : > { %v13721_v5 = vadd.f32 %v28836_v34, %v12802_v32  ;;  %v13736_v11 = vadd.f32 %v32269_v42, %v13718_v63  ;;  %v13749_v9 = vmax.f32 %v13738_v59, 0.0  ;;  %v32336_v34 = vrot.slane %v16874_v3, %v29572_v50 }
 0x495   : > { %v13675_v16 = vpop.f32.mrf.mxu1 }
 0x496   : > { %v13739_v45 = vadd.f32 %v32269_v42, %v13721_v5  ;;  %v13719_v47 = vadd.f32 %v13675_v16, %v12800_v33  ;;  %v13747_v12 = vmax.f32 %v13736_v11, 0.0 }
 0x498   : > { %v13750_v38 = vmax.f32 %v13739_v45, 0.0  ;;  %v13737_v25 = vadd.f32 %v32269_v42, %v13719_v47 }
 0x49a   : > { %v13759_v52 = vpack.c.bf16 %v13750_v38, %v13749_v9  ;;  %v27497_v39 = vpack.c.bf16 %v13750_v38, %v13750_v38  ;;  %v13748_v36 = vmax.f32 %v13737_v25, 0.0 }
 0x49c   : > { %v13826_v8 = vrot.slane %v13759_v52, %v29572_v50  ;;  %v13833_v6 = vrot.slane %v27497_v39, %v29572_v50  ;;  %v13758_v21 = vpack.c.bf16 %v13748_v36, %v13747_v12  ;;  %v27496_v56 = vpack.c.bf16 %v13748_v36, %v13748_v36  ;;  %v14525_v39 = vld [vmem:[#allocation4 + $0x2c] sm:$0x1] }
 0x49e   : > { %v13834_v22 = vcombine.high %v13826_v8, %v13826_v8  ;;  %v13835_v2 = vcombine.high %v13833_v6, %v13833_v6  ;;  %v13842_v61 = vrot.slane %v13826_v8, %v29572_v50  ;;  %v13849_v35 = vrot.slane %v13833_v6, %v29572_v50  ;;  %v28839_v20 = vpop.f32.mrf.mxu1 }
 0x49f   : > { %v13777_v63 = vrot.slane %v13758_v21, %v29572_v50  ;;  %v13784_v32 = vrot.slane %v27496_v56, %v29572_v50  ;;  %v32333_v7 = vadd.f32 %v28839_v20, %v12805_v1 }
 0x4a0   : > { %v13856_v18 = vrot.slane %v13834_v22, %v29572_v50  ;;  %v13863_v55 = vrot.slane %v13835_v2, %v29572_v50  ;;  %v13864_v26 = vcombine.high %v13842_v61, %v13842_v61  ;;  %v13865_v59 = vcombine.high %v13849_v35, %v13849_v35  ;;  %v13688_v5 = vpop.f32.mrf.mxu1 }
 0x4a1   : > { %v14046_v33 = vunpack.i.h.s16 %v13842_v61  ;;  %v13785_v28 = vcombine.high %v13777_v63, %v13777_v63  ;;  %v13786_v41 = vcombine.high %v13784_v32, %v13784_v32  ;;  %v13793_v37 = vrot.slane %v13777_v63, %v29572_v50 }
 0x4a2   : > { %v13866_v16 = vcombine.high %v13856_v18, %v13856_v18  ;;  %v32341_v48 = vcombine.high %v13863_v55, %v13863_v55  ;;  %v14055_v11 = vunpack.i.l.s16 %v13863_v55  ;;  %v14056_v45 = vunpack.i.h.s16 %v13863_v55  ;;  %v28840_v47 = vpop.f32.mrf.mxu1 }
 0x4a3   : > { %v14058_v3 = vunpack.i.h.s16 %v13865_v59  ;;  %v14223_v49 = vrot.slane %v14046_v33, %v34853_v27  ;;  %v14232_v54 = vcombine.low %v13864_v26, %v13849_v35  ;;  %v13800_v58 = vrot.slane %v13784_v32, %v29572_v50 }
 0x4a4   : > { %v32345_v9 = vpack.i.b16 %v13865_v59, %v14056_v45  ;;  %v14231_v38 = vcombine.low %v13856_v18, %v13866_v16  ;;  %v14261_v25 = vrot.slane %v14055_v11, %v34853_v27  ;;  %v13807_v44 = vrot.slane %v13785_v28, %v29572_v50  ;;  %v13691_v40 = vpop.f32.mrf.mxu1  ;;  %v14517_v45 = vld [vmem:[#allocation4 + $0x1c] sm:$0x1] }
 0x4a5   : > { %v32350_v31 = vpack.i.b16 %v32341_v48, %v14058_v3  ;;  %v14230_v12 = vrot.slane %v14223_v49, %v34853_v27  ;;  %v14246_v52 = vrot.slane %v14232_v54, %v34853_v27  ;;  %v13814_v36 = vrot.slane %v13786_v41, %v29572_v50 }
 0x4a6   : > { %v14239_v19 = vrot.slane %v14231_v38, %v34853_v27  ;;  %v14268_v1 = vrot.slane %v14261_v25, %v34853_v27  ;;  %v13815_v0 = vcombine.high %v13793_v37, %v13793_v37  ;;  %v13816_v10 = vcombine.high %v13800_v58, %v13800_v58 }
 0x4a7   : > { %v14522_v8 = vsel %vm29587_vm4, %v14230_v12, %v14521_v29  ;;  %v13817_v6 = vcombine.high %v13807_v44, %v13807_v44  ;;  %v13818_v21 = vcombine.high %v13814_v36, %v13814_v36  ;;  %v14037_v56 = vunpack.i.l.s16 %v13800_v58 }
 0x4a8   : > { %v28843_v30 = vpop.f32.mrf.mxu1  ;;  %v14247_v60 = vcombine.low %v14239_v19, %v14246_v52  ;;  %14523 = vst [vmem:[#allocation4 + $0x24] sm:$0x1] %v14522_v8  ;;  %v14526_v15 = vsel %vm29587_vm4, %v14268_v1, %v14525_v39  ;;  %v14038_v22 = vunpack.i.h.s16 %v13800_v58  ;;  %v14040_v2 = vunpack.i.h.s16 %v13814_v36 }
 0x4a9   : > { %14527 = vst [vmem:[#allocation4 + $0x2c] sm:$0x1] %v14526_v15  ;;  %v14042_v35 = vunpack.i.h.s16 %v13816_v10  ;;  %v14044_v20 = vunpack.i.h.s16 %v13818_v21  ;;  %v14155_v63 = vcombine.low %v13793_v37, %v13815_v0  ;;  %v14156_v32 = vcombine.low %v13807_v44, %v13817_v6 }
 0x4aa   : > { %v13704_v18 = vpop.f32.mrf.mxu1  ;;  %v14254_v55 = vrot.slane %v14247_v60, %v34853_v27  ;;  %v27501_v26 = vpack.i.b16 %v13814_v36, %v14038_v22  ;;  %v27502_v59 = vpack.i.b16 %v13816_v10, %v14040_v2  ;;  %v14185_v33 = vrot.slane %v14037_v56, %v34853_v27 }
 0x4ab   : > { %v27503_v28 = vpack.i.b16 %v13818_v21, %v14042_v35  ;;  %v27504_v41 = vpack.i.b16 %v13842_v61, %v14044_v20  ;;  %v14163_v16 = vrot.slane %v14155_v63, %v34853_v27  ;;  %v14170_v11 = vrot.slane %v14156_v32, %v34853_v27 }
 0x4ac   : > { %v28844_v3 = vpop.f32.mrf.mxu1  ;;  %14524 = vst.msk [vmem:[#allocation4 + $0x28] sm:$0xf] %vm442_vm1, %v14254_v55  ;;  %v14192_v37 = vrot.slane %v14185_v33, %v34853_v27  ;;  %v13742_v49 = vadd.f32 %v32269_v42, %v32333_v7  ;;  %v13722_v54 = vadd.f32 %v13688_v5, %v32305_v14  ;;  %v13725_v58 = vadd.f32 %v28840_v47, %v32308_v57 }
 0x4ad   : > { %v14171_v38 = vcombine.low %v14163_v16, %v14170_v11  ;;  %v14193_v25 = vcombine.low %v27501_v26, %v27503_v28  ;;  %v14194_v61 = vcombine.low %v27502_v59, %v27504_v41  ;;  %v13723_v29 = vadd.f32 %v13691_v40, %v32319_v46 }
 0x4ae   : > { %v14518_v44 = vsel %vm29587_vm4, %v14192_v37, %v14517_v45  ;;  %v13753_v12 = vmax.f32 %v13742_v49, 0.0  ;;  %v13740_v52 = vadd.f32 %v32269_v42, %v13722_v54  ;;  %v13743_v39 = vadd.f32 %v32269_v42, %v13725_v58  ;;  %v13707_v36 = vpop.f32.mrf.mxu1 }
 0x4af   : > { %v14178_v7 = vrot.slane %v14171_v38, %v34853_v27  ;;  %v14201_v14 = vrot.slane %v14193_v25, %v34853_v27  ;;  %v14208_v57 = vrot.slane %v14194_v61, %v34853_v27  ;;  %14519 = vst [vmem:[#allocation4 + $0x1c] sm:$0x1] %v14518_v44  ;;  %v13741_v5 = vadd.f32 %v32269_v42, %v13723_v29  ;;  %v27526_v47 = vld.sshfl [vmem:[#allocation4 + $0x24] sm:$0x1 pattern:$0x75316420] }
 0x4b0   : > { %v13751_v46 = vmax.f32 %v13740_v52, 0.0  ;;  %v13754_v40 = vmax.f32 %v13743_v39, 0.0  ;;  %v14060_v19 = vunpack.i.h.s16 %v32341_v48  ;;  %v13728_v1 = vadd.f32 %v28843_v30, %v32322_v4 }
 0x4b1   : > { %v14209_v0 = vcombine.low %v14201_v14, %v14208_v57  ;;  %14516 = vst.msk [vmem:[#allocation4 + $0x18] sm:$0xf] %vm442_vm1, %v14178_v7  ;;  %v13752_v10 = vmax.f32 %v13741_v5, 0.0  ;;  %v13726_v8 = vadd.f32 %v13704_v18, %v32325_v51  ;;  %v13727_v6 = vadd.f32 %v13707_v36, %v32327_v13 }
 0x4b2   : > { %v13761_v21 = vpack.c.bf16 %v13754_v40, %v13753_v12  ;;  %v27499_v56 = vpack.c.bf16 %v13754_v40, %v13754_v40  ;;  %v32386_v60 = vadd.f32 %v32269_v42, %v13728_v1  ;;  %v32389_v15 = vrot.slane %v27526_v47, %v29572_v50 }
 0x4b3   : > { %v14216_v22 = vrot.slane %v14209_v0, %v34853_v27  ;;  %v13760_v2 = vpack.c.bf16 %v13752_v10, %v13751_v46  ;;  %v27498_v4 = vpack.c.bf16 %v13752_v10, %v13752_v10  ;;  %v32393_v30 = vadd.f32 %v32269_v42, %v13726_v8  ;;  %v32395_v35 = vld.sshfl [vmem:[#allocation4 + $0x28] sm:$0x33 pattern:$0x75316420]  ;;  %v14537_v0 = vld [vmem:[#allocation4 + $0x44] sm:$0x1] }
 0x4b4   : > { %v13924_v51 = vrot.slane %v13761_v21, %v29572_v50  ;;  %v13931_v13 = vrot.slane %v27499_v56, %v29572_v50  ;;  %v13757_v20 = vmax.f32 %v32386_v60, 0.0  ;;  %v32401_v63 = vadd.f32 %v32269_v42, %v13727_v6 }
 0x4b5   : > { %14520 = vst.msk [vmem:[#allocation4 + $0x20] sm:$0xf] %vm442_vm1, %v14216_v22  ;;  %v13875_v32 = vrot.slane %v13760_v2, %v29572_v50  ;;  %v13882_v18 = vrot.slane %v27498_v4, %v29572_v50  ;;  %v13755_v55 = vmax.f32 %v32393_v30, 0.0  ;;  %v14785_v26 = vcombine.high %v32395_v35, %v32395_v35  ;;  %v14541_v4 = vld [vmem:[#allocation4 + $0x4c] sm:$0x1] }
 0x4b6   : > { %v13932_v59 = vcombine.high %v13924_v51, %v13924_v51  ;;  %v13933_v33 = vcombine.high %v13931_v13, %v13931_v13  ;;  %v13940_v28 = vrot.slane %v13924_v51, %v29572_v50  ;;  %v13947_v41 = vrot.slane %v13931_v13, %v29572_v50 }
 0x4b7   : > { %v13883_v16 = vcombine.high %v13875_v32, %v13875_v32  ;;  %v13884_v42 = vcombine.high %v13882_v18, %v13882_v18  ;;  %v13891_v11 = vrot.slane %v13875_v32, %v29572_v50  ;;  %v13898_v45 = vrot.slane %v13882_v18, %v29572_v50 }
 0x4b8   : > { %v13954_v3 = vrot.slane %v13932_v59, %v29572_v50  ;;  %v13961_v37 = vrot.slane %v13933_v33, %v29572_v50  ;;  %v13962_v49 = vcombine.high %v13940_v28, %v13940_v28  ;;  %v13963_v54 = vcombine.high %v13947_v41, %v13947_v41 }
 0x4b9   : > { %v14078_v58 = vunpack.i.h.s16 %v13940_v28  ;;  %v13905_v38 = vrot.slane %v13883_v16, %v29572_v50  ;;  %v13912_v25 = vrot.slane %v13884_v42, %v29572_v50  ;;  %v13913_v61 = vcombine.high %v13891_v11, %v13891_v11 }
 0x4ba   : > { %v13964_v29 = vcombine.high %v13954_v3, %v13954_v3  ;;  %v32417_v44 = vcombine.high %v13961_v37, %v13961_v37  ;;  %v14080_v12 = vunpack.i.h.s16 %v13954_v3  ;;  %v14082_v52 = vunpack.i.h.s16 %v13962_v49 }
 0x4bb   : > { %v27511_v39 = vpack.i.b16 %v13954_v3, %v14078_v58  ;;  %v14384_v36 = vcombine.low %v13947_v41, %v13963_v54  ;;  %v13914_v7 = vcombine.high %v13898_v45, %v13898_v45  ;;  %v13915_v14 = vcombine.high %v13905_v38, %v13905_v38  ;;  %v14529_v54 = vld [vmem:[#allocation4 + $0x34] sm:$0x1] }
 0x4bc   : > { %v14091_v57 = vunpack.i.l.s16 %v32417_v44  ;;  %v14092_v5 = vunpack.i.h.s16 %v32417_v44  ;;  %v27512_v47 = vpack.i.b16 %v13962_v49, %v14080_v12  ;;  %v14375_v46 = vrot.slane %v14082_v52, %v34853_v27 }
 0x4bd   : > { %v14383_v40 = vcombine.low %v13964_v29, %v13961_v37  ;;  %v14398_v1 = vrot.slane %v14384_v36, %v34853_v27  ;;  %v13916_v10 = vcombine.high %v13912_v25, %v13912_v25  ;;  %v14062_v8 = vunpack.i.h.s16 %v13891_v11 }
 0x4be   : > { %v14382_v6 = vrot.slane %v14375_v46, %v34853_v27  ;;  %v14413_v21 = vrot.slane %v14091_v57, %v34853_v27  ;;  %v14064_v56 = vunpack.i.h.s16 %v13905_v38  ;;  %v14073_v22 = vunpack.i.l.s16 %v13914_v7 }
 0x4bf   : > { %v14391_v2 = vrot.slane %v14383_v40, %v34853_v27  ;;  %v14074_v51 = vunpack.i.h.s16 %v13914_v7  ;;  %v14076_v13 = vunpack.i.h.s16 %v13916_v10  ;;  %v27507_v32 = vpack.i.b16 %v13891_v11, %v14060_v19  ;;  %v14533_v7 = vld [vmem:[#allocation4 + $0x3c] sm:$0x1] }
 0x4c0   : > { %v14420_v18 = vrot.slane %v14413_v21, %v34853_v27  ;;  %v14538_v59 = vsel %vm29587_vm4, %v14382_v6, %v14537_v0  ;;  %v27508_v33 = vpack.i.b16 %v13905_v38, %v14062_v8  ;;  %v14299_v41 = vrot.slane %v14064_v56, %v34853_v27  ;;  %v27524_v8 = vld.sshfl [vmem:[#allocation4 + $0x1c] sm:$0x1 pattern:$0x75316420] }
 0x4c1   : > { %v14399_v16 = vcombine.low %v14391_v2, %v14398_v1  ;;  %14539 = vst [vmem:[#allocation4 + $0x44] sm:$0x1] %v14538_v59  ;;  %v27509_v42 = vpack.i.b16 %v13916_v10, %v14074_v51  ;;  %v27510_v3 = vpack.i.b16 %v13940_v28, %v14076_v13  ;;  %v14269_v37 = vcombine.low %v32345_v9, %v27507_v32 }
 0x4c2   : > { %v14542_v49 = vsel %vm29587_vm4, %v14420_v18, %v14541_v4  ;;  %v14270_v48 = vcombine.low %v32350_v31, %v27508_v33  ;;  %v14306_v19 = vrot.slane %v14299_v41, %v34853_v27  ;;  %v14307_v11 = vcombine.low %v13913_v61, %v13898_v45  ;;  %v27523_v31 = vld.sshfl [vmem:[#allocation4 + $0x18] sm:$0x33 pattern:$0x75316420] }
 0x4c3   : > { %v14406_v58 = vrot.slane %v14399_v16, %v34853_v27  ;;  %14543 = vst [vmem:[#allocation4 + $0x4c] sm:$0x1] %v14542_v49  ;;  %v14277_v38 = vrot.slane %v14269_v37, %v34853_v27  ;;  %v14308_v29 = vcombine.low %v13915_v14, %v13912_v25  ;;  %v14337_v12 = vrot.slane %v14073_v22, %v34853_v27 }
 0x4c4   : > { %v14284_v28 = vrot.slane %v14270_v48, %v34853_v27  ;;  %v14315_v9 = vrot.slane %v14307_v11, %v34853_v27  ;;  %v14345_v52 = vcombine.low %v27509_v42, %v27511_v39  ;;  %v14346_v36 = vcombine.low %v27510_v3, %v27512_v47 }
 0x4c5   : > { %14540 = vst.msk [vmem:[#allocation4 + $0x48] sm:$0xf] %vm442_vm1, %v14406_v58  ;;  %v14322_v45 = vrot.slane %v14308_v29, %v34853_v27  ;;  %v14344_v61 = vrot.slane %v14337_v12, %v34853_v27  ;;  %v14530_v57 = vsel %vm29587_vm4, %v14306_v19, %v14529_v54  ;;  %v13763_v25 = vpack.c.bf16 %v13757_v20, %v13757_v20  ;;  %v14549_v19 = vld [vmem:[#allocation4 + $0x5c] sm:$0x1] }
 0x4c6   : > { %v14285_v14 = vcombine.low %v14277_v38, %v14284_v28  ;;  %v14353_v46 = vrot.slane %v14345_v52, %v34853_v27  ;;  %v14360_v39 = vrot.slane %v14346_v36, %v34853_v27  ;;  %14531 = vst [vmem:[#allocation4 + $0x34] sm:$0x1] %v14530_v57  ;;  %v13756_v47 = vmax.f32 %v32401_v63, 0.0 }
 0x4c7   : > { %v14323_v40 = vcombine.low %v14315_v9, %v14322_v45  ;;  %v14534_v1 = vsel %vm29587_vm4, %v14344_v61, %v14533_v7  ;;  %v14021_v0 = vrot.slane %v13763_v25, %v29572_v50  ;;  %v14709_v10 = vcombine.high %v27523_v31, %v27523_v31 }
 0x4c8   : > { %v14292_v60 = vrot.slane %v14285_v14, %v34853_v27  ;;  %v14361_v6 = vcombine.low %v14353_v46, %v14360_v39  ;;  %14535 = vst [vmem:[#allocation4 + $0x3c] sm:$0x1] %v14534_v1  ;;  %v13762_v20 = vpack.c.bf16 %v13756_v47, %v13755_v55  ;;  %v27500_v21 = vpack.c.bf16 %v13756_v47, %v13756_v47  ;;  %v27525_v46 = vld.sshfl [vmem:[#allocation4 + $0x20] sm:$0x33 pattern:$0x75316420] }
 0x4c9   : > { %v14330_v56 = vrot.slane %v14323_v40, %v34853_v27  ;;  %v14028_v63 = vrot.slane %v14021_v0, %v29572_v50  ;;  %v32462_v22 = vrot.slane %v27523_v31, %v29572_v50  ;;  %v32465_v2 = vrot.slane %v14709_v10, %v29572_v50  ;;  %v27550_v43 = vld.sshfl [vmem:[#allocation4 + $0x44] sm:$0x1 pattern:$0x75316420] }
 0x4ca   : > { %v14368_v4 = vrot.slane %v14361_v6, %v34853_v27  ;;  %14528 = vst.msk [vmem:[#allocation4 + $0x30] sm:$0xf] %vm442_vm1, %v14292_v60  ;;  %v13973_v51 = vrot.slane %v13762_v20, %v29572_v50  ;;  %v13980_v30 = vrot.slane %v27500_v21, %v29572_v50  ;;  %v32472_v55 = vrot.slane %v27524_v8, %v29572_v50  ;;  %v14545_v60 = vld [vmem:[#allocation4 + $0x54] sm:$0x1] }
 0x4cb   : > { %14532 = vst.msk [vmem:[#allocation4 + $0x38] sm:$0xf] %vm442_vm1, %v14330_v56  ;;  %v14109_v13 = vunpack.i.l.s16 %v14028_v63  ;;  %v32477_v32 = vcombine.high %v32462_v22, %v32462_v22  ;;  %v14958_v18 = vunpack.i.h.s16 %v32462_v22  ;;  %v14960_v59 = vunpack.i.h.s16 %v32465_v2 }
 0x4cc   : > { %14536 = vst.msk [vmem:[#allocation4 + $0x40] sm:$0xf] %vm442_vm1, %v14368_v4  ;;  %v13981_v33 = vcombine.high %v13973_v51, %v13973_v51  ;;  %v13982_v41 = vcombine.high %v13980_v30, %v13980_v30  ;;  %v13989_v16 = vrot.slane %v13973_v51, %v29572_v50  ;;  %v13996_v42 = vrot.slane %v13980_v30, %v29572_v50 }
 0x4cd   : > { %v14489_v3 = vrot.slane %v14109_v13, %v34853_v27  ;;  %v32487_v37 = vpack.i.b16 %v32462_v22, %v32287_v62  ;;  %v32490_v49 = vpack.i.b16 %v32465_v2, %v14958_v18  ;;  %v32493_v48 = vpack.i.b16 %v32477_v32, %v14960_v59 }
 0x4ce   : > { %v14003_v11 = vrot.slane %v13981_v33, %v29572_v50  ;;  %v14010_v54 = vrot.slane %v13982_v41, %v29572_v50  ;;  %v14011_v58 = vcombine.high %v13989_v16, %v13989_v16  ;;  %v14012_v38 = vcombine.high %v13996_v42, %v13996_v42 }
 0x4cf   : > { %v14496_v29 = vrot.slane %v14489_v3, %v34853_v27  ;;  %v14094_v12 = vunpack.i.h.s16 %v13989_v16  ;;  %v27513_v62 = vpack.i.b16 %v13989_v16, %v14092_v5  ;;  %v16002_v28 = vcombine.low %v32211_v24, %v32487_v37 }
 0x4d0   : > { %v14013_v9 = vcombine.high %v14003_v11, %v14003_v11  ;;  %v14014_v52 = vcombine.high %v14010_v54, %v14010_v54  ;;  %v14096_v36 = vunpack.i.h.s16 %v14003_v11  ;;  %v14098_v7 = vunpack.i.h.s16 %v14011_v58 }
 0x4d1   : > { %v14550_v31 = vsel %vm29587_vm4, %v14496_v29, %v14549_v19  ;;  %v27514_v45 = vpack.i.b16 %v14003_v11, %v14094_v12  ;;  %v14459_v61 = vcombine.low %v13996_v42, %v14012_v38  ;;  %v16003_v57 = vcombine.low %v32490_v49, %v32493_v48 }
 0x4d2   : > { %14551 = vst [vmem:[#allocation4 + $0x5c] sm:$0x1] %v14550_v31  ;;  %v14100_v25 = vunpack.i.h.s16 %v14013_v9  ;;  %v27515_v14 = vpack.i.b16 %v14011_v58, %v14096_v36  ;;  %v27516_v44 = vpack.i.b16 %v14013_v9, %v14098_v7  ;;  %v14460_v5 = vcombine.low %v14010_v54, %v14014_v52 }
 0x4d3   : > { %v14467_v24 = vrot.slane %v14459_v61, %v34853_v27  ;;  %v16024_v39 = vrot.slane %v16002_v28, %v29572_v50  ;;  %v16031_v47 = vrot.slane %v16003_v57, %v29572_v50  ;;  %v32511_v40 = vcombine.high %v32465_v2, %v32465_v2 }
 0x4d4   : > { %v14421_v1 = vcombine.low %v27513_v62, %v27515_v14  ;;  %v14422_v0 = vcombine.low %v27514_v45, %v27516_v44  ;;  %v14451_v10 = vrot.slane %v14100_v25, %v34853_v27  ;;  %v14474_v8 = vrot.slane %v14460_v5, %v34853_v27  ;;  %v27544_v45 = vld.sshfl [vmem:[#allocation4 + $0x2c] sm:$0x1 pattern:$0x75316420] }
 0x4d5   : > { %v16033_v6 = vcombine.low %v16024_v39, %v16031_v47  ;;  %v14747_v20 = vcombine.high %v27525_v46, %v27525_v46  ;;  %v32516_v21 = vrot.slane %v27525_v46, %v29572_v50  ;;  %v32520_v56 = vrot.slane %v32395_v35, %v29572_v50  ;;  %v27545_v44 = vld.sshfl [vmem:[#allocation4 + $0x30] sm:$0x33 pattern:$0x75316420] }
 0x4d6   : > { %v14429_v63 = vrot.slane %v14421_v1, %v34853_v27  ;;  %v14436_v4 = vrot.slane %v14422_v0, %v34853_v27  ;;  %v14458_v51 = vrot.slane %v14451_v10, %v34853_v27  ;;  %v14475_v30 = vcombine.low %v14467_v24, %v14474_v8 }
 0x4d7   : > { %v16047_v13 = vrot.slane %v16033_v6, %v29572_v50  ;;  %v32527_v18 = vrot.slane %v14747_v20, %v29572_v50  ;;  %v32533_v59 = vrot.slane %v14785_v26, %v29572_v50  ;;  %v14962_v33 = vunpack.i.h.s16 %v32477_v32  ;;  %v29255_v26 = vld [vmem:[%s34689_s9 + $0x70] sm:$0xff]  }
 0x4d8   : > { %v14437_v41 = vcombine.low %v14429_v63, %v14436_v4  ;;  %v14482_v16 = vrot.slane %v14475_v30, %v34853_v27  ;;  %v14546_v42 = vsel %vm29587_vm4, %v14458_v51, %v14545_v60  ;;  %v14964_v3 = vunpack.i.h.s16 %v32511_v40  ;;  %v29258_v63 = vld [vmem:[%s34689_s9 + $0x60] sm:$0xff]  }
 0x4d9   : > { %14547 = vst [vmem:[#allocation4 + $0x54] sm:$0x1] %v14546_v42  ;;  %v16048_v19 = vcombine.low %v32314_v17, %v16047_v13  ;;  %v14976_v11 = vunpack.i.h.s16 %v32520_v56  ;;  %v32543_v54 = vpack.i.b16 %v32511_v40, %v14962_v33  ;;  %v32547_v35 = vpack.i.b16 %v32520_v56, %v32389_v15 }
 0x4da   : > { %v14444_v58 = vrot.slane %v14437_v41, %v34853_v27  ;;  %14548 = vst.msk [vmem:[#allocation4 + $0x58] sm:$0xf] %vm442_vm1, %v14482_v16  ;;  %v32555_v38 = vpack.i.b16 %v32472_v55, %v14964_v3  ;;  %v16050_v17 = vcombine.low %v32516_v21, %v32527_v18  ;;  %v27615_v29 = vcombine.high %v32516_v21, %v32527_v18 }
 0x4db   : > { %28874 = vmatmul.mubr.msk.bf16.vlgmr.msra.gmra.mxu1 %vm2062_vm5, %v16048_v19  ;;  %v32563_v12 = vpack.i.b16 %v32533_v59, %v14976_v11  ;;  %v32567_v62 = vcombine.high %v32516_v21, %v32516_v21  ;;  %v15426_v28 = vunpack.i.h.s16 %v32516_v21  ;;  %v15428_v9 = vunpack.i.h.s16 %v32527_v18 }
 0x4dc   : > { %14544 = vst.msk [vmem:[#allocation4 + $0x50] sm:$0xf] %vm442_vm1, %v14444_v58  ;;  %v16049_v52 = vcombine.low %v32543_v54, %v32555_v38  ;;  %v16066_v36 = vrot.slane %v16050_v17, %v29572_v50  ;;  %v16073_v7 = vrot.slane %v27615_v29, %v29572_v50  ;;  %v32578_v31 = vpack.i.b16 %v32516_v21, %v32472_v55  ;;  %v29257_v55 = vld [vmem:[%s34689_s9 + $0x68] sm:$0xff]  }
 0x4dd   : > { %28906 = vmatpush3.bf16.msra.mxu1 %v32243_v23  ;;  %v16052_v61 = vcombine.low %v32547_v35, %v32563_v12  ;;  %v32584_v57 = vpack.i.b16 %v32527_v18, %v15426_v28  ;;  %v32587_v25 = vpack.i.b16 %v32567_v62, %v15428_v9  ;;  %v15578_v14 = vcombine.low %v32301_v53, %v32462_v22  ;;  %v27530_v58 = vld.sshfl [vmem:[#allocation4 + $0x34] sm:$0x1 pattern:$0x75316420] }
 0x4de   : > { %28907 = vmatprep.subr.bf16.mxu1 %v29255_v26  ;;  %v16059_v23 = vrot.slane %v16049_v52, %v29572_v50  ;;  %v15579_v5 = vcombine.low %v32465_v2, %v32477_v32  ;;  %v15580_v46 = vcombine.low %v32511_v40, %v32578_v31  ;;  %v32601_v24 = vcombine.high %v32527_v18, %v32527_v18  ;;  %v32649_v52 = vld [vmem:[%s34689_s9 + $0xb8] sm:$0xff]  }
 0x4df   : > { %v16080_v53 = vrot.slane %v16052_v61, %v29572_v50  ;;  %v15581_v39 = vcombine.low %v32584_v57, %v32587_v25  ;;  %v15588_v47 = vrot.slane %v15578_v14, %v29572_v50  ;;  %v32608_v1 = vrot.slane %v27544_v45, %v29572_v50 }
 0x4e0   : > { %v16081_v0 = vcombine.low %v16059_v23, %v16066_v36  ;;  %v15595_v32 = vrot.slane %v15579_v5, %v29572_v50  ;;  %v15602_v10 = vrot.slane %v15580_v46, %v29572_v50  ;;  %v15253_v40 = vcombine.high %v27545_v44, %v27545_v44  ;;  %v29254_v5 = vld [vmem:[%s34689_s9 + $0x50] sm:$0xff]  }
 0x4e1   : > { %28908 = vmatpush3.bf16.msra.mxu1 %v29255_v26  ;;  %v16082_v8 = vcombine.low %v16073_v7, %v16080_v53  ;;  %v15609_v60 = vrot.slane %v15581_v39, %v29572_v50  ;;  %v32614_v6 = vrot.slane %v27545_v44, %v29572_v50  ;;  %v15430_v20 = vunpack.i.h.s16 %v32567_v62 }
 0x4e2   : > { %28909 = vmatprep.subr.bf16.mxu1 %v29257_v55  ;;  %v16089_v4 = vrot.slane %v16081_v0, %v29572_v50  ;;  %v15610_v51 = vcombine.low %v15588_v47, %v15595_v32  ;;  %v32622_v30 = vrot.slane %v15253_v40, %v29572_v50  ;;  %v15432_v13 = vunpack.i.h.s16 %v32601_v24 }
 0x4e3   : > { %v16096_v33 = vrot.slane %v16082_v8, %v29572_v50  ;;  %v15611_v41 = vcombine.low %v15602_v10, %v15609_v60  ;;  %v15444_v16 = vunpack.i.h.s16 %v32614_v6  ;;  %v32628_v42 = vpack.i.b16 %v32601_v24, %v15430_v20  ;;  %v34855_v8 = vld [vmem:[#allocation16_spill] sm:$0xff] }
 0x4e4   : > { %v15618_v3 = vrot.slane %v15610_v51, %v29572_v50  ;;  %v32632_v19 = vpack.i.b16 %v32389_v15, %v15432_v13  ;;  %v32636_v11 = vpack.i.b16 %v32614_v6, %v32608_v1  ;;  %v15628_v26 = vcombine.low %v32520_v56, %v32533_v59  ;;  %v27531_v15 = vld.sshfl [vmem:[#allocation4 + $0x38] sm:$0x33 pattern:$0x75316420] }
 0x4e5   : > { %28910 = vmatpush3.bf16.msra.mxu1 %v29257_v55  ;;  %v16097_v17 = vcombine.low %v16089_v4, %v16096_v33  ;;  %v15625_v29 = vrot.slane %v15611_v41, %v29572_v50  ;;  %v32642_v28 = vpack.i.b16 %v32622_v30, %v15444_v16  ;;  %v27582_v9 = vcombine.high %v32520_v56, %v32533_v59  ;;  %v27532_v4 = vld.sshfl [vmem:[#allocation4 + $0x3c] sm:$0x1 pattern:$0x75316420] }
 0x4e6   : > { %28911 = vmatprep.subr.bf16.mxu1 %v29258_v63  ;;  %v15627_v36 = vcombine.low %v32628_v42, %v32632_v19  ;;  %v15644_v7 = vrot.slane %v15628_v26, %v29572_v50  ;;  %v32656_v45 = vcombine.high %v32520_v56, %v32520_v56  ;;  %v32660_v61 = vcombine.high %v32533_v59, %v32533_v59  ;;  %v29256_v26 = vld [vmem:[%s34689_s9 + $0x48] sm:$0xff]  }
 0x4e7   : > { %28877 = vmatprep.mubr.msk.bf16.mxu1 %vm2062_vm5, %v16097_v17  ;;  %v15626_v14 = vcombine.low %v15618_v3, %v15625_v29  ;;  %v15630_v44 = vcombine.low %v32636_v11, %v32642_v28  ;;  %v15651_v55 = vrot.slane %v27582_v9, %v29572_v50  ;;  %v32668_v23 = vcombine.high %v32614_v6, %v32614_v6  ;;  %v27533_v3 = vld.sshfl [vmem:[#allocation4 + $0x40] sm:$0x33 pattern:$0x75316420] }
 0x4e8   : > { %v15637_v46 = vrot.slane %v15627_v36, %v29572_v50  ;;  %v32676_v53 = vcombine.high %v32622_v30, %v32622_v30  ;;  %v32679_v39 = vrot.slane %v27530_v58, %v29572_v50  ;;  %v32682_v47 = vrot.slane %v27531_v15, %v29572_v50 }
 0x4e9   : > { %28912 = vmatpush3.bf16.msra.mxu1 %v29258_v63  ;;  %28854 = vmatmul.mubr.msk.bf16.vlgmr.msra.gmra.mxu0 %vm2062_vm5, %v15626_v14  ;;  %v15658_v0 = vrot.slane %v15630_v44, %v29572_v50  ;;  %v14978_v32 = vunpack.i.h.s16 %v32533_v59  ;;  %v14980_v10 = vunpack.i.h.s16 %v32656_v45  ;;  %v14982_v40 = vunpack.i.h.s16 %v32660_v61 }
 0x4ea   : > { %28945 = vmatprep.subr.bf16.mxu1 %v32649_v52  ;;  %28886 = vmatpush3.bf16.msra.mxu0 %v34855_v8  ;;  %v15659_v60 = vcombine.low %v15637_v46, %v15644_v7  ;;  %v32693_v20 = vpack.i.b16 %v32682_v47, %v32679_v39  ;;  %v16100_v63 = vcombine.low %v32622_v30, %v32668_v23  ;;  %v29259_v8 = vld [vmem:[%s34689_s9 + $0x40] sm:$0xff]  }
 0x4eb   : > { %v14861_v51 = vcombine.high %v27531_v15, %v27531_v15  ;;  %v15660_v13 = vcombine.low %v15651_v55, %v15658_v0  ;;  %v32698_v33 = vpack.i.b16 %v32656_v45, %v14978_v32  ;;  %v32701_v41 = vpack.i.b16 %v32660_v61, %v14980_v10  ;;  %28887 = vmatprep.subr.bf16.mxu0 %v29254_v5 }
 0x4ec   : > { %v32704_v16 = vpack.i.b16 %v32608_v1, %v14982_v40  ;;  %v15667_v58 = vrot.slane %v15659_v60, %v29572_v50  ;;  %v16101_v17 = vcombine.low %v32676_v53, %v32693_v20  ;;  %v16122_v29 = vrot.slane %v16100_v63, %v29572_v50 }
 0x4ed   : > { %v32714_v9 = vrot.slane %v14861_v51, %v29572_v50  ;;  %v15674_v15 = vrot.slane %v15660_v13, %v29572_v50  ;;  %v16098_v1 = vcombine.low %v32698_v33, %v32701_v41  ;;  %v14876_v7 = vcombine.high %v32682_v47, %v32682_v47 }
 0x4ee   : > { %v16099_v36 = vcombine.low %v32704_v16, %v32614_v6  ;;  %v16129_v14 = vrot.slane %v16101_v17, %v29572_v50  ;;  %v14891_v55 = vrot.slane %v27532_v4, %v29572_v50  ;;  %v14899_v46 = vcombine.high %v27533_v3, %v27533_v3  ;;  %28888 = vmatpush3.bf16.msra.mxu0 %v29254_v5 }
 0x4ef   : > { %v14877_v44 = vcombine.high %v32714_v9, %v32714_v9  ;;  %v15675_v0 = vcombine.low %v15667_v58, %v15674_v15  ;;  %v16108_v32 = vrot.slane %v16098_v1, %v29572_v50  ;;  %v32730_v40 = vrot.slane %v27533_v3, %v29572_v50  ;;  %28889 = vmatprep.subr.bf16.mxu0 %v29256_v26 }
 0x4f0   : > { %v16115_v10 = vrot.slane %v16099_v36, %v29572_v50  ;;  %v16131_v60 = vcombine.low %v16122_v29, %v16129_v14  ;;  %v32736_v63 = vrot.slane %v14899_v46, %v29572_v50  ;;  %v14994_v4 = vunpack.i.h.s16 %v32682_v47 }
 0x4f1   : > { %34856 = vst [vmem:[#allocation21_spill] sm:$0xff] %v32730_v40  ;;  %v14996_v5 = vunpack.i.h.s16 %v32714_v9  ;;  %28857 = vmatprep.mubr.msk.bf16.mxu0 %vm2062_vm5, %v15675_v0  ;;  %v14998_v13 = vunpack.i.h.s16 %v14876_v7  ;;  %v15000_v58 = vunpack.i.h.s16 %v14877_v44  ;;  %v32775_v27 = vpack.i.b16 %v32730_v40, %v14891_v55 }
 0x4f2   : > { %34857 = vst [vmem:[#allocation20_spill] sm:$0xff] %v32736_v63  ;;  %v16130_v51 = vcombine.low %v16108_v32, %v16115_v10  ;;  %v16145_v3 = vrot.slane %v16131_v60, %v29572_v50  ;;  %v32743_v17 = vpack.i.b16 %v32714_v9, %v14994_v4  ;;  %v16149_v29 = vcombine.low %v32730_v40, %v32736_v63 }
 0x4f3   : > { %v32745_v15 = vpack.i.b16 %v14876_v7, %v14996_v5  ;;  %28890 = vmatpush3.bf16.msra.mxu0 %v29256_v26  ;;  %v32750_v36 = vpack.i.b16 %v14877_v44, %v14998_v13  ;;  %v32752_v14 = vpack.i.b16 %v14891_v55, %v15000_v58  ;;  %v27616_v46 = vcombine.high %v32730_v40, %v32736_v63  ;;  %v32763_v26 = vld [vmem:[%s34689_s9 + $0x98] sm:$0xff]  }
 0x4f4   : > { %v16138_v1 = vrot.slane %v16130_v51, %v29572_v50  ;;  %28891 = vmatprep.subr.bf16.mxu0 %v29259_v8  ;;  %v16171_v32 = vrot.slane %v16149_v29, %v29572_v50  ;;  %v15446_v10 = vunpack.i.h.s16 %v32622_v30  ;;  %34861 = vst [vmem:[#allocation10_spill] sm:$0xff] %v32763_v26  ;;  %v15448_v51 = vunpack.i.h.s16 %v32668_v23 }
 0x4f5   : > { %34858 = vst [vmem:[#allocation22_spill] sm:$0xff] %v32745_v15  ;;  %34859 = vst [vmem:[#allocation15_spill] sm:$0xff] %v32750_v36  ;;  %v16147_v0 = vcombine.low %v32743_v17, %v32745_v15  ;;  %v16148_v4 = vcombine.low %v32750_v36, %v32752_v14  ;;  %v16178_v5 = vrot.slane %v27616_v46, %v29572_v50  ;;  %v15450_v58 = vunpack.i.h.s16 %v32676_v53 }
 0x4f6   : > { %34860 = vst [vmem:[#allocation6_spill] sm:$0xff] %v32752_v14  ;;  %v16146_v60 = vcombine.low %v16138_v1, %v16145_v3  ;;  %v32772_v29 = vpack.i.b16 %v32668_v23, %v15446_v10  ;;  %v32780_v46 = vpack.i.b16 %v32676_v53, %v15448_v51  ;;  %v27551_v14 = vld.sshfl [vmem:[#allocation4 + $0x48] sm:$0x33 pattern:$0x75316420]  ;;  %v15679_v23 = vcombine.low %v14877_v44, %v32775_v27 }
 0x4f7   : > { %v16157_v13 = vrot.slane %v16147_v0, %v29572_v50  ;;  %28892 = vmatpush3.bf16.msra.mxu0 %v29259_v8  ;;  %v16164_v3 = vrot.slane %v16148_v4, %v29572_v50  ;;  %v16180_v1 = vcombine.low %v16171_v32, %v16178_v5  ;;  %v15678_v0 = vcombine.low %v32714_v9, %v14876_v7 }
 0x4f8   : > { %28878 = vmatmul.mubr.msk.bf16.gmra.mxu1 %vm2062_vm5, %v16146_v60  ;;  %v32784_v15 = vpack.i.b16 %v32679_v39, %v15450_v58  ;;  %v32789_v55 = vcombine.high %v32730_v40, %v32730_v40  ;;  %v32793_v8 = vcombine.high %v32736_v63, %v32736_v63  ;;  %28925 = vmatprep.subr.bf16.mxu0 %v32763_v26  ;;  %v15462_v58 = vunpack.i.h.s16 %v32730_v40 }
 0x4f9   : > { %v16179_v53 = vcombine.low %v16157_v13, %v16164_v3  ;;  %v16194_v32 = vrot.slane %v16180_v1, %v29572_v50  ;;  %v15676_v7 = vcombine.low %v32772_v29, %v32780_v46  ;;  %v15700_v39 = vrot.slane %v15678_v0, %v29572_v50 }
 0x4fa   : > { %34862 = vst [vmem:[#allocation14_spill] sm:$0xff] %v32789_v55  ;;  %34863 = vst [vmem:[#allocation7_spill] sm:$0xff] %v32793_v8  ;;  %v15677_v44 = vcombine.low %v32784_v15, %v32682_v47  ;;  %v15707_v10 = vrot.slane %v15679_v23, %v29572_v50  ;;  %v32804_v60 = vrot.slane %v27550_v43, %v29572_v50  ;;  %v15464_v23 = vunpack.i.h.s16 %v32736_v63 }
 0x4fb   : > { %v15367_v4 = vcombine.high %v27551_v14, %v27551_v14  ;;  %v16187_v5 = vrot.slane %v16179_v53, %v29572_v50  ;;  %v15686_v51 = vrot.slane %v15676_v7, %v29572_v50  ;;  %v32809_v13 = vrot.slane %v27551_v14, %v29572_v50 }
 0x4fc   : > { %v15693_v3 = vrot.slane %v15677_v44, %v29572_v50  ;;  %v15709_v1 = vcombine.low %v15700_v39, %v15707_v10  ;;  %v15466_v36 = vunpack.i.h.s16 %v32789_v55  ;;  %v15468_v53 = vunpack.i.h.s16 %v32793_v8 }
 0x4fd   : > { %v32814_v0 = vrot.slane %v15367_v4, %v29572_v50  ;;  %v16195_v43 = vcombine.low %v16187_v5, %v16194_v32  ;;  %v32820_v7 = vpack.i.b16 %v32736_v63, %v15462_v58  ;;  %v32824_v40 = vpack.i.b16 %v32789_v55, %v15464_v23  ;;  %v27552_v63 = vld.sshfl [vmem:[#allocation4 + $0x4c] sm:$0x1 pattern:$0x75316420] }
 0x4fe   : > { %v15708_v14 = vcombine.low %v15686_v51, %v15693_v3  ;;  %v15723_v26 = vrot.slane %v15709_v1, %v29572_v50  ;;  %v32830_v32 = vpack.i.b16 %v32793_v8, %v15466_v36  ;;  %v32833_v44 = vpack.i.b16 %v32804_v60, %v15468_v53 }
 0x4ff   : > { %v15727_v39 = vcombine.low %v32809_v13, %v32814_v0  ;;  %28881 = vmatprep.mubr.msk.bf16.mxu1 %vm2062_vm5, %v16195_v43  ;;  %v27583_v10 = vcombine.high %v32809_v13, %v32814_v0  ;;  %v15010_v4 = vunpack.i.l.s16 %v32804_v60  ;;  %v15725_v51 = vcombine.low %v32820_v7, %v32824_v40 }
 0x500   : > { %v15716_v5 = vrot.slane %v15708_v14, %v29572_v50  ;;  %v15726_v3 = vcombine.low %v32830_v32, %v32833_v44 }
 0x501   : > { %v15749_v58 = vrot.slane %v15727_v39, %v29572_v50  ;;  %v15756_v36 = vrot.slane %v27583_v10, %v29572_v50  ;;  %v16202_v1 = vrot.slane %v15010_v4, %v29572_v50  ;;  %v15735_v43 = vrot.slane %v15725_v51, %v29572_v50 }
 0x502   : > { %v15724_v23 = vcombine.low %v15716_v5, %v15723_v26  ;;  %v15742_v53 = vrot.slane %v15726_v3, %v29572_v50  ;;  %v17743_v10 = vcombine.low %v32462_v22, %v32465_v2  ;;  %v27732_v26 = vcombine.high %v32462_v22, %v32465_v2 }
 0x503   : > { %v15758_v8 = vcombine.low %v15749_v58, %v15756_v36  ;;  %v16209_v14 = vrot.slane %v16202_v1, %v29572_v50  ;;  %v17745_v4 = vcombine.low %v32578_v31, %v32584_v57  ;;  %v17793_v5 = vcombine.low %v32533_v59, %v32656_v45 }
 0x504   : > { %28858 = vmatmul.mubr.msk.bf16.gmra.mxu0 %vm2062_vm5, %v15724_v23  ;;  %v15757_v55 = vcombine.low %v15735_v43, %v15742_v53  ;;  %v17746_v58 = vcombine.low %v32587_v25, %v32628_v42  ;;  %v32865_v3 = vrot.slane %v27552_v63, %v29572_v50  ;;  %v17760_v36 = vrot.slane %v27732_v26, %v29572_v50 }
 0x505   : > { %v15772_v39 = vrot.slane %v15758_v8, %v29572_v50  ;;  %28882 = vmatmul.mubr.msk.bf16.gmra.mxu1 %vm2062_vm5, %v16209_v14  ;;  %v17753_v8 = vrot.slane %v17743_v10, %v29572_v50  ;;  %v17767_v22 = vrot.slane %v17745_v4, %v29572_v50  ;;  %v17792_v2 = vcombine.low %v32632_v19, %v32520_v56 }
 0x506   : > { %v15765_v51 = vrot.slane %v15757_v55, %v29572_v50  ;;  %v16844_v59 = vcombine.low %v32487_v37, %v32490_v49  ;;  %v17774_v57 = vrot.slane %v17746_v58, %v29572_v50  ;;  %v15478_v25 = vunpack.i.l.s16 %v32865_v3 }
 0x507   : > { %v16845_v42 = vcombine.low %v32493_v48, %v32543_v54  ;;  %v17775_v45 = vcombine.low %v17753_v8, %v17760_v36  ;;  %v17802_v63 = vrot.slane %v17792_v2, %v29572_v50  ;;  %v17794_v1 = vcombine.low %v32660_v61, %v32636_v11  ;;  %v29263_v2 = vld [vmem:[%s34689_s9 + $0xb0] sm:$0xff]  }
 0x508   : > { %v15773_v31 = vcombine.low %v15765_v51, %v15772_v39  ;;  %v16866_v55 = vrot.slane %v16844_v59, %v29572_v50  ;;  %v17776_v56 = vcombine.low %v17767_v22, %v17774_v57  ;;  %v15780_v37 = vrot.slane %v15478_v25, %v29572_v50 }
 0x509   : > { %v16873_v49 = vrot.slane %v16845_v42, %v29572_v50  ;;  %v17795_v19 = vcombine.low %v32642_v28, %v32772_v29  ;;  %v17783_v48 = vrot.slane %v17775_v45, %v29572_v50  ;;  %v17809_v54 = vrot.slane %v17793_v5, %v29572_v50  ;;  %v27700_v45 = vld.sshfl [vmem:[#allocation4 + $0x50] sm:$0x33 pattern:$0x75316420] }
 0x50a   : > { %28861 = vmatprep.mubr.msk.bf16.mxu0 %vm2062_vm5, %v15773_v31  ;;  %v17816_v23 = vrot.slane %v17794_v1, %v29572_v50  ;;  %v17790_v43 = vrot.slane %v17776_v56, %v29572_v50  ;;  %v15787_v11 = vrot.slane %v15780_v37, %v29572_v50  ;;  %v17841_v39 = vcombine.low %v32780_v46, %v32784_v15 }
 0x50b   : > { %v16875_v61 = vcombine.low %v16866_v55, %v16873_v49  ;;  %v17823_v53 = vrot.slane %v17795_v19, %v29572_v50  ;;  %v17824_v14 = vcombine.low %v17802_v63, %v17809_v54  ;;  %v17842_v26 = vcombine.low %v32682_v47, %v32714_v9 }
 0x50c   : > { %v17791_v10 = vcombine.low %v17783_v48, %v17790_v43  ;;  %28862 = vmatmul.mubr.msk.bf16.gmra.mxu0 %vm2062_vm5, %v15787_v11  ;;  %v27733_v5 = vcombine.high %v32682_v47, %v32714_v9  ;;  %v17844_v51 = vcombine.low %v32775_v27, %v32820_v7  ;;  %v17851_v58 = vrot.slane %v17841_v39, %v29572_v50 }
 0x50d   : > { %v16889_v28 = vrot.slane %v16875_v61, %v29572_v50  ;;  %v17825_v29 = vcombine.low %v17816_v23, %v17823_v53  ;;  %v17832_v4 = vrot.slane %v17824_v14, %v29572_v50  ;;  %v17858_v8 = vrot.slane %v17842_v26, %v29572_v50  ;;  %v27701_v61 = vld.sshfl [vmem:[#allocation4 + $0x54] sm:$0x1 pattern:$0x75316420]  ;;  %v29262_v53 = vld [vmem:[%s34689_s9 + $0x90] sm:$0xff]  }
 0x50e   : > { %28913 = vmatprep.mubr.msk.bf16.mxu1 %vm2062_vm5, %v17791_v10  ;;  %v17865_v36 = vrot.slane %v27733_v5, %v29572_v50  ;;  %v17872_v22 = vrot.slane %v17844_v51, %v29572_v50  ;;  %v16891_v47 = vcombine.low %v32555_v38, %v32516_v21  ;;  %v16892_v7 = vcombine.low %v32527_v18, %v32567_v62  ;;  %v27702_v14 = vld.sshfl [vmem:[#allocation4 + $0x58] sm:$0x33 pattern:$0x75316420]  ;;  %v34864_v5 = vld [vmem:[#allocation10_spill] sm:$0xff] }
 0x50f   : > { %v16890_v15 = vcombine.low %v32336_v34, %v16889_v28  ;;  %v17839_v46 = vrot.slane %v17825_v29, %v29572_v50  ;;  %v17873_v9 = vcombine.low %v17851_v58, %v17858_v8  ;;  %v16894_v34 = vcombine.low %v32563_v12, %v32698_v33 }
 0x510   : > { %v17874_v59 = vcombine.low %v17865_v36, %v17872_v22  ;;  %v16893_v31 = vcombine.low %v32601_v24, %v32547_v35  ;;  %v16901_v21 = vrot.slane %v16891_v47, %v29572_v50  ;;  %v16940_v38 = vcombine.low %v32701_v41, %v32704_v16 }
 0x511   : > { %28893 = vmatprep.mubr.msk.bf16.mxu0 %vm2062_vm5, %v16890_v15  ;;  %v17840_v27 = vcombine.low %v17832_v4, %v17839_v46  ;;  %v17881_v18 = vrot.slane %v17873_v9, %v29572_v50  ;;  %v16908_v62 = vrot.slane %v16892_v7, %v29572_v50  ;;  %v16922_v12 = vrot.slane %v16894_v34, %v29572_v50  ;;  %v29266_v4 = vld [vmem:[%s34689_s9 + $0xa0] sm:$0xff]  }
 0x512   : > { %v16941_v33 = vcombine.low %v32614_v6, %v32622_v30  ;;  %v17888_v57 = vrot.slane %v17874_v59, %v29572_v50  ;;  %v16915_v35 = vrot.slane %v16893_v31, %v29572_v50  ;;  %v27674_v24 = vcombine.high %v32614_v6, %v32622_v30  ;;  %v29265_v6 = vld [vmem:[%s34689_s9 + $0xa8] sm:$0xff]  }
 0x513   : > { %28914 = vmatmul.mubr.msk.bf16.vlgmr.msra.gmra.mxu1 %vm2062_vm5, %v17840_v27  ;;  %v16943_v41 = vcombine.low %v32693_v20, %v32743_v17  ;;  %v16923_v16 = vcombine.low %v16901_v21, %v16908_v62  ;;  %v16950_v25 = vrot.slane %v16940_v38, %v29572_v50  ;;  %v32948_v20 = vcombine.high %v32809_v13, %v32809_v13 }
 0x514   : > { %28946 = vmatpush3.bf16.msra.mxu1 %v32649_v52  ;;  %v16957_v42 = vrot.slane %v16941_v33, %v29572_v50  ;;  %v17889_v63 = vcombine.low %v17881_v18, %v17888_v57  ;;  %v16924_v55 = vcombine.low %v16915_v35, %v16922_v12  ;;  %v16964_v1 = vrot.slane %v27674_v24, %v29572_v50  ;;  %v29267_v57 = vld [vmem:[%s34689_s9 + $0x80] sm:$0xff]  }
 0x515   : > { %28947 = vmatprep.subr.bf16.mxu1 %v29263_v2  ;;  %v16971_v56 = vrot.slane %v16943_v41, %v29572_v50  ;;  %v16931_v30 = vrot.slane %v16923_v16, %v29572_v50  ;;  %v32954_v49 = vcombine.high %v32814_v0, %v32814_v0  ;;  %v32957_v19 = vrot.slane %v27700_v45, %v29572_v50 }
 0x516   : > { %v16972_v52 = vcombine.low %v16950_v25, %v16957_v42  ;;  %28917 = vmatprep.mubr.msk.bf16.mxu1 %vm2062_vm5, %v17889_v63  ;;  %v16938_v17 = vrot.slane %v16924_v55, %v29572_v50  ;;  %v17892_v11 = vcombine.low %v32814_v0, %v32948_v20  ;;  %v17543_v39 = vcombine.high %v27700_v45, %v27700_v45  ;;  %v34865_v45 = vld [vmem:[#allocation15_spill] sm:$0xff]  ;;  %v34866_v63 = vld [vmem:[#allocation22_spill] sm:$0xff] }
 0x517   : > { %v16973_v37 = vcombine.low %v16964_v1, %v16971_v56  ;;  %v32963_v43 = vpack.i.b16 %v32957_v19, %v32865_v3  ;;  %v32976_v26 = vcombine.high %v32957_v19, %v32957_v19  ;;  %v17890_v51 = vcombine.low %v32824_v40, %v32830_v32  ;;  %v29264_v40 = vld [vmem:[%s34689_s9 + $0x88] sm:$0xff]  }
 0x518   : > { %v16980_v48 = vrot.slane %v16972_v52, %v29572_v50  ;;  %28948 = vmatpush3.bf16.msra.mxu1 %v29263_v2  ;;  %v16939_v54 = vcombine.low %v16931_v30, %v16938_v17  ;;  %v17914_v29 = vrot.slane %v17892_v11, %v29572_v50  ;;  %v17891_v58 = vcombine.low %v32833_v44, %v32809_v13  ;;  %v34867_v30 = vld [vmem:[#allocation21_spill] sm:$0xff]  ;;  %v34868_v52 = vld [vmem:[#allocation6_spill] sm:$0xff]  ;;  %v34871_v11 = vld [vmem:[#allocation7_spill] sm:$0xff] }
 0x519   : > { %v16987_v23 = vrot.slane %v16973_v37, %v29572_v50  ;;  %28949 = vmatprep.subr.bf16.mxu1 %v29265_v6  ;;  %v17893_v28 = vcombine.low %v32954_v49, %v32963_v43  ;;  %v32987_v15 = vrot.slane %v17543_v39, %v29572_v50  ;;  %v32990_v46 = vrot.slane %v27701_v61, %v29572_v50 }
 0x51a   : > { %28894 = vmatmul.mubr.msk.bf16.vlgmr.msra.gmra.mxu0 %vm2062_vm5, %v16939_v54  ;;  %v17581_v36 = vcombine.high %v27702_v14, %v27702_v14  ;;  %v32995_v22 = vrot.slane %v27702_v14, %v29572_v50  ;;  %v17676_v47 = vunpack.i.h.s16 %v32957_v19  ;;  %v17900_v32 = vrot.slane %v17890_v51, %v29572_v50  ;;  %v34870_v54 = vld [vmem:[#allocation20_spill] sm:$0xff] }
 0x51b   : > { %v16988_v10 = vcombine.low %v16980_v48, %v16987_v23  ;;  %28926 = vmatpush3.bf16.msra.mxu0 %v34864_v5  ;;  %v17921_v8 = vrot.slane %v17893_v28, %v29572_v50  ;;  %v17907_v44 = vrot.slane %v17891_v58, %v29572_v50  ;;  %v33005_v27 = vcombine.high %v32987_v15, %v32987_v15  ;;  %v34869_v48 = vld [vmem:[#allocation14_spill] sm:$0xff] }
 0x51c   : > { %28927 = vmatprep.subr.bf16.mxu0 %v29262_v53  ;;  %v17678_v9 = vunpack.i.h.s16 %v32987_v15  ;;  %28950 = vmatpush3.bf16.msra.mxu1 %v29265_v6  ;;  %v33009_v34 = vrot.slane %v17581_v36, %v29572_v50  ;;  %v17680_v2 = vunpack.i.h.s16 %v32976_v26  ;;  %v33013_v59 = vpack.i.b16 %v32987_v15, %v17676_v47  ;;  %v27804_v36 = vld.sshfl [vmem:[#allocation4 + $0x28] sm:$0x33 pattern:$0x75316420] }
 0x51d   : > { %28897 = vmatprep.mubr.msk.bf16.mxu0 %vm2062_vm5, %v16988_v10  ;;  %v17923_v7 = vcombine.low %v17914_v29, %v17921_v8  ;;  %28951 = vmatprep.subr.bf16.mxu1 %v29266_v4  ;;  %v17922_v31 = vcombine.low %v17900_v32, %v17907_v44  ;;  %v17682_v21 = vunpack.i.h.s16 %v33005_v27  ;;  %v27668_v42 = vpack.i.b16 %v32809_v13, %v32804_v60 }
 0x51e   : > { %v33017_v38 = vpack.i.b16 %v32976_v26, %v17678_v9  ;;  %v33021_v62 = vpack.i.b16 %v33005_v27, %v17680_v2  ;;  %v17941_v12 = vcombine.low %v32995_v22, %v33009_v34  ;;  %v27734_v33 = vcombine.high %v32995_v22, %v33009_v34  ;;  %v27703_v9 = vld.sshfl [vmem:[#allocation4 + $0x5c] sm:$0x1 pattern:$0x75316420] }
 0x51f   : > { %28928 = vmatpush3.bf16.msra.mxu0 %v29262_v53  ;;  %v17937_v18 = vrot.slane %v17923_v7, %v29572_v50  ;;  %v17930_v35 = vrot.slane %v17922_v31, %v29572_v50  ;;  %v33032_v24 = vpack.i.b16 %v32990_v46, %v17682_v21  ;;  %v16989_v55 = vcombine.low %v34866_v63, %v34865_v45  ;;  %v33054_v53 = vld [vmem:[%s34689_s9 + $0xd8] sm:$0xff]   ;;  %v27808_v63 = vld.sshfl [vmem:[#allocation4 + $0x38] sm:$0x33 pattern:$0x75316420] }
 0x520   : > { %28929 = vmatprep.subr.bf16.mxu0 %v29264_v40  ;;  %v17939_v41 = vcombine.low %v33013_v59, %v33017_v38  ;;  %28952 = vmatpush3.bf16.msra.mxu1 %v29266_v4  ;;  %v17963_v16 = vrot.slane %v17941_v12, %v29572_v50  ;;  %v17970_v25 = vrot.slane %v27734_v33, %v29572_v50  ;;  %v16775_v4 = vunpack.i.h.s16 %v32809_v13  ;;  %v27805_v21 = vld.sshfl [vmem:[#allocation4 + $0x2c] sm:$0x1 pattern:$0x75316420] }
 0x521   : > { %v17938_v1 = vcombine.low %v17930_v35, %v17937_v18  ;;  %v17940_v56 = vcombine.low %v33021_v62, %v33032_v24  ;;  %v16990_v17 = vcombine.low %v34868_v52, %v34867_v30  ;;  %v16991_v23 = vcombine.low %v34870_v54, %v34869_v48 }
 0x522   : > { %v17949_v6 = vrot.slane %v17939_v41, %v29572_v50  ;;  %v17972_v37 = vcombine.low %v17963_v16, %v17970_v25  ;;  %v16992_v61 = vcombine.low %v34871_v11, %v27668_v42  ;;  %v16999_v60 = vrot.slane %v16989_v55, %v29572_v50  ;;  %v27806_v25 = vld.sshfl [vmem:[#allocation4 + $0x30] sm:$0x33 pattern:$0x75316420] }
 0x523   : > { %28930 = vmatpush3.bf16.msra.mxu0 %v29264_v40  ;;  %28918 = vmatmul.mubr.msk.bf16.gmra.mxu1 %vm2062_vm5, %v17938_v1  ;;  %v17956_v14 = vrot.slane %v17940_v56, %v29572_v50  ;;  %v17006_v39 = vrot.slane %v16990_v17, %v29572_v50  ;;  %v17013_v28 = vrot.slane %v16991_v23, %v29572_v50  ;;  %v16777_v58 = vunpack.i.h.s16 %v32814_v0 }
 0x524   : > { %28931 = vmatprep.subr.bf16.mxu0 %v29267_v57  ;;  %v17986_v10 = vrot.slane %v17972_v37, %v29572_v50  ;;  %v17020_v29 = vrot.slane %v16992_v61, %v29572_v50  ;;  %v16779_v8 = vunpack.i.h.s16 %v32948_v20  ;;  %v16781_v40 = vunpack.i.h.s16 %v32954_v49 }
 0x525   : > { %v17971_v5 = vcombine.low %v17949_v6, %v17956_v14  ;;  %v17021_v51 = vcombine.low %v16999_v60, %v17006_v39  ;;  %v27669_v32 = vpack.i.b16 %v32814_v0, %v16775_v4  ;;  %v17040_v44 = vcombine.low %v32957_v19, %v32987_v15 }
 0x526   : > { %v17022_v47 = vcombine.low %v17013_v28, %v17020_v29  ;;  %v27670_v2 = vpack.i.b16 %v32948_v20, %v16777_v58  ;;  %v27671_v31 = vpack.i.b16 %v32954_v49, %v16779_v8  ;;  %v27672_v12 = vpack.i.b16 %v32865_v3, %v16781_v40 }
 0x527   : > { %28932 = vmatpush3.bf16.msra.mxu0 %v29267_v57  ;;  %v17979_v13 = vrot.slane %v17971_v5, %v29572_v50  ;;  %v17029_v7 = vrot.slane %v17021_v51, %v29572_v50  ;;  %v27675_v0 = vcombine.high %v32957_v19, %v32987_v15  ;;  %v17062_v33 = vrot.slane %v17040_v44, %v29572_v50  ;;  %v27807_v57 = vld.sshfl [vmem:[#allocation4 + $0x34] sm:$0x1 pattern:$0x75316420] }
 0x528   : > { %28965 = vmatprep.subr.bf16.mxu0 %v33054_v53  ;;  %v17036_v18 = vrot.slane %v17022_v47, %v29572_v50  ;;  %v17038_v41 = vcombine.low %v27669_v32, %v27670_v2  ;;  %v33080_v16 = vrot.slane %v27703_v9, %v29572_v50  ;;  %v19081_v20 = vcombine.high %v27804_v36, %v27804_v36  ;;  %v27745_v44 = vld.sshfl [vmem:[#allocation4 + $0x20] sm:$0x33 pattern:$0x75316420] }
 0x529   : > { %v17987_v35 = vcombine.low %v17979_v13, %v17986_v10  ;;  %v17039_v49 = vcombine.low %v27671_v31, %v27672_v12  ;;  %v17069_v45 = vrot.slane %v27675_v0, %v29572_v50  ;;  %v33084_v3 = vrot.slane %v27804_v36, %v29572_v50  ;;  %v27746_v31 = vld.sshfl [vmem:[#allocation4 + $0x24] sm:$0x1 pattern:$0x75316420] }
 0x52a   : > { %v17037_v42 = vcombine.low %v17029_v7, %v17036_v18  ;;  %v17048_v55 = vrot.slane %v17038_v41, %v29572_v50  ;;  %v17692_v1 = vunpack.i.l.s16 %v33080_v16  ;;  %v33090_v56 = vrot.slane %v19081_v20, %v29572_v50 }
 0x52b   : > { %28921 = vmatprep.mubr.msk.bf16.mxu1 %vm2062_vm5, %v17987_v35  ;;  %v33093_v6 = vrot.slane %v27805_v21, %v29572_v50  ;;  %v17055_v30 = vrot.slane %v17039_v49, %v29572_v50  ;;  %v17071_v52 = vcombine.low %v17062_v33, %v17069_v45  ;;  %v19119_v17 = vcombine.high %v27806_v25, %v27806_v25 }
 0x52c   : > { %28898 = vmatmul.mubr.msk.bf16.gmra.mxu0 %vm2062_vm5, %v17037_v42  ;;  %v33098_v37 = vrot.slane %v27806_v25, %v29572_v50  ;;  %v17994_v48 = vrot.slane %v17692_v1, %v29572_v50  ;;  %v33102_v54 = vrot.slane %v27807_v57, %v29572_v50  ;;  %v19157_v23 = vcombine.high %v27808_v63, %v27808_v63 }
 0x52d   : > { %v33105_v11 = vrot.slane %v27808_v63, %v29572_v50  ;;  %v17070_v61 = vcombine.low %v17048_v55, %v17055_v30  ;;  %v17085_v60 = vrot.slane %v17071_v52, %v29572_v50  ;;  %v33109_v14 = vrot.slane %v19119_v17, %v29572_v50 }
 0x52e   : > { %v33113_v39 = vcombine.high %v33098_v37, %v33098_v37  ;;  %v18001_v10 = vrot.slane %v17994_v48, %v29572_v50  ;;  %v33117_v28 = vrot.slane %v19157_v23, %v29572_v50  ;;  %v19426_v4 = vunpack.i.h.s16 %v33098_v37 }
 0x52f   : > { %v33121_v29 = vcombine.high %v33105_v11, %v33105_v11  ;;  %v17078_v5 = vrot.slane %v17070_v61, %v29572_v50  ;;  %v33127_v51 = vcombine.high %v33109_v14, %v33109_v14  ;;  %v19428_v58 = vunpack.i.h.s16 %v33109_v14 }
 0x530   : > { %v19430_v8 = vunpack.i.h.s16 %v33113_v39  ;;  %28922 = vmatmul.mubr.msk.bf16.gmra.mxu1 %vm2062_vm5, %v18001_v10  ;;  %v33134_v36 = vcombine.high %v33117_v28, %v33117_v28  ;;  %v27830_v47 = vpack.i.b16 %v33098_v37, %v33093_v6  ;;  %v27831_v40 = vpack.i.b16 %v33109_v14, %v19426_v4 }
 0x531   : > { %v19547_v32 = vcombine.low %v33084_v3, %v33090_v56  ;;  %v17086_v9 = vcombine.low %v17078_v5, %v17085_v60  ;;  %v19432_v13 = vunpack.i.h.s16 %v33127_v51  ;;  %v27832_v7 = vpack.i.b16 %v33113_v39, %v19428_v58 }
 0x532   : > { %v27833_v2 = vpack.i.b16 %v33127_v51, %v19430_v8  ;;  %v27850_v21 = vcombine.high %v33084_v3, %v33090_v56  ;;  %v19549_v18 = vcombine.low %v27830_v47, %v27831_v40  ;;  %v19597_v0 = vcombine.low %v33117_v28, %v33121_v29  ;;  %v27809_v47 = vld.sshfl [vmem:[#allocation4 + $0x3c] sm:$0x1 pattern:$0x75316420] }
 0x533   : > { %v19557_v12 = vrot.slane %v19547_v32, %v29572_v50  ;;  %28901 = vmatprep.mubr.msk.bf16.mxu0 %vm2062_vm5, %v17086_v9  ;;  %v27834_v33 = vpack.i.b16 %v33102_v54, %v19432_v13  ;;  %v16791_v35 = vunpack.i.l.s16 %v32990_v46  ;;  %v18179_v41 = vcombine.high %v27745_v44, %v27745_v44  ;;  %v27810_v13 = vld.sshfl [vmem:[#allocation4 + $0x40] sm:$0x33 pattern:$0x75316420] }
 0x534   : > { %v19550_v57 = vcombine.low %v27832_v7, %v27833_v2  ;;  %v19564_v25 = vrot.slane %v27850_v21, %v29572_v50  ;;  %v19571_v20 = vrot.slane %v19549_v18, %v29572_v50  ;;  %v18186_v42 = vrot.slane %v27745_v44, %v29572_v50  ;;  %v27811_v18 = vld.sshfl [vmem:[#allocation4 + $0x44] sm:$0x1 pattern:$0x75316420] }
 0x535   : > { %v18209_v49 = vrot.slane %v27746_v31, %v29572_v50  ;;  %v19596_v63 = vcombine.low %v27834_v33, %v33105_v11  ;;  %v17093_v55 = vrot.slane %v16791_v35, %v29572_v50  ;;  %v18193_v1 = vrot.slane %v18179_v41, %v29572_v50 }
 0x536   : > { %v19578_v45 = vrot.slane %v19550_v57, %v29572_v50  ;;  %v19579_v30 = vcombine.low %v19557_v12, %v19564_v25  ;;  %v18232_v52 = vcombine.high %v33084_v3, %v33084_v3  ;;  %v18233_v17 = vcombine.high %v33090_v56, %v33090_v56 }
 0x537   : > { %v18524_v48 = vunpack.i.h.s16 %v33084_v3  ;;  %v19606_v61 = vrot.slane %v19596_v63, %v29572_v50  ;;  %v17100_v60 = vrot.slane %v17093_v55, %v29572_v50  ;;  %v18526_v10 = vunpack.i.h.s16 %v33090_v56 }
 0x538   : > { %v19580_v23 = vcombine.low %v19571_v20, %v19578_v45  ;;  %v19587_v4 = vrot.slane %v19579_v30, %v29572_v50  ;;  %v18528_v5 = vunpack.i.h.s16 %v18232_v52  ;;  %v18530_v58 = vunpack.i.h.s16 %v18233_v17 }
 0x539   : > { %v27771_v8 = vpack.i.b16 %v33084_v3, %v18209_v49  ;;  %28902 = vmatmul.mubr.msk.bf16.gmra.mxu0 %vm2062_vm5, %v17100_v60  ;;  %v27772_v32 = vpack.i.b16 %v33090_v56, %v18524_v48  ;;  %v27773_v44 = vpack.i.b16 %v18232_v52, %v18526_v10  ;;  %v18645_v9 = vcombine.low %v18186_v42, %v18193_v1 }
 0x53a   : > { %v19594_v40 = vrot.slane %v19580_v23, %v29572_v50  ;;  %v27774_v7 = vpack.i.b16 %v18233_v17, %v18528_v5  ;;  %v27775_v2 = vpack.i.b16 %v33093_v6, %v18530_v58  ;;  %v27791_v31 = vcombine.high %v18186_v42, %v18193_v1  ;;  %v27812_v1 = vld.sshfl [vmem:[#allocation4 + $0x48] sm:$0x33 pattern:$0x75316420] }
 0x53b   : > { %v18695_v21 = vcombine.low %v33109_v14, %v33113_v39  ;;  %v18647_v3 = vcombine.low %v27771_v8, %v27772_v32  ;;  %v18655_v33 = vrot.slane %v18645_v9, %v29572_v50  ;;  %v33178_v57 = vrot.slane %v27809_v47, %v29572_v50 }
 0x53c   : > { %v19595_v12 = vcombine.low %v19587_v4, %v19594_v40  ;;  %v18648_v35 = vcombine.low %v27773_v44, %v27774_v7  ;;  %v18662_v56 = vrot.slane %v27791_v31, %v29572_v50  ;;  %v18694_v41 = vcombine.low %v27775_v2, %v33098_v37 }
 0x53d   : > { %v19195_v25 = vcombine.high %v27810_v13, %v27810_v13  ;;  %v18669_v6 = vrot.slane %v18647_v3, %v29572_v50  ;;  %v33185_v39 = vrot.slane %v27810_v13, %v29572_v50  ;;  %v19613_v20 = vrot.slane %v19597_v0, %v29572_v50 }
 0x53e   : > { %28953 = vmatprep.mubr.msk.bf16.mxu1 %vm2062_vm5, %v19595_v12  ;;  %v19225_v42 = vrot.slane %v27811_v18, %v29572_v50  ;;  %v18676_v49 = vrot.slane %v18648_v35, %v29572_v50  ;;  %v18677_v45 = vcombine.low %v18655_v33, %v18662_v56  ;;  %v18704_v63 = vrot.slane %v18694_v41, %v29572_v50 }
 0x53f   : > { %v33192_v55 = vrot.slane %v19195_v25, %v29572_v50  ;;  %v33196_v30 = vcombine.high %v33185_v39, %v33185_v39  ;;  %v19444_v52 = vunpack.i.h.s16 %v33185_v39  ;;  %v27835_v0 = vpack.i.b16 %v33185_v39, %v33178_v57 }
 0x540   : > { %v19628_v17 = vcombine.low %v19606_v61, %v19613_v20  ;;  %v18678_v48 = vcombine.low %v18669_v6, %v18676_v49  ;;  %v18685_v23 = vrot.slane %v18677_v45, %v29572_v50  ;;  %v19233_v8 = vcombine.high %v27812_v1, %v27812_v1 }
 0x541   : > { %v19446_v60 = vunpack.i.h.s16 %v33192_v55  ;;  %v33205_v10 = vcombine.high %v33192_v55, %v33192_v55  ;;  %v27836_v4 = vpack.i.b16 %v33192_v55, %v19444_v52  ;;  %v19598_v5 = vcombine.low %v33134_v36, %v27835_v0 }
 0x542   : > { %v19636_v58 = vrot.slane %v19628_v17, %v29572_v50  ;;  %v18692_v47 = vrot.slane %v18678_v48, %v29572_v50  ;;  %v33213_v40 = vrot.slane %v27812_v1, %v29572_v50  ;;  %v19448_v32 = vunpack.i.h.s16 %v33196_v30 }
 0x543   : > { %v27837_v61 = vpack.i.b16 %v33196_v30, %v19446_v60  ;;  %v19620_v44 = vrot.slane %v19598_v5, %v29572_v50  ;;  %v33218_v9 = vrot.slane %v19233_v8, %v29572_v50  ;;  %v19450_v13 = vunpack.i.h.s16 %v33205_v10 }
 0x544   : > { %v19648_v7 = vcombine.low %v32963_v43, %v33013_v59  ;;  %v18693_v2 = vcombine.low %v18685_v23, %v18692_v47  ;;  %v27838_v18 = vpack.i.b16 %v33205_v10, %v19448_v32  ;;  %v18542_v12 = vunpack.i.h.s16 %v33105_v11 }
 0x545   : > { %v19599_v31 = vcombine.low %v27836_v4, %v27837_v61  ;;  %v27839_v3 = vpack.i.b16 %v19225_v42, %v19450_v13  ;;  %v19646_v33 = vcombine.low %v33213_v40, %v33218_v9  ;;  %v27851_v35 = vcombine.high %v33213_v40, %v33218_v9 }
 0x546   : > { %v19676_v56 = vrot.slane %v19648_v7, %v29572_v50  ;;  %28933 = vmatprep.mubr.msk.bf16.mxu0 %vm2062_vm5, %v18693_v2  ;;  %v18544_v43 = vunpack.i.h.s16 %v33117_v28  ;;  %v33235_v59 = vpack.i.b16 %v33105_v11, %v33102_v54  ;;  %v33238_v25 = vpack.i.b16 %v33117_v28, %v18542_v12 }
 0x547   : > { %v19627_v41 = vrot.slane %v19599_v31, %v29572_v50  ;;  %v19645_v6 = vcombine.low %v27838_v18, %v27839_v3  ;;  %v19662_v20 = vrot.slane %v19646_v33, %v29572_v50  ;;  %v19669_v49 = vrot.slane %v27851_v35, %v29572_v50 }
 0x548   : > { %v18711_v45 = vrot.slane %v18695_v21, %v29572_v50  ;;  %v33244_v52 = vpack.i.b16 %v33121_v29, %v18544_v43  ;;  %v18696_v0 = vcombine.low %v33127_v51, %v33235_v59  ;;  %v18546_v54 = vunpack.i.h.s16 %v33121_v29 }
 0x549   : > { %v19629_v1 = vcombine.low %v19620_v44, %v19627_v41  ;;  %v19655_v11 = vrot.slane %v19645_v6, %v29572_v50  ;;  %v19678_v28 = vcombine.low %v19669_v49, %v19676_v56  ;;  %v18548_v48 = vunpack.i.h.s16 %v33134_v36 }
 0x54a   : > { %v18726_v17 = vcombine.low %v18704_v63, %v18711_v45  ;;  %v18697_v21 = vcombine.low %v33238_v25, %v33244_v52  ;;  %v18718_v60 = vrot.slane %v18696_v0, %v29572_v50  ;;  %v18560_v4 = vunpack.i.h.s16 %v33213_v40  ;;  %v27756_v45 = vld.sshfl [vmem:[#allocation4 + $0x4c] sm:$0x1 pattern:$0x75316420] }
 0x54b   : > { %v19643_v23 = vrot.slane %v19629_v1, %v29572_v50  ;;  %v19677_v5 = vcombine.low %v19655_v11, %v19662_v20  ;;  %v19692_v51 = vrot.slane %v19678_v28, %v29572_v50  ;;  %v33259_v8 = vpack.i.b16 %v33134_v36, %v18546_v54 }
 0x54c   : > { %v18734_v29 = vrot.slane %v18726_v17, %v29572_v50  ;;  %v18725_v47 = vrot.slane %v18697_v21, %v29572_v50  ;;  %v33263_v61 = vpack.i.b16 %v33178_v57, %v18548_v48  ;;  %v33266_v32 = vpack.i.b16 %v33213_v40, %v19225_v42 }
 0x54d   : > { %v19644_v63 = vcombine.low %v19636_v58, %v19643_v23  ;;  %v19685_v44 = vrot.slane %v19677_v5, %v29572_v50  ;;  %v33270_v13 = vpack.i.b16 %v33218_v9, %v18560_v4  ;;  %v18744_v7 = vcombine.low %v33185_v39, %v33192_v55  ;;  %v33276_v58 = vld.sshfl [vmem:[#allocation4 + $0x60] sm:$0x33 pattern:$0x75316420] }
 0x54e   : > { %v27792_v36 = vcombine.high %v33185_v39, %v33192_v55  ;;  %v18727_v57 = vcombine.low %v18718_v60, %v18725_v47  ;;  %v18743_v42 = vcombine.low %v33259_v8, %v33263_v61  ;;  %v33283_v2 = vcombine.high %v32995_v22, %v32995_v22 }
 0x54f   : > { %28954 = vmatmul.mubr.msk.bf16.vlgmr.msra.gmra.mxu1 %vm2062_vm5, %v19644_v63  ;;  %v33287_v31 = vcombine.high %v33009_v34, %v33009_v34  ;;  %v19693_v18 = vcombine.low %v19685_v44, %v19692_v51  ;;  %v18746_v12 = vcombine.low %v33266_v32, %v33270_v13  ;;  %v18760_v3 = vrot.slane %v18744_v7, %v29572_v50 }
 0x550   : > { %v18767_v33 = vrot.slane %v27792_v36, %v29572_v50  ;;  %v18741_v35 = vrot.slane %v18727_v57, %v29572_v50  ;;  %v18753_v56 = vrot.slane %v18743_v42, %v29572_v50  ;;  %v33297_v41 = vrot.slane %v33276_v58, %v29572_v50 }
 0x551   : > { %v19694_v43 = vcombine.low %v33017_v38, %v33021_v62  ;;  %28957 = vmatprep.mubr.msk.bf16.mxu1 %vm2062_vm5, %v19693_v18  ;;  %v18774_v6 = vrot.slane %v18746_v12, %v29572_v50  ;;  %v19695_v20 = vcombine.low %v33032_v24, %v32995_v22  ;;  %v19696_v49 = vcombine.low %v33009_v34, %v33283_v2  ;;  %v29269_v62 = vld [vmem:[%s34689_s9 + $0xd0] sm:$0xff]  }
 0x552   : > { %v18384_v1 = vcombine.high %v33213_v40, %v33213_v40  ;;  %v18742_v0 = vcombine.low %v18734_v29, %v18741_v35  ;;  %v18775_v54 = vcombine.low %v18753_v56, %v18760_v3  ;;  %v27845_v11 = vpack.i.b16 %v33297_v41, %v33080_v16 }
 0x553   : > { %v19704_v38 = vrot.slane %v19694_v43, %v29572_v50  ;;  %v18776_v28 = vcombine.low %v18767_v33, %v18774_v6  ;;  %v19711_v24 = vrot.slane %v19695_v20, %v29572_v50  ;;  %v19718_v17 = vrot.slane %v19696_v49, %v29572_v50  ;;  %v29271_v43 = vld [vmem:[%s34689_s9 + $0xc0] sm:$0xff]   ;;  %v534_v49 = vld [vmem:[#allocation4 + $0x64] sm:$0x1] }
 0x554   : > { %v18385_v48 = vcombine.high %v33218_v9, %v33218_v9  ;;  %28934 = vmatmul.mubr.msk.bf16.vlgmr.msra.gmra.mxu0 %vm2062_vm5, %v18742_v0  ;;  %v18783_v40 = vrot.slane %v18775_v54, %v29572_v50  ;;  %v19697_v23 = vcombine.low %v33287_v31, %v27845_v11  ;;  %v18399_v21 = vrot.slane %v27756_v45, %v29572_v50 }
 0x555   : > { %v18562_v60 = vunpack.i.h.s16 %v33218_v9  ;;  %28966 = vmatpush3.bf16.msra.mxu0 %v33054_v53  ;;  %v18790_v4 = vrot.slane %v18776_v28, %v29572_v50  ;;  %v19726_v5 = vcombine.low %v19704_v38, %v19711_v24  ;;  %v18564_v51 = vunpack.i.h.s16 %v18384_v1  ;;  %v29270_v53 = vld [vmem:[%s34689_s9 + $0xc8] sm:$0xff]  }
 0x556   : > { %v18566_v29 = vunpack.i.h.s16 %v18385_v48  ;;  %v19725_v63 = vrot.slane %v19697_v23, %v29572_v50  ;;  %28967 = vmatprep.subr.bf16.mxu0 %v29269_v62  ;;  %v27786_v44 = vpack.i.b16 %v32995_v22, %v32990_v46  ;;  %v18794_v7 = vcombine.low %v32987_v15, %v32976_v26 }
 0x557   : > { %v33327_v47 = vpack.i.b16 %v18384_v1, %v18562_v60  ;;  %v18791_v9 = vcombine.low %v18783_v40, %v18790_v4  ;;  %v19734_v36 = vrot.slane %v19726_v5, %v29572_v50  ;;  %v33337_v57 = vpack.i.b16 %v18385_v48, %v18564_v51  ;;  %v27820_v40 = vld.sshfl [vmem:[#allocation4 + $0x68] sm:$0x33 pattern:$0x75316420] }
 0x558   : > { %v33339_v42 = vpack.i.b16 %v18399_v21, %v18566_v29  ;;  %v19727_v18 = vcombine.low %v19718_v17, %v19725_v63  ;;  %v18795_v12 = vcombine.low %v33005_v27, %v27786_v44  ;;  %v18816_v3 = vrot.slane %v18794_v7, %v29572_v50 }
 0x559   : > { %28937 = vmatprep.mubr.msk.bf16.mxu0 %vm2062_vm5, %v18791_v9  ;;  %28968 = vmatpush3.bf16.msra.mxu0 %v29269_v62  ;;  %v18792_v26 = vcombine.low %v33327_v47, %v33337_v57  ;;  %v18578_v46 = vunpack.i.h.s16 %v32995_v22  ;;  %v18483_v27 = vcombine.high %v33276_v58, %v33276_v58  ;;  %v18580_v56 = vunpack.i.h.s16 %v33009_v34 }
 0x55a   : > { %v18793_v15 = vcombine.low %v33339_v42, %v32957_v19  ;;  %v19741_v33 = vrot.slane %v19727_v18, %v29572_v50  ;;  %v18823_v35 = vrot.slane %v18795_v12, %v29572_v50  ;;  %28969 = vmatprep.subr.bf16.mxu0 %v29270_v53  ;;  %v18582_v22 = vunpack.i.h.s16 %v33283_v2 }
 0x55b   : > { %v18802_v6 = vrot.slane %v18792_v26, %v29572_v50  ;;  %v18584_v20 = vunpack.i.h.s16 %v33287_v31  ;;  %v33362_v58 = vrot.slane %v18483_v27, %v29572_v50  ;;  %v27787_v0 = vpack.i.b16 %v33009_v34, %v18578_v46 }
 0x55c   : > { %v18809_v19 = vrot.slane %v18793_v15, %v29572_v50  ;;  %v19742_v45 = vcombine.low %v19734_v36, %v19741_v33  ;;  %v18825_v1 = vcombine.low %v18816_v3, %v18823_v35  ;;  %v27788_v11 = vpack.i.b16 %v33283_v2, %v18580_v56 }
 0x55d   : > { %v27789_v38 = vpack.i.b16 %v33287_v31, %v18582_v22  ;;  %v27790_v62 = vpack.i.b16 %v33080_v16, %v18584_v20  ;;  %28970 = vmatpush3.bf16.msra.mxu0 %v29270_v53  ;;  %v18843_v24 = vcombine.low %v33297_v41, %v33362_v58  ;;  %v27793_v17 = vcombine.high %v33297_v41, %v33362_v58 }
 0x55e   : > { %v18824_v54 = vcombine.low %v18802_v6, %v18809_v19  ;;  %28958 = vmatmul.mubr.msk.bf16.gmra.mxu1 %vm2062_vm5, %v19742_v45  ;;  %v18839_v28 = vrot.slane %v18825_v1, %v29572_v50  ;;  %v535_v34 = vsel %vm29587_vm4, 0, %v534_v49  ;;  %28971 = vmatprep.subr.bf16.mxu0 %v29271_v43  ;;  %v18841_v31 = vcombine.low %v27787_v0, %v27788_v11 }
 0x55f   : > { %v18842_v23 = vcombine.low %v27789_v38, %v27790_v62  ;;  %536 = vst [vmem:[#allocation4 + $0x64] sm:$0x1] %v535_v34  ;;  %v33379_v21 = vcombine.high %v33297_v41, %v33297_v41  ;;  %v18865_v60 = vrot.slane %v18843_v24, %v29572_v50  ;;  %v18872_v4 = vrot.slane %v27793_v17, %v29572_v50 }
 0x560   : > { %v18832_v2 = vrot.slane %v18824_v54, %v29572_v50  ;;  %v33385_v5 = vcombine.high %v33362_v58, %v33362_v58  ;;  %v19385_v51 = vcombine.high %v27820_v40, %v27820_v40  ;;  %v18851_v63 = vrot.slane %v18841_v31, %v29572_v50  ;;  %v538_v31 = vld [vmem:[#allocation4 + $0x6c] sm:$0x1] }
 0x561   : > { %v18858_v44 = vrot.slane %v18842_v23, %v29572_v50  ;;  %v33390_v7 = vrot.slane %v27820_v40, %v29572_v50  ;;  %28972 = vmatpush3.bf16.msra.mxu0 %v29271_v43  ;;  %v18874_v53 = vcombine.low %v18865_v60, %v18872_v4  ;;  %v19480_v36 = vunpack.i.h.s16 %v33297_v41 }
 0x562   : > { %v18840_v29 = vcombine.low %v18832_v2, %v18839_v28  ;;  %v33393_v9 = vrot.slane %v19385_v51, %v29572_v50  ;;  %v19482_v18 = vunpack.i.h.s16 %v33362_v58  ;;  %v19484_v3 = vunpack.i.h.s16 %v33379_v21 }
 0x563   : > { %v18873_v12 = vcombine.low %v18851_v63, %v18858_v44  ;;  %v19486_v26 = vunpack.i.h.s16 %v33385_v5  ;;  %v18888_v15 = vrot.slane %v18874_v53, %v29572_v50  ;;  %v27846_v46 = vpack.i.b16 %v33362_v58, %v19480_v36  ;;  %v27872_v36 = vld.sshfl [vmem:[#allocation4 + $0x54] sm:$0x1 pattern:$0x75316420] }
 0x564   : > { %28938 = vmatmul.mubr.msk.bf16.gmra.mxu0 %vm2062_vm5, %v18840_v29  ;;  %v27847_v33 = vpack.i.b16 %v33379_v21, %v19482_v18  ;;  %v19745_v35 = vcombine.low %v33390_v7, %v33393_v9  ;;  %v27848_v56 = vpack.i.b16 %v33385_v5, %v19484_v3  ;;  %v27852_v43 = vcombine.high %v33390_v7, %v33393_v9  ;;  %v27871_v29 = vld.sshfl [vmem:[#allocation4 + $0x50] sm:$0x33 pattern:$0x75316420] }
 0x565   : > { %v18881_v27 = vrot.slane %v18873_v12, %v29572_v50  ;;  %v20449_v38 = vcombine.low %v33098_v37, %v33109_v14  ;;  %v27909_v62 = vcombine.high %v33098_v37, %v33109_v14  ;;  %v20451_v28 = vcombine.low %v33235_v59, %v33238_v25  ;;  %v27873_v18 = vld.sshfl [vmem:[#allocation4 + $0x58] sm:$0x33 pattern:$0x75316420] }
 0x566   : > { %v27762_v6 = vld.sshfl [vmem:[#allocation4 + $0x64] sm:$0x1 pattern:$0x75316420]  ;;  %v19743_v19 = vcombine.low %v27846_v46, %v27847_v33  ;;  %v19767_v22 = vrot.slane %v19745_v35, %v29572_v50  ;;  %v19774_v45 = vrot.slane %v27852_v43, %v29572_v50  ;;  %v20452_v24 = vcombine.low %v33244_v52, %v33259_v8 }
 0x567   : > { %v18889_v20 = vcombine.low %v18881_v27, %v18888_v15  ;;  %v33411_v49 = vrot.slane %v27762_v6, %v29572_v50  ;;  %v20498_v2 = vcombine.low %v33263_v61, %v33185_v39  ;;  %v20459_v23 = vrot.slane %v20449_v38, %v29572_v50 }
 0x568   : > { %v19753_v1 = vrot.slane %v19743_v19, %v29572_v50  ;;  %v19776_v11 = vcombine.low %v19767_v22, %v19774_v45  ;;  %v20466_v60 = vrot.slane %v27909_v62, %v29572_v50  ;;  %v20473_v37 = vrot.slane %v20451_v28, %v29572_v50 }
 0x569   : > { %28941 = vmatprep.mubr.msk.bf16.mxu0 %vm2062_vm5, %v18889_v20  ;;  %v18594_v0 = vunpack.i.l.s16 %v33411_v49  ;;  %v27849_v54 = vpack.i.b16 %v33411_v49, %v19486_v26  ;;  %v20480_v14 = vrot.slane %v20452_v24, %v29572_v50  ;;  %v20499_v52 = vcombine.low %v33192_v55, %v33196_v30 }
 0x56a   : > { %v19790_v40 = vrot.slane %v19776_v11, %v29572_v50  ;;  %v20508_v8 = vrot.slane %v20498_v2, %v29572_v50  ;;  %v20481_v4 = vcombine.low %v20459_v23, %v20466_v60  ;;  %v539_v61 = vsel %vm29587_vm4, 0, %v538_v31 }
 0x56b   : > { %v18896_v17 = vrot.slane %v18594_v0, %v29572_v50  ;;  %v19744_v34 = vcombine.low %v27848_v56, %v27849_v54  ;;  %v20482_v39 = vcombine.low %v20473_v37, %v20480_v14  ;;  %540 = vst [vmem:[#allocation4 + $0x6c] sm:$0x1] %v539_v61  ;;  %v20515_v53 = vrot.slane %v20499_v52, %v29572_v50 }
 0x56c   : > { %v20489_v63 = vrot.slane %v20481_v4, %v29572_v50  ;;  %v20500_v30 = vcombine.low %v33205_v10, %v33266_v32  ;;  %v20135_v26 = vcombine.high %v27871_v29, %v27871_v29  ;;  %v20142_v15 = vrot.slane %v27871_v29, %v29572_v50 }
 0x56d   : > { %v18903_v59 = vrot.slane %v18896_v17, %v29572_v50  ;;  %v19760_v25 = vrot.slane %v19744_v34, %v29572_v50  ;;  %v20496_v44 = vrot.slane %v20482_v39, %v29572_v50  ;;  %v20530_v3 = vcombine.low %v20508_v8, %v20515_v53  ;;  %v27879_v39 = vld.sshfl [vmem:[#allocation4 + $0x70] sm:$0x33 pattern:$0x75316420] }
 0x56e   : > { %v20501_v33 = vcombine.low %v33270_v13, %v33327_v47  ;;  %v20522_v35 = vrot.slane %v20500_v30, %v29572_v50  ;;  %v20165_v27 = vrot.slane %v27872_v36, %v29572_v50  ;;  %v20149_v10 = vrot.slane %v20135_v26, %v29572_v50 }
 0x56f   : > { %28942 = vmatmul.mubr.msk.bf16.gmra.mxu0 %vm2062_vm5, %v18903_v59  ;;  %v19775_v51 = vcombine.low %v19753_v1, %v19760_v25  ;;  %v20497_v12 = vcombine.low %v20489_v63, %v20496_v44  ;;  %v20538_v56 = vrot.slane %v20530_v3, %v29572_v50  ;;  %v20173_v32 = vcombine.high %v27873_v18, %v27873_v18 }
 0x570   : > { %v20180_v43 = vrot.slane %v27873_v18, %v29572_v50  ;;  %v20529_v6 = vrot.slane %v20501_v33, %v29572_v50  ;;  %v20548_v20 = vcombine.low %v20142_v15, %v20149_v10  ;;  %v27910_v54 = vcombine.high %v20142_v15, %v20149_v10  ;;  %v542_v33 = vld [vmem:[#allocation4 + $0x74] sm:$0x1] }
 0x571   : > { %v19783_v55 = vrot.slane %v19775_v51, %v29572_v50  ;;  %28973 = vmatprep.mubr.msk.bf16.mxu0 %vm2062_vm5, %v20497_v12  ;;  %v20187_v13 = vrot.slane %v20173_v32, %v29572_v50  ;;  %v20547_v24 = vcombine.low %v33337_v57, %v33339_v42  ;;  %v27904_v52 = vpack.i.b16 %v33390_v7, %v33411_v49 }
 0x572   : > { %v27821_v19 = vld.sshfl [vmem:[#allocation4 + $0x6c] sm:$0x1 pattern:$0x75316420]  ;;  %v20364_v47 = vunpack.i.h.s16 %v20180_v43  ;;  %v27899_v22 = vpack.i.b16 %v20180_v43, %v20165_v27  ;;  %v20531_v1 = vcombine.low %v20522_v35, %v20529_v6  ;;  %v20564_v11 = vrot.slane %v20548_v20, %v29572_v50 }
 0x573   : > { %v19791_v46 = vcombine.low %v19783_v55, %v19790_v40  ;;  %v19415_v45 = vrot.slane %v27821_v19, %v29572_v50  ;;  %v20188_v38 = vcombine.high %v20180_v43, %v20180_v43  ;;  %v20189_v17 = vcombine.high %v20187_v13, %v20187_v13 }
 0x574   : > { %v27900_v0 = vpack.i.b16 %v20187_v13, %v20364_v47  ;;  %v20545_v28 = vrot.slane %v20531_v1, %v29572_v50  ;;  %v20571_v40 = vrot.slane %v27910_v54, %v29572_v50  ;;  %v20366_v2 = vunpack.i.h.s16 %v20187_v13 }
 0x575   : > { %28961 = vmatprep.mubr.msk.bf16.mxu1 %vm2062_vm5, %v19791_v46  ;;  %v19496_v62 = vunpack.i.l.s16 %v19415_v45  ;;  %v20557_v60 = vrot.slane %v20547_v24, %v29572_v50  ;;  %v20368_v37 = vunpack.i.h.s16 %v20188_v38  ;;  %v20370_v59 = vunpack.i.h.s16 %v20189_v17 }
 0x576   : > { %v20550_v34 = vcombine.low %v27899_v22, %v27900_v0  ;;  %v20546_v23 = vcombine.low %v20538_v56, %v20545_v28  ;;  %v27901_v25 = vpack.i.b16 %v20188_v38, %v20366_v2  ;;  %v20598_v4 = vcombine.low %v33362_v58, %v33379_v21 }
 0x577   : > { %v19798_v31 = vrot.slane %v19496_v62, %v29572_v50  ;;  %v20579_v42 = vcombine.low %v20557_v60, %v20564_v11  ;;  %v27902_v8 = vpack.i.b16 %v20189_v17, %v20368_v37  ;;  %v27903_v51 = vpack.i.b16 %v33080_v16, %v20370_v59 }
 0x578   : > { %v20578_v14 = vrot.slane %v20550_v34, %v29572_v50  ;;  %28974 = vmatmul.mubr.msk.bf16.vlgmr.msra.gmra.mxu0 %vm2062_vm5, %v20546_v23  ;;  %v20599_v29 = vcombine.low %v33385_v5, %v27904_v52  ;;  %v20264_v63 = vcombine.high %v33390_v7, %v33390_v7  ;;  %v20620_v53 = vrot.slane %v20598_v4, %v29572_v50 }
 0x579   : > { %v19805_v57 = vrot.slane %v19798_v31, %v29572_v50  ;;  %v20587_v49 = vrot.slane %v20579_v42, %v29572_v50  ;;  %v20596_v44 = vcombine.low %v27901_v25, %v27902_v8  ;;  %v20265_v36 = vcombine.high %v33393_v9, %v33393_v9 }
 0x57a   : > { %v20580_v61 = vcombine.low %v20571_v40, %v20578_v14  ;;  %v20597_v21 = vcombine.low %v27903_v51, %v33297_v41  ;;  %v20627_v16 = vrot.slane %v20599_v29, %v29572_v50  ;;  %v20287_v5 = vcombine.high %v27879_v39, %v27879_v39 }
 0x57b   : > { %28962 = vmatmul.mubr.msk.bf16.gmra.mxu1 %vm2062_vm5, %v19805_v57  ;;  %v20606_v55 = vrot.slane %v20596_v44, %v29572_v50  ;;  %v20294_v30 = vrot.slane %v27879_v39, %v29572_v50  ;;  %v20382_v18 = vunpack.i.h.s16 %v33390_v7  ;;  %v20384_v12 = vunpack.i.h.s16 %v33393_v9 }
 0x57c   : > { %v20594_v58 = vrot.slane %v20580_v61, %v29572_v50  ;;  %v20613_v26 = vrot.slane %v20597_v21, %v29572_v50  ;;  %v20629_v15 = vcombine.low %v20620_v53, %v20627_v16  ;;  %v20301_v46 = vrot.slane %v20287_v5, %v29572_v50 }
 0x57d   : > { %v20386_v35 = vunpack.i.h.s16 %v20264_v63  ;;  %v20388_v41 = vunpack.i.h.s16 %v20265_v36  ;;  %v27905_v27 = vpack.i.b16 %v33393_v9, %v20382_v18  ;;  %v27906_v56 = vpack.i.b16 %v20264_v63, %v20384_v12 }
 0x57e   : > { %v20595_v3 = vcombine.low %v20587_v49, %v20594_v58  ;;  %v20628_v10 = vcombine.low %v20606_v55, %v20613_v26  ;;  %v20643_v32 = vrot.slane %v20629_v15, %v29572_v50  ;;  %v20647_v7 = vcombine.low %v20294_v30, %v20301_v46 }
 0x57f   : > { %v27911_v43 = vcombine.high %v20294_v30, %v20301_v46  ;;  %v27907_v6 = vpack.i.b16 %v20265_v36, %v20386_v35  ;;  %v27908_v19 = vpack.i.b16 %v19415_v45, %v20388_v41  ;;  %v20645_v13 = vcombine.low %v27905_v27, %v27906_v56 }
 0x580   : > { %28977 = vmatprep.mubr.msk.bf16.mxu0 %vm2062_vm5, %v20595_v3  ;;  %v543_v47 = vsel %vm29587_vm4, 0, %v542_v33  ;;  %v20636_v22 = vrot.slane %v20628_v10, %v29572_v50  ;;  %v20669_v20 = vrot.slane %v20647_v7, %v29572_v50 }
 0x581   : > { %v20676_v9 = vrot.slane %v27911_v43, %v29572_v50  ;;  %544 = vst [vmem:[#allocation4 + $0x74] sm:$0x1] %v543_v47  ;;  %v20646_v1 = vcombine.low %v27907_v6, %v27908_v19  ;;  %v20655_v0 = vrot.slane %v20645_v13, %v29572_v50 }
 0x582   : > { %v20644_v54 = vcombine.low %v20636_v22, %v20643_v32 }
 0x583   : > { %v20678_v11 = vcombine.low %v20669_v20, %v20676_v9  ;;  %v20662_v38 = vrot.slane %v20646_v1, %v29572_v50 }
 0x584   : > { %28978 = vmatmul.mubr.msk.bf16.gmra.mxu0 %vm2062_vm5, %v20644_v54 }
 0x585   : > { %v20677_v45 = vcombine.low %v20655_v0, %v20662_v38  ;;  %v20692_v62 = vrot.slane %v20678_v11, %v29572_v50 }
 0x587   : > { %v20685_v28 = vrot.slane %v20677_v45, %v29572_v50 }
 0x588   : > { %v27880_v24 = vld.sshfl [vmem:[#allocation4 + $0x74] sm:$0x1 pattern:$0x75316420] }
 0x589   : > { %v20317_v17 = vrot.slane %v27880_v24, %v29572_v50  ;;  %v20693_v34 = vcombine.low %v20685_v28, %v20692_v62 }
 0x58b   : > { %v20398_v40 = vunpack.i.l.s16 %v20317_v17  ;;  %28981 = vmatprep.mubr.msk.bf16.mxu0 %vm2062_vm5, %v20693_v34 }
 0x58d   : > { %v20700_v2 = vrot.slane %v20398_v40, %v29572_v50 }
 0x58f   : > { %v20707_v31 = vrot.slane %v20700_v2, %v29572_v50 }
 0x591   : > { %28982 = vmatmul.mubr.msk.bf16.gmra.mxu0 %vm2062_vm5, %v20707_v31 }
 0x59b   : > { %v28875_v23 = vpop.f32.mrf.mxu1 }
 0x59d   : > { %v16286_v60 = vpop.f32.mrf.mxu1 }
 0x59f   : > { %v28876_v59 = vpop.f32.mrf.mxu1 }
 0x5a1   : > { %v16289_v8 = vpop.f32.mrf.mxu1 }
 0x5a9   : > { %v28855_v37 = vpop.f32.mrf.mxu0 }
 0x5aa   : > { %v16295_v14 = vadd.f32 %v28875_v23, %v28855_v37 }
 0x5ab   : > { %v15864_v25 = vpop.f32.mrf.mxu0 }
 0x5ac   : > { %v16287_v52 = vadd.f32 %v16286_v60, %v15864_v25 }
 0x5ad   : > { %v28856_v57 = vpop.f32.mrf.mxu0 }
 0x5ae   : > { %v16298_v42 = vadd.f32 %v28876_v59, %v28856_v57 }
 0x5af   : > { %v15867_v4 = vpop.f32.mrf.mxu0 }
 0x5b0   : > { %v16290_v39 = vadd.f32 %v16289_v8, %v15867_v4 }
 0x5b8   : > { %v28879_v61 = vpop.f32.mrf.mxu1 }
 0x5ba   : > { %v16302_v51 = vpop.f32.mrf.mxu1 }
 0x5bc   : > { %v28880_v29 = vpop.f32.mrf.mxu1 }
 0x5be   : > { %v16305_v63 = vpop.f32.mrf.mxu1 }
 0x5c4   : > { %v28859_v49 = vpop.f32.mrf.mxu0 }
 0x5c5   : > { %v16311_v44 = vadd.f32 %v28879_v61, %v28859_v49  ;;  %v28883_v53 = vpop.f32.mrf.mxu1 }
 0x5c6   : > { %v15880_v36 = vpop.f32.mrf.mxu0 }
 0x5c7   : > { %v16303_v58 = vadd.f32 %v16302_v51, %v15880_v36  ;;  %v16318_v21 = vpop.f32.mrf.mxu1  ;;  %v29274_v36 = vld [vmem:[%s34691_s11 + $0x18] sm:$0xff]  }
 0x5c8   : > { %v28860_v16 = vpop.f32.mrf.mxu0  ;;  %29001 = vmatprep.subr.bf16.mxu0 %v29274_v36 }
 0x5c9   : > { %v16314_v5 = vadd.f32 %v28880_v29, %v28860_v16  ;;  %v28884_v55 = vpop.f32.mrf.mxu1  ;;  %29002 = vmatpush3.bf16.msra.mxu0 %v29274_v36  ;;  %v29277_v16 = vld [vmem:[%s34691_s11 + $0x8] sm:$0xff]  }
 0x5ca   : > { %v15883_v30 = vpop.f32.mrf.mxu0 }
 0x5cb   : > { %v16306_v18 = vadd.f32 %v16305_v63, %v15883_v30  ;;  %v16321_v33 = vpop.f32.mrf.mxu1  ;;  %v29279_v30 = vld [vmem:[%s34691_s11] sm:$0xff]  }
 0x5cc   : > { %v28863_v12 = vpop.f32.mrf.mxu0 }
 0x5cd   : > { %v16327_v3 = vadd.f32 %v28883_v53, %v28863_v12  ;;  %v29273_v53 = vld [vmem:[%s34691_s11 + $0x30] sm:$0xff]  }
 0x5ce   : > { %v15896_v26 = vpop.f32.mrf.mxu0 }
 0x5cf   : > { %v16319_v15 = vadd.f32 %v16318_v21, %v15896_v26  ;;  %v29275_v21 = vld [vmem:[%s34691_s11 + $0x28] sm:$0xff]  }
 0x5d0   : > { %v28864_v46 = vpop.f32.mrf.mxu0 }
 0x5d2   : > { %v15899_v35 = vpop.f32.mrf.mxu0 }
 0x5d3   : > { %v16322_v41 = vadd.f32 %v16321_v33, %v15899_v35  ;;  %v28915_v27 = vpop.f32.mrf.mxu1  ;;  %v33566_v35 = vld [vmem:[%s34691_s11 + $0x78] sm:$0xff]  }
 0x5d5   : > { %v18078_v56 = vpop.f32.mrf.mxu1 }
 0x5d7   : > { %v28916_v43 = vpop.f32.mrf.mxu1 }
 0x5d9   : > { %v18081_v9 = vpop.f32.mrf.mxu1 }
 0x5da   : > { %v28895_v10 = vpop.f32.mrf.mxu0 }
 0x5db   : > { %v17225_v32 = vadd.f32 %v28895_v10, %v16295_v14 }
 0x5dc   : > { %v17177_v7 = vpop.f32.mrf.mxu0 }
 0x5dd   : > { %v17223_v6 = vadd.f32 %v17177_v7, %v16287_v52  ;;  %v33511_v19 = vadd.f32 %v28915_v27, %v17225_v32 }
 0x5de   : > { %v28896_v13 = vpop.f32.mrf.mxu0 }
 0x5df   : > { %v17226_v47 = vadd.f32 %v28896_v13, %v16298_v42  ;;  %v33513_v22 = vadd.f32 %v18078_v56, %v17223_v6 }
 0x5e0   : > { %v17180_v20 = vpop.f32.mrf.mxu0 }
 0x5e1   : > { %v17224_v1 = vadd.f32 %v17180_v20, %v16290_v39  ;;  %v33515_v0 = vadd.f32 %v28916_v43, %v17226_v47 }
 0x5e3   : > { %v33517_v54 = vadd.f32 %v18081_v9, %v17224_v1  ;;  %v28919_v11 = vpop.f32.mrf.mxu1 }
 0x5e5   : > { %v18094_v38 = vpop.f32.mrf.mxu1 }
 0x5e7   : > { %v28920_v45 = vpop.f32.mrf.mxu1 }
 0x5e9   : > { %v18097_v24 = vpop.f32.mrf.mxu1 }
 0x5ec   : > { %v28899_v62 = vpop.f32.mrf.mxu0 }
 0x5ed   : > { %v17229_v28 = vadd.f32 %v28899_v62, %v16311_v44  ;;  %v29272_v44 = vld [vmem:[%s34691_s11 + $0x38] sm:$0xff]  }
 0x5ee   : > { %v17193_v17 = vpop.f32.mrf.mxu0  ;;  %28985 = vmatprep.subr.bf16.mxu1 %v29272_v44 }
 0x5ef   : > { %v17227_v34 = vadd.f32 %v17193_v17, %v16303_v58  ;;  %v33519_v40 = vadd.f32 %v28919_v11, %v17229_v28  ;;  %v29276_v58 = vld [vmem:[%s34691_s11 + $0x10] sm:$0xff]   ;;  %28986 = vmatpush3.bf16.msra.mxu1 %v29272_v44 }
 0x5f0   : > { %v28900_v2 = vpop.f32.mrf.mxu0  ;;  %v28923_v23 = vpop.f32.mrf.mxu1  ;;  %28987 = vmatprep.subr.bf16.mxu1 %v29273_v53  ;;  %29003 = vmatprep.subr.bf16.mxu0 %v29276_v58 }
 0x5f1   : > { %v17230_v31 = vadd.f32 %v28900_v2, %v16314_v5  ;;  %v33521_v60 = vadd.f32 %v18094_v38, %v17227_v34  ;;  %29004 = vmatpush3.bf16.msra.mxu0 %v29276_v58  ;;  %v29278_v5 = vld [vmem:[%s34691_s11 + $0x20] sm:$0xff]  }
 0x5f2   : > { %v17196_v37 = vpop.f32.mrf.mxu0  ;;  %v18110_v59 = vpop.f32.mrf.mxu1  ;;  %29005 = vmatprep.subr.bf16.mxu0 %v29277_v16 }
 0x5f3   : > { %v17228_v14 = vadd.f32 %v17196_v37, %v16306_v18  ;;  %v33523_v25 = vadd.f32 %v28920_v45, %v17230_v31  ;;  %28988 = vmatpush3.bf16.msra.mxu1 %v29273_v53  ;;  %v33560_v18 = vld [vmem:[%s34691_s11 + $0x58] sm:$0xff]  }
 0x5f4   : > { %v28924_v52 = vpop.f32.mrf.mxu1  ;;  %28989 = vmatprep.subr.bf16.mxu1 %v29275_v21 }
 0x5f5   : > { %v33525_v57 = vadd.f32 %v18097_v24, %v17228_v14  ;;  %29006 = vmatpush3.bf16.msra.mxu0 %v29277_v16 }
 0x5f6   : > { %29007 = vmatprep.subr.bf16.mxu0 %v29279_v30  ;;  %v18113_v26 = vpop.f32.mrf.mxu1 }
 0x5f7   : > { %28990 = vmatpush3.bf16.msra.mxu1 %v29275_v21 }
 0x5f8   : > { %28991 = vmatprep.subr.bf16.mxu1 %v29278_v5 }
 0x5f9   : > { %v28903_v42 = vpop.f32.mrf.mxu0  ;;  %29008 = vmatpush3.bf16.msra.mxu0 %v29279_v30 }
 0x5fa   : > { %v17233_v8 = vadd.f32 %v28903_v42, %v16327_v3  ;;  %29033 = vmatprep.subr.bf16.mxu0 %v33566_v35 }
 0x5fb   : > { %v17209_v4 = vpop.f32.mrf.mxu0  ;;  %28992 = vmatpush3.bf16.msra.mxu1 %v29278_v5 }
 0x5fc   : > { %v17231_v39 = vadd.f32 %v17209_v4, %v16319_v15  ;;  %v33527_v61 = vadd.f32 %v28923_v23, %v17233_v8  ;;  %29017 = vmatprep.subr.bf16.mxu1 %v33560_v18  ;;  %v33576_v23 = vld [vmem:[%s34690_s10] ss:$0 sm:$0xff] }
 0x5fd   : > { %v28904_v51 = vpop.f32.mrf.mxu0 }
 0x5fe   : > { %v33529_v29 = vadd.f32 %v18110_v59, %v17231_v39 }
 0x5ff   : > { %v17212_v63 = vpop.f32.mrf.mxu0 }
 0x600   : > { %v33531_v49 = vadd.f32 %v17212_v63, %v16322_v41 }
 0x60f   : > { %v28955_v46 = vpop.f32.mrf.mxu1 }
 0x611   : > { %v19882_v41 = vpop.f32.mrf.mxu1 }
 0x613   : > { %v28956_v10 = vpop.f32.mrf.mxu1 }
 0x614   : > { %v28935_v55 = vpop.f32.mrf.mxu0 }
 0x615   : > { %v19885_v7 = vpop.f32.mrf.mxu1  ;;  %v19028_v9 = vadd.f32 %v28935_v55, %v33511_v19 }
 0x616   : > { %v18980_v12 = vpop.f32.mrf.mxu0 }
 0x617   : > { %v19026_v38 = vadd.f32 %v18980_v12, %v33513_v22  ;;  %v19930_v62 = vadd.f32 %v28955_v46, %v19028_v9 }
 0x618   : > { %v28936_v3 = vpop.f32.mrf.mxu0 }
 0x619   : > { %v19029_v45 = vadd.f32 %v28936_v3, %v33515_v0  ;;  %v19928_v2 = vadd.f32 %v19882_v41, %v19026_v38 }
 0x61a   : > { %v18983_v15 = vpop.f32.mrf.mxu0 }
 0x61b   : > { %v19027_v17 = vadd.f32 %v18983_v15, %v33517_v54  ;;  %v19931_v14 = vadd.f32 %v28956_v10, %v19029_v45  ;;  %v18133_v54 = vadd.f32 %v18113_v26, %v33531_v49 }
 0x61d   : > { %v19929_v42 = vadd.f32 %v19885_v7, %v19027_v17 }
 0x61e   : > { %v28959_v6 = vpop.f32.mrf.mxu1 }
 0x620   : > { %v19898_v20 = vpop.f32.mrf.mxu1 }
 0x622   : > { %v28960_v1 = vpop.f32.mrf.mxu1 }
 0x624   : > { %v28939_v33 = vpop.f32.mrf.mxu0  ;;  %v19901_v28 = vpop.f32.mrf.mxu1 }
 0x625   : > { %v19032_v44 = vadd.f32 %v28939_v33, %v33519_v40 }
 0x626   : > { %v18996_v27 = vpop.f32.mrf.mxu0 }
 0x627   : > { %v19030_v53 = vadd.f32 %v18996_v27, %v33521_v60  ;;  %v19934_v46 = vadd.f32 %v28959_v6, %v19032_v44 }
 0x628   : > { %v28940_v56 = vpop.f32.mrf.mxu0 }
 0x629   : > { %v19033_v36 = vadd.f32 %v28940_v56, %v33523_v25  ;;  %v19932_v60 = vadd.f32 %v19898_v20, %v19030_v53 }
 0x62a   : > { %v18999_v32 = vpop.f32.mrf.mxu0 }
 0x62b   : > { %v19031_v58 = vadd.f32 %v18999_v32, %v33525_v57  ;;  %v33589_v33 = vadd.f32 %v28960_v1, %v19033_v36 }
 0x62d   : > { %v33591_v25 = vadd.f32 %v19901_v28, %v19031_v58 }
 0x62f   : > { %v28943_v43 = vpop.f32.mrf.mxu0 }
 0x630   : > { %v19036_v55 = vadd.f32 %v28943_v43, %v33527_v61 }
 0x631   : > { %v19012_v13 = vpop.f32.mrf.mxu0 }
 0x632   : > { %v19034_v49 = vadd.f32 %v19012_v13, %v33529_v29 }
 0x633   : > { %v28944_v47 = vpop.f32.mrf.mxu0 }
 0x635   : > { %v19015_v11 = vpop.f32.mrf.mxu0 }
 0x636   : > { %v19035_v30 = vadd.f32 %v19015_v11, %v18133_v54 }
 0x638   : > { %v28975_v24 = vpop.f32.mrf.mxu0 }
 0x639   : > { %v20832_v34 = vadd.f32 %v28975_v24, %v19930_v62 }
 0x63a   : > { %v20784_v19 = vpop.f32.mrf.mxu0 }
 0x63b   : > { %v28963_v31 = vpop.f32.mrf.mxu1  ;;  %v20830_v37 = vadd.f32 %v20784_v19, %v19928_v2  ;;  %v20850_v0 = vadd.f32 %v33576_v23, %v20832_v34 }
 0x63c   : > { %v28976_v22 = vpop.f32.mrf.mxu0  ;;  %v33595_v29 = vadd.f32 %v28963_v31, %v19036_v55 }
 0x63d   : > { %v19914_v59 = vpop.f32.mrf.mxu1  ;;  %v20833_v52 = vadd.f32 %v28976_v22, %v19931_v14  ;;  %v20848_v39 = vadd.f32 %v33576_v23, %v20830_v37  ;;  %v20861_v21 = vmax.f32 %v20850_v0, 0.0 }
 0x63e   : > { %v20787_v4 = vpop.f32.mrf.mxu0  ;;  %v33597_v10 = vadd.f32 %v19914_v59, %v19034_v49 }
 0x63f   : > { %v28964_v8 = vpop.f32.mrf.mxu1  ;;  %v20851_v51 = vadd.f32 %v33576_v23, %v20833_v52  ;;  %v20831_v63 = vadd.f32 %v20787_v4, %v19929_v42  ;;  %v20859_v3 = vmax.f32 %v20848_v39, 0.0  ;;  %v34873_v52 = vld [vmem:[#allocation8_spill] sm:$0xff] }
 0x641   : > { %v20862_v16 = vmax.f32 %v20851_v51, 0.0  ;;  %v20849_v5 = vadd.f32 %v33576_v23, %v20831_v63  ;;  %v19917_v12 = vpop.f32.mrf.mxu1  ;;  %v21632_v63 = vld [vmem:[#allocation5 + $0xc] sm:$0x1] }
 0x642   : > { %v33599_v32 = vadd.f32 %v19917_v12, %v19035_v30 }
 0x643   : > { %v20871_v26 = vpack.c.bf16 %v20862_v16, %v20861_v21  ;;  %v27924_v15 = vpack.c.bf16 %v20862_v16, %v20862_v16  ;;  %v20860_v40 = vmax.f32 %v20849_v5, 0.0  ;;  %v21636_v16 = vld [vmem:[#allocation5 + $0x14] sm:$0x1] }
 0x644   : > { %v28979_v56 = vpop.f32.mrf.mxu0 }
 0x645   : > { %v20938_v57 = vrot.slane %v20871_v26, %v29572_v50  ;;  %v20945_v41 = vrot.slane %v27924_v15, %v29572_v50  ;;  %v20870_v27 = vpack.c.bf16 %v20860_v40, %v20859_v3  ;;  %v27923_v61 = vpack.c.bf16 %v20860_v40, %v20860_v40 }
 0x646   : > { %v20836_v7 = vadd.f32 %v28979_v56, %v19934_v46  ;;  %v20800_v20 = vpop.f32.mrf.mxu0 }
 0x647   : > { %v20946_v43 = vcombine.high %v20938_v57, %v20938_v57  ;;  %v20947_v6 = vcombine.high %v20945_v41, %v20945_v41  ;;  %v20954_v13 = vrot.slane %v20938_v57, %v29572_v50  ;;  %v20961_v47 = vrot.slane %v20945_v41, %v29572_v50 }
 0x648   : > { %v20889_v9 = vrot.slane %v20870_v27, %v29572_v50  ;;  %v20896_v1 = vrot.slane %v27923_v61, %v29572_v50  ;;  %v33606_v11 = vadd.f32 %v33576_v23, %v20836_v7  ;;  %v20834_v38 = vadd.f32 %v20800_v20, %v19932_v60  ;;  %v28980_v17 = vpop.f32.mrf.mxu0 }
 0x649   : > { %v20968_v45 = vrot.slane %v20946_v43, %v29572_v50  ;;  %v20975_v62 = vrot.slane %v20947_v6, %v29572_v50  ;;  %v20976_v28 = vcombine.high %v20954_v13, %v20954_v13  ;;  %v20977_v24 = vcombine.high %v20961_v47, %v20961_v47 }
 0x64a   : > { %v21158_v34 = vunpack.i.h.s16 %v20954_v13  ;;  %v20897_v2 = vcombine.high %v20889_v9, %v20889_v9  ;;  %v20898_v31 = vcombine.high %v20896_v1, %v20896_v1  ;;  %v20905_v19 = vrot.slane %v20889_v9, %v29572_v50  ;;  %v20803_v53 = vpop.f32.mrf.mxu0 }
 0x64b   : > { %v20978_v37 = vcombine.high %v20968_v45, %v20968_v45  ;;  %v33611_v14 = vcombine.high %v20975_v62, %v20975_v62  ;;  %v21167_v59 = vunpack.i.l.s16 %v20975_v62  ;;  %v21168_v22 = vunpack.i.h.s16 %v20975_v62 }
 0x64c   : > { %v21170_v0 = vunpack.i.h.s16 %v20977_v24  ;;  %v21335_v42 = vrot.slane %v21158_v34, %v34873_v52  ;;  %v21344_v8 = vcombine.low %v20976_v28, %v20961_v47  ;;  %v20912_v4 = vrot.slane %v20896_v1, %v29572_v50  ;;  %v21628_v34 = vld [vmem:[#allocation5 + $0x4] sm:$0x1] }
 0x64d   : > { %v33615_v54 = vpack.i.b16 %v20977_v24, %v21168_v22  ;;  %v21343_v39 = vcombine.low %v20968_v45, %v20978_v37  ;;  %v21373_v51 = vrot.slane %v21167_v59, %v34873_v52  ;;  %v20919_v44 = vrot.slane %v20897_v2, %v29572_v50 }
 0x64e   : > { %v33620_v36 = vpack.i.b16 %v33611_v14, %v21170_v0  ;;  %v21342_v58 = vrot.slane %v21335_v42, %v34873_v52  ;;  %v21358_v21 = vrot.slane %v21344_v8, %v34873_v52  ;;  %v20926_v5 = vrot.slane %v20898_v31, %v29572_v50 }
 0x64f   : > { %v21351_v55 = vrot.slane %v21343_v39, %v34873_v52  ;;  %v21380_v49 = vrot.slane %v21373_v51, %v34873_v52  ;;  %v20927_v30 = vcombine.high %v20905_v19, %v20905_v19  ;;  %v20928_v12 = vcombine.high %v20912_v4, %v20912_v4 }
 0x650   : > { %v21633_v3 = vsel %vm29587_vm4, %v21342_v58, %v21632_v63  ;;  %v20929_v26 = vcombine.high %v20919_v44, %v20919_v44  ;;  %v20930_v15 = vcombine.high %v20926_v5, %v20926_v5  ;;  %v21149_v40 = vunpack.i.l.s16 %v20912_v4 }
 0x651   : > { %v21359_v46 = vcombine.low %v21351_v55, %v21358_v21  ;;  %21634 = vst [vmem:[#allocation5 + $0xc] sm:$0x1] %v21633_v3  ;;  %v21637_v60 = vsel %vm29587_vm4, %v21380_v49, %v21636_v16  ;;  %v21150_v57 = vunpack.i.h.s16 %v20912_v4  ;;  %v21152_v41 = vunpack.i.h.s16 %v20926_v5  ;;  %v28983_v27 = vpop.f32.mrf.mxu0 }
 0x652   : > { %21638 = vst [vmem:[#allocation5 + $0x14] sm:$0x1] %v21637_v60  ;;  %v21154_v61 = vunpack.i.h.s16 %v20928_v12  ;;  %v21156_v56 = vunpack.i.h.s16 %v20930_v15  ;;  %v21267_v7 = vcombine.low %v20905_v19, %v20927_v30  ;;  %v21268_v43 = vcombine.low %v20919_v44, %v20929_v26 }
 0x653   : > { %v21366_v6 = vrot.slane %v21359_v46, %v34873_v52  ;;  %v27928_v47 = vpack.i.b16 %v20926_v5, %v21150_v57  ;;  %v27929_v20 = vpack.i.b16 %v20928_v12, %v21152_v41  ;;  %v21297_v9 = vrot.slane %v21149_v40, %v34873_v52  ;;  %v20816_v1 = vpop.f32.mrf.mxu0 }
 0x654   : > { %v27930_v45 = vpack.i.b16 %v20930_v15, %v21154_v61  ;;  %v27931_v62 = vpack.i.b16 %v20954_v13, %v21156_v56  ;;  %v21275_v28 = vrot.slane %v21267_v7, %v34873_v52  ;;  %v21282_v24 = vrot.slane %v21268_v43, %v34873_v52 }
 0x655   : > { %21635 = vst.msk [vmem:[#allocation5 + $0x10] sm:$0xf] %vm442_vm1, %v21366_v6  ;;  %v21304_v2 = vrot.slane %v21297_v9, %v34873_v52  ;;  %v20865_v31 = vmax.f32 %v33606_v11, 0.0  ;;  %v20852_v19 = vadd.f32 %v33576_v23, %v20834_v38  ;;  %v20837_v37 = vadd.f32 %v28980_v17, %v33589_v33  ;;  %v28984_v59 = vpop.f32.mrf.mxu0 }
 0x656   : > { %v21283_v22 = vcombine.low %v21275_v28, %v21282_v24  ;;  %v21305_v0 = vcombine.low %v27928_v47, %v27930_v45  ;;  %v21306_v42 = vcombine.low %v27929_v20, %v27931_v62  ;;  %v20835_v13 = vadd.f32 %v20803_v53, %v33591_v25 }
 0x657   : > { %v21629_v8 = vsel %vm29587_vm4, %v21304_v2, %v21628_v34  ;;  %v20863_v4 = vmax.f32 %v20852_v19, 0.0  ;;  %v20855_v39 = vadd.f32 %v33576_v23, %v20837_v37  ;;  %v21172_v51 = vunpack.i.h.s16 %v33611_v14  ;;  %v20819_v63 = vpop.f32.mrf.mxu0 }
 0x658   : > { %v21290_v11 = vrot.slane %v21283_v22, %v34873_v52  ;;  %v21313_v38 = vrot.slane %v21305_v0, %v34873_v52  ;;  %v21320_v33 = vrot.slane %v21306_v42, %v34873_v52  ;;  %21630 = vst [vmem:[#allocation5 + $0x4] sm:$0x1] %v21629_v8  ;;  %v20853_v17 = vadd.f32 %v33576_v23, %v20835_v13  ;;  %v28003_v44 = vld.sshfl [vmem:[#allocation5 + $0xc] sm:$0x1 pattern:$0x75316420] }
 0x659   : > { %v20866_v25 = vmax.f32 %v20855_v39, 0.0  ;;  %v20840_v53 = vadd.f32 %v28983_v27, %v33595_v29  ;;  %v20838_v58 = vadd.f32 %v20816_v1, %v33597_v10  ;;  %v20839_v21 = vadd.f32 %v20819_v63, %v33599_v32  ;;  %v28005_v16 = vld.sshfl [vmem:[#allocation5 + $0x14] sm:$0x1 pattern:$0x75316420] }
 0x65a   : > { %v21321_v5 = vcombine.low %v21313_v38, %v21320_v33  ;;  %21627 = vst.msk [vmem:[#allocation5] sm:$0xf] %vm442_vm1, %v21290_v11  ;;  %v20864_v55 = vmax.f32 %v20853_v17, 0.0  ;;  %v33654_v49 = vrot.slane %v28003_v44, %v29572_v50  ;;  %v33657_v30 = vrot.slane %v28005_v16, %v29572_v50 }
 0x65b   : > { %v20873_v12 = vpack.c.bf16 %v20866_v25, %v20865_v31  ;;  %v27926_v3 = vpack.c.bf16 %v20866_v25, %v20866_v25  ;;  %v33660_v26 = vadd.f32 %v33576_v23, %v20840_v53  ;;  %v33663_v29 = vadd.f32 %v33576_v23, %v20838_v58  ;;  %v21648_v53 = vld [vmem:[#allocation5 + $0x2c] sm:$0x1] }
 0x65c   : > { %v21328_v10 = vrot.slane %v21321_v5, %v34873_v52  ;;  %v20872_v32 = vpack.c.bf16 %v20864_v55, %v20863_v4  ;;  %v27925_v15 = vpack.c.bf16 %v20864_v55, %v20864_v55  ;;  %v20857_v40 = vadd.f32 %v33576_v23, %v20839_v21  ;;  %v33667_v46 = vld.sshfl [vmem:[#allocation5 + $0x10] sm:$0x33 pattern:$0x75316420] }
 0x65d   : > { %v21036_v60 = vrot.slane %v20873_v12, %v29572_v50  ;;  %v21043_v57 = vrot.slane %v27926_v3, %v29572_v50  ;;  %v20869_v41 = vmax.f32 %v33660_v26, 0.0  ;;  %v20867_v27 = vmax.f32 %v33663_v29, 0.0 }
 0x65e   : > { %21631 = vst.msk [vmem:[#allocation5 + $0x8] sm:$0xf] %vm442_vm1, %v21328_v10  ;;  %v20987_v61 = vrot.slane %v20872_v32, %v29572_v50  ;;  %v20994_v56 = vrot.slane %v27925_v15, %v29572_v50  ;;  %v33676_v7 = vmax.f32 %v20857_v40, 0.0  ;;  %v21732_v23 = vcombine.high %v33667_v46, %v33667_v46  ;;  %v21652_v10 = vld [vmem:[#allocation5 + $0x34] sm:$0x1] }
 0x65f   : > { %v21044_v43 = vcombine.high %v21036_v60, %v21036_v60  ;;  %v21045_v6 = vcombine.high %v21043_v57, %v21043_v57  ;;  %v21052_v47 = vrot.slane %v21036_v60, %v29572_v50  ;;  %v21059_v20 = vrot.slane %v21043_v57, %v29572_v50 }
 0x660   : > { %v20995_v9 = vcombine.high %v20987_v61, %v20987_v61  ;;  %v20996_v1 = vcombine.high %v20994_v56, %v20994_v56  ;;  %v21003_v45 = vrot.slane %v20987_v61, %v29572_v50  ;;  %v21010_v62 = vrot.slane %v20994_v56, %v29572_v50 }
 0x661   : > { %v21066_v28 = vrot.slane %v21044_v43, %v29572_v50  ;;  %v21073_v24 = vrot.slane %v21045_v6, %v29572_v50  ;;  %v21074_v34 = vcombine.high %v21052_v47, %v21052_v47  ;;  %v21075_v2 = vcombine.high %v21059_v20, %v21059_v20 }
 0x662   : > { %v21190_v31 = vunpack.i.h.s16 %v21052_v47  ;;  %v21017_v19 = vrot.slane %v20995_v9, %v29572_v50  ;;  %v21024_v37 = vrot.slane %v20996_v1, %v29572_v50  ;;  %v21025_v59 = vcombine.high %v21003_v45, %v21003_v45 }
 0x663   : > { %v21076_v22 = vcombine.high %v21066_v28, %v21066_v28  ;;  %v33688_v0 = vcombine.high %v21073_v24, %v21073_v24  ;;  %v21192_v42 = vunpack.i.h.s16 %v21066_v28  ;;  %v21194_v13 = vunpack.i.h.s16 %v21074_v34 }
 0x664   : > { %v27938_v8 = vpack.i.b16 %v21066_v28, %v21190_v31  ;;  %v21496_v4 = vcombine.low %v21059_v20, %v21075_v2  ;;  %v21026_v39 = vcombine.high %v21010_v62, %v21010_v62  ;;  %v21027_v63 = vcombine.high %v21017_v19, %v21017_v19  ;;  %v21640_v28 = vld [vmem:[#allocation5 + $0x1c] sm:$0x1] }
 0x665   : > { %v21203_v11 = vunpack.i.l.s16 %v33688_v0  ;;  %v21204_v38 = vunpack.i.h.s16 %v33688_v0  ;;  %v27939_v33 = vpack.i.b16 %v21074_v34, %v21192_v42  ;;  %v21487_v17 = vrot.slane %v21194_v13, %v34873_v52  ;;  %v21644_v42 = vld [vmem:[#allocation5 + $0x24] sm:$0x1]  ;;  %v27944_v13 = vld.sshfl [vmem:[#allocation5] sm:$0x33 pattern:$0x75316420] }
 0x666   : > { %v21495_v44 = vcombine.low %v21076_v22, %v21073_v24  ;;  %v21510_v25 = vrot.slane %v21496_v4, %v34873_v52  ;;  %v21028_v58 = vcombine.high %v21024_v37, %v21024_v37  ;;  %v21174_v21 = vunpack.i.h.s16 %v21003_v45 }
 0x667   : > { %v21494_v16 = vrot.slane %v21487_v17, %v34873_v52  ;;  %v21525_v5 = vrot.slane %v21203_v11, %v34873_v52  ;;  %v21176_v55 = vunpack.i.h.s16 %v21017_v19  ;;  %v21185_v12 = vunpack.i.l.s16 %v21026_v39 }
 0x668   : > { %v21503_v3 = vrot.slane %v21495_v44, %v34873_v52  ;;  %v21186_v32 = vunpack.i.h.s16 %v21026_v39  ;;  %v21188_v15 = vunpack.i.h.s16 %v21028_v58  ;;  %v27934_v40 = vpack.i.b16 %v21003_v45, %v21172_v51 }
 0x669   : > { %v21532_v60 = vrot.slane %v21525_v5, %v34873_v52  ;;  %v21649_v57 = vsel %vm29587_vm4, %v21494_v16, %v21648_v53  ;;  %v27935_v61 = vpack.i.b16 %v21017_v19, %v21174_v21  ;;  %v21411_v56 = vrot.slane %v21176_v55, %v34873_v52 }
 0x66a   : > { %v21511_v43 = vcombine.low %v21503_v3, %v21510_v25  ;;  %21650 = vst [vmem:[#allocation5 + $0x2c] sm:$0x1] %v21649_v57  ;;  %v27936_v6 = vpack.i.b16 %v21028_v58, %v21186_v32  ;;  %v27937_v20 = vpack.i.b16 %v21052_v47, %v21188_v15  ;;  %v21381_v9 = vcombine.low %v33615_v54, %v27934_v40 }
 0x66b   : > { %v21653_v1 = vsel %vm29587_vm4, %v21532_v60, %v21652_v10  ;;  %v21382_v14 = vcombine.low %v33620_v36, %v27935_v61  ;;  %v21418_v51 = vrot.slane %v21411_v56, %v34873_v52  ;;  %v21419_v45 = vcombine.low %v21025_v59, %v21010_v62  ;;  %v27945_v61 = vld.sshfl [vmem:[#allocation5 + $0x8] sm:$0x33 pattern:$0x75316420] }
 0x66c   : > { %v21518_v24 = vrot.slane %v21511_v43, %v34873_v52  ;;  %21654 = vst [vmem:[#allocation5 + $0x34] sm:$0x1] %v21653_v1  ;;  %v21389_v34 = vrot.slane %v21381_v9, %v34873_v52  ;;  %v21420_v2 = vcombine.low %v21027_v63, %v21024_v37  ;;  %v21449_v31 = vrot.slane %v21185_v12, %v34873_v52  ;;  %v21660_v9 = vld [vmem:[#allocation5 + $0x44] sm:$0x1] }
 0x66d   : > { %v21396_v47 = vrot.slane %v21382_v14, %v34873_v52  ;;  %v21427_v54 = vrot.slane %v21419_v45, %v34873_v52  ;;  %v21457_v19 = vcombine.low %v27936_v6, %v27938_v8  ;;  %v21458_v22 = vcombine.low %v27937_v20, %v27939_v33 }
 0x66e   : > { %21651 = vst.msk [vmem:[#allocation5 + $0x30] sm:$0xf] %vm442_vm1, %v21518_v24  ;;  %v21434_v36 = vrot.slane %v21420_v2, %v34873_v52  ;;  %v21456_v62 = vrot.slane %v21449_v31, %v34873_v52  ;;  %v21641_v59 = vsel %vm29587_vm4, %v21418_v51, %v21640_v28  ;;  %v20875_v37 = vpack.c.bf16 %v20869_v41, %v20869_v41 }
 0x66f   : > { %v21397_v4 = vcombine.low %v21389_v34, %v21396_v47  ;;  %v21465_v39 = vrot.slane %v21457_v19, %v34873_v52  ;;  %v21472_v8 = vrot.slane %v21458_v22, %v34873_v52  ;;  %21642 = vst [vmem:[#allocation5 + $0x1c] sm:$0x1] %v21641_v59  ;;  %v20874_v63 = vpack.c.bf16 %v33676_v7, %v20867_v27 }
 0x670   : > { %v21435_v11 = vcombine.low %v21427_v54, %v21434_v36  ;;  %v21645_v33 = vsel %vm29587_vm4, %v21456_v62, %v21644_v42  ;;  %v21133_v17 = vrot.slane %v20875_v37, %v29572_v50  ;;  %v27927_v26 = vpack.c.bf16 %v33676_v7, %v33676_v7 }
 0x671   : > { %v21404_v41 = vrot.slane %v21397_v4, %v34873_v52  ;;  %v21473_v44 = vcombine.low %v21465_v39, %v21472_v8  ;;  %21646 = vst [vmem:[#allocation5 + $0x24] sm:$0x1] %v21645_v33  ;;  %v21085_v25 = vrot.slane %v20874_v63, %v29572_v50  ;;  %v21684_v53 = vcombine.high %v27944_v13, %v27944_v13  ;;  %v21656_v4 = vld [vmem:[#allocation5 + $0x3c] sm:$0x1] }
 0x672   : > { %v21442_v29 = vrot.slane %v21435_v11, %v34873_v52  ;;  %v21140_v27 = vrot.slane %v21133_v17, %v29572_v50  ;;  %v21092_v58 = vrot.slane %v27927_v26, %v29572_v50  ;;  %v33737_v21 = vrot.slane %v27944_v13, %v29572_v50 }
 0x673   : > { %v21480_v16 = vrot.slane %v21473_v44, %v34873_v52  ;;  %21639 = vst.msk [vmem:[#allocation5 + $0x18] sm:$0xf] %vm442_vm1, %v21404_v41  ;;  %v21093_v7 = vcombine.high %v21085_v25, %v21085_v25  ;;  %v21101_v5 = vrot.slane %v21085_v25, %v29572_v50  ;;  %v33743_v55 = vrot.slane %v21684_v53, %v29572_v50 }
 0x674   : > { %21643 = vst.msk [vmem:[#allocation5 + $0x20] sm:$0xf] %vm442_vm1, %v21442_v29  ;;  %v21221_v12 = vunpack.i.l.s16 %v21140_v27  ;;  %v21094_v3 = vcombine.high %v21092_v58, %v21092_v58  ;;  %v21108_v10 = vrot.slane %v21092_v58, %v29572_v50  ;;  %v33749_v32 = vcombine.high %v33737_v21, %v33737_v21 }
 0x675   : > { %21647 = vst.msk [vmem:[#allocation5 + $0x28] sm:$0xf] %vm442_vm1, %v21480_v16  ;;  %v21115_v15 = vrot.slane %v21093_v7, %v29572_v50  ;;  %v21123_v40 = vcombine.high %v21101_v5, %v21101_v5  ;;  %v21206_v60 = vunpack.i.h.s16 %v21101_v5  ;;  %v27940_v57 = vpack.i.b16 %v21101_v5, %v21204_v38 }
 0x676   : > { %v21601_v56 = vrot.slane %v21221_v12, %v34873_v52  ;;  %v21122_v43 = vrot.slane %v21094_v3, %v29572_v50  ;;  %v21124_v6 = vcombine.high %v21108_v10, %v21108_v10  ;;  %v33759_v20 = vcombine.high %v33743_v55, %v33743_v55 }
 0x677   : > { %v21125_v1 = vcombine.high %v21115_v15, %v21115_v15  ;;  %v21208_v14 = vunpack.i.h.s16 %v21115_v15  ;;  %v21210_v51 = vunpack.i.h.s16 %v21123_v40  ;;  %v27941_v45 = vpack.i.b16 %v21115_v15, %v21206_v60 }
 0x678   : > { %v21608_v28 = vrot.slane %v21601_v56, %v34873_v52  ;;  %v21126_v24 = vcombine.high %v21122_v43, %v21122_v43  ;;  %v21571_v0 = vcombine.low %v21108_v10, %v21124_v6  ;;  %v21708_v38 = vcombine.high %v27945_v61, %v27945_v61 }
 0x679   : > { %v21212_v34 = vunpack.i.h.s16 %v21125_v1  ;;  %v27942_v2 = vpack.i.b16 %v21123_v40, %v21208_v14  ;;  %v27943_v31 = vpack.i.b16 %v21125_v1, %v21210_v51  ;;  %v33763_v47 = vrot.slane %v27945_v61, %v29572_v50 }
 0x67a   : > { %v21661_v54 = vsel %vm29587_vm4, %v21608_v28, %v21660_v9  ;;  %v21572_v19 = vcombine.low %v21122_v43, %v21126_v24  ;;  %v21579_v22 = vrot.slane %v21571_v0, %v34873_v52  ;;  %v33769_v42 = vrot.slane %v21708_v38, %v29572_v50  ;;  %v27947_v6 = vld.sshfl [vmem:[#allocation5 + $0x18] sm:$0x33 pattern:$0x75316420] }
 0x67b   : > { %21662 = vst [vmem:[#allocation5 + $0x44] sm:$0x1] %v21661_v54  ;;  %v21533_v36 = vcombine.low %v27940_v57, %v27942_v2  ;;  %v21534_v62 = vcombine.low %v27941_v45, %v27943_v31  ;;  %v21563_v59 = vrot.slane %v21212_v34, %v34873_v52  ;;  %v33774_v37 = vcombine.high %v33763_v47, %v33763_v47  ;;  %v27948_v31 = vld.sshfl [vmem:[#allocation5 + $0x20] sm:$0x33 pattern:$0x75316420] }
 0x67c   : > { %v21586_v13 = vrot.slane %v21572_v19, %v34873_v52  ;;  %v33779_v39 = vcombine.high %v33769_v42, %v33769_v42  ;;  %v33783_v8 = vrot.slane %v33667_v46, %v29572_v50  ;;  %v33789_v63 = vrot.slane %v21732_v23, %v29572_v50 }
 0x67d   : > { %v21541_v11 = vrot.slane %v21533_v36, %v34873_v52  ;;  %v21548_v33 = vrot.slane %v21534_v62, %v34873_v52  ;;  %v21570_v17 = vrot.slane %v21563_v59, %v34873_v52  ;;  %v21846_v26 = vunpack.i.h.s16 %v33737_v21 }
 0x67e   : > { %v21587_v41 = vcombine.low %v21579_v22, %v21586_v13  ;;  %v33797_v44 = vcombine.high %v33783_v8, %v33783_v8  ;;  %v33801_v25 = vcombine.high %v33789_v63, %v33789_v63  ;;  %v21848_v46 = vunpack.i.h.s16 %v33743_v55 }
 0x67f   : > { %v21549_v23 = vcombine.low %v21541_v11, %v21548_v33  ;;  %v21657_v53 = vsel %vm29587_vm4, %v21570_v17, %v21656_v4  ;;  %v21850_v29 = vunpack.i.h.s16 %v33749_v32  ;;  %v21853_v27 = vunpack.i.h.s16 %v33763_v47 }
 0x680   : > { %v21594_v58 = vrot.slane %v21587_v41, %v34873_v52  ;;  %21658 = vst [vmem:[#allocation5 + $0x3c] sm:$0x1] %v21657_v53  ;;  %v34740_v16 = vunpack.i.h.s16 %v33783_v8  ;;  %v21862_v7 = vunpack.i.h.s16 %v33789_v63  ;;  %v21864_v5 = vunpack.i.h.s16 %v33797_v44 }
 0x681   : > { %v21556_v12 = vrot.slane %v21549_v23, %v34873_v52  ;;  %v21902_v3 = vunpack.i.h.s16 %v33759_v20  ;;  %v27959_v48 = vpack.i.b16 %v33743_v55, %v21846_v26  ;;  %v27960_v10 = vpack.i.b16 %v33749_v32, %v21848_v46 }
 0x682   : > { %21659 = vst.msk [vmem:[#allocation5 + $0x40] sm:$0xf] %vm442_vm1, %v21594_v58  ;;  %v27961_v15 = vpack.i.b16 %v33759_v20, %v21850_v29  ;;  %v33821_v40 = vpack.i.b16 %v33789_v63, %v34740_v16  ;;  %v33824_v60 = vpack.i.b16 %v33797_v44, %v21862_v7  ;;  %v21945_v52 = vcombine.low %v33769_v42, %v33774_v37 }
 0x683   : > { %21655 = vst.msk [vmem:[#allocation5 + $0x38] sm:$0xf] %vm442_vm1, %v21556_v12  ;;  %v21921_v57 = vpack.i.b16 %v21853_v27, %v21902_v3  ;;  %v21943_v61 = vcombine.low %v27959_v48, %v27960_v10  ;;  %v21855_v56 = vunpack.i.h.s16 %v33769_v42  ;;  %v21857_v43 = vunpack.i.h.s16 %v33774_v37 }
 0x684   : > { %v21946_v9 = vcombine.low %v33779_v39, %v33821_v40  ;;  %v21967_v1 = vrot.slane %v21945_v52, %v29572_v50  ;;  %v27980_v14 = vpack.i.b16 %v33763_v47, %v33759_v20  ;;  %v27981_v51 = vpack.i.b16 %v33769_v42, %v21853_v27 }
 0x685   : > { %v21944_v45 = vcombine.low %v27961_v15, %v21921_v57  ;;  %v21953_v28 = vrot.slane %v21943_v61, %v29572_v50  ;;  %v27982_v24 = vpack.i.b16 %v33774_v37, %v21855_v56  ;;  %v33840_v0 = vpack.i.b16 %v33779_v39, %v21857_v43 }
 0x686   : > { %v21974_v38 = vrot.slane %v21946_v9, %v29572_v50  ;;  %v22229_v34 = vcombine.low %v33737_v21, %v33743_v55  ;;  %v22230_v2 = vcombine.low %v33749_v32, %v27980_v14  ;;  %v21756_v54 = vcombine.high %v27947_v6, %v27947_v6 }
 0x687   : > { %v21960_v20 = vrot.slane %v21944_v45, %v29572_v50  ;;  %v22231_v19 = vcombine.low %v27981_v51, %v27982_v24  ;;  %v22232_v22 = vcombine.low %v33840_v0, %v33783_v8  ;;  %v33850_v36 = vrot.slane %v27947_v6, %v29572_v50 }
 0x688   : > { %v21976_v62 = vcombine.low %v21967_v1, %v21974_v38  ;;  %v22239_v59 = vrot.slane %v22229_v34, %v29572_v50  ;;  %v22246_v13 = vrot.slane %v22230_v2, %v29572_v50  ;;  %v33855_v21 = vrot.slane %v21756_v54, %v29572_v50  ;;  %v27949_v2 = vld.sshfl [vmem:[#allocation5 + $0x28] sm:$0x33 pattern:$0x75316420] }
 0x689   : > { %v21975_v55 = vcombine.low %v21953_v28, %v21960_v20  ;;  %v33858_v32 = vrot.slane %v22231_v19, %v29572_v50  ;;  %v22260_v4 = vrot.slane %v22232_v22, %v29572_v50  ;;  %v21780_v11 = vcombine.high %v27948_v31, %v27948_v31 }
 0x68a   : > { %v21990_v33 = vrot.slane %v21976_v62, %v29572_v50  ;;  %v22261_v17 = vcombine.low %v22239_v59, %v22246_v13  ;;  %v33863_v26 = vrot.slane %v27948_v31, %v29572_v50  ;;  %v21867_v41 = vunpack.i.h.s16 %v33850_v36  ;;  %v27950_v13 = vld.sshfl [vmem:[#allocation5 + $0x30] sm:$0x33 pattern:$0x75316420] }
 0x68b   : > { %v21983_v46 = vrot.slane %v21975_v55, %v29572_v50  ;;  %v22262_v23 = vcombine.low %v33858_v32, %v22260_v4  ;;  %v33869_v53 = vrot.slane %v21780_v11, %v29572_v50  ;;  %v21904_v29 = vunpack.i.h.s16 %v33801_v25 }
 0x68c   : > { %v22269_v27 = vrot.slane %v22261_v17, %v29572_v50  ;;  %v33875_v58 = vcombine.high %v33863_v26, %v33863_v26  ;;  %v34739_v7 = vunpack.i.h.s16 %v33863_v26  ;;  %v33879_v12 = vpack.i.b16 %v33801_v25, %v21864_v5 }
 0x68d   : > { %v21991_v3 = vcombine.low %v21983_v46, %v21990_v33  ;;  %v22276_v48 = vrot.slane %v22262_v23, %v29572_v50  ;;  %v21876_v10 = vunpack.i.h.s16 %v33869_v53  ;;  %v21928_v15 = vpack.i.b16 %v21867_v41, %v21904_v29 }
 0x68e   : > { %v33886_v52 = vpack.i.b16 %v33869_v53, %v34739_v7  ;;  %v21992_v57 = vcombine.low %v33824_v60, %v33879_v12  ;;  %v27971_v61 = vcombine.high %v33850_v36, %v33855_v21  ;;  %v33894_v5 = vcombine.high %v33850_v36, %v33850_v36 }
 0x68f   : > { %28993 = vmatprep.mubr.msk.bf16.mxu1 %vm2062_vm5, %v21991_v3  ;;  %v22277_v56 = vcombine.low %v22269_v27, %v22276_v48  ;;  %v33898_v43 = vpack.i.b16 %v33875_v58, %v21876_v10  ;;  %v21993_v6 = vcombine.low %v21928_v15, %v33855_v21  ;;  %v33903_v9 = vcombine.high %v33855_v21, %v33855_v21 }
 0x690   : > { %v22002_v1 = vrot.slane %v21992_v57, %v29572_v50  ;;  %v22016_v14 = vrot.slane %v27971_v61, %v29572_v50  ;;  %v21869_v51 = vunpack.i.h.s16 %v33855_v21  ;;  %v21871_v45 = vunpack.i.h.s16 %v33894_v5 }
 0x691   : > { %29009 = vmatprep.mubr.msk.bf16.mxu0 %vm2062_vm5, %v22277_v56  ;;  %v21995_v28 = vcombine.low %v33886_v52, %v33898_v43  ;;  %v22009_v24 = vrot.slane %v21993_v6, %v29572_v50  ;;  %v27984_v38 = vpack.i.b16 %v33850_v36, %v33801_v25  ;;  %v33916_v34 = vpack.i.b16 %v33855_v21, %v21867_v41 }
 0x692   : > { %v27986_v31 = vpack.i.b16 %v33894_v5, %v21869_v51  ;;  %v27987_v54 = vpack.i.b16 %v33903_v9, %v21871_v45  ;;  %v22278_v20 = vcombine.low %v33789_v63, %v33797_v44  ;;  %v22281_v19 = vcombine.low %v33863_v26, %v33869_v53 }
 0x693   : > { %v22023_v22 = vrot.slane %v21995_v28, %v29572_v50  ;;  %v22024_v62 = vcombine.low %v22002_v1, %v22009_v24  ;;  %v22279_v59 = vcombine.low %v27984_v38, %v33916_v34  ;;  %v21796_v55 = vcombine.high %v33869_v53, %v33869_v53  ;;  %v29282_v24 = vld [vmem:[%s34691_s11 + $0x50] sm:$0xff]  }
 0x694   : > { %v22280_v4 = vcombine.low %v27986_v31, %v27987_v54  ;;  %v33929_v11 = vrot.slane %v22278_v20, %v29572_v50  ;;  %v22309_v33 = vrot.slane %v22281_v19, %v29572_v50  ;;  %v21804_v17 = vcombine.high %v27949_v2, %v27949_v2 }
 0x695   : > { %v22025_v63 = vcombine.low %v22016_v14, %v22023_v22  ;;  %v22032_v44 = vrot.slane %v22024_v62, %v29572_v50  ;;  %v22295_v41 = vrot.slane %v22279_v59, %v29572_v50  ;;  %v33935_v46 = vrot.slane %v27949_v2, %v29572_v50 }
 0x696   : > { %v33938_v23 = vrot.slane %v22280_v4, %v29572_v50  ;;  %v33941_v29 = vrot.slane %v21804_v17, %v29572_v50  ;;  %v21828_v27 = vcombine.high %v27950_v13, %v27950_v13  ;;  %v33944_v3 = vrot.slane %v27950_v13, %v29572_v50  ;;  %v29283_v17 = vld [vmem:[%s34691_s11 + $0x70] sm:$0xff]  }
 0x697   : > { %v22039_v48 = vrot.slane %v22025_v63, %v29572_v50  ;;  %v22310_v10 = vcombine.low %v33929_v11, %v22295_v41  ;;  %v33950_v15 = vcombine.high %v33935_v46, %v33935_v46  ;;  %v21878_v57 = vunpack.i.h.s16 %v33875_v58 }
 0x698   : > { %v22311_v61 = vcombine.low %v33938_v23, %v22309_v33  ;;  %v33956_v56 = vcombine.high %v33941_v29, %v33941_v29  ;;  %v21842_v6 = vrot.slane %v21828_v27, %v29572_v50  ;;  %v21843_v1 = vcombine.high %v33944_v3, %v33944_v3 }
 0x699   : > { %v22040_v14 = vcombine.low %v22032_v44, %v22039_v48  ;;  %v22318_v51 = vrot.slane %v22310_v10, %v29572_v50  ;;  %v21881_v45 = vunpack.i.h.s16 %v33935_v46  ;;  %v21888_v28 = vunpack.i.h.s16 %v33944_v3 }
 0x69a   : > { %v22325_v38 = vrot.slane %v22311_v61, %v29572_v50  ;;  %v21844_v2 = vcombine.high %v21842_v6, %v21842_v6  ;;  %v21890_v31 = vunpack.i.h.s16 %v21842_v6  ;;  %v21892_v54 = vunpack.i.h.s16 %v21843_v1 }
 0x69b   : > { %28994 = vmatmul.mubr.msk.bf16.vlgmr.msra.gmra.mxu1 %vm2062_vm5, %v22040_v14  ;;  %v21906_v20 = vunpack.i.h.s16 %v21796_v55  ;;  %v33969_v19 = vpack.i.b16 %v21796_v55, %v21878_v57  ;;  %v33971_v22 = vpack.i.b16 %v21842_v6, %v21888_v28  ;;  %v22042_v62 = vcombine.low %v33941_v29, %v33950_v15 }
 0x69c   : > { %v22326_v59 = vcombine.low %v22318_v51, %v22325_v38  ;;  %29018 = vmatpush3.bf16.msra.mxu1 %v33560_v18  ;;  %v33976_v13 = vpack.i.b16 %v21843_v1, %v21890_v31  ;;  %v33978_v4 = vpack.i.b16 %v21844_v2, %v21892_v54  ;;  %v21883_v33 = vunpack.i.h.s16 %v33941_v29  ;;  %v29284_v18 = vld [vmem:[%s34691_s11 + $0x48] sm:$0xff]  }
 0x69d   : > { %v21935_v63 = vpack.i.b16 %v21881_v45, %v21906_v20  ;;  %v22043_v44 = vcombine.low %v33956_v56, %v33971_v22  ;;  %v22058_v41 = vrot.slane %v22042_v62, %v29572_v50  ;;  %29019 = vmatprep.subr.bf16.mxu1 %v29282_v24  ;;  %v21885_v27 = vunpack.i.h.s16 %v33950_v15 }
 0x69e   : > { %29010 = vmatmul.mubr.msk.bf16.vlgmr.msra.gmra.mxu0 %vm2062_vm5, %v22326_v59  ;;  %v22044_v48 = vcombine.low %v33976_v13, %v33978_v4  ;;  %v27988_v10 = vpack.i.b16 %v33935_v46, %v21796_v55  ;;  %v27989_v57 = vpack.i.b16 %v33941_v29, %v21881_v45  ;;  %v27990_v61 = vpack.i.b16 %v33950_v15, %v21883_v33  ;;  %v28000_v45 = vld.sshfl [vmem:[#allocation5] sm:$0x32 pattern:$0x75316420] }
 0x69f   : > { %29034 = vmatpush3.bf16.msra.mxu0 %v33566_v35  ;;  %v22041_v14 = vcombine.low %v33969_v19, %v21935_v63  ;;  %v22065_v51 = vrot.slane %v22043_v44, %v29572_v50  ;;  %v34001_v28 = vpack.i.b16 %v33956_v56, %v21885_v27  ;;  %v22330_v38 = vcombine.low %v21842_v6, %v21843_v1  ;;  %v29285_v35 = vld [vmem:[%s34691_s11 + $0x68] sm:$0xff]  }
 0x6a0   : > { %v22072_v31 = vrot.slane %v22044_v48, %v29572_v50  ;;  %v22327_v54 = vcombine.low %v33875_v58, %v27988_v10  ;;  %v22328_v20 = vcombine.low %v27989_v57, %v27990_v61  ;;  %29020 = vmatpush3.bf16.msra.mxu1 %v29282_v24  ;;  %29035 = vmatprep.subr.bf16.mxu0 %v29283_v17  ;;  %v21908_v55 = vunpack.i.h.s16 %v21844_v2  ;;  %v29286_v58 = vld [vmem:[%s34691_s11 + $0x40] sm:$0xff]   ;;  %v28001_v27 = vld.sshfl [vmem:[#allocation5 + $0x4] sm:$0x1 pattern:$0x75316420] }
 0x6a1   : > { %34874 = vst [vmem:[#allocation23_spill] sm:$0xff] %v34001_v28  ;;  %v22051_v62 = vrot.slane %v22041_v14, %v29572_v50  ;;  %v22329_v59 = vcombine.low %v34001_v28, %v33944_v3  ;;  %v22358_v6 = vrot.slane %v22330_v38, %v29572_v50  ;;  %29021 = vmatprep.subr.bf16.mxu1 %v29284_v18  ;;  %v21893_v1 = vunpack.i.l.s16 %v21844_v2  ;;  %v28002_v2 = vld.sshfl [vmem:[#allocation5 + $0x8] sm:$0x32 pattern:$0x75316420] }
 0x6a2   : > { %v22074_v24 = vcombine.low %v22065_v51, %v22072_v31  ;;  %v22337_v33 = vrot.slane %v22327_v54, %v29572_v50  ;;  %v34017_v63 = vrot.slane %v22328_v20, %v29572_v50  ;;  %v22096_v44 = vrot.slane %v21908_v55, %v29572_v50 }
 0x6a3   : > { %v22073_v48 = vcombine.low %v22051_v62, %v22058_v41  ;;  %v22351_v10 = vrot.slane %v22329_v59, %v29572_v50  ;;  %29036 = vmatpush3.bf16.msra.mxu0 %v29283_v17  ;;  %v22382_v57 = vrot.slane %v21893_v1, %v29572_v50  ;;  %v22525_v61 = vcombine.high %v28000_v45, %v28000_v45  ;;  %v28004_v17 = vld.sshfl [vmem:[#allocation5 + $0x10] sm:$0x32 pattern:$0x75316420] }
 0x6a4   : > { %v22088_v14 = vrot.slane %v22074_v24, %v29572_v50  ;;  %v22359_v51 = vcombine.low %v22337_v33, %v34017_v63  ;;  %v22103_v38 = vrot.slane %v22096_v44, %v29572_v50  ;;  %29022 = vmatpush3.bf16.msra.mxu1 %v29284_v18  ;;  %29037 = vmatprep.subr.bf16.mxu0 %v29285_v35  ;;  %v28006_v59 = vld.sshfl [vmem:[#allocation5 + $0x18] sm:$0x32 pattern:$0x75316420] }
 0x6a5   : > { %v22081_v54 = vrot.slane %v22073_v48, %v29572_v50  ;;  %v22360_v41 = vcombine.low %v22351_v10, %v22358_v6  ;;  %v22389_v20 = vrot.slane %v22382_v57, %v29572_v50  ;;  %v22532_v55 = vrot.slane %v28000_v45, %v29572_v50  ;;  %29023 = vmatprep.subr.bf16.mxu1 %v29286_v58  ;;  %v29287_v33 = vld [vmem:[%s34691_s11 + $0x60] sm:$0xff]  }
 0x6a6   : > { %v22367_v62 = vrot.slane %v22359_v51, %v29572_v50  ;;  %v22539_v1 = vrot.slane %v22525_v61, %v29572_v50  ;;  %v22555_v24 = vrot.slane %v28001_v27, %v29572_v50  ;;  %v22563_v18 = vcombine.high %v28002_v2, %v28002_v2  ;;  %v34046_v27 = vld [vmem:[%s34691_s11 + $0x98] sm:$0xff]  }
 0x6a7   : > { %v22089_v44 = vcombine.low %v22081_v54, %v22088_v14  ;;  %v22374_v6 = vrot.slane %v22360_v41, %v29572_v50  ;;  %v22540_v48 = vcombine.high %v22532_v55, %v22532_v55  ;;  %v22570_v10 = vrot.slane %v28002_v2, %v29572_v50  ;;  %29038 = vmatpush3.bf16.msra.mxu0 %v29285_v35  ;;  %v34057_v41 = vld [vmem:[%s34691_s11 + $0xb8] sm:$0xff]  }
 0x6a8   : > { %v22541_v45 = vcombine.high %v22539_v1, %v22539_v1  ;;  %v34038_v57 = vrot.slane %v22563_v18, %v29572_v50  ;;  %v22601_v51 = vcombine.high %v28004_v17, %v28004_v17  ;;  %v34041_v61 = vrot.slane %v28004_v17, %v29572_v50  ;;  %29024 = vmatpush3.bf16.msra.mxu1 %v29286_v58 }
 0x6a9   : > { %28997 = vmatprep.mubr.msk.bf16.mxu1 %vm2062_vm5, %v22089_v44  ;;  %v22375_v14 = vcombine.low %v22367_v62, %v22374_v6  ;;  %v34049_v54 = vcombine.high %v22570_v10, %v22570_v10  ;;  %v22639_v35 = vcombine.high %v28006_v59, %v28006_v59  ;;  %v34052_v2 = vrot.slane %v28006_v59, %v29572_v50 }
 0x6aa   : > { %28998 = vmatmul.mubr.msk.bf16.gmra.mxu1 %vm2062_vm5, %v22103_v38  ;;  %v34062_v58 = vcombine.high %v34038_v57, %v34038_v57  ;;  %v34065_v17 = vrot.slane %v22601_v51, %v29572_v50  ;;  %v22792_v55 = vunpack.i.h.s16 %v34038_v57  ;;  %v28022_v62 = vpack.i.b16 %v34038_v57, %v22555_v24  ;;  %29039 = vmatprep.subr.bf16.mxu0 %v29287_v33 }
 0x6ab   : > { %29013 = vmatprep.mubr.msk.bf16.mxu0 %vm2062_vm5, %v22375_v14  ;;  %v34071_v59 = vrot.slane %v22639_v35, %v29572_v50  ;;  %v34075_v38 = vcombine.high %v34052_v2, %v34052_v2  ;;  %v22794_v18 = vunpack.i.h.s16 %v34049_v54  ;;  %v22867_v44 = vcombine.low %v22539_v1, %v22540_v48  ;;  %29040 = vmatpush3.bf16.msra.mxu0 %v29287_v33 }
 0x6ac   : > { %29014 = vmatmul.mubr.msk.bf16.gmra.mxu0 %vm2062_vm5, %v22389_v20  ;;  %v22796_v6 = vunpack.i.h.s16 %v34062_v58  ;;  %v28023_v24 = vpack.i.b16 %v34049_v54, %v22792_v55  ;;  %v22868_v10 = vcombine.low %v22541_v45, %v28022_v62  ;;  %v28034_v51 = vcombine.high %v34041_v61, %v34065_v17  ;;  %29049 = vmatprep.subr.bf16.mxu1 %v34046_v27 }
 0x6ad   : > { %v22806_v14 = vunpack.i.h.s16 %v34071_v59  ;;  %v22808_v35 = vunpack.i.h.s16 %v34075_v38  ;;  %v28024_v7 = vpack.i.b16 %v34062_v58, %v22794_v18  ;;  %v28026_v1 = vpack.i.b16 %v34071_v59, %v33657_v30  ;;  %29065 = vmatprep.subr.bf16.mxu0 %v34057_v41 }
 0x6ae   : > { %v28025_v20 = vpack.i.b16 %v33654_v49, %v22796_v6  ;;  %v22877_v33 = vrot.slane %v22867_v44, %v29572_v50  ;;  %v22884_v48 = vrot.slane %v22868_v10, %v29572_v50  ;;  %v22926_v45 = vrot.slane %v28034_v51, %v29572_v50 }
 0x6af   : > { %v28027_v55 = vpack.i.b16 %v34075_v38, %v22806_v14  ;;  %v22869_v62 = vcombine.low %v28023_v24, %v28024_v7  ;;  %v28059_v16 = vpack.i.b16 %v33783_v8, %v33779_v39  ;;  %v28063_v18 = vpack.i.b16 %v33863_v26, %v33903_v9  ;;  %v28007_v24 = vld.sshfl [vmem:[#allocation5 + $0x1c] sm:$0x1 pattern:$0x75316420] }
 0x6b0   : > { %v22870_v31 = vcombine.low %v28025_v20, %v34065_v17  ;;  %v22899_v28 = vcombine.low %v22877_v33, %v22884_v48  ;;  %v23401_v6 = vcombine.low %v33763_v47, %v33769_v42  ;;  %v23403_v44 = vcombine.low %v33821_v40, %v33824_v60 }
 0x6b1   : > { %v22891_v10 = vrot.slane %v22869_v62, %v29572_v50  ;;  %v22917_v51 = vcombine.low %v28026_v1, %v28027_v55  ;;  %v23402_v7 = vcombine.low %v33774_v37, %v28059_v16  ;;  %v23404_v38 = vcombine.low %v33879_v12, %v33850_v36  ;;  %v28008_v16 = vld.sshfl [vmem:[#allocation5 + $0x20] sm:$0x32 pattern:$0x75316420] }
 0x6b2   : > { %v22898_v14 = vrot.slane %v22870_v31, %v29572_v50  ;;  %v22907_v20 = vrot.slane %v22899_v28, %v29572_v50  ;;  %v23411_v33 = vrot.slane %v23401_v6, %v29572_v50  ;;  %v23425_v47 = vrot.slane %v23403_v44, %v29572_v50 }
 0x6b3   : > { %v22933_v42 = vrot.slane %v22917_v51, %v29572_v50  ;;  %v23418_v40 = vrot.slane %v23402_v7, %v29572_v50  ;;  %v23432_v60 = vrot.slane %v23404_v38, %v29572_v50  ;;  %v23450_v37 = vcombine.low %v33855_v21, %v33894_v5  ;;  %v28009_v51 = vld.sshfl [vmem:[#allocation5 + $0x24] sm:$0x1 pattern:$0x75316420] }
 0x6b4   : > { %v22900_v36 = vcombine.low %v22891_v10, %v22898_v14  ;;  %v23451_v12 = vcombine.low %v28063_v18, %v33886_v52  ;;  %v22655_v28 = vcombine.high %v34071_v59, %v34071_v59  ;;  %v34121_v31 = vrot.slane %v28007_v24, %v29572_v50 }
 0x6b5   : > { %v34123_v1 = vcombine.low %v22926_v45, %v22933_v42  ;;  %v23433_v48 = vcombine.low %v23411_v33, %v23418_v40  ;;  %v23434_v55 = vcombine.low %v23425_v47, %v23432_v60  ;;  %v23460_v62 = vrot.slane %v23450_v37, %v29572_v50  ;;  %v28010_v33 = vld.sshfl [vmem:[#allocation5 + $0x28] sm:$0x32 pattern:$0x75316420] }
 0x6b6   : > { %v22914_v6 = vrot.slane %v22900_v36, %v29572_v50  ;;  %v23467_v21 = vrot.slane %v23451_v12, %v29572_v50  ;;  %v22677_v5 = vcombine.high %v28008_v16, %v28008_v16  ;;  %v22684_v44 = vrot.slane %v28008_v16, %v29572_v50  ;;  %v28011_v37 = vld.sshfl [vmem:[#allocation5 + $0x2c] sm:$0x1 pattern:$0x75316420] }
 0x6b7   : > { %v22956_v52 = vrot.slane %v34123_v1, %v29572_v50  ;;  %v23441_v18 = vrot.slane %v23433_v48, %v29572_v50  ;;  %v23448_v10 = vrot.slane %v23434_v55, %v29572_v50  ;;  %v22810_v45 = vunpack.i.h.s16 %v22655_v28  ;;  %v28012_v12 = vld.sshfl [vmem:[#allocation5 + $0x30] sm:$0x32 pattern:$0x75316420] }
 0x6b8   : > { %v22915_v7 = vcombine.low %v22907_v20, %v22914_v6  ;;  %v23482_v38 = vcombine.low %v23460_v62, %v23467_v21  ;;  %v34134_v24 = vrot.slane %v22677_v5, %v29572_v50  ;;  %v34136_v14 = vcombine.high %v22684_v44, %v22684_v44  ;;  %v28050_v48 = vld.sshfl [vmem:[#allocation5 + $0x38] sm:$0x33 pattern:$0x75316420] }
 0x6b9   : > { %v23449_v47 = vcombine.low %v23441_v18, %v23448_v10  ;;  %v28028_v42 = vpack.i.b16 %v22655_v28, %v22808_v35  ;;  %v28029_v40 = vpack.i.b16 %v34121_v31, %v22810_v45  ;;  %v23452_v60 = vcombine.low %v33898_v43, %v33969_v19 }
 0x6ba   : > { %29025 = vmatprep.mubr.msk.bf16.mxu1 %vm2062_vm5, %v22915_v7  ;;  %v22919_v20 = vcombine.low %v34134_v24, %v34136_v14  ;;  %v23453_v16 = vcombine.low %v33935_v46, %v33941_v29  ;;  %v23490_v36 = vrot.slane %v23482_v38, %v29572_v50  ;;  %v34149_v35 = vcombine.high %v34134_v24, %v34134_v24 }
 0x6bb   : > { %29041 = vmatprep.mubr.msk.bf16.mxu0 %vm2062_vm5, %v23449_v47  ;;  %v22918_v28 = vcombine.low %v28028_v42, %v28029_v40  ;;  %v23474_v43 = vrot.slane %v23452_v60, %v29572_v50  ;;  %v34154_v19 = vrot.slane %v28009_v51, %v29572_v50  ;;  %v22715_v1 = vcombine.high %v28010_v33, %v28010_v33 }
 0x6bc   : > { %v22947_v55 = vrot.slane %v22919_v20, %v29572_v50  ;;  %v23481_v46 = vrot.slane %v23453_v16, %v29572_v50  ;;  %v22722_v29 = vrot.slane %v28010_v33, %v29572_v50  ;;  %v34160_v62 = vrot.slane %v28011_v37, %v29572_v50 }
 0x6bd   : > { %v22940_v6 = vrot.slane %v22918_v28, %v29572_v50  ;;  %v34164_v21 = vrot.slane %v22715_v1, %v29572_v50  ;;  %v22753_v5 = vcombine.high %v28012_v12, %v28012_v12  ;;  %v34167_v44 = vrot.slane %v28012_v12, %v29572_v50 }
 0x6be   : > { %v23483_v18 = vcombine.low %v23474_v43, %v23481_v46  ;;  %v34169_v10 = vcombine.high %v22722_v29, %v22722_v29  ;;  %v23301_v45 = vcombine.high %v28050_v48, %v28050_v48  ;;  %v34172_v51 = vrot.slane %v28050_v48, %v29572_v50  ;;  %v29291_v46 = vld [vmem:[%s34691_s11 + $0xb0] sm:$0xff]  }
 0x6bf   : > { %v22949_v7 = vcombine.low %v22940_v6, %v22947_v55  ;;  %v34176_v38 = vcombine.high %v34164_v21, %v34164_v21  ;;  %v34179_v33 = vrot.slane %v22753_v5, %v29572_v50  ;;  %v22820_v47 = vunpack.i.h.s16 %v34164_v21 }
 0x6c0   : > { %v23497_v42 = vrot.slane %v23483_v18, %v29572_v50  ;;  %v22822_v40 = vunpack.i.h.s16 %v34169_v10  ;;  %v28030_v60 = vpack.i.b16 %v34164_v21, %v34154_v19  ;;  %v34187_v37 = vrot.slane %v23301_v45, %v29572_v50  ;;  %v29290_v18 = vld [vmem:[%s34691_s11 + $0x90] sm:$0xff]  }
 0x6c1   : > { %v22963_v20 = vrot.slane %v22949_v7, %v29572_v50  ;;  %v22824_v16 = vunpack.i.h.s16 %v34176_v38  ;;  %v28031_v12 = vpack.i.b16 %v34169_v10, %v22820_v47  ;;  %v28035_v28 = vcombine.high %v34167_v44, %v34179_v33 }
 0x6c2   : > { %v23498_v43 = vcombine.low %v23490_v36, %v23497_v42  ;;  %v28032_v1 = vpack.i.b16 %v34176_v38, %v22822_v40  ;;  %v22965_v48 = vcombine.low %v34149_v35, %v28030_v60  ;;  %v34198_v55 = vcombine.high %v34172_v51, %v34172_v51  ;;  %v28013_v42 = vld.sshfl [vmem:[#allocation5 + $0x34] sm:$0x1 pattern:$0x75316420] }
 0x6c3   : > { %v22964_v29 = vcombine.low %v22956_v52, %v22963_v20  ;;  %v28033_v6 = vpack.i.b16 %v34160_v62, %v22824_v16  ;;  %v22996_v5 = vrot.slane %v28035_v28, %v29572_v50  ;;  %v28067_v36 = vpack.i.b16 %v33944_v3, %v33956_v56 }
 0x6c4   : > { %29042 = vmatmul.mubr.msk.bf16.vlgmr.msra.gmra.mxu0 %vm2062_vm5, %v23498_v43  ;;  %v22966_v45 = vcombine.low %v28031_v12, %v28032_v1  ;;  %v22975_v7 = vrot.slane %v22965_v48, %v29572_v50  ;;  %v23500_v47 = vcombine.low %v33971_v22, %v33976_v13  ;;  %v23501_v52 = vcombine.low %v33978_v4, %v34172_v51 }
 0x6c5   : > { %29026 = vmatmul.mubr.msk.bf16.vlgmr.msra.gmra.mxu1 %vm2062_vm5, %v22964_v29  ;;  %v22967_v3 = vcombine.low %v28033_v6, %v34179_v33  ;;  %v23499_v40 = vcombine.low %v33950_v15, %v28067_v36  ;;  %v23502_v60 = vcombine.low %v34187_v37, %v34198_v55  ;;  %29066 = vmatpush3.bf16.msra.mxu0 %v34057_v41  ;;  %v23871_v20 = vunpack.i.h.s16 %v33903_v9  ;;  %v29293_v15 = vld [vmem:[%s34691_s11 + $0xa8] sm:$0xff]  }
 0x6c6   : > { %29050 = vmatpush3.bf16.msra.mxu1 %v34046_v27  ;;  %v22982_v22 = vrot.slane %v22966_v45, %v29572_v50  ;;  %v23516_v13 = vrot.slane %v23500_v47, %v29572_v50  ;;  %v23523_v4 = vrot.slane %v23501_v52, %v29572_v50  ;;  %29067 = vmatprep.subr.bf16.mxu0 %v29291_v46  ;;  %v24504_v16 = vunpack.i.h.s16 %v34065_v17  ;;  %v29292_v27 = vld [vmem:[%s34691_s11 + $0x88] sm:$0xff]  }
 0x6c7   : > { %v22989_v12 = vrot.slane %v22967_v3, %v29572_v50  ;;  %v23509_v41 = vrot.slane %v23499_v40, %v29572_v50  ;;  %v23530_v9 = vrot.slane %v23502_v60, %v29572_v50  ;;  %29051 = vmatprep.subr.bf16.mxu1 %v29290_v18  ;;  %v34238_v28 = vrot.slane %v28013_v42, %v29572_v50 }
 0x6c8   : > { %v22997_v43 = vcombine.low %v22975_v7, %v22982_v22  ;;  %v34242_v1 = vcombine.high %v34187_v37, %v34187_v37  ;;  %v34875_v48 = vunpack.i.h.s16 %v33779_v39  ;;  %v34876_v29 = vunpack.i.h.s16 %v33783_v8 }
 0x6c9   : > { %v34877_v36 = vunpack.i.h.s16 %v33863_v26  ;;  %v22998_v47 = vcombine.low %v22989_v12, %v22996_v5  ;;  %v23531_v52 = vcombine.low %v23509_v41, %v23516_v13  ;;  %v23532_v3 = vcombine.low %v23523_v4, %v23530_v9  ;;  %29068 = vmatpush3.bf16.msra.mxu0 %v29291_v46  ;;  %v29295_v5 = vld [vmem:[%s34691_s11 + $0xa0] sm:$0xff]  }
 0x6ca   : > { %v23912_v6 = vpack.i.b16 %v34876_v29, %v34875_v48  ;;  %v22832_v42 = vunpack.i.l.s16 %v34238_v28  ;;  %v23005_v7 = vrot.slane %v22997_v43, %v29572_v50  ;;  %29052 = vmatpush3.bf16.msra.mxu1 %v29290_v18  ;;  %v23366_v40 = vunpack.i.l.s16 %v34242_v1  ;;  %29069 = vmatprep.subr.bf16.mxu0 %v29293_v15  ;;  %v29294_v9 = vld [vmem:[%s34691_s11 + $0x80] sm:$0xff]  }
 0x6cb   : > { %v34250_v45 = vpack.i.b16 %v34877_v36, %v23871_v20  ;;  %v23937_v8 = vcombine.low %v33801_v25, %v33916_v34  ;;  %v23012_v60 = vrot.slane %v22998_v47, %v29572_v50  ;;  %v23539_v46 = vrot.slane %v23531_v52, %v29572_v50  ;;  %29053 = vmatprep.subr.bf16.mxu1 %v29292_v27 }
 0x6cc   : > { %v23935_v39 = vcombine.low %v33840_v0, %v23912_v6  ;;  %v23546_v20 = vrot.slane %v23532_v3, %v29572_v50  ;;  %v23020_v18 = vrot.slane %v22832_v42, %v29572_v50  ;;  %v23554_v22 = vrot.slane %v23366_v40, %v29572_v50  ;;  %v34302_v40 = vld [vmem:[%s34691_s11 + $0xf8] sm:$0xff]  }
 0x6cd   : > { %v23965_v13 = vrot.slane %v23937_v8, %v29572_v50  ;;  %v24290_v25 = vcombine.high %v34041_v61, %v34041_v61  ;;  %v23013_v34 = vcombine.low %v23005_v7, %v23012_v60  ;;  %29070 = vmatpush3.bf16.msra.mxu0 %v29293_v15  ;;  %v24291_v41 = vcombine.high %v34065_v17, %v34065_v17 }
 0x6ce   : > { %v23951_v0 = vrot.slane %v23935_v39, %v29572_v50  ;;  %v23547_v4 = vcombine.low %v23539_v46, %v23546_v20  ;;  %v23027_v12 = vrot.slane %v23020_v18, %v29572_v50  ;;  %v23561_v43 = vrot.slane %v23554_v22, %v29572_v50  ;;  %29054 = vmatpush3.bf16.msra.mxu1 %v29292_v27 }
 0x6cf   : > { %v23967_v29 = vcombine.low %v33929_v11, %v23965_v13  ;;  %v24506_v61 = vunpack.i.h.s16 %v24290_v25  ;;  %29071 = vmatprep.subr.bf16.mxu0 %v29295_v5  ;;  %29029 = vmatprep.mubr.msk.bf16.mxu1 %vm2062_vm5, %v23013_v34  ;;  %v24508_v15 = vunpack.i.h.s16 %v24291_v41  ;;  %v24518_v6 = vunpack.i.h.s16 %v34134_v24 }
 0x6d0   : > { %v23966_v48 = vcombine.low %v33858_v32, %v23951_v0  ;;  %29045 = vmatprep.mubr.msk.bf16.mxu0 %vm2062_vm5, %v23547_v4  ;;  %v24520_v36 = vunpack.i.h.s16 %v34136_v14  ;;  %v28137_v47 = vpack.i.b16 %v34065_v17, %v33654_v49  ;;  %v34288_v32 = vld [vmem:[%s34691_s11 + $0xd8] sm:$0xff]   ;;  %29030 = vmatmul.mubr.msk.bf16.gmra.mxu1 %vm2062_vm5, %v23027_v12  ;;  %v28138_v52 = vpack.i.b16 %v24290_v25, %v24504_v16 }
 0x6d1   : > { %29046 = vmatmul.mubr.msk.bf16.gmra.mxu0 %vm2062_vm5, %v23561_v43  ;;  %v23981_v27 = vrot.slane %v23967_v29, %v29572_v50  ;;  %v24522_v3 = vunpack.i.h.s16 %v34149_v35  ;;  %v28139_v42 = vpack.i.b16 %v24291_v41, %v24506_v61  ;;  %v28140_v7 = vpack.i.b16 %v33657_v30, %v24508_v15  ;;  %29055 = vmatprep.subr.bf16.mxu1 %v29294_v9 }
 0x6d2   : > { %v23974_v11 = vrot.slane %v23966_v48, %v29572_v50  ;;  %v28141_v49 = vpack.i.b16 %v34134_v24, %v34121_v31  ;;  %v28142_v17 = vpack.i.b16 %v34136_v14, %v24518_v6  ;;  %v24579_v16 = vcombine.low %v34038_v57, %v34049_v54  ;;  %29056 = vmatpush3.bf16.msra.mxu1 %v29294_v9 }
 0x6d3   : > { %v24580_v8 = vcombine.low %v34062_v58, %v28137_v47  ;;  %v28149_v30 = vcombine.high %v34052_v2, %v34071_v59  ;;  %v24581_v60 = vcombine.low %v28138_v52, %v28139_v42  ;;  %v24582_v31 = vcombine.low %v28140_v7, %v34071_v59  ;;  %29072 = vmatpush3.bf16.msra.mxu0 %v29295_v5  ;;  %v28084_v58 = vld.sshfl [vmem:[#allocation5 + $0x30] sm:$0x33 pattern:$0x75316420] }
 0x6d4   : > { %v23982_v39 = vcombine.low %v23974_v11, %v23981_v27  ;;  %v24629_v24 = vcombine.low %v28141_v49, %v28142_v17  ;;  %29081 = vmatprep.subr.bf16.mxu1 %v34288_v32  ;;  %v23893_v14 = vunpack.i.h.s16 %v34172_v51  ;;  %v24589_v46 = vrot.slane %v24579_v16, %v29572_v50  ;;  %29097 = vmatprep.subr.bf16.mxu0 %v34302_v40  ;;  %v34878_v17 = vld [vmem:[#allocation23_spill] sm:$0xff] }
 0x6d5   : > { %v24596_v57 = vrot.slane %v24580_v8, %v29572_v50  ;;  %v24638_v54 = vrot.slane %v28149_v30, %v29572_v50  ;;  %v24603_v2 = vrot.slane %v24581_v60, %v29572_v50  ;;  %v24610_v20 = vrot.slane %v24582_v31, %v29572_v50  ;;  %v28127_v8 = vld.sshfl [vmem:[#allocation5 + $0x38] sm:$0x32 pattern:$0x75316420] }
 0x6d6   : > { %29057 = vmatprep.mubr.msk.bf16.mxu1 %vm2062_vm5, %v23982_v39  ;;  %v24645_v59 = vrot.slane %v24629_v24, %v29572_v50  ;;  %v28143_v5 = vpack.i.b16 %v34149_v35, %v24520_v36  ;;  %v28144_v22 = vpack.i.b16 %v34154_v19, %v24522_v3  ;;  %v24631_v0 = vcombine.low %v34164_v21, %v34169_v10  ;;  %v29299_v24 = vld [vmem:[%s34691_s11 + $0xf0] sm:$0xff]  }
 0x6d7   : > { %v24611_v18 = vcombine.low %v24589_v46, %v24596_v57  ;;  %v24612_v13 = vcombine.low %v24603_v2, %v24610_v20  ;;  %v23810_v34 = vcombine.high %v28084_v58, %v28084_v58  ;;  %v23984_v12 = vcombine.low %v34250_v45, %v33869_v53 }
 0x6d8   : > { %v24660_v25 = vcombine.low %v24638_v54, %v24645_v59  ;;  %v28106_v41 = vcombine.high %v33863_v26, %v33869_v53  ;;  %v24630_v35 = vcombine.low %v28143_v5, %v28144_v22  ;;  %v24659_v19 = vrot.slane %v24631_v0, %v29572_v50  ;;  %v28128_v0 = vld.sshfl [vmem:[#allocation5 + $0x3c] sm:$0x1 pattern:$0x75316420] }
 0x6d9   : > { %v24619_v4 = vrot.slane %v24611_v18, %v29572_v50  ;;  %v24626_v9 = vrot.slane %v24612_v13, %v29572_v50  ;;  %v34333_v21 = vrot.slane %v28084_v58, %v29572_v50  ;;  %v24000_v10 = vrot.slane %v23984_v12, %v29572_v50 }
 0x6da   : > { %v24668_v43 = vrot.slane %v24660_v25, %v29572_v50  ;;  %v24007_v48 = vrot.slane %v28106_v41, %v29572_v50  ;;  %v24652_v29 = vrot.slane %v24630_v35, %v29572_v50  ;;  %v34339_v45 = vrot.slane %v23810_v34, %v29572_v50 }
 0x6db   : > { %v24627_v26 = vcombine.low %v24619_v4, %v24626_v9  ;;  %v34343_v53 = vcombine.high %v34333_v21, %v34333_v21  ;;  %v23885_v61 = vunpack.i.h.s16 %v33956_v56  ;;  %v23886_v15 = vunpack.i.h.s16 %v34333_v21 }
 0x6dc   : > { %v24015_v6 = vcombine.low %v33938_v23, %v24000_v10  ;;  %v24016_v36 = vcombine.low %v24007_v48, %v34017_v63  ;;  %v24661_v47 = vcombine.low %v24652_v29, %v24659_v19  ;;  %v34351_v11 = vcombine.high %v34339_v45, %v34339_v45 }
 0x6dd   : > { %29073 = vmatprep.mubr.msk.bf16.mxu0 %vm2062_vm5, %v24627_v26  ;;  %v23895_v27 = vunpack.i.h.s16 %v34187_v37  ;;  %v23897_v52 = vunpack.i.h.s16 %v34198_v55  ;;  %v23926_v56 = vpack.i.b16 %v23886_v15, %v23885_v61  ;;  %v34362_v42 = vpack.i.b16 %v34187_v37, %v23893_v14  ;;  %v28160_v26 = vld.sshfl [vmem:[#allocation5 + $0x18] sm:$0x33 pattern:$0x75316420] }
 0x6de   : > { %v24023_v3 = vrot.slane %v24015_v6, %v29572_v50  ;;  %v24030_v23 = vrot.slane %v24016_v36, %v29572_v50  ;;  %v24675_v63 = vrot.slane %v24661_v47, %v29572_v50  ;;  %v24033_v16 = vcombine.low %v34339_v45, %v34343_v53 }
 0x6df   : > { %v34365_v7 = vpack.i.b16 %v34198_v55, %v23895_v27  ;;  %v34368_v49 = vpack.i.b16 %v34242_v1, %v23897_v52  ;;  %v24032_v39 = vcombine.low %v34878_v17, %v23926_v56  ;;  %v24034_v31 = vcombine.low %v34351_v11, %v34362_v42  ;;  %v29298_v55 = vld [vmem:[%s34691_s11 + $0xd0] sm:$0xff]  }
 0x6e0   : > { %v24031_v30 = vcombine.low %v24023_v3, %v24030_v23  ;;  %v24676_v60 = vcombine.low %v24668_v43, %v24675_v63  ;;  %v24442_v37 = vcombine.high %v34167_v44, %v34167_v44  ;;  %v24049_v57 = vrot.slane %v24033_v16, %v29572_v50  ;;  %v28161_v23 = vld.sshfl [vmem:[#allocation5 + $0x20] sm:$0x33 pattern:$0x75316420]  ;;  %v29302_v16 = vld [vmem:[%s34691_s11 + $0xc0] sm:$0xff]  }
 0x6e1   : > { %v24035_v14 = vcombine.low %v34365_v7, %v34368_v49  ;;  %v24042_v46 = vrot.slane %v24032_v39, %v29572_v50  ;;  %v24443_v54 = vcombine.high %v34179_v33, %v34179_v33  ;;  %v24056_v44 = vrot.slane %v24034_v31, %v29572_v50 }
 0x6e2   : > { %29058 = vmatmul.mubr.msk.bf16.vlgmr.msra.gmra.mxu1 %vm2062_vm5, %v24031_v30  ;;  %29074 = vmatmul.mubr.msk.bf16.vlgmr.msra.gmra.mxu0 %vm2062_vm5, %v24676_v60  ;;  %v24465_v58 = vcombine.high %v28127_v8, %v28127_v8  ;;  %v34393_v2 = vrot.slane %v28127_v8, %v29572_v50  ;;  %v24532_v20 = vunpack.i.h.s16 %v34179_v33  ;;  %v24534_v18 = vunpack.i.h.s16 %v24442_v37  ;;  %v28162_v60 = vld.sshfl [vmem:[#allocation5 + $0x28] sm:$0x33 pattern:$0x75316420] }
 0x6e3   : > { %29082 = vmatpush3.bf16.msra.mxu1 %v34288_v32  ;;  %v24063_v59 = vrot.slane %v24035_v14, %v29572_v50  ;;  %v24064_v5 = vcombine.low %v24042_v46, %v24049_v57  ;;  %v24536_v22 = vunpack.i.h.s16 %v24443_v54  ;;  %29098 = vmatpush3.bf16.msra.mxu0 %v34302_v40  ;;  %v28145_v25 = vpack.i.b16 %v34179_v33, %v34160_v62  ;;  %v29300_v32 = vld [vmem:[%s34691_s11 + $0xc8] sm:$0xff]   ;;  %v34462_v57 = vld [vmem:[%s34691_s11 + $0x118] sm:$0xff]  }
 0x6e4   : > { %v34400_v13 = vrot.slane %v24465_v58, %v29572_v50  ;;  %v28146_v34 = vpack.i.b16 %v24442_v37, %v24532_v20  ;;  %29083 = vmatprep.subr.bf16.mxu1 %v29298_v55  ;;  %29099 = vmatprep.subr.bf16.mxu0 %v29299_v24  ;;  %v23899_v4 = vunpack.i.h.s16 %v34242_v1  ;;  %v29301_v40 = vld [vmem:[%s34691_s11 + $0xe8] sm:$0xff]   ;;  %v28147_v35 = vpack.i.b16 %v24443_v54, %v24534_v18  ;;  %v28159_v1 = vld.sshfl [vmem:[#allocation5 + $0x10] sm:$0x33 pattern:$0x75316420]  ;;  %v29303_v37 = vld [vmem:[%s34691_s11 + $0xe0] sm:$0xff]  }
 0x6e5   : > { %v24065_v12 = vcombine.low %v24056_v44, %v24063_v59  ;;  %v24072_v41 = vrot.slane %v24064_v5, %v29572_v50  ;;  %v28148_v9 = vpack.i.b16 %v34238_v28, %v24536_v22  ;;  %v24677_v62 = vcombine.low %v34176_v38, %v28145_v25 }
 0x6e6   : > { %v28150_v33 = vcombine.high %v34393_v2, %v34400_v13  ;;  %v24087_v43 = vrot.slane %v23899_v4, %v29572_v50  ;;  %v34418_v19 = vrot.slane %v28128_v0, %v29572_v50  ;;  %v24678_v48 = vcombine.low %v28146_v34, %v28147_v35 }
 0x6e7   : > { %v24079_v10 = vrot.slane %v24065_v12, %v29572_v50  ;;  %v24679_v29 = vcombine.low %v28148_v9, %v34400_v13  ;;  %29084 = vmatpush3.bf16.msra.mxu1 %v29298_v55  ;;  %29100 = vmatpush3.bf16.msra.mxu0 %v29299_v24  ;;  %v25593_v28 = vunpack.i.h.s16 %v34339_v45  ;;  %v24687_v38 = vrot.slane %v24677_v62, %v29572_v50 }
 0x6e8   : > { %v24708_v61 = vrot.slane %v28150_v33, %v29572_v50  ;;  %29085 = vmatprep.subr.bf16.mxu1 %v29300_v32  ;;  %v24094_v6 = vrot.slane %v24087_v43, %v29572_v50  ;;  %v24544_v36 = vunpack.i.l.s16 %v34418_v19  ;;  %29101 = vmatprep.subr.bf16.mxu0 %v29301_v40  ;;  %v24694_v27 = vrot.slane %v24678_v48, %v29572_v50 }
 0x6e9   : > { %v24080_v47 = vcombine.low %v24072_v41, %v24079_v10  ;;  %v24701_v52 = vrot.slane %v24679_v29, %v29572_v50  ;;  %v24869_v56 = vcombine.high %v28159_v1, %v28159_v1  ;;  %v34431_v63 = vrot.slane %v28159_v1, %v29572_v50 }
 0x6ea   : > { %v24732_v3 = vrot.slane %v24544_v36, %v29572_v50  ;;  %v24893_v17 = vcombine.high %v28160_v26, %v28160_v26  ;;  %v34434_v39 = vrot.slane %v28160_v26, %v29572_v50  ;;  %v24709_v8 = vcombine.low %v24687_v38, %v24694_v27 }
 0x6eb   : > { %29061 = vmatprep.mubr.msk.bf16.mxu1 %vm2062_vm5, %v24080_v47  ;;  %v24710_v30 = vcombine.low %v24701_v52, %v24708_v61  ;;  %29086 = vmatpush3.bf16.msra.mxu1 %v29300_v32  ;;  %v34441_v31 = vrot.slane %v24869_v56, %v29572_v50  ;;  %v34450_v24 = vcombine.high %v34431_v63, %v34431_v63  ;;  %v25563_v61 = vunpack.i.h.s16 %v34431_v63 }
 0x6ec   : > { %29062 = vmatmul.mubr.msk.bf16.gmra.mxu1 %vm2062_vm5, %v24094_v6  ;;  %v24739_v55 = vrot.slane %v24732_v3, %v29572_v50  ;;  %v34453_v14 = vrot.slane %v24893_v17, %v29572_v50  ;;  %v34457_v46 = vcombine.high %v34434_v39, %v34434_v39  ;;  %v24717_v54 = vrot.slane %v24709_v8, %v29572_v50 }
 0x6ed   : > { %v24724_v44 = vrot.slane %v24710_v30, %v29572_v50  ;;  %v24885_v58 = vcombine.high %v34441_v31, %v34441_v31  ;;  %v24917_v20 = vcombine.high %v28161_v23, %v28161_v23  ;;  %29102 = vmatpush3.bf16.msra.mxu0 %v29301_v40  ;;  %v24924_v5 = vrot.slane %v28161_v23, %v29572_v50 }
 0x6ee   : > { %v34470_v59 = vcombine.high %v34453_v14, %v34453_v14  ;;  %v24941_v18 = vcombine.high %v28162_v60, %v28162_v60  ;;  %v34474_v22 = vrot.slane %v28162_v60, %v29572_v50  ;;  %29087 = vmatprep.subr.bf16.mxu1 %v29302_v16  ;;  %v25038_v34 = vunpack.i.h.s16 %v34434_v39  ;;  %29103 = vmatprep.subr.bf16.mxu0 %v29303_v37 }
 0x6ef   : > { %v24725_v0 = vcombine.low %v24717_v54, %v24724_v44  ;;  %v24931_v25 = vrot.slane %v24917_v20, %v29572_v50  ;;  %v25040_v32 = vunpack.i.h.s16 %v34453_v14  ;;  %29088 = vmatpush3.bf16.msra.mxu1 %v29302_v16  ;;  %v24932_v4 = vcombine.high %v24924_v5, %v24924_v5 }
 0x6f0   : > { %v34480_v40 = vrot.slane %v24941_v18, %v29572_v50  ;;  %v34484_v12 = vcombine.high %v34474_v22, %v34474_v22  ;;  %v25042_v41 = vunpack.i.h.s16 %v34457_v46  ;;  %29113 = vmatprep.subr.bf16.mxu1 %v34462_v57  ;;  %v25052_v9 = vunpack.i.h.s16 %v34474_v22 }
 0x6f1   : > { %29077 = vmatprep.mubr.msk.bf16.mxu0 %vm2062_vm5, %v24725_v0  ;;  %v24933_v35 = vcombine.high %v24931_v25, %v24931_v25  ;;  %v28174_v62 = vpack.i.b16 %v34434_v39, %v24885_v58  ;;  %v28175_v33 = vpack.i.b16 %v34453_v14, %v25038_v34  ;;  %29104 = vmatpush3.bf16.msra.mxu0 %v29303_v37  ;;  %v25565_v3 = vunpack.i.h.s16 %v34441_v31 }
 0x6f2   : > { %29078 = vmatmul.mubr.msk.bf16.gmra.mxu0 %vm2062_vm5, %v24739_v55  ;;  %v28176_v43 = vpack.i.b16 %v34457_v46, %v25040_v32  ;;  %v28177_v1 = vpack.i.b16 %v34470_v59, %v25042_v41  ;;  %v25113_v10 = vcombine.low %v34431_v63, %v34441_v31  ;;  %v25162_v48 = vcombine.low %v24931_v25, %v24932_v4 }
 0x6f3   : > { %v28178_v29 = vpack.i.b16 %v34474_v22, %v24933_v35  ;;  %v28179_v26 = vpack.i.b16 %v34480_v40, %v25052_v9  ;;  %v25114_v38 = vcombine.low %v34450_v24, %v28174_v62  ;;  %v25567_v23 = vunpack.i.h.s16 %v34450_v24 }
 0x6f4   : > { %v25115_v6 = vcombine.low %v28175_v33, %v28176_v43  ;;  %v25116_v36 = vcombine.low %v28177_v1, %v24924_v5  ;;  %v25123_v47 = vrot.slane %v25113_v10, %v29572_v50  ;;  %v25172_v27 = vrot.slane %v25162_v48, %v29572_v50 }
 0x6f5   : > { %v25130_v52 = vrot.slane %v25114_v38, %v29572_v50  ;;  %v25163_v56 = vcombine.low %v28178_v29, %v28179_v26  ;;  %v25569_v16 = vunpack.i.h.s16 %v24885_v58  ;;  %v25577_v8 = vunpack.i.h.s16 %v24924_v5 }
 0x6f6   : > { %v25137_v17 = vrot.slane %v25115_v6, %v29572_v50  ;;  %v25144_v39 = vrot.slane %v25116_v36, %v29572_v50  ;;  %v25579_v60 = vunpack.i.h.s16 %v24931_v25  ;;  %v25581_v37 = vunpack.i.h.s16 %v24932_v4 }
 0x6f7   : > { %v25145_v63 = vcombine.low %v25123_v47, %v25130_v52  ;;  %v25179_v30 = vrot.slane %v25163_v56, %v29572_v50  ;;  %v25583_v54 = vunpack.i.h.s16 %v24933_v35  ;;  %v28209_v44 = vpack.i.b16 %v34441_v31, %v25563_v61 }
 0x6f8   : > { %v25146_v55 = vcombine.low %v25137_v17, %v25144_v39  ;;  %v28210_v20 = vpack.i.b16 %v34450_v24, %v25565_v3  ;;  %v28211_v32 = vpack.i.b16 %v24885_v58, %v25567_v23  ;;  %v25624_v41 = vpack.i.b16 %v25038_v34, %v25569_v16 }
 0x6f9   : > { %v25153_v18 = vrot.slane %v25145_v63, %v29572_v50  ;;  %v34512_v0 = vcombine.low %v25172_v27, %v25179_v30  ;;  %v28212_v5 = vpack.i.b16 %v24931_v25, %v25577_v8  ;;  %v28213_v33 = vpack.i.b16 %v24932_v4, %v25579_v60 }
 0x6fa   : > { %v25160_v62 = vrot.slane %v25146_v55, %v29572_v50  ;;  %v28214_v43 = vpack.i.b16 %v24933_v35, %v25581_v37  ;;  %v25631_v1 = vpack.i.b16 %v25052_v9, %v25583_v54  ;;  %v25646_v10 = vcombine.low %v28209_v44, %v28210_v20  ;;  %v28165_v9 = vld.sshfl [vmem:[#allocation5 + $0x40] sm:$0x33 pattern:$0x75316420] }
 0x6fb   : > { %v25647_v48 = vcombine.low %v28211_v32, %v25624_v41  ;;  %v25648_v29 = vcombine.low %v34453_v14, %v34457_v46  ;;  %v25649_v24 = vcombine.low %v34470_v59, %v28212_v5  ;;  %v24957_v38 = vcombine.high %v34480_v40, %v34480_v40 }
 0x6fc   : > { %v25161_v31 = vcombine.low %v25153_v18, %v25160_v62  ;;  %v25695_v26 = vcombine.low %v28213_v33, %v28214_v43  ;;  %v25656_v58 = vrot.slane %v25646_v10, %v29572_v50  ;;  %v25054_v4 = vunpack.i.h.s16 %v34480_v40 }
 0x6fd   : > { %v25663_v34 = vrot.slane %v25647_v48, %v29572_v50  ;;  %v25670_v25 = vrot.slane %v25648_v29, %v29572_v50  ;;  %v25677_v35 = vrot.slane %v25649_v24, %v29572_v50  ;;  %v25056_v46 = vunpack.i.h.s16 %v34484_v12 }
 0x6fe   : > { %29089 = vmatprep.mubr.msk.bf16.mxu1 %vm2062_vm5, %v25161_v31  ;;  %v25705_v14 = vrot.slane %v25695_v26, %v29572_v50  ;;  %v25165_v59 = vcombine.low %v34333_v21, %v34339_v45  ;;  %v28180_v6 = vpack.i.b16 %v34484_v12, %v25054_v4  ;;  %v25202_v36 = vrot.slane %v34512_v0, %v29572_v50 }
 0x6ff   : > { %v25678_v61 = vcombine.low %v25656_v58, %v25663_v34  ;;  %v28215_v47 = vpack.i.b16 %v34339_v45, %v23886_v15  ;;  %v25679_v27 = vcombine.low %v25670_v25, %v25677_v35  ;;  %v28181_v52 = vpack.i.b16 %v24957_v38, %v25056_v46  ;;  %v29305_v38 = vld [vmem:[%s34691_s11 + $0x110] sm:$0xff]  }
 0x700   : > { %v25193_v56 = vrot.slane %v25165_v59, %v29572_v50  ;;  %v28216_v3 = vpack.i.b16 %v34343_v53, %v25593_v28  ;;  %v25696_v17 = vcombine.low %v25631_v1, %v34480_v40  ;;  %v28221_v12 = vcombine.high %v34474_v22, %v34480_v40  ;;  %v28199_v22 = vld.sshfl [vmem:[#allocation5 + $0x38] sm:$0x33 pattern:$0x75316420] }
 0x701   : > { %v25686_v23 = vrot.slane %v25678_v61, %v29572_v50  ;;  %v25013_v39 = vcombine.high %v28165_v9, %v28165_v9  ;;  %v25693_v21 = vrot.slane %v25679_v27, %v29572_v50  ;;  %v25164_v16 = vcombine.low %v28180_v6, %v28181_v52  ;;  %v28230_v27 = vld.sshfl [vmem:[#allocation5 + $0x10] sm:$0x32 pattern:$0x75316420] }
 0x702   : > { %v25698_v15 = vcombine.low %v28215_v47, %v28216_v3  ;;  %v25020_v8 = vrot.slane %v28165_v9, %v29572_v50  ;;  %v25712_v63 = vrot.slane %v25696_v17, %v29572_v50  ;;  %v25719_v45 = vrot.slane %v28221_v12, %v29572_v50  ;;  %v29306_v47 = vld [vmem:[%s34691_s11 + $0x108] sm:$0xff]   ;;  %v28231_v12 = vld.sshfl [vmem:[#allocation5 + $0x14] sm:$0x1 pattern:$0x75316420] }
 0x703   : > { %v25027_v28 = vrot.slane %v25013_v39, %v29572_v50  ;;  %v25694_v30 = vcombine.low %v25686_v23, %v25693_v21  ;;  %v25186_v60 = vrot.slane %v25164_v16, %v29572_v50  ;;  %v28182_v54 = vpack.i.b16 %v34172_v51, %v34351_v11 }
 0x704   : > { %v25726_v37 = vrot.slane %v25698_v15, %v29572_v50  ;;  %v25028_v55 = vcombine.high %v25020_v8, %v25020_v8  ;;  %v25727_v40 = vcombine.low %v25705_v14, %v25712_v63  ;;  %v25522_v41 = vcombine.high %v28199_v22, %v28199_v22  ;;  %v28232_v15 = vld.sshfl [vmem:[#allocation5 + $0x18] sm:$0x32 pattern:$0x75316420] }
 0x705   : > { %29105 = vmatprep.mubr.msk.bf16.mxu0 %vm2062_vm5, %v25694_v30  ;;  %v25195_v44 = vcombine.low %v25186_v60, %v25193_v56  ;;  %v25211_v32 = vcombine.low %v34343_v53, %v28182_v54  ;;  %v25212_v33 = vcombine.low %v34362_v42, %v34365_v7  ;;  %v25213_v51 = vcombine.low %v34368_v49, %v25020_v8  ;;  %v29307_v60 = vld [vmem:[%s34691_s11 + $0x100] sm:$0xff]  }
 0x706   : > { %v25728_v20 = vcombine.low %v25719_v45, %v25726_v37  ;;  %v25214_v18 = vcombine.low %v25027_v28, %v25028_v55  ;;  %v25735_v0 = vrot.slane %v25727_v40, %v29572_v50  ;;  %v25529_v10 = vrot.slane %v28199_v22, %v29572_v50  ;;  %v28234_v22 = vld.sshfl [vmem:[#allocation5 + $0x20] sm:$0x32 pattern:$0x75316420] }
 0x707   : > { %v25209_v62 = vrot.slane %v25195_v44, %v29572_v50  ;;  %v25221_v1 = vrot.slane %v25211_v32, %v29572_v50  ;;  %v25536_v48 = vrot.slane %v25522_v41, %v29572_v50  ;;  %v25228_v24 = vrot.slane %v25212_v33, %v29572_v50 }
 0x708   : > { %v25742_v5 = vrot.slane %v25728_v20, %v29572_v50  ;;  %v25242_v43 = vrot.slane %v25214_v18, %v29572_v50  ;;  %v25562_v26 = vcombine.high %v25027_v28, %v25027_v28  ;;  %v25235_v42 = vrot.slane %v25213_v51, %v29572_v50  ;;  %v28233_v20 = vld.sshfl [vmem:[#allocation5 + $0x1c] sm:$0x1 pattern:$0x75316420] }
 0x709   : > { %v25210_v29 = vcombine.low %v25202_v36, %v25209_v62  ;;  %v25537_v7 = vcombine.high %v25529_v10, %v25529_v10  ;;  %v25538_v58 = vcombine.high %v25536_v48, %v25536_v48  ;;  %v25595_v49 = vunpack.i.h.s16 %v34343_v53  ;;  %v28236_v62 = vld.sshfl [vmem:[#allocation5 + $0x28] sm:$0x32 pattern:$0x75316420] }
 0x70a   : > { %v25743_v31 = vcombine.low %v25735_v0, %v25742_v5  ;;  %v25243_v34 = vcombine.low %v25221_v1, %v25228_v24  ;;  %v25597_v25 = vunpack.i.h.s16 %v34351_v11  ;;  %v25598_v4 = vunpack.i.h.s16 %v25529_v10 }
 0x70b   : > { %29090 = vmatmul.mubr.msk.bf16.vlgmr.msra.gmra.mxu1 %vm2062_vm5, %v25210_v29  ;;  %v25605_v35 = vunpack.i.h.s16 %v25020_v8  ;;  %v25244_v14 = vcombine.low %v25235_v42, %v25242_v43  ;;  %v25607_v46 = vunpack.i.h.s16 %v25027_v28  ;;  %v25609_v59 = vunpack.i.h.s16 %v25028_v55 }
 0x70c   : > { %29106 = vmatmul.mubr.msk.bf16.vlgmr.msra.gmra.mxu0 %vm2062_vm5, %v25743_v31  ;;  %29114 = vmatpush3.bf16.msra.mxu1 %v34462_v57  ;;  %v28217_v9 = vpack.i.b16 %v34351_v11, %v25595_v49  ;;  %v25251_v61 = vrot.slane %v25243_v34, %v29572_v50  ;;  %v25638_v6 = vpack.i.b16 %v25598_v4, %v25597_v25  ;;  %v25611_v11 = vunpack.i.h.s16 %v25562_v26  ;;  %v28235_v49 = vld.sshfl [vmem:[#allocation5 + $0x24] sm:$0x1 pattern:$0x75316420] }
 0x70d   : > { %v28218_v53 = vpack.i.b16 %v25027_v28, %v25605_v35  ;;  %v25745_v36 = vcombine.low %v25536_v48, %v25537_v7  ;;  %29115 = vmatprep.subr.bf16.mxu1 %v29305_v38  ;;  %v25258_v52 = vrot.slane %v25244_v14, %v29572_v50  ;;  %v28219_v56 = vpack.i.b16 %v25028_v55, %v25607_v46 }
 0x70e   : > { %v28220_v57 = vpack.i.b16 %v25562_v26, %v25609_v59  ;;  %v25744_v3 = vcombine.low %v28217_v9, %v25638_v6  ;;  %v25078_v16 = vunpack.i.l.s16 %v25562_v26  ;;  %v25949_v8 = vcombine.high %v28230_v27, %v28230_v27 }
 0x70f   : > { %v25746_v23 = vcombine.low %v25538_v58, %v28218_v53  ;;  %v25761_v17 = vrot.slane %v25745_v36, %v29572_v50  ;;  %v25259_v39 = vcombine.low %v25251_v61, %v25258_v52  ;;  %v25799_v28 = vrot.slane %v25611_v11, %v29572_v50  ;;  %v28237_v53 = vld.sshfl [vmem:[#allocation5 + $0x2c] sm:$0x1 pattern:$0x75316420] }
 0x710   : > { %v25747_v21 = vcombine.low %v28219_v56, %v28220_v57  ;;  %29116 = vmatpush3.bf16.msra.mxu1 %v29305_v38  ;;  %v25754_v63 = vrot.slane %v25744_v3, %v29572_v50  ;;  %v25956_v30 = vrot.slane %v28230_v27, %v29572_v50  ;;  %v25266_v55 = vrot.slane %v25078_v16, %v29572_v50  ;;  %v28238_v56 = vld.sshfl [vmem:[#allocation5 + $0x30] sm:$0x32 pattern:$0x75316420] }
 0x711   : > { %v25768_v45 = vrot.slane %v25746_v23, %v29572_v50  ;;  %29117 = vmatprep.subr.bf16.mxu1 %v29306_v47  ;;  %29093 = vmatprep.mubr.msk.bf16.mxu1 %vm2062_vm5, %v25259_v39  ;;  %v25963_v40 = vrot.slane %v25949_v8, %v29572_v50  ;;  %v25806_v44 = vrot.slane %v25799_v28, %v29572_v50 }
 0x712   : > { %v25775_v37 = vrot.slane %v25747_v21, %v29572_v50  ;;  %v25776_v54 = vcombine.low %v25754_v63, %v25761_v17  ;;  %v25979_v18 = vrot.slane %v28231_v12, %v29572_v50  ;;  %v25987_v0 = vcombine.high %v28232_v15, %v28232_v15 }
 0x713   : > { %v25273_v41 = vrot.slane %v25266_v55, %v29572_v50  ;;  %v25964_v5 = vcombine.high %v25956_v30, %v25956_v30  ;;  %v25994_v33 = vrot.slane %v28232_v15, %v29572_v50  ;;  %v25965_v51 = vcombine.high %v25963_v40, %v25963_v40 }
 0x714   : > { %v25777_v32 = vcombine.low %v25768_v45, %v25775_v37  ;;  %29118 = vmatpush3.bf16.msra.mxu1 %v29306_v47  ;;  %v25784_v43 = vrot.slane %v25776_v54, %v29572_v50  ;;  %v26001_v1 = vrot.slane %v25987_v0, %v29572_v50  ;;  %v26025_v10 = vcombine.high %v28234_v22, %v28234_v22  ;;  %v28242_v37 = vld.sshfl [vmem:[#allocation5 + $0x40] sm:$0x32 pattern:$0x75316420] }
 0x715   : > { %29119 = vmatprep.subr.bf16.mxu1 %v29307_v60  ;;  %29094 = vmatmul.mubr.msk.bf16.gmra.mxu1 %vm2062_vm5, %v25273_v41  ;;  %v26002_v29 = vcombine.high %v25994_v33, %v25994_v33  ;;  %v26017_v31 = vrot.slane %v28233_v20, %v29572_v50  ;;  %v26032_v24 = vrot.slane %v28234_v22, %v29572_v50 }
 0x716   : > { %v25791_v48 = vrot.slane %v25777_v32, %v29572_v50  ;;  %v26003_v26 = vcombine.high %v26001_v1, %v26001_v1  ;;  %v26039_v38 = vrot.slane %v26025_v10, %v29572_v50  ;;  %v26063_v42 = vcombine.high %v28236_v62, %v28236_v62 }
 0x717   : > { %v26070_v7 = vrot.slane %v28236_v62, %v29572_v50  ;;  %v26216_v34 = vunpack.i.h.s16 %v26001_v1  ;;  %v26218_v25 = vunpack.i.h.s16 %v26002_v29  ;;  %v28252_v4 = vpack.i.b16 %v26001_v1, %v25979_v18 }
 0x718   : > { %v25792_v58 = vcombine.low %v25784_v43, %v25791_v48  ;;  %29120 = vmatpush3.bf16.msra.mxu1 %v29307_v60  ;;  %v26077_v35 = vrot.slane %v26063_v42, %v29572_v50  ;;  %v26220_v46 = vunpack.i.h.s16 %v26003_v26  ;;  %v26291_v59 = vcombine.low %v25963_v40, %v25964_v5 }
 0x719   : > { %v26078_v14 = vcombine.high %v26070_v7, %v26070_v7  ;;  %v28253_v9 = vpack.i.b16 %v26002_v29, %v26216_v34  ;;  %v28254_v61 = vpack.i.b16 %v26003_v26, %v26218_v25  ;;  %v26292_v6 = vcombine.low %v25965_v51, %v28252_v4 }
 0x71a   : > { %29109 = vmatprep.mubr.msk.bf16.mxu0 %vm2062_vm5, %v25792_v58  ;;  %v26055_v36 = vrot.slane %v28235_v49, %v29572_v50  ;;  %v26230_v47 = vunpack.i.h.s16 %v26077_v35  ;;  %v28255_v27 = vpack.i.b16 %v26017_v31, %v26220_v46  ;;  %v28264_v52 = vcombine.high %v26032_v24, %v26039_v38  ;;  %v28243_v24 = vld.sshfl [vmem:[#allocation5 + $0x44] sm:$0x1 pattern:$0x75316420] }
 0x71b   : > { %29110 = vmatmul.mubr.msk.bf16.gmra.mxu0 %vm2062_vm5, %v25806_v44  ;;  %v26232_v57 = vunpack.i.h.s16 %v26078_v14  ;;  %v26293_v3 = vcombine.low %v28253_v9, %v28254_v61  ;;  %v26301_v23 = vrot.slane %v26291_v59, %v29572_v50  ;;  %v26308_v17 = vrot.slane %v26292_v6, %v29572_v50  ;;  %v28239_v44 = vld.sshfl [vmem:[#allocation5 + $0x34] sm:$0x1 pattern:$0x75316420] }
 0x71c   : > { %v28256_v11 = vpack.i.b16 %v26077_v35, %v26055_v36  ;;  %v28257_v12 = vpack.i.b16 %v26078_v14, %v26230_v47  ;;  %v26294_v39 = vcombine.low %v28255_v27, %v26039_v38  ;;  %v26079_v21 = vcombine.high %v26077_v35, %v26077_v35 }
 0x71d   : > { %v26323_v16 = vcombine.low %v26301_v23, %v26308_v17  ;;  %v26093_v15 = vrot.slane %v28237_v53, %v29572_v50  ;;  %v26101_v8 = vcombine.high %v28238_v56, %v28238_v56  ;;  %v26108_v63 = vrot.slane %v28238_v56, %v29572_v50 }
 0x71e   : > { %v26315_v45 = vrot.slane %v26293_v3, %v29572_v50  ;;  %v26322_v28 = vrot.slane %v26294_v39, %v29572_v50  ;;  %v26341_v30 = vcombine.low %v28256_v11, %v28257_v12  ;;  %v26234_v60 = vunpack.i.h.s16 %v26079_v21 }
 0x71f   : > { %v26350_v55 = vrot.slane %v28264_v52, %v29572_v50  ;;  %v26115_v22 = vrot.slane %v26101_v8, %v29572_v50  ;;  %v26116_v40 = vcombine.high %v26108_v63, %v26108_v63  ;;  %v28258_v54 = vpack.i.b16 %v26079_v21, %v26232_v57 }
 0x720   : > { %v26324_v20 = vcombine.low %v26315_v45, %v26322_v28  ;;  %v26357_v18 = vrot.slane %v26341_v30, %v29572_v50  ;;  %v28259_v0 = vpack.i.b16 %v26093_v15, %v26234_v60  ;;  %v26154_v32 = vcombine.high %v34393_v2, %v34393_v2 }
 0x721   : > { %v26331_v41 = vrot.slane %v26323_v16, %v29572_v50  ;;  %v26343_v62 = vcombine.low %v26115_v22, %v26116_v40  ;;  %v26155_v5 = vcombine.high %v34400_v13, %v34400_v13  ;;  %v26177_v33 = vcombine.high %v28242_v37, %v28242_v37 }
 0x722   : > { %v26338_v43 = vrot.slane %v26324_v20, %v29572_v50  ;;  %v26372_v51 = vcombine.low %v26350_v55, %v26357_v18  ;;  %v26342_v1 = vcombine.low %v28258_v54, %v28259_v0  ;;  %v26131_v10 = vrot.slane %v28239_v44, %v29572_v50 }
 0x723   : > { %v26184_v48 = vrot.slane %v28242_v37, %v29572_v50  ;;  %v26191_v29 = vrot.slane %v26177_v33, %v29572_v50  ;;  %v26244_v31 = vunpack.i.h.s16 %v34400_v13  ;;  %v26246_v2 = vunpack.i.h.s16 %v26154_v32 }
 0x724   : > { %v26339_v26 = vcombine.low %v26331_v41, %v26338_v43  ;;  %v26364_v38 = vrot.slane %v26342_v1, %v29572_v50  ;;  %v26371_v42 = vrot.slane %v26343_v62, %v29572_v50  ;;  %v26248_v7 = vunpack.i.h.s16 %v26155_v5 }
 0x725   : > { %v26117_v58 = vcombine.high %v26115_v22, %v26115_v22  ;;  %v28260_v49 = vpack.i.b16 %v34400_v13, %v26131_v10  ;;  %v28261_v34 = vpack.i.b16 %v26154_v32, %v26244_v31  ;;  %v28262_v25 = vpack.i.b16 %v26155_v5, %v26246_v2 }
 0x726   : > { %29121 = vmatprep.mubr.msk.bf16.mxu1 %vm2062_vm5, %v26339_v26  ;;  %v26373_v4 = vcombine.low %v26364_v38, %v26371_v42  ;;  %v28263_v35 = vpack.i.b16 %v34418_v19, %v26248_v7  ;;  %v28265_v14 = vcombine.high %v26184_v48, %v26191_v29  ;;  %v26207_v46 = vrot.slane %v28243_v24, %v29572_v50 }
 0x727   : > { %v26389_v59 = vcombine.low %v26117_v58, %v28260_v49  ;;  %v26390_v9 = vcombine.low %v28261_v34, %v28262_v25  ;;  %v26380_v61 = vrot.slane %v26372_v51, %v29572_v50 }
 0x728   : > { %v26387_v6 = vrot.slane %v26373_v4, %v29572_v50  ;;  %v26391_v53 = vcombine.low %v28263_v35, %v26191_v29  ;;  %v26420_v52 = vrot.slane %v28265_v14, %v29572_v50  ;;  %v26256_v19 = vunpack.i.l.s16 %v26207_v46 }
 0x729   : > { %v26399_v36 = vrot.slane %v26389_v59, %v29572_v50  ;;  %v26406_v13 = vrot.slane %v26390_v9, %v29572_v50 }
 0x72a   : > { %v26388_v47 = vcombine.low %v26380_v61, %v26387_v6  ;;  %v26413_v27 = vrot.slane %v26391_v53, %v29572_v50  ;;  %v26444_v17 = vrot.slane %v26256_v19, %v29572_v50 }
 0x72b   : > { %v26421_v56 = vcombine.low %v26399_v36, %v26406_v13 }
 0x72c   : > { %29122 = vmatmul.mubr.msk.bf16.vlgmr.msra.gmra.mxu1 %vm2062_vm5, %v26388_v47  ;;  %v26422_v57 = vcombine.low %v26413_v27, %v26420_v52  ;;  %v26451_v12 = vrot.slane %v26444_v17, %v29572_v50 }
 0x72d   : > { %v26429_v3 = vrot.slane %v26421_v56, %v29572_v50 }
 0x72e   : > { %v26436_v23 = vrot.slane %v26422_v57, %v29572_v50 }
 0x730   : > { %v26437_v11 = vcombine.low %v26429_v3, %v26436_v23 }
 0x732   : > { %29125 = vmatprep.mubr.msk.bf16.mxu1 %vm2062_vm5, %v26437_v11 }
 0x734   : > { %29126 = vmatmul.mubr.msk.bf16.gmra.mxu1 %vm2062_vm5, %v26451_v12 }
 0x75b   : > { %v28995_v39 = vpop.f32.mrf.mxu1 }
 0x75d   : > { %v22174_v21 = vpop.f32.mrf.mxu1 }
 0x75e   : > { %v29011_v16 = vpop.f32.mrf.mxu0 }
 0x75f   : > { %v22469_v15 = vadd.f32 %v29011_v16, %v28995_v39  ;;  %v28996_v8 = vpop.f32.mrf.mxu1 }
 0x760   : > { %v22460_v63 = vpop.f32.mrf.mxu0 }
 0x761   : > { %v22461_v45 = vadd.f32 %v22460_v63, %v22174_v21  ;;  %v22177_v30 = vpop.f32.mrf.mxu1 }
 0x762   : > { %v29012_v28 = vpop.f32.mrf.mxu0 }
 0x763   : > { %v22472_v60 = vadd.f32 %v29012_v28, %v28996_v8 }
 0x764   : > { %v22463_v37 = vpop.f32.mrf.mxu0 }
 0x765   : > { %v22464_v55 = vadd.f32 %v22463_v37, %v22177_v30 }
 0x76a   : > { %v28999_v22 = vpop.f32.mrf.mxu1 }
 0x76c   : > { %v29015_v40 = vpop.f32.mrf.mxu0  ;;  %v22190_v54 = vpop.f32.mrf.mxu1 }
 0x76d   : > { %v22485_v44 = vadd.f32 %v29015_v40, %v28999_v22 }
 0x76e   : > { %v22476_v20 = vpop.f32.mrf.mxu0  ;;  %v29000_v50 = vpop.f32.mrf.mxu1 }
 0x76f   : > { %v22477_v18 = vadd.f32 %v22476_v20, %v22190_v54 }
 0x770   : > { %v29016_v0 = vpop.f32.mrf.mxu0  ;;  %v22193_v32 = vpop.f32.mrf.mxu1 }
 0x772   : > { %v22479_v41 = vpop.f32.mrf.mxu0 }
 0x773   : > { %v22480_v62 = vadd.f32 %v22479_v41, %v22193_v32 }
 0x784   : > { %v29043_v5 = vpop.f32.mrf.mxu0 }
 0x785   : > { %v29027_v33 = vpop.f32.mrf.mxu1 }
 0x786   : > { %v23130_v43 = vadd.f32 %v29027_v33, %v22469_v15  ;;  %v23632_v51 = vpop.f32.mrf.mxu0 }
 0x787   : > { %v23098_v1 = vpop.f32.mrf.mxu1 }
 0x788   : > { %v23664_v10 = vadd.f32 %v29043_v5, %v23130_v43  ;;  %v23128_v48 = vadd.f32 %v23098_v1, %v22461_v45  ;;  %v29044_v29 = vpop.f32.mrf.mxu0 }
 0x789   : > { %v29028_v31 = vpop.f32.mrf.mxu1 }
 0x78a   : > { %v23662_v2 = vadd.f32 %v23632_v51, %v23128_v48  ;;  %v23131_v24 = vadd.f32 %v29028_v31, %v22472_v60  ;;  %v23635_v7 = vpop.f32.mrf.mxu0 }
 0x78b   : > { %v23101_v26 = vpop.f32.mrf.mxu1 }
 0x78c   : > { %v23665_v38 = vadd.f32 %v29044_v29, %v23131_v24  ;;  %v23129_v42 = vadd.f32 %v23101_v26, %v22464_v55 }
 0x78e   : > { %v23663_v58 = vadd.f32 %v23635_v7, %v23129_v42  ;;  %v28274_v7 = vld [vmem:[%s34692_s12] ss:$0 sm:$0xff] }
 0x790   : > { %v29031_v49 = vpop.f32.mrf.mxu1 }
 0x791   : > { %v29047_v34 = vpop.f32.mrf.mxu0  ;;  %v23134_v25 = vadd.f32 %v29031_v49, %v22485_v44 }
 0x792   : > { %v23114_v4 = vpop.f32.mrf.mxu1 }
 0x793   : > { %v23648_v35 = vpop.f32.mrf.mxu0  ;;  %v23668_v14 = vadd.f32 %v29047_v34, %v23134_v25  ;;  %v23132_v46 = vadd.f32 %v23114_v4, %v22477_v18 }
 0x794   : > { %v29032_v59 = vpop.f32.mrf.mxu1 }
 0x795   : > { %v29048_v9 = vpop.f32.mrf.mxu0  ;;  %v23666_v61 = vadd.f32 %v23648_v35, %v23132_v46 }
 0x796   : > { %v23117_v6 = vpop.f32.mrf.mxu1 }
 0x797   : > { %v23133_v53 = vadd.f32 %v23117_v6, %v22480_v62  ;;  %v23651_v36 = vpop.f32.mrf.mxu0 }
 0x799   : > { %v23667_v13 = vadd.f32 %v23651_v36, %v23133_v53 }
 0x7a2   : > { %v29059_v47 = vpop.f32.mrf.mxu1  ;;  %v29075_v27 = vpop.f32.mrf.mxu0 }
 0x7a3   : > { %v24197_v52 = vadd.f32 %v29059_v47, %v23664_v10 }
 0x7a4   : > { %v24165_v19 = vpop.f32.mrf.mxu1  ;;  %v24810_v57 = vpop.f32.mrf.mxu0 }
 0x7a5   : > { %v24195_v56 = vadd.f32 %v24165_v19, %v23662_v2  ;;  %v24842_v51 = vadd.f32 %v29075_v27, %v24197_v52 }
 0x7a6   : > { %v29060_v3 = vpop.f32.mrf.mxu1  ;;  %v29076_v12 = vpop.f32.mrf.mxu0 }
 0x7a7   : > { %v24198_v23 = vadd.f32 %v29060_v3, %v23665_v38  ;;  %v24840_v1 = vadd.f32 %v24810_v57, %v24195_v56 }
 0x7a8   : > { %v24168_v17 = vpop.f32.mrf.mxu1  ;;  %v24813_v16 = vpop.f32.mrf.mxu0 }
 0x7a9   : > { %v24196_v11 = vadd.f32 %v24168_v17, %v23663_v58  ;;  %v24843_v29 = vadd.f32 %v29076_v12, %v24198_v23 }
 0x7ab   : > { %v24841_v2 = vadd.f32 %v24813_v16, %v24196_v11 }
 0x7ac   : > { %v29063_v39 = vpop.f32.mrf.mxu1 }
 0x7ad   : > { %v24201_v21 = vadd.f32 %v29063_v39, %v23668_v14 }
 0x7ae   : > { %v24181_v15 = vpop.f32.mrf.mxu1 }
 0x7af   : > { %v24199_v8 = vadd.f32 %v24181_v15, %v23666_v61 }
 0x7b0   : > { %v29064_v63 = vpop.f32.mrf.mxu1 }
 0x7b2   : > { %v29079_v45 = vpop.f32.mrf.mxu0  ;;  %v24184_v37 = vpop.f32.mrf.mxu1 }
 0x7b3   : > { %v24846_v28 = vadd.f32 %v29079_v45, %v24201_v21  ;;  %v24200_v34 = vadd.f32 %v24184_v37, %v23667_v13 }
 0x7b4   : > { %v24826_v30 = vpop.f32.mrf.mxu0 }
 0x7b5   : > { %v24844_v4 = vadd.f32 %v24826_v30, %v24199_v8 }
 0x7b6   : > { %v29080_v60 = vpop.f32.mrf.mxu0 }
 0x7b8   : > { %v24829_v55 = vpop.f32.mrf.mxu0 }
 0x7b9   : > { %v24845_v52 = vadd.f32 %v24829_v55, %v24200_v34 }
 0x7cb   : > { %v29091_v22 = vpop.f32.mrf.mxu1 }
 0x7cc   : > { %v29107_v40 = vpop.f32.mrf.mxu0  ;;  %v25376_v10 = vadd.f32 %v29091_v22, %v24842_v51 }
 0x7cd   : > { %v25344_v54 = vpop.f32.mrf.mxu1 }
 0x7ce   : > { %v25877_v44 = vpop.f32.mrf.mxu0  ;;  %v25374_v31 = vadd.f32 %v25344_v54, %v24840_v1  ;;  %v25909_v24 = vadd.f32 %v29107_v40, %v25376_v10 }
 0x7cf   : > { %v29092_v20 = vpop.f32.mrf.mxu1 }
 0x7d0   : > { %v29108_v18 = vpop.f32.mrf.mxu0  ;;  %v25377_v26 = vadd.f32 %v29092_v20, %v24843_v29  ;;  %v25907_v58 = vadd.f32 %v25877_v44, %v25374_v31 }
 0x7d1   : > { %v25347_v50 = vpop.f32.mrf.mxu1 }
 0x7d2   : > { %v25880_v32 = vpop.f32.mrf.mxu0  ;;  %v25375_v38 = vadd.f32 %v25347_v50, %v24841_v2  ;;  %v25910_v35 = vadd.f32 %v29108_v18, %v25377_v26 }
 0x7d4   : > { %v25908_v59 = vadd.f32 %v25880_v32, %v25375_v38 }
 0x7d5   : > { %v29095_v0 = vpop.f32.mrf.mxu1 }
 0x7d6   : > { %v25380_v9 = vadd.f32 %v29095_v0, %v24846_v28 }
 0x7d7   : > { %v25360_v41 = vpop.f32.mrf.mxu1 }
 0x7d8   : > { %v25378_v6 = vadd.f32 %v25360_v41, %v24844_v4 }
 0x7d9   : > { %v29096_v62 = vpop.f32.mrf.mxu1 }
 0x7db   : > { %v29111_v5 = vpop.f32.mrf.mxu0  ;;  %v25363_v48 = vpop.f32.mrf.mxu1 }
 0x7dc   : > { %v25913_v13 = vadd.f32 %v29111_v5, %v25380_v9  ;;  %v25379_v17 = vadd.f32 %v25363_v48, %v24845_v52 }
 0x7dd   : > { %v25893_v33 = vpop.f32.mrf.mxu0 }
 0x7de   : > { %v25911_v23 = vadd.f32 %v25893_v33, %v25378_v6 }
 0x7df   : > { %v29112_v43 = vpop.f32.mrf.mxu0 }
 0x7e1   : > { %v25896_v8 = vpop.f32.mrf.mxu0 }
 0x7e2   : > { %v25912_v45 = vadd.f32 %v25896_v8, %v25379_v17 }
 0x7ec   : > { %v29123_v42 = vpop.f32.mrf.mxu1 }
 0x7ed   : > { %v26554_v49 = vadd.f32 %v29123_v42, %v25909_v24 }
 0x7ee   : > { %v26522_v25 = vpop.f32.mrf.mxu1 }
 0x7ef   : > { %v26552_v14 = vadd.f32 %v26522_v25, %v25907_v58  ;;  %v26568_v46 = vadd.f32 %v28274_v7, %v26554_v49 }
 0x7f0   : > { %v29124_v61 = vpop.f32.mrf.mxu1 }
 0x7f1   : > { %v26555_v53 = vadd.f32 %v29124_v61, %v25910_v35  ;;  %v26575_v36 = vmax.f32 %v26568_v46, 0.0  ;;  %v26566_v47 = vadd.f32 %v28274_v7, %v26552_v14 }
 0x7f2   : > { %v26525_v27 = vpop.f32.mrf.mxu1 }
 0x7f3   : > { %v26569_v19 = vadd.f32 %v28274_v7, %v26555_v53  ;;  %v26553_v56 = vadd.f32 %v26525_v27, %v25908_v59  ;;  %26591 = vrot.lane.b32.xlu1 %v26575_v36, %s29331_s21  ;;  %v26573_v57 = vmax.f32 %v26566_v47, 0.0 }
 0x7f4   : > { %v29127_v3 = vpop.f32.mrf.mxu1 }
 0x7f5   : > { %v26576_v11 = vmax.f32 %v26569_v19, 0.0  ;;  %v26567_v12 = vadd.f32 %v28274_v7, %v26553_v56  ;;  %26587 = vrot.lane.b32.xlu0 %v26573_v57, %s29331_s21  ;;  %v26558_v16 = vadd.f32 %v29127_v3, %v25913_v13 }
 0x7f6   : > { %v26538_v39 = vpop.f32.mrf.mxu1 }
 0x7f7   : > { %v26574_v21 = vmax.f32 %v26567_v12, 0.0  ;;  %v26556_v15 = vadd.f32 %v26538_v39, %v25911_v23  ;;  %26593 = vrot.lane.b32.xlu1 %v26576_v11, %s29331_s21  ;;  %v26572_v60 = vadd.f32 %v28274_v7, %v26558_v16 }
 0x7f8   : > { %v29128_v63 = vpop.f32.mrf.mxu1 }
 0x7f9   : > { %v26570_v28 = vadd.f32 %v28274_v7, %v26556_v15  ;;  %26589 = vrot.lane.b32.xlu0 %v26574_v21, %s29331_s21  ;;  %v26579_v40 = vmax.f32 %v26572_v60, 0.0 }
 0x7fa   : > { %v26541_v30 = vpop.f32.mrf.mxu1 }
 0x7fb   : > { %v26577_v37 = vmax.f32 %v26570_v28, 0.0  ;;  %v26557_v55 = vadd.f32 %v26541_v30, %v25912_v45 }
 0x7fd   : > { %v26571_v22 = vadd.f32 %v28274_v7, %v26557_v55  ;;  %26595 = vrot.lane.b32.xlu0 %v26577_v37, %s29331_s21 }
 0x7ff   : > { %v26578_v54 = vmax.f32 %v26571_v22, 0.0 }
 0x801   : > { %26599 = vrot.lane.b32.xlu0 %v26579_v40, %s29331_s21  ;;  %26597 = vrot.lane.b32.xlu1 %v26578_v54, %s29331_s21 }
 0x865   : > { %v26592_v44 = vpop.permute.xlu1 %26591 }
 0x866   : > { %26613 = vst.msk [vmem:[%s32061_s22 + $0x20] sm:$0xff] %vm26608_vm14, %v26592_v44 }
 0x867   : > { %26614 = vst.msk [vmem:[%s32061_s22 + $0x28] sm:$0xff] %vm2062_vm5, %v26592_v44  ;;  %v26588_v20 = vpop.permute.xlu0 %26587 }
 0x868   : > { %26609 = vst.msk [vmem:[%s32061_s22] sm:$0xff] %vm26608_vm14, %v26588_v20 }
 0x869   : > { %26610 = vst.msk [vmem:[%s32061_s22 + $0x8] sm:$0xff] %vm2062_vm5, %v26588_v20  ;;  %v26594_v50 = vpop.permute.xlu1 %26593 }
 0x86a   : > { %26615 = vst.msk [vmem:[%s32061_s22 + $0x30] sm:$0xff] %vm26608_vm14, %v26594_v50 }
 0x86b   : > { %26616 = vst.msk [vmem:[%s32061_s22 + $0x38] sm:$0xff] %vm2062_vm5, %v26594_v50  ;;  %v26590_v18 = vpop.permute.xlu0 %26589 }
 0x86c   : > { %26611 = vst.msk [vmem:[%s32061_s22 + $0x10] sm:$0xff] %vm26608_vm14, %v26590_v18 }
 0x86d   : > { %26612 = vst.msk [vmem:[%s32061_s22 + $0x18] sm:$0xff] %vm2062_vm5, %v26590_v18 }
 0x86f   : > { %v26596_v0 = vpop.permute.xlu0 %26595 }
 0x870   : > { %26617 = vst.msk [vmem:[%s32061_s22 + $0x40] sm:$0xff] %vm26608_vm14, %v26596_v0 }
 0x871   : > { %26618 = vst.msk [vmem:[%s32061_s22 + $0x48] sm:$0xff] %vm2062_vm5, %v26596_v0 }
 0x873   : > { %v26600_v32 = vpop.permute.xlu0 %26599  ;;  %v26598_v41 = vpop.permute.xlu1 %26597 }
 0x874   : > { %26622 = vst.msk [vmem:[%s32061_s22 + $0x60] sm:$0x1] %vm26621_vm15, %v26600_v32 }
 0x875   : > { %26624 = vst.msk [vmem:[%s32061_s22 + $0x68] sm:$0x1] %vm483_vm2, %v26600_v32 }
 0x876   : > { %26619 = vst.msk [vmem:[%s32061_s22 + $0x50] sm:$0xff] %vm26608_vm14, %v26598_v41 }
 0x877   : > { %26620 = vst.msk [vmem:[%s32061_s22 + $0x58] sm:$0xff] %vm2062_vm5, %v26598_v41 }
 0x878 PF: > { %s23_s25 = sadd.s32 1, %s29326_s25  }
 0x879   : > { %p20_p4 = scmp.ge.s32.totalorder %s23_s25, 4  }
 0x87b   :  { %22 = sbr.rel (!%p20_p4) target bundleno = 1 (0x1), region = 140 }

</bundles_post_ra>
